<compile_context>
chip_gen: v7x
topology: tpu7x:2x2x1
jax: 0.10.0
libtpu: 0.0.40
codegen_flags: <defaults>
</compile_context>

<pallas_src>
import functools

import jax
import jax.numpy as jnp
from jax.experimental import pallas as pl
from jax.experimental.pallas import tpu as pltpu

EPS = 1e-5


def _layernorm(x, g, b):
    mu = jnp.mean(x, axis=-1, keepdims=True)
    var = jnp.mean((x - mu) ** 2, axis=-1, keepdims=True)
    return (x - mu) * jax.lax.rsqrt(var + EPS) * g + b


def _mha(x_q, x_k, x_v, qf, kf, vf, woT, hcat_ref, *, H, dq):
    """Multi-head attention for one batch element.

    x_* are (S, D).  qf/kf/vf are the per-head projections pre-flattened host-side to
    (D, H*dq) so each projection is a single full-width matmul.  woT is (D, D).
    hcat_ref is a (H*S, dq) VMEM scratch holding the head-major attention contexts.
    """
    S = x_q.shape[0]
    scale = 1.0 / jnp.sqrt(jnp.float32(dq))
    q_all = jnp.dot(x_q, qf, preferred_element_type=jnp.float32) * scale   # (S, H*dq)
    k_all = jnp.dot(x_k, kf, preferred_element_type=jnp.float32)           # (S, H*dq)
    v_all = jnp.dot(x_v, vf, preferred_element_type=jnp.float32)           # (S, H*dq)

    # Per-head attention.  Each head's context is written with ONE contiguous store
    # into the head-major scratch (no per-row masked stores).
    for h in range(H):
        qh = q_all[:, h * dq:(h + 1) * dq]
        kh = k_all[:, h * dq:(h + 1) * dq]
        vh = v_all[:, h * dq:(h + 1) * dq]
        s = jax.lax.dot_general(qh, kh, (((1,), (1,)), ((), ())),
                                preferred_element_type=jnp.float32)        # (S, S)
        s = s - jnp.max(s, axis=-1, keepdims=True)
        p = jnp.exp(s)
        p = p * pl.reciprocal(jnp.sum(p, axis=-1, keepdims=True), approx=True)
        hcat_ref[h * S:(h + 1) * S, :] = jnp.dot(
            p, vh, preferred_element_type=jnp.float32)                     # (S, dq)

    # torch's `heads.view(B, S, -1)` on a contiguous (B, H, S, dq) tensor is a raw
    # row-major reinterpretation: column block c of the (S, H*dq) view equals rows
    # c::H of the head-major (H*S, dq) buffer.  H strided reads + one lane concat.
    hcat = jnp.concatenate(
        [hcat_ref[pl.ds(c, S, stride=H), :] for c in range(H)], axis=1)    # (S, D)

    # Output projection (Wout, no bias).
    return jnp.dot(hcat, woT, preferred_element_type=jnp.float32)


def decoder_layer_kernel(tgt_ref, src_ref,
                         q1_ref, k1_ref, v1_ref, wo1_ref, g1_ref, b1_ref,
                         q2_ref, k2_ref, v2_ref, wo2_ref, g2_ref, b2_ref,
                         w1_ref, bb1_ref, w2_ref, bb2_ref, g3_ref, b3_ref,
                         out_ref, hcat_ref, *, H, dq):
    tgt = tgt_ref[0]                                    # (S, D)
    src = src_ref[0]                                    # (S, D)

    # --- masked self-attention block (mask=None here) + residual + layernorm ---
    # TODO(synk): optional attention masks (source_mask/target_mask) not plumbed in; None path only.
    sa = _mha(tgt, tgt, tgt, q1_ref[...], k1_ref[...], v1_ref[...], wo1_ref[...],
              hcat_ref, H=H, dq=dq)
    res = _layernorm(sa + tgt, g1_ref[...], b1_ref[...])

    # --- source (cross) attention block + residual + layernorm ---
    ca = _mha(res, src, src, q2_ref[...], k2_ref[...], v2_ref[...], wo2_ref[...],
              hcat_ref, H=H, dq=dq)
    res2 = _layernorm(ca + res, g2_ref[...], b2_ref[...])

    # --- feedforward (Linear -> ReLU -> Linear) + residual + layernorm ---
    hid = jnp.maximum(
        jnp.dot(res2, w1_ref[...], preferred_element_type=jnp.float32) + bb1_ref[...], 0.0)
    ff = jnp.dot(hid, w2_ref[...], preferred_element_type=jnp.float32) + bb2_ref[...]
    out_ref[0] = _layernorm(ff + res2, g3_ref[...], b3_ref[...])


def _build_decoder_layer_call(B, S, D, H, dq, Dff, weight_pipeline_mode):
    f32 = jnp.float32

    def batch_spec():
        return pl.BlockSpec((1, S, D), lambda b: (b, 0, 0))

    def weight_spec(shape):
        n = len(shape)
        imap = lambda b, n=n: (0,) * n
        if weight_pipeline_mode is None:
            return pl.BlockSpec(shape, imap)
        return pl.BlockSpec(shape, imap, pipeline_mode=weight_pipeline_mode)

    in_specs = [
        batch_spec(), batch_spec(),
        weight_spec((D, D)), weight_spec((D, D)), weight_spec((D, D)),
        weight_spec((D, D)), weight_spec((1, D)), weight_spec((1, D)),
        weight_spec((D, D)), weight_spec((D, D)), weight_spec((D, D)),
        weight_spec((D, D)), weight_spec((1, D)), weight_spec((1, D)),
        weight_spec((D, Dff)), weight_spec((1, Dff)),
        weight_spec((Dff, D)), weight_spec((1, D)),
        weight_spec((1, D)), weight_spec((1, D)),
    ]

    kernel = functools.partial(decoder_layer_kernel, H=H, dq=dq)
    return pl.pallas_call(
        kernel,
        out_shape=jax.ShapeDtypeStruct((B, S, D), f32),
        grid_spec=pltpu.PrefetchScalarGridSpec(
            num_scalar_prefetch=0,
            grid=(B,),
            in_specs=in_specs,
            out_specs=batch_spec(),
            # Head-major attention context scratch (reused by both MHA blocks;
            # every element is rewritten before it is read).
            scratch_shapes=[pltpu.VMEM((H * S, dq), f32)],
        ),
        compiler_params=pltpu.CompilerParams(
            dimension_semantics=("parallel",),
            # Explicit budget (re-derive per chip for production d_model/d_ff;
            # v7x has only 64 MiB physical VMEM).
            vmem_limit_bytes=48 * 1024 * 1024,
        ),
    )


def decoder_layer(source, target, p):
    B, S, D = target.shape
    H, _, dq = p["Q1"].shape
    Dff = p["W1"].shape[1]

    # Host-side weight prep: flatten (H, D, dq) -> (D, H*dq) so each Q/K/V projection
    # is one MXU-wide matmul in the kernel (flat[:, h*dq:(h+1)*dq] == W[h]).
    flat = lambda w: jnp.transpose(w, (1, 0, 2)).reshape(D, H * dq)
    args = (target, source,
            flat(p["Q1"]), flat(p["K1"]), flat(p["V1"]), p["WoT1"], p["g1"], p["b1"],
            flat(p["Q2"]), flat(p["K2"]), flat(p["V2"]), p["WoT2"], p["g2"], p["b2"],
            p["W1"], p["bb1"], p["W2"], p["bb2"], p["g3"], p["b3"])

    try:
        # Weights have a constant block index across the batch grid -> single-buffer
        # them (halves their VMEM footprint; important at real sizes on v7x).
        # Block here so any lowering/runtime rejection of Buffered(1) surfaces inside
        # the try and we can fall back cleanly.
        return jax.block_until_ready(
            _build_decoder_layer_call(B, S, D, H, dq, Dff, pl.Buffered(1))(*args))
    except Exception:
        # Fallback to default double-buffering if this JAX build rejects Buffered(1).
        return _build_decoder_layer_call(B, S, D, H, dq, Dff, None)(*args)


def reference(source, target, p):
    """Pure-JAX replica of the PyTorch forward (eval mode, masks=None)."""
    def mha(xq, xk, xv, Qw, Kw, Vw, WoT):
        dq = Qw.shape[-1]
        q = jnp.einsum('bsd,hde->bhse', xq, Qw)
        k = jnp.einsum('bsd,hde->bhse', xk, Kw)
        v = jnp.einsum('bsd,hde->bhse', xv, Vw)
        s = jnp.einsum('bhqe,bhke->bhqk', q, k) / jnp.sqrt(jnp.float32(dq))
        att = jax.nn.softmax(s, axis=-1)
        heads = jnp.einsum('bhqk,bhke->bhqe', att, v)        # (B, H, S, dq) contiguous
        B, S = xq.shape[0], xq.shape[1]
        return heads.reshape(B, S, -1) @ WoT                 # == torch .view(B, S, -1)

    def ln(x, g, b):
        mu = x.mean(-1, keepdims=True)
        var = ((x - mu) ** 2).mean(-1, keepdims=True)
        return (x - mu) / jnp.sqrt(var + EPS) * g + b

    out = mha(target, target, target, p["Q1"], p["K1"], p["V1"], p["WoT1"])
    res = ln(out + target, p["g1"], p["b1"])
    out = mha(res, source, source, p["Q2"], p["K2"], p["V2"], p["WoT2"])
    res = ln(out + res, p["g2"], p["b2"])
    out = jnp.maximum(res @ p["W1"] + p["bb1"], 0.0) @ p["W2"] + p["bb2"]
    return ln(out + res, p["g3"], p["b3"])


def init_params(key, num_heads, d_model, d_ff):
    dq = d_model // num_heads
    ks = jax.random.split(key, 16)
    u = lambda k, shape, s: jax.random.uniform(k, shape, jnp.float32, -s, s)
    s_in = 1.0 / (d_model ** 0.5)   # kaiming_uniform(a=sqrt(5)) bound ~ 1/sqrt(fan_in)
    s_ff = 1.0 / (d_ff ** 0.5)
    return dict(
        Q1=u(ks[0], (num_heads, d_model, dq), s_in),
        K1=u(ks[1], (num_heads, d_model, dq), s_in),
        V1=u(ks[2], (num_heads, d_model, dq), s_in),
        WoT1=u(ks[3], (d_model, d_model), s_in),
        g1=jnp.ones((1, d_model), jnp.float32), b1=jnp.zeros((1, d_model), jnp.float32),
        Q2=u(ks[4], (num_heads, d_model, dq), s_in),
        K2=u(ks[5], (num_heads, d_model, dq), s_in),
        V2=u(ks[6], (num_heads, d_model, dq), s_in),
        WoT2=u(ks[7], (d_model, d_model), s_in),
        g2=jnp.ones((1, d_model), jnp.float32), b2=jnp.zeros((1, d_model), jnp.float32),
        W1=u(ks[8], (d_model, d_ff), s_in), bb1=u(ks[9], (1, d_ff), s_in),
        W2=u(ks[10], (d_ff, d_model), s_ff), bb2=u(ks[11], (1, d_model), s_ff),
        g3=jnp.ones((1, d_model), jnp.float32), b3=jnp.zeros((1, d_model), jnp.float32),
    )


if __name__ == "__main__":
    # d_model = 128 keeps every matmul / output store lane-dense on the TPU.
    B, S = 2, 16
    num_heads, d_model, d_ff = 4, 128, 256

    key = jax.random.PRNGKey(0)
    k_src, k_tgt, k_par = jax.random.split(key, 3)
    source = jax.random.normal(k_src, (B, S, d_model), jnp.float32)
    target = jax.random.normal(k_tgt, (B, S, d_model), jnp.float32)
    params = init_params(k_par, num_heads, d_model, d_ff)

    out = decoder_layer(source, target, params)
    out = jax.block_until_ready(out)

    ref = reference(source, target, params)
    assert out.shape == (B, S, d_model)
    max_err = jnp.max(jnp.abs(out - ref))
    # Tolerance covers the approx (EUP) softmax reciprocal and f32 reassociation.
    assert jnp.allclose(out, ref, atol=2e-3, rtol=2e-3), f"max abs err {max_err}"
    print("KERNEL_OK")
</pallas_src>

<mosaic_0001>
module attributes {stable_mosaic.version = 11 : i64} {
  func.func @decoder_layer_kernel(%arg0: i32, %arg1: memref<1x16x128xf32, #tpu.memory_space<vmem>>, %arg2: memref<1x16x128xf32, #tpu.memory_space<vmem>>, %arg3: memref<128x128xf32, #tpu.memory_space<vmem>>, %arg4: memref<128x128xf32, #tpu.memory_space<vmem>>, %arg5: memref<128x128xf32, #tpu.memory_space<vmem>>, %arg6: memref<128x128xf32, #tpu.memory_space<vmem>>, %arg7: memref<1x128xf32, #tpu.memory_space<vmem>>, %arg8: memref<1x128xf32, #tpu.memory_space<vmem>>, %arg9: memref<128x128xf32, #tpu.memory_space<vmem>>, %arg10: memref<128x128xf32, #tpu.memory_space<vmem>>, %arg11: memref<128x128xf32, #tpu.memory_space<vmem>>, %arg12: memref<128x128xf32, #tpu.memory_space<vmem>>, %arg13: memref<1x128xf32, #tpu.memory_space<vmem>>, %arg14: memref<1x128xf32, #tpu.memory_space<vmem>>, %arg15: memref<128x256xf32, #tpu.memory_space<vmem>>, %arg16: memref<1x256xf32, #tpu.memory_space<vmem>>, %arg17: memref<256x128xf32, #tpu.memory_space<vmem>>, %arg18: memref<1x128xf32, #tpu.memory_space<vmem>>, %arg19: memref<1x128xf32, #tpu.memory_space<vmem>>, %arg20: memref<1x128xf32, #tpu.memory_space<vmem>>, %arg21: memref<1x16x128xf32, #tpu.memory_space<vmem>>, %arg22: memref<64x32xf32, #tpu.memory_space<vmem>>) attributes {dimension_semantics = [#tpu.dimension_semantics<parallel>], iteration_bounds = array<i64: 2>, scalar_prefetch = 0 : i64, scratch_operands = 1 : i64, tpu.core_type = #tpu.core_type<tc>, window_params = [{transform_indices = @transform_0, window_bounds = array<i64: 1, 16, 128>}, {transform_indices = @transform_1, window_bounds = array<i64: 1, 16, 128>}, {pipeline_mode = #tpu.pipeline_mode<synchronous>, transform_indices = @transform_2, window_bounds = array<i64: 128, 128>}, {pipeline_mode = #tpu.pipeline_mode<synchronous>, transform_indices = @transform_3, window_bounds = array<i64: 128, 128>}, {pipeline_mode = #tpu.pipeline_mode<synchronous>, transform_indices = @transform_4, window_bounds = array<i64: 128, 128>}, {pipeline_mode = #tpu.pipeline_mode<synchronous>, transform_indices = @transform_5, window_bounds = array<i64: 128, 128>}, {pipeline_mode = #tpu.pipeline_mode<synchronous>, transform_indices = @transform_6, window_bounds = array<i64: 1, 128>}, {pipeline_mode = #tpu.pipeline_mode<synchronous>, transform_indices = @transform_7, window_bounds = array<i64: 1, 128>}, {pipeline_mode = #tpu.pipeline_mode<synchronous>, transform_indices = @transform_8, window_bounds = array<i64: 128, 128>}, {pipeline_mode = #tpu.pipeline_mode<synchronous>, transform_indices = @transform_9, window_bounds = array<i64: 128, 128>}, {pipeline_mode = #tpu.pipeline_mode<synchronous>, transform_indices = @transform_10, window_bounds = array<i64: 128, 128>}, {pipeline_mode = #tpu.pipeline_mode<synchronous>, transform_indices = @transform_11, window_bounds = array<i64: 128, 128>}, {pipeline_mode = #tpu.pipeline_mode<synchronous>, transform_indices = @transform_12, window_bounds = array<i64: 1, 128>}, {pipeline_mode = #tpu.pipeline_mode<synchronous>, transform_indices = @transform_13, window_bounds = array<i64: 1, 128>}, {pipeline_mode = #tpu.pipeline_mode<synchronous>, transform_indices = @transform_14, window_bounds = array<i64: 128, 256>}, {pipeline_mode = #tpu.pipeline_mode<synchronous>, transform_indices = @transform_15, window_bounds = array<i64: 1, 256>}, {pipeline_mode = #tpu.pipeline_mode<synchronous>, transform_indices = @transform_16, window_bounds = array<i64: 256, 128>}, {pipeline_mode = #tpu.pipeline_mode<synchronous>, transform_indices = @transform_17, window_bounds = array<i64: 1, 128>}, {pipeline_mode = #tpu.pipeline_mode<synchronous>, transform_indices = @transform_18, window_bounds = array<i64: 1, 128>}, {pipeline_mode = #tpu.pipeline_mode<synchronous>, transform_indices = @transform_19, window_bounds = array<i64: 1, 128>}, {transform_indices = @transform_20, window_bounds = array<i64: 1, 16, 128>}]} {
    %c0 = arith.constant 0 : index
    %c0_0 = arith.constant 0 : index
    %c0_1 = arith.constant 0 : index
    %0 = vector.load %arg1[%c0, %c0_0, %c0_1] : memref<1x16x128xf32, #tpu.memory_space<vmem>>, vector<1x16x128xf32>
    %1 = vector.shape_cast %0 : vector<1x16x128xf32> to vector<16x128xf32>
    %c0_2 = arith.constant 0 : index
    %c0_3 = arith.constant 0 : index
    %c0_4 = arith.constant 0 : index
    %2 = vector.load %arg2[%c0_2, %c0_3, %c0_4] : memref<1x16x128xf32, #tpu.memory_space<vmem>>, vector<1x16x128xf32>
    %3 = vector.shape_cast %2 : vector<1x16x128xf32> to vector<16x128xf32>
    %c0_5 = arith.constant 0 : index
    %c0_6 = arith.constant 0 : index
    %4 = vector.load %arg3[%c0_5, %c0_6] : memref<128x128xf32, #tpu.memory_space<vmem>>, vector<128x128xf32>
    %c0_7 = arith.constant 0 : index
    %c0_8 = arith.constant 0 : index
    %5 = vector.load %arg4[%c0_7, %c0_8] : memref<128x128xf32, #tpu.memory_space<vmem>>, vector<128x128xf32>
    %c0_9 = arith.constant 0 : index
    %c0_10 = arith.constant 0 : index
    %6 = vector.load %arg5[%c0_9, %c0_10] : memref<128x128xf32, #tpu.memory_space<vmem>>, vector<128x128xf32>
    %c0_11 = arith.constant 0 : index
    %c0_12 = arith.constant 0 : index
    %7 = vector.load %arg6[%c0_11, %c0_12] : memref<128x128xf32, #tpu.memory_space<vmem>>, vector<128x128xf32>
    %cst = arith.constant 3.200000e+01 : f32
    %8 = math.sqrt %cst : f32
    %cst_13 = arith.constant 1.000000e+00 : f32
    %9 = arith.divf %cst_13, %8 : f32
    %cst_14 = arith.constant dense<0.000000e+00> : vector<16x128xf32>
    %10 = tpu.matmul %1, %4, %cst_14 {dimension_numbers = #tpu.dot_dimension_numbers<[1], [0], [0], [1], [0, 0, 1, 1], [], []>} : vector<16x128xf32>, vector<128x128xf32>, vector<16x128xf32> -> vector<16x128xf32>
    %11 = vector.broadcast %9 : f32 to vector<16x128xf32>
    %12 = arith.mulf %10, %11 : vector<16x128xf32>
    %cst_15 = arith.constant dense<0.000000e+00> : vector<16x128xf32>
    %13 = tpu.matmul %1, %5, %cst_15 {dimension_numbers = #tpu.dot_dimension_numbers<[1], [0], [0], [1], [0, 0, 1, 1], [], []>} : vector<16x128xf32>, vector<128x128xf32>, vector<16x128xf32> -> vector<16x128xf32>
    %cst_16 = arith.constant dense<0.000000e+00> : vector<16x128xf32>
    %14 = tpu.matmul %1, %6, %cst_16 {dimension_numbers = #tpu.dot_dimension_numbers<[1], [0], [0], [1], [0, 0, 1, 1], [], []>} : vector<16x128xf32>, vector<128x128xf32>, vector<16x128xf32> -> vector<16x128xf32>
    %15 = vector.extract_strided_slice %12 {offsets = [0, 0], sizes = [16, 32], strides = [1, 1]} : vector<16x128xf32> to vector<16x32xf32>
    %16 = vector.extract_strided_slice %13 {offsets = [0, 0], sizes = [16, 32], strides = [1, 1]} : vector<16x128xf32> to vector<16x32xf32>
    %17 = vector.extract_strided_slice %14 {offsets = [0, 0], sizes = [16, 32], strides = [1, 1]} : vector<16x128xf32> to vector<16x32xf32>
    %cst_17 = arith.constant dense<0.000000e+00> : vector<16x16xf32>
    %18 = tpu.matmul %15, %16, %cst_17 {dimension_numbers = #tpu.dot_dimension_numbers<[1], [1], [0], [0], [0, 0, 1, 0], [], []>} : vector<16x32xf32>, vector<16x32xf32>, vector<16x16xf32> -> vector<16x16xf32>
    %cst_18 = arith.constant dense<0xFF800000> : vector<16xf32>
    %19 = vector.multi_reduction <maximumf>, %18, %cst_18 [1] : vector<16x16xf32> to vector<16xf32>
    %20 = vector.shape_cast %19 : vector<16xf32> to vector<16x1xf32>
    %21 = vector.broadcast %20 : vector<16x1xf32> to vector<16x16xf32>
    %22 = arith.subf %18, %21 : vector<16x16xf32>
    %23 = math.exp %22 : vector<16x16xf32>
    %cst_19 = arith.constant dense<0.000000e+00> : vector<16xf32>
    %24 = vector.multi_reduction <add>, %23, %cst_19 [1] : vector<16x16xf32> to vector<16xf32>
    %25 = vector.shape_cast %24 : vector<16xf32> to vector<16x1xf32>
    %26 = tpu.reciprocal %25 {approx = true} : vector<16x1xf32> -> vector<16x1xf32>
    %27 = vector.broadcast %26 : vector<16x1xf32> to vector<16x16xf32>
    %28 = arith.mulf %23, %27 : vector<16x16xf32>
    %cst_20 = arith.constant dense<0.000000e+00> : vector<16x32xf32>
    %29 = tpu.matmul %28, %17, %cst_20 {dimension_numbers = #tpu.dot_dimension_numbers<[1], [0], [0], [1], [0, 0, 1, 1], [], []>} : vector<16x16xf32>, vector<16x32xf32>, vector<16x32xf32> -> vector<16x32xf32>
    %c0_21 = arith.constant 0 : index
    %c0_22 = arith.constant 0 : index
    %30 = vector.load %arg22[%c0_21, %c0_22] : memref<64x32xf32, #tpu.memory_space<vmem>>, vector<16x32xf32>
    tpu.vector_store %arg22[%c0_21, %c0_22], %29 {strides = array<i32>} : memref<64x32xf32, #tpu.memory_space<vmem>>, vector<16x32xf32>,
    %31 = vector.extract_strided_slice %12 {offsets = [0, 32], sizes = [16, 32], strides = [1, 1]} : vector<16x128xf32> to vector<16x32xf32>
    %32 = vector.extract_strided_slice %13 {offsets = [0, 32], sizes = [16, 32], strides = [1, 1]} : vector<16x128xf32> to vector<16x32xf32>
    %33 = vector.extract_strided_slice %14 {offsets = [0, 32], sizes = [16, 32], strides = [1, 1]} : vector<16x128xf32> to vector<16x32xf32>
    %cst_23 = arith.constant dense<0.000000e+00> : vector<16x16xf32>
    %34 = tpu.matmul %31, %32, %cst_23 {dimension_numbers = #tpu.dot_dimension_numbers<[1], [1], [0], [0], [0, 0, 1, 0], [], []>} : vector<16x32xf32>, vector<16x32xf32>, vector<16x16xf32> -> vector<16x16xf32>
    %cst_24 = arith.constant dense<0xFF800000> : vector<16xf32>
    %35 = vector.multi_reduction <maximumf>, %34, %cst_24 [1] : vector<16x16xf32> to vector<16xf32>
    %36 = vector.shape_cast %35 : vector<16xf32> to vector<16x1xf32>
    %37 = vector.broadcast %36 : vector<16x1xf32> to vector<16x16xf32>
    %38 = arith.subf %34, %37 : vector<16x16xf32>
    %39 = math.exp %38 : vector<16x16xf32>
    %cst_25 = arith.constant dense<0.000000e+00> : vector<16xf32>
    %40 = vector.multi_reduction <add>, %39, %cst_25 [1] : vector<16x16xf32> to vector<16xf32>
    %41 = vector.shape_cast %40 : vector<16xf32> to vector<16x1xf32>
    %42 = tpu.reciprocal %41 {approx = true} : vector<16x1xf32> -> vector<16x1xf32>
    %43 = vector.broadcast %42 : vector<16x1xf32> to vector<16x16xf32>
    %44 = arith.mulf %39, %43 : vector<16x16xf32>
    %cst_26 = arith.constant dense<0.000000e+00> : vector<16x32xf32>
    %45 = tpu.matmul %44, %33, %cst_26 {dimension_numbers = #tpu.dot_dimension_numbers<[1], [0], [0], [1], [0, 0, 1, 1], [], []>} : vector<16x16xf32>, vector<16x32xf32>, vector<16x32xf32> -> vector<16x32xf32>
    %c16 = arith.constant 16 : index
    %c0_27 = arith.constant 0 : index
    %46 = vector.load %arg22[%c16, %c0_27] : memref<64x32xf32, #tpu.memory_space<vmem>>, vector<16x32xf32>
    tpu.vector_store %arg22[%c16, %c0_27], %45 {strides = array<i32>} : memref<64x32xf32, #tpu.memory_space<vmem>>, vector<16x32xf32>,
    %47 = vector.extract_strided_slice %12 {offsets = [0, 64], sizes = [16, 32], strides = [1, 1]} : vector<16x128xf32> to vector<16x32xf32>
    %48 = vector.extract_strided_slice %13 {offsets = [0, 64], sizes = [16, 32], strides = [1, 1]} : vector<16x128xf32> to vector<16x32xf32>
    %49 = vector.extract_strided_slice %14 {offsets = [0, 64], sizes = [16, 32], strides = [1, 1]} : vector<16x128xf32> to vector<16x32xf32>
    %cst_28 = arith.constant dense<0.000000e+00> : vector<16x16xf32>
    %50 = tpu.matmul %47, %48, %cst_28 {dimension_numbers = #tpu.dot_dimension_numbers<[1], [1], [0], [0], [0, 0, 1, 0], [], []>} : vector<16x32xf32>, vector<16x32xf32>, vector<16x16xf32> -> vector<16x16xf32>
    %cst_29 = arith.constant dense<0xFF800000> : vector<16xf32>
    %51 = vector.multi_reduction <maximumf>, %50, %cst_29 [1] : vector<16x16xf32> to vector<16xf32>
    %52 = vector.shape_cast %51 : vector<16xf32> to vector<16x1xf32>
    %53 = vector.broadcast %52 : vector<16x1xf32> to vector<16x16xf32>
    %54 = arith.subf %50, %53 : vector<16x16xf32>
    %55 = math.exp %54 : vector<16x16xf32>
    %cst_30 = arith.constant dense<0.000000e+00> : vector<16xf32>
    %56 = vector.multi_reduction <add>, %55, %cst_30 [1] : vector<16x16xf32> to vector<16xf32>
    %57 = vector.shape_cast %56 : vector<16xf32> to vector<16x1xf32>
    %58 = tpu.reciprocal %57 {approx = true} : vector<16x1xf32> -> vector<16x1xf32>
    %59 = vector.broadcast %58 : vector<16x1xf32> to vector<16x16xf32>
    %60 = arith.mulf %55, %59 : vector<16x16xf32>
    %cst_31 = arith.constant dense<0.000000e+00> : vector<16x32xf32>
    %61 = tpu.matmul %60, %49, %cst_31 {dimension_numbers = #tpu.dot_dimension_numbers<[1], [0], [0], [1], [0, 0, 1, 1], [], []>} : vector<16x16xf32>, vector<16x32xf32>, vector<16x32xf32> -> vector<16x32xf32>
    %c32 = arith.constant 32 : index
    %c0_32 = arith.constant 0 : index
    %62 = vector.load %arg22[%c32, %c0_32] : memref<64x32xf32, #tpu.memory_space<vmem>>, vector<16x32xf32>
    tpu.vector_store %arg22[%c32, %c0_32], %61 {strides = array<i32>} : memref<64x32xf32, #tpu.memory_space<vmem>>, vector<16x32xf32>,
    %63 = vector.extract_strided_slice %12 {offsets = [0, 96], sizes = [16, 32], strides = [1, 1]} : vector<16x128xf32> to vector<16x32xf32>
    %64 = vector.extract_strided_slice %13 {offsets = [0, 96], sizes = [16, 32], strides = [1, 1]} : vector<16x128xf32> to vector<16x32xf32>
    %65 = vector.extract_strided_slice %14 {offsets = [0, 96], sizes = [16, 32], strides = [1, 1]} : vector<16x128xf32> to vector<16x32xf32>
    %cst_33 = arith.constant dense<0.000000e+00> : vector<16x16xf32>
    %66 = tpu.matmul %63, %64, %cst_33 {dimension_numbers = #tpu.dot_dimension_numbers<[1], [1], [0], [0], [0, 0, 1, 0], [], []>} : vector<16x32xf32>, vector<16x32xf32>, vector<16x16xf32> -> vector<16x16xf32>
    %cst_34 = arith.constant dense<0xFF800000> : vector<16xf32>
    %67 = vector.multi_reduction <maximumf>, %66, %cst_34 [1] : vector<16x16xf32> to vector<16xf32>
    %68 = vector.shape_cast %67 : vector<16xf32> to vector<16x1xf32>
    %69 = vector.broadcast %68 : vector<16x1xf32> to vector<16x16xf32>
    %70 = arith.subf %66, %69 : vector<16x16xf32>
    %71 = math.exp %70 : vector<16x16xf32>
    %cst_35 = arith.constant dense<0.000000e+00> : vector<16xf32>
    %72 = vector.multi_reduction <add>, %71, %cst_35 [1] : vector<16x16xf32> to vector<16xf32>
    %73 = vector.shape_cast %72 : vector<16xf32> to vector<16x1xf32>
    %74 = tpu.reciprocal %73 {approx = true} : vector<16x1xf32> -> vector<16x1xf32>
    %75 = vector.broadcast %74 : vector<16x1xf32> to vector<16x16xf32>
    %76 = arith.mulf %71, %75 : vector<16x16xf32>
    %cst_36 = arith.constant dense<0.000000e+00> : vector<16x32xf32>
    %77 = tpu.matmul %76, %65, %cst_36 {dimension_numbers = #tpu.dot_dimension_numbers<[1], [0], [0], [1], [0, 0, 1, 1], [], []>} : vector<16x16xf32>, vector<16x32xf32>, vector<16x32xf32> -> vector<16x32xf32>
    %c48 = arith.constant 48 : index
    %c0_37 = arith.constant 0 : index
    %78 = vector.load %arg22[%c48, %c0_37] : memref<64x32xf32, #tpu.memory_space<vmem>>, vector<16x32xf32>
    tpu.vector_store %arg22[%c48, %c0_37], %77 {strides = array<i32>} : memref<64x32xf32, #tpu.memory_space<vmem>>, vector<16x32xf32>,
    %c0_38 = arith.constant 0 : index
    %c0_39 = arith.constant 0 : index
    %79 = tpu.strided_load %arg22[%c0_38, %c0_39] {strides = array<i32: 4, 1>} : memref<64x32xf32, #tpu.memory_space<vmem>>, vector<16x32xf32>
    %c1 = arith.constant 1 : index
    %c0_40 = arith.constant 0 : index
    %80 = tpu.strided_load %arg22[%c1, %c0_40] {strides = array<i32: 4, 1>} : memref<64x32xf32, #tpu.memory_space<vmem>>, vector<16x32xf32>
    %c2 = arith.constant 2 : index
    %c0_41 = arith.constant 0 : index
    %81 = tpu.strided_load %arg22[%c2, %c0_41] {strides = array<i32: 4, 1>} : memref<64x32xf32, #tpu.memory_space<vmem>>, vector<16x32xf32>
    %c3 = arith.constant 3 : index
    %c0_42 = arith.constant 0 : index
    %82 = tpu.strided_load %arg22[%c3, %c0_42] {strides = array<i32: 4, 1>} : memref<64x32xf32, #tpu.memory_space<vmem>>, vector<16x32xf32>
    %83 = tpu.concatenate %79, %80, %81, %82 in 1 : vector<16x32xf32>, vector<16x32xf32>, vector<16x32xf32>, vector<16x32xf32> -> vector<16x128xf32>
    %cst_43 = arith.constant dense<0.000000e+00> : vector<16x128xf32>
    %84 = tpu.matmul %83, %7, %cst_43 {dimension_numbers = #tpu.dot_dimension_numbers<[1], [0], [0], [1], [0, 0, 1, 1], [], []>} : vector<16x128xf32>, vector<128x128xf32>, vector<16x128xf32> -> vector<16x128xf32>
    %85 = arith.addf %84, %1 : vector<16x128xf32>
    %c0_44 = arith.constant 0 : index
    %c0_45 = arith.constant 0 : index
    %86 = vector.load %arg7[%c0_44, %c0_45] : memref<1x128xf32, #tpu.memory_space<vmem>>, vector<1x128xf32>
    %c0_46 = arith.constant 0 : index
    %c0_47 = arith.constant 0 : index
    %87 = vector.load %arg8[%c0_46, %c0_47] : memref<1x128xf32, #tpu.memory_space<vmem>>, vector<1x128xf32>
    %cst_48 = arith.constant dense<0.000000e+00> : vector<16xf32>
    %88 = vector.multi_reduction <add>, %85, %cst_48 [1] : vector<16x128xf32> to vector<16xf32>
    %89 = vector.shape_cast %88 : vector<16xf32> to vector<16x1xf32>
    %cst_49 = arith.constant 1.280000e+02 : f32
    %90 = vector.broadcast %cst_49 : f32 to vector<16x1xf32>
    %91 = arith.divf %89, %90 : vector<16x1xf32>
    %92 = vector.broadcast %91 : vector<16x1xf32> to vector<16x128xf32>
    %93 = arith.subf %85, %92 : vector<16x128xf32>
    %94 = arith.mulf %93, %93 : vector<16x128xf32>
    %cst_50 = arith.constant dense<0.000000e+00> : vector<16xf32>
    %95 = vector.multi_reduction <add>, %94, %cst_50 [1] : vector<16x128xf32> to vector<16xf32>
    %96 = vector.shape_cast %95 : vector<16xf32> to vector<16x1xf32>
    %cst_51 = arith.constant 1.280000e+02 : f32
    %97 = vector.broadcast %cst_51 : f32 to vector<16x1xf32>
    %98 = arith.divf %96, %97 : vector<16x1xf32>
    %99 = vector.broadcast %91 : vector<16x1xf32> to vector<16x128xf32>
    %100 = arith.subf %85, %99 : vector<16x128xf32>
    %cst_52 = arith.constant 9.99999974E-6 : f32
    %101 = vector.broadcast %cst_52 : f32 to vector<16x1xf32>
    %102 = arith.addf %98, %101 : vector<16x1xf32>
    %103 = math.rsqrt %102 : vector<16x1xf32>
    %104 = vector.broadcast %103 : vector<16x1xf32> to vector<16x128xf32>
    %105 = arith.mulf %100, %104 : vector<16x128xf32>
    %106 = vector.broadcast %86 : vector<1x128xf32> to vector<16x128xf32>
    %107 = arith.mulf %105, %106 : vector<16x128xf32>
    %108 = vector.broadcast %87 : vector<1x128xf32> to vector<16x128xf32>
    %109 = arith.addf %107, %108 : vector<16x128xf32>
    %c0_53 = arith.constant 0 : index
    %c0_54 = arith.constant 0 : index
    %110 = vector.load %arg9[%c0_53, %c0_54] : memref<128x128xf32, #tpu.memory_space<vmem>>, vector<128x128xf32>
    %c0_55 = arith.constant 0 : index
    %c0_56 = arith.constant 0 : index
    %111 = vector.load %arg10[%c0_55, %c0_56] : memref<128x128xf32, #tpu.memory_space<vmem>>, vector<128x128xf32>
    %c0_57 = arith.constant 0 : index
    %c0_58 = arith.constant 0 : index
    %112 = vector.load %arg11[%c0_57, %c0_58] : memref<128x128xf32, #tpu.memory_space<vmem>>, vector<128x128xf32>
    %c0_59 = arith.constant 0 : index
    %c0_60 = arith.constant 0 : index
    %113 = vector.load %arg12[%c0_59, %c0_60] : memref<128x128xf32, #tpu.memory_space<vmem>>, vector<128x128xf32>
    %cst_61 = arith.constant 3.200000e+01 : f32
    %114 = math.sqrt %cst_61 : f32
    %cst_62 = arith.constant 1.000000e+00 : f32
    %115 = arith.divf %cst_62, %114 : f32
    %cst_63 = arith.constant dense<0.000000e+00> : vector<16x128xf32>
    %116 = tpu.matmul %109, %110, %cst_63 {dimension_numbers = #tpu.dot_dimension_numbers<[1], [0], [0], [1], [0, 0, 1, 1], [], []>} : vector<16x128xf32>, vector<128x128xf32>, vector<16x128xf32> -> vector<16x128xf32>
    %117 = vector.broadcast %115 : f32 to vector<16x128xf32>
    %118 = arith.mulf %116, %117 : vector<16x128xf32>
    %cst_64 = arith.constant dense<0.000000e+00> : vector<16x128xf32>
    %119 = tpu.matmul %3, %111, %cst_64 {dimension_numbers = #tpu.dot_dimension_numbers<[1], [0], [0], [1], [0, 0, 1, 1], [], []>} : vector<16x128xf32>, vector<128x128xf32>, vector<16x128xf32> -> vector<16x128xf32>
    %cst_65 = arith.constant dense<0.000000e+00> : vector<16x128xf32>
    %120 = tpu.matmul %3, %112, %cst_65 {dimension_numbers = #tpu.dot_dimension_numbers<[1], [0], [0], [1], [0, 0, 1, 1], [], []>} : vector<16x128xf32>, vector<128x128xf32>, vector<16x128xf32> -> vector<16x128xf32>
    %121 = vector.extract_strided_slice %118 {offsets = [0, 0], sizes = [16, 32], strides = [1, 1]} : vector<16x128xf32> to vector<16x32xf32>
    %122 = vector.extract_strided_slice %119 {offsets = [0, 0], sizes = [16, 32], strides = [1, 1]} : vector<16x128xf32> to vector<16x32xf32>
    %123 = vector.extract_strided_slice %120 {offsets = [0, 0], sizes = [16, 32], strides = [1, 1]} : vector<16x128xf32> to vector<16x32xf32>
    %cst_66 = arith.constant dense<0.000000e+00> : vector<16x16xf32>
    %124 = tpu.matmul %121, %122, %cst_66 {dimension_numbers = #tpu.dot_dimension_numbers<[1], [1], [0], [0], [0, 0, 1, 0], [], []>} : vector<16x32xf32>, vector<16x32xf32>, vector<16x16xf32> -> vector<16x16xf32>
    %cst_67 = arith.constant dense<0xFF800000> : vector<16xf32>
    %125 = vector.multi_reduction <maximumf>, %124, %cst_67 [1] : vector<16x16xf32> to vector<16xf32>
    %126 = vector.shape_cast %125 : vector<16xf32> to vector<16x1xf32>
    %127 = vector.broadcast %126 : vector<16x1xf32> to vector<16x16xf32>
    %128 = arith.subf %124, %127 : vector<16x16xf32>
    %129 = math.exp %128 : vector<16x16xf32>
    %cst_68 = arith.constant dense<0.000000e+00> : vector<16xf32>
    %130 = vector.multi_reduction <add>, %129, %cst_68 [1] : vector<16x16xf32> to vector<16xf32>
    %131 = vector.shape_cast %130 : vector<16xf32> to vector<16x1xf32>
    %132 = tpu.reciprocal %131 {approx = true} : vector<16x1xf32> -> vector<16x1xf32>
    %133 = vector.broadcast %132 : vector<16x1xf32> to vector<16x16xf32>
    %134 = arith.mulf %129, %133 : vector<16x16xf32>
    %cst_69 = arith.constant dense<0.000000e+00> : vector<16x32xf32>
    %135 = tpu.matmul %134, %123, %cst_69 {dimension_numbers = #tpu.dot_dimension_numbers<[1], [0], [0], [1], [0, 0, 1, 1], [], []>} : vector<16x16xf32>, vector<16x32xf32>, vector<16x32xf32> -> vector<16x32xf32>
    %c0_70 = arith.constant 0 : index
    %c0_71 = arith.constant 0 : index
    %136 = vector.load %arg22[%c0_70, %c0_71] : memref<64x32xf32, #tpu.memory_space<vmem>>, vector<16x32xf32>
    tpu.vector_store %arg22[%c0_70, %c0_71], %135 {strides = array<i32>} : memref<64x32xf32, #tpu.memory_space<vmem>>, vector<16x32xf32>,
    %137 = vector.extract_strided_slice %118 {offsets = [0, 32], sizes = [16, 32], strides = [1, 1]} : vector<16x128xf32> to vector<16x32xf32>
    %138 = vector.extract_strided_slice %119 {offsets = [0, 32], sizes = [16, 32], strides = [1, 1]} : vector<16x128xf32> to vector<16x32xf32>
    %139 = vector.extract_strided_slice %120 {offsets = [0, 32], sizes = [16, 32], strides = [1, 1]} : vector<16x128xf32> to vector<16x32xf32>
    %cst_72 = arith.constant dense<0.000000e+00> : vector<16x16xf32>
    %140 = tpu.matmul %137, %138, %cst_72 {dimension_numbers = #tpu.dot_dimension_numbers<[1], [1], [0], [0], [0, 0, 1, 0], [], []>} : vector<16x32xf32>, vector<16x32xf32>, vector<16x16xf32> -> vector<16x16xf32>
    %cst_73 = arith.constant dense<0xFF800000> : vector<16xf32>
    %141 = vector.multi_reduction <maximumf>, %140, %cst_73 [1] : vector<16x16xf32> to vector<16xf32>
    %142 = vector.shape_cast %141 : vector<16xf32> to vector<16x1xf32>
    %143 = vector.broadcast %142 : vector<16x1xf32> to vector<16x16xf32>
    %144 = arith.subf %140, %143 : vector<16x16xf32>
    %145 = math.exp %144 : vector<16x16xf32>
    %cst_74 = arith.constant dense<0.000000e+00> : vector<16xf32>
    %146 = vector.multi_reduction <add>, %145, %cst_74 [1] : vector<16x16xf32> to vector<16xf32>
    %147 = vector.shape_cast %146 : vector<16xf32> to vector<16x1xf32>
    %148 = tpu.reciprocal %147 {approx = true} : vector<16x1xf32> -> vector<16x1xf32>
    %149 = vector.broadcast %148 : vector<16x1xf32> to vector<16x16xf32>
    %150 = arith.mulf %145, %149 : vector<16x16xf32>
    %cst_75 = arith.constant dense<0.000000e+00> : vector<16x32xf32>
    %151 = tpu.matmul %150, %139, %cst_75 {dimension_numbers = #tpu.dot_dimension_numbers<[1], [0], [0], [1], [0, 0, 1, 1], [], []>} : vector<16x16xf32>, vector<16x32xf32>, vector<16x32xf32> -> vector<16x32xf32>
    %c16_76 = arith.constant 16 : index
    %c0_77 = arith.constant 0 : index
    %152 = vector.load %arg22[%c16_76, %c0_77] : memref<64x32xf32, #tpu.memory_space<vmem>>, vector<16x32xf32>
    tpu.vector_store %arg22[%c16_76, %c0_77], %151 {strides = array<i32>} : memref<64x32xf32, #tpu.memory_space<vmem>>, vector<16x32xf32>,
    %153 = vector.extract_strided_slice %118 {offsets = [0, 64], sizes = [16, 32], strides = [1, 1]} : vector<16x128xf32> to vector<16x32xf32>
    %154 = vector.extract_strided_slice %119 {offsets = [0, 64], sizes = [16, 32], strides = [1, 1]} : vector<16x128xf32> to vector<16x32xf32>
    %155 = vector.extract_strided_slice %120 {offsets = [0, 64], sizes = [16, 32], strides = [1, 1]} : vector<16x128xf32> to vector<16x32xf32>
    %cst_78 = arith.constant dense<0.000000e+00> : vector<16x16xf32>
    %156 = tpu.matmul %153, %154, %cst_78 {dimension_numbers = #tpu.dot_dimension_numbers<[1], [1], [0], [0], [0, 0, 1, 0], [], []>} : vector<16x32xf32>, vector<16x32xf32>, vector<16x16xf32> -> vector<16x16xf32>
    %cst_79 = arith.constant dense<0xFF800000> : vector<16xf32>
    %157 = vector.multi_reduction <maximumf>, %156, %cst_79 [1] : vector<16x16xf32> to vector<16xf32>
    %158 = vector.shape_cast %157 : vector<16xf32> to vector<16x1xf32>
    %159 = vector.broadcast %158 : vector<16x1xf32> to vector<16x16xf32>
    %160 = arith.subf %156, %159 : vector<16x16xf32>
    %161 = math.exp %160 : vector<16x16xf32>
    %cst_80 = arith.constant dense<0.000000e+00> : vector<16xf32>
    %162 = vector.multi_reduction <add>, %161, %cst_80 [1] : vector<16x16xf32> to vector<16xf32>
    %163 = vector.shape_cast %162 : vector<16xf32> to vector<16x1xf32>
    %164 = tpu.reciprocal %163 {approx = true} : vector<16x1xf32> -> vector<16x1xf32>
    %165 = vector.broadcast %164 : vector<16x1xf32> to vector<16x16xf32>
    %166 = arith.mulf %161, %165 : vector<16x16xf32>
    %cst_81 = arith.constant dense<0.000000e+00> : vector<16x32xf32>
    %167 = tpu.matmul %166, %155, %cst_81 {dimension_numbers = #tpu.dot_dimension_numbers<[1], [0], [0], [1], [0, 0, 1, 1], [], []>} : vector<16x16xf32>, vector<16x32xf32>, vector<16x32xf32> -> vector<16x32xf32>
    %c32_82 = arith.constant 32 : index
    %c0_83 = arith.constant 0 : index
    %168 = vector.load %arg22[%c32_82, %c0_83] : memref<64x32xf32, #tpu.memory_space<vmem>>, vector<16x32xf32>
    tpu.vector_store %arg22[%c32_82, %c0_83], %167 {strides = array<i32>} : memref<64x32xf32, #tpu.memory_space<vmem>>, vector<16x32xf32>,
    %169 = vector.extract_strided_slice %118 {offsets = [0, 96], sizes = [16, 32], strides = [1, 1]} : vector<16x128xf32> to vector<16x32xf32>
    %170 = vector.extract_strided_slice %119 {offsets = [0, 96], sizes = [16, 32], strides = [1, 1]} : vector<16x128xf32> to vector<16x32xf32>
    %171 = vector.extract_strided_slice %120 {offsets = [0, 96], sizes = [16, 32], strides = [1, 1]} : vector<16x128xf32> to vector<16x32xf32>
    %cst_84 = arith.constant dense<0.000000e+00> : vector<16x16xf32>
    %172 = tpu.matmul %169, %170, %cst_84 {dimension_numbers = #tpu.dot_dimension_numbers<[1], [1], [0], [0], [0, 0, 1, 0], [], []>} : vector<16x32xf32>, vector<16x32xf32>, vector<16x16xf32> -> vector<16x16xf32>
    %cst_85 = arith.constant dense<0xFF800000> : vector<16xf32>
    %173 = vector.multi_reduction <maximumf>, %172, %cst_85 [1] : vector<16x16xf32> to vector<16xf32>
    %174 = vector.shape_cast %173 : vector<16xf32> to vector<16x1xf32>
    %175 = vector.broadcast %174 : vector<16x1xf32> to vector<16x16xf32>
    %176 = arith.subf %172, %175 : vector<16x16xf32>
    %177 = math.exp %176 : vector<16x16xf32>
    %cst_86 = arith.constant dense<0.000000e+00> : vector<16xf32>
    %178 = vector.multi_reduction <add>, %177, %cst_86 [1] : vector<16x16xf32> to vector<16xf32>
    %179 = vector.shape_cast %178 : vector<16xf32> to vector<16x1xf32>
    %180 = tpu.reciprocal %179 {approx = true} : vector<16x1xf32> -> vector<16x1xf32>
    %181 = vector.broadcast %180 : vector<16x1xf32> to vector<16x16xf32>
    %182 = arith.mulf %177, %181 : vector<16x16xf32>
    %cst_87 = arith.constant dense<0.000000e+00> : vector<16x32xf32>
    %183 = tpu.matmul %182, %171, %cst_87 {dimension_numbers = #tpu.dot_dimension_numbers<[1], [0], [0], [1], [0, 0, 1, 1], [], []>} : vector<16x16xf32>, vector<16x32xf32>, vector<16x32xf32> -> vector<16x32xf32>
    %c48_88 = arith.constant 48 : index
    %c0_89 = arith.constant 0 : index
    %184 = vector.load %arg22[%c48_88, %c0_89] : memref<64x32xf32, #tpu.memory_space<vmem>>, vector<16x32xf32>
    tpu.vector_store %arg22[%c48_88, %c0_89], %183 {strides = array<i32>} : memref<64x32xf32, #tpu.memory_space<vmem>>, vector<16x32xf32>,
    %c0_90 = arith.constant 0 : index
    %c0_91 = arith.constant 0 : index
    %185 = tpu.strided_load %arg22[%c0_90, %c0_91] {strides = array<i32: 4, 1>} : memref<64x32xf32, #tpu.memory_space<vmem>>, vector<16x32xf32>
    %c1_92 = arith.constant 1 : index
    %c0_93 = arith.constant 0 : index
    %186 = tpu.strided_load %arg22[%c1_92, %c0_93] {strides = array<i32: 4, 1>} : memref<64x32xf32, #tpu.memory_space<vmem>>, vector<16x32xf32>
    %c2_94 = arith.constant 2 : index
    %c0_95 = arith.constant 0 : index
    %187 = tpu.strided_load %arg22[%c2_94, %c0_95] {strides = array<i32: 4, 1>} : memref<64x32xf32, #tpu.memory_space<vmem>>, vector<16x32xf32>
    %c3_96 = arith.constant 3 : index
    %c0_97 = arith.constant 0 : index
    %188 = tpu.strided_load %arg22[%c3_96, %c0_97] {strides = array<i32: 4, 1>} : memref<64x32xf32, #tpu.memory_space<vmem>>, vector<16x32xf32>
    %189 = tpu.concatenate %185, %186, %187, %188 in 1 : vector<16x32xf32>, vector<16x32xf32>, vector<16x32xf32>, vector<16x32xf32> -> vector<16x128xf32>
    %cst_98 = arith.constant dense<0.000000e+00> : vector<16x128xf32>
    %190 = tpu.matmul %189, %113, %cst_98 {dimension_numbers = #tpu.dot_dimension_numbers<[1], [0], [0], [1], [0, 0, 1, 1], [], []>} : vector<16x128xf32>, vector<128x128xf32>, vector<16x128xf32> -> vector<16x128xf32>
    %191 = arith.addf %190, %109 : vector<16x128xf32>
    %c0_99 = arith.constant 0 : index
    %c0_100 = arith.constant 0 : index
    %192 = vector.load %arg13[%c0_99, %c0_100] : memref<1x128xf32, #tpu.memory_space<vmem>>, vector<1x128xf32>
    %c0_101 = arith.constant 0 : index
    %c0_102 = arith.constant 0 : index
    %193 = vector.load %arg14[%c0_101, %c0_102] : memref<1x128xf32, #tpu.memory_space<vmem>>, vector<1x128xf32>
    %cst_103 = arith.constant dense<0.000000e+00> : vector<16xf32>
    %194 = vector.multi_reduction <add>, %191, %cst_103 [1] : vector<16x128xf32> to vector<16xf32>
    %195 = vector.shape_cast %194 : vector<16xf32> to vector<16x1xf32>
    %cst_104 = arith.constant 1.280000e+02 : f32
    %196 = vector.broadcast %cst_104 : f32 to vector<16x1xf32>
    %197 = arith.divf %195, %196 : vector<16x1xf32>
    %198 = vector.broadcast %197 : vector<16x1xf32> to vector<16x128xf32>
    %199 = arith.subf %191, %198 : vector<16x128xf32>
    %200 = arith.mulf %199, %199 : vector<16x128xf32>
    %cst_105 = arith.constant dense<0.000000e+00> : vector<16xf32>
    %201 = vector.multi_reduction <add>, %200, %cst_105 [1] : vector<16x128xf32> to vector<16xf32>
    %202 = vector.shape_cast %201 : vector<16xf32> to vector<16x1xf32>
    %cst_106 = arith.constant 1.280000e+02 : f32
    %203 = vector.broadcast %cst_106 : f32 to vector<16x1xf32>
    %204 = arith.divf %202, %203 : vector<16x1xf32>
    %205 = vector.broadcast %197 : vector<16x1xf32> to vector<16x128xf32>
    %206 = arith.subf %191, %205 : vector<16x128xf32>
    %cst_107 = arith.constant 9.99999974E-6 : f32
    %207 = vector.broadcast %cst_107 : f32 to vector<16x1xf32>
    %208 = arith.addf %204, %207 : vector<16x1xf32>
    %209 = math.rsqrt %208 : vector<16x1xf32>
    %210 = vector.broadcast %209 : vector<16x1xf32> to vector<16x128xf32>
    %211 = arith.mulf %206, %210 : vector<16x128xf32>
    %212 = vector.broadcast %192 : vector<1x128xf32> to vector<16x128xf32>
    %213 = arith.mulf %211, %212 : vector<16x128xf32>
    %214 = vector.broadcast %193 : vector<1x128xf32> to vector<16x128xf32>
    %215 = arith.addf %213, %214 : vector<16x128xf32>
    %c0_108 = arith.constant 0 : index
    %c0_109 = arith.constant 0 : index
    %216 = vector.load %arg15[%c0_108, %c0_109] : memref<128x256xf32, #tpu.memory_space<vmem>>, vector<128x256xf32>
    %cst_110 = arith.constant dense<0.000000e+00> : vector<16x256xf32>
    %217 = tpu.matmul %215, %216, %cst_110 {dimension_numbers = #tpu.dot_dimension_numbers<[1], [0], [0], [1], [0, 0, 1, 1], [], []>} : vector<16x128xf32>, vector<128x256xf32>, vector<16x256xf32> -> vector<16x256xf32>
    %c0_111 = arith.constant 0 : index
    %c0_112 = arith.constant 0 : index
    %218 = vector.load %arg16[%c0_111, %c0_112] : memref<1x256xf32, #tpu.memory_space<vmem>>, vector<1x256xf32>
    %219 = vector.broadcast %218 : vector<1x256xf32> to vector<16x256xf32>
    %220 = arith.addf %217, %219 : vector<16x256xf32>
    %cst_113 = arith.constant 0.000000e+00 : f32
    %221 = vector.broadcast %cst_113 : f32 to vector<16x256xf32>
    %222 = arith.maximumf %220, %221 : vector<16x256xf32>
    %c0_114 = arith.constant 0 : index
    %c0_115 = arith.constant 0 : index
    %223 = vector.load %arg17[%c0_114, %c0_115] : memref<256x128xf32, #tpu.memory_space<vmem>>, vector<256x128xf32>
    %cst_116 = arith.constant dense<0.000000e+00> : vector<16x128xf32>
    %224 = tpu.matmul %222, %223, %cst_116 {dimension_numbers = #tpu.dot_dimension_numbers<[1], [0], [0], [1], [0, 0, 1, 1], [], []>} : vector<16x256xf32>, vector<256x128xf32>, vector<16x128xf32> -> vector<16x128xf32>
    %c0_117 = arith.constant 0 : index
    %c0_118 = arith.constant 0 : index
    %225 = vector.load %arg18[%c0_117, %c0_118] : memref<1x128xf32, #tpu.memory_space<vmem>>, vector<1x128xf32>
    %226 = vector.broadcast %225 : vector<1x128xf32> to vector<16x128xf32>
    %227 = arith.addf %224, %226 : vector<16x128xf32>
    %228 = arith.addf %227, %215 : vector<16x128xf32>
    %c0_119 = arith.constant 0 : index
    %c0_120 = arith.constant 0 : index
    %229 = vector.load %arg19[%c0_119, %c0_120] : memref<1x128xf32, #tpu.memory_space<vmem>>, vector<1x128xf32>
    %c0_121 = arith.constant 0 : index
    %c0_122 = arith.constant 0 : index
    %230 = vector.load %arg20[%c0_121, %c0_122] : memref<1x128xf32, #tpu.memory_space<vmem>>, vector<1x128xf32>
    %cst_123 = arith.constant dense<0.000000e+00> : vector<16xf32>
    %231 = vector.multi_reduction <add>, %228, %cst_123 [1] : vector<16x128xf32> to vector<16xf32>
    %232 = vector.shape_cast %231 : vector<16xf32> to vector<16x1xf32>
    %cst_124 = arith.constant 1.280000e+02 : f32
    %233 = vector.broadcast %cst_124 : f32 to vector<16x1xf32>
    %234 = arith.divf %232, %233 : vector<16x1xf32>
    %235 = vector.broadcast %234 : vector<16x1xf32> to vector<16x128xf32>
    %236 = arith.subf %228, %235 : vector<16x128xf32>
    %237 = arith.mulf %236, %236 : vector<16x128xf32>
    %cst_125 = arith.constant dense<0.000000e+00> : vector<16xf32>
    %238 = vector.multi_reduction <add>, %237, %cst_125 [1] : vector<16x128xf32> to vector<16xf32>
    %239 = vector.shape_cast %238 : vector<16xf32> to vector<16x1xf32>
    %cst_126 = arith.constant 1.280000e+02 : f32
    %240 = vector.broadcast %cst_126 : f32 to vector<16x1xf32>
    %241 = arith.divf %239, %240 : vector<16x1xf32>
    %242 = vector.broadcast %234 : vector<16x1xf32> to vector<16x128xf32>
    %243 = arith.subf %228, %242 : vector<16x128xf32>
    %cst_127 = arith.constant 9.99999974E-6 : f32
    %244 = vector.broadcast %cst_127 : f32 to vector<16x1xf32>
    %245 = arith.addf %241, %244 : vector<16x1xf32>
    %246 = math.rsqrt %245 : vector<16x1xf32>
    %247 = vector.broadcast %246 : vector<16x1xf32> to vector<16x128xf32>
    %248 = arith.mulf %243, %247 : vector<16x128xf32>
    %249 = vector.broadcast %229 : vector<1x128xf32> to vector<16x128xf32>
    %250 = arith.mulf %248, %249 : vector<16x128xf32>
    %251 = vector.broadcast %230 : vector<1x128xf32> to vector<16x128xf32>
    %252 = arith.addf %250, %251 : vector<16x128xf32>
    %c0_128 = arith.constant 0 : index
    %c0_129 = arith.constant 0 : index
    %c0_130 = arith.constant 0 : index
    %253 = vector.load %arg21[%c0_128, %c0_129, %c0_130] : memref<1x16x128xf32, #tpu.memory_space<vmem>>, vector<1x16x128xf32>
    %254 = vector.shape_cast %253 : vector<1x16x128xf32> to vector<16x128xf32>
    %255 = vector.shape_cast %252 : vector<16x128xf32> to vector<1x16x128xf32>
    tpu.vector_store %arg21[%c0_128, %c0_129, %c0_130], %255 {strides = array<i32>} : memref<1x16x128xf32, #tpu.memory_space<vmem>>, vector<1x16x128xf32>,
    return
  }
  func.func @transform_0(%arg0: i32) -> (i32, i32, i32) {
    %c0_i32 = arith.constant 0 : i32
    %c0_i32_0 = arith.constant 0 : i32
    %c0_i32_1 = arith.constant 0 : i32
    return %arg0, %c0_i32, %c0_i32_0 : i32, i32, i32
  }
  func.func @transform_1(%arg0: i32) -> (i32, i32, i32) {
    %c0_i32 = arith.constant 0 : i32
    %c0_i32_0 = arith.constant 0 : i32
    %c0_i32_1 = arith.constant 0 : i32
    return %arg0, %c0_i32, %c0_i32_0 : i32, i32, i32
  }
  func.func @transform_2(%arg0: i32) -> (i32, i32) {
    %c0_i32 = arith.constant 0 : i32
    %c0_i32_0 = arith.constant 0 : i32
    %c0_i32_1 = arith.constant 0 : i32
    return %c0_i32, %c0_i32_0 : i32, i32
  }
  func.func @transform_3(%arg0: i32) -> (i32, i32) {
    %c0_i32 = arith.constant 0 : i32
    %c0_i32_0 = arith.constant 0 : i32
    %c0_i32_1 = arith.constant 0 : i32
    return %c0_i32, %c0_i32_0 : i32, i32
  }
  func.func @transform_4(%arg0: i32) -> (i32, i32) {
    %c0_i32 = arith.constant 0 : i32
    %c0_i32_0 = arith.constant 0 : i32
    %c0_i32_1 = arith.constant 0 : i32
    return %c0_i32, %c0_i32_0 : i32, i32
  }
  func.func @transform_5(%arg0: i32) -> (i32, i32) {
    %c0_i32 = arith.constant 0 : i32
    %c0_i32_0 = arith.constant 0 : i32
    %c0_i32_1 = arith.constant 0 : i32
    return %c0_i32, %c0_i32_0 : i32, i32
  }
  func.func @transform_6(%arg0: i32) -> (i32, i32) {
    %c0_i32 = arith.constant 0 : i32
    %c0_i32_0 = arith.constant 0 : i32
    %c0_i32_1 = arith.constant 0 : i32
    return %c0_i32, %c0_i32_0 : i32, i32
  }
  func.func @transform_7(%arg0: i32) -> (i32, i32) {
    %c0_i32 = arith.constant 0 : i32
    %c0_i32_0 = arith.constant 0 : i32
    %c0_i32_1 = arith.constant 0 : i32
    return %c0_i32, %c0_i32_0 : i32, i32
  }
  func.func @transform_8(%arg0: i32) -> (i32, i32) {
    %c0_i32 = arith.constant 0 : i32
    %c0_i32_0 = arith.constant 0 : i32
    %c0_i32_1 = arith.constant 0 : i32
    return %c0_i32, %c0_i32_0 : i32, i32
  }
  func.func @transform_9(%arg0: i32) -> (i32, i32) {
    %c0_i32 = arith.constant 0 : i32
    %c0_i32_0 = arith.constant 0 : i32
    %c0_i32_1 = arith.constant 0 : i32
    return %c0_i32, %c0_i32_0 : i32, i32
  }
  func.func @transform_10(%arg0: i32) -> (i32, i32) {
    %c0_i32 = arith.constant 0 : i32
    %c0_i32_0 = arith.constant 0 : i32
    %c0_i32_1 = arith.constant 0 : i32
    return %c0_i32, %c0_i32_0 : i32, i32
  }
  func.func @transform_11(%arg0: i32) -> (i32, i32) {
    %c0_i32 = arith.constant 0 : i32
    %c0_i32_0 = arith.constant 0 : i32
    %c0_i32_1 = arith.constant 0 : i32
    return %c0_i32, %c0_i32_0 : i32, i32
  }
  func.func @transform_12(%arg0: i32) -> (i32, i32) {
    %c0_i32 = arith.constant 0 : i32
    %c0_i32_0 = arith.constant 0 : i32
    %c0_i32_1 = arith.constant 0 : i32
    return %c0_i32, %c0_i32_0 : i32, i32
  }
  func.func @transform_13(%arg0: i32) -> (i32, i32) {
    %c0_i32 = arith.constant 0 : i32
    %c0_i32_0 = arith.constant 0 : i32
    %c0_i32_1 = arith.constant 0 : i32
    return %c0_i32, %c0_i32_0 : i32, i32
  }
  func.func @transform_14(%arg0: i32) -> (i32, i32) {
    %c0_i32 = arith.constant 0 : i32
    %c0_i32_0 = arith.constant 0 : i32
    %c0_i32_1 = arith.constant 0 : i32
    return %c0_i32, %c0_i32_0 : i32, i32
  }
  func.func @transform_15(%arg0: i32) -> (i32, i32) {
    %c0_i32 = arith.constant 0 : i32
    %c0_i32_0 = arith.constant 0 : i32
    %c0_i32_1 = arith.constant 0 : i32
    return %c0_i32, %c0_i32_0 : i32, i32
  }
  func.func @transform_16(%arg0: i32) -> (i32, i32) {
    %c0_i32 = arith.constant 0 : i32
    %c0_i32_0 = arith.constant 0 : i32
    %c0_i32_1 = arith.constant 0 : i32
    return %c0_i32, %c0_i32_0 : i32, i32
  }
  func.func @transform_17(%arg0: i32) -> (i32, i32) {
    %c0_i32 = arith.constant 0 : i32
    %c0_i32_0 = arith.constant 0 : i32
    %c0_i32_1 = arith.constant 0 : i32
    return %c0_i32, %c0_i32_0 : i32, i32
  }
  func.func @transform_18(%arg0: i32) -> (i32, i32) {
    %c0_i32 = arith.constant 0 : i32
    %c0_i32_0 = arith.constant 0 : i32
    %c0_i32_1 = arith.constant 0 : i32
    return %c0_i32, %c0_i32_0 : i32, i32
  }
  func.func @transform_19(%arg0: i32) -> (i32, i32) {
    %c0_i32 = arith.constant 0 : i32
    %c0_i32_0 = arith.constant 0 : i32
    %c0_i32_1 = arith.constant 0 : i32
    return %c0_i32, %c0_i32_0 : i32, i32
  }
  func.func @transform_20(%arg0: i32) -> (i32, i32, i32) {
    %c0_i32 = arith.constant 0 : i32
    %c0_i32_0 = arith.constant 0 : i32
    %c0_i32_1 = arith.constant 0 : i32
    return %arg0, %c0_i32, %c0_i32_0 : i32, i32, i32
  }
}

module attributes {stable_mosaic.version = 11 : i64} {
  func.func @decoder_layer_kernel(%arg0: i32, %arg1: memref<1x16x128xf32, #tpu.memory_space<vmem>>, %arg2: memref<1x16x128xf32, #tpu.memory_space<vmem>>, %arg3: memref<128x128xf32, #tpu.memory_space<vmem>>, %arg4: memref<128x128xf32, #tpu.memory_space<vmem>>, %arg5: memref<128x128xf32, #tpu.memory_space<vmem>>, %arg6: memref<128x128xf32, #tpu.memory_space<vmem>>, %arg7: memref<1x128xf32, #tpu.memory_space<vmem>>, %arg8: memref<1x128xf32, #tpu.memory_space<vmem>>, %arg9: memref<128x128xf32, #tpu.memory_space<vmem>>, %arg10: memref<128x128xf32, #tpu.memory_space<vmem>>, %arg11: memref<128x128xf32, #tpu.memory_space<vmem>>, %arg12: memref<128x128xf32, #tpu.memory_space<vmem>>, %arg13: memref<1x128xf32, #tpu.memory_space<vmem>>, %arg14: memref<1x128xf32, #tpu.memory_space<vmem>>, %arg15: memref<128x256xf32, #tpu.memory_space<vmem>>, %arg16: memref<1x256xf32, #tpu.memory_space<vmem>>, %arg17: memref<256x128xf32, #tpu.memory_space<vmem>>, %arg18: memref<1x128xf32, #tpu.memory_space<vmem>>, %arg19: memref<1x128xf32, #tpu.memory_space<vmem>>, %arg20: memref<1x128xf32, #tpu.memory_space<vmem>>, %arg21: memref<1x16x128xf32, #tpu.memory_space<vmem>>, %arg22: memref<64x32xf32, #tpu.memory_space<vmem>>) attributes {dimension_semantics = [#tpu.dimension_semantics<parallel>], iteration_bounds = array<i64: 2>, scalar_prefetch = 0 : i64, scratch_operands = 1 : i64, tpu.core_type = #tpu.core_type<tc>, window_params = [{transform_indices = @transform_0, window_bounds = array<i64: 1, 16, 128>}, {transform_indices = @transform_1, window_bounds = array<i64: 1, 16, 128>}, {pipeline_mode = #tpu.pipeline_mode<synchronous>, transform_indices = @transform_2, window_bounds = array<i64: 128, 128>}, {pipeline_mode = #tpu.pipeline_mode<synchronous>, transform_indices = @transform_3, window_bounds = array<i64: 128, 128>}, {pipeline_mode = #tpu.pipeline_mode<synchronous>, transform_indices = @transform_4, window_bounds = array<i64: 128, 128>}, {pipeline_mode = #tpu.pipeline_mode<synchronous>, transform_indices = @transform_5, window_bounds = array<i64: 128, 128>}, {pipeline_mode = #tpu.pipeline_mode<synchronous>, transform_indices = @transform_6, window_bounds = array<i64: 1, 128>}, {pipeline_mode = #tpu.pipeline_mode<synchronous>, transform_indices = @transform_7, window_bounds = array<i64: 1, 128>}, {pipeline_mode = #tpu.pipeline_mode<synchronous>, transform_indices = @transform_8, window_bounds = array<i64: 128, 128>}, {pipeline_mode = #tpu.pipeline_mode<synchronous>, transform_indices = @transform_9, window_bounds = array<i64: 128, 128>}, {pipeline_mode = #tpu.pipeline_mode<synchronous>, transform_indices = @transform_10, window_bounds = array<i64: 128, 128>}, {pipeline_mode = #tpu.pipeline_mode<synchronous>, transform_indices = @transform_11, window_bounds = array<i64: 128, 128>}, {pipeline_mode = #tpu.pipeline_mode<synchronous>, transform_indices = @transform_12, window_bounds = array<i64: 1, 128>}, {pipeline_mode = #tpu.pipeline_mode<synchronous>, transform_indices = @transform_13, window_bounds = array<i64: 1, 128>}, {pipeline_mode = #tpu.pipeline_mode<synchronous>, transform_indices = @transform_14, window_bounds = array<i64: 128, 256>}, {pipeline_mode = #tpu.pipeline_mode<synchronous>, transform_indices = @transform_15, window_bounds = array<i64: 1, 256>}, {pipeline_mode = #tpu.pipeline_mode<synchronous>, transform_indices = @transform_16, window_bounds = array<i64: 256, 128>}, {pipeline_mode = #tpu.pipeline_mode<synchronous>, transform_indices = @transform_17, window_bounds = array<i64: 1, 128>}, {pipeline_mode = #tpu.pipeline_mode<synchronous>, transform_indices = @transform_18, window_bounds = array<i64: 1, 128>}, {pipeline_mode = #tpu.pipeline_mode<synchronous>, transform_indices = @transform_19, window_bounds = array<i64: 1, 128>}, {transform_indices = @transform_20, window_bounds = array<i64: 1, 16, 128>}]} {
    %c0 = arith.constant 0 : index
    %c0_0 = arith.constant 0 : index
    %c0_1 = arith.constant 0 : index
    %0 = vector.load %arg1[%c0, %c0_0, %c0_1] : memref<1x16x128xf32, #tpu.memory_space<vmem>>, vector<1x16x128xf32>
    %1 = vector.shape_cast %0 : vector<1x16x128xf32> to vector<16x128xf32>
    %c0_2 = arith.constant 0 : index
    %c0_3 = arith.constant 0 : index
    %c0_4 = arith.constant 0 : index
    %2 = vector.load %arg2[%c0_2, %c0_3, %c0_4] : memref<1x16x128xf32, #tpu.memory_space<vmem>>, vector<1x16x128xf32>
    %3 = vector.shape_cast %2 : vector<1x16x128xf32> to vector<16x128xf32>
    %c0_5 = arith.constant 0 : index
    %c0_6 = arith.constant 0 : index
    %4 = vector.load %arg3[%c0_5, %c0_6] : memref<128x128xf32, #tpu.memory_space<vmem>>, vector<128x128xf32>
    %c0_7 = arith.constant 0 : index
    %c0_8 = arith.constant 0 : index
    %5 = vector.load %arg4[%c0_7, %c0_8] : memref<128x128xf32, #tpu.memory_space<vmem>>, vector<128x128xf32>
    %c0_9 = arith.constant 0 : index
    %c0_10 = arith.constant 0 : index
    %6 = vector.load %arg5[%c0_9, %c0_10] : memref<128x128xf32, #tpu.memory_space<vmem>>, vector<128x128xf32>
    %c0_11 = arith.constant 0 : index
    %c0_12 = arith.constant 0 : index
    %7 = vector.load %arg6[%c0_11, %c0_12] : memref<128x128xf32, #tpu.memory_space<vmem>>, vector<128x128xf32>
    %cst = arith.constant 3.200000e+01 : f32
    %8 = math.sqrt %cst : f32
    %cst_13 = arith.constant 1.000000e+00 : f32
    %9 = arith.divf %cst_13, %8 : f32
    %cst_14 = arith.constant dense<0.000000e+00> : vector<16x128xf32>
    %10 = tpu.matmul %1, %4, %cst_14 {dimension_numbers = #tpu.dot_dimension_numbers<[1], [0], [0], [1], [0, 0, 1, 1], [], []>} : vector<16x128xf32>, vector<128x128xf32>, vector<16x128xf32> -> vector<16x128xf32>
    %11 = vector.broadcast %9 : f32 to vector<16x128xf32>
    %12 = arith.mulf %10, %11 : vector<16x128xf32>
    %cst_15 = arith.constant dense<0.000000e+00> : vector<16x128xf32>
    %13 = tpu.matmul %1, %5, %cst_15 {dimension_numbers = #tpu.dot_dimension_numbers<[1], [0], [0], [1], [0, 0, 1, 1], [], []>} : vector<16x128xf32>, vector<128x128xf32>, vector<16x128xf32> -> vector<16x128xf32>
    %cst_16 = arith.constant dense<0.000000e+00> : vector<16x128xf32>
    %14 = tpu.matmul %1, %6, %cst_16 {dimension_numbers = #tpu.dot_dimension_numbers<[1], [0], [0], [1], [0, 0, 1, 1], [], []>} : vector<16x128xf32>, vector<128x128xf32>, vector<16x128xf32> -> vector<16x128xf32>
    %15 = vector.extract_strided_slice %12 {offsets = [0, 0], sizes = [16, 32], strides = [1, 1]} : vector<16x128xf32> to vector<16x32xf32>
    %16 = vector.extract_strided_slice %13 {offsets = [0, 0], sizes = [16, 32], strides = [1, 1]} : vector<16x128xf32> to vector<16x32xf32>
    %17 = vector.extract_strided_slice %14 {offsets = [0, 0], sizes = [16, 32], strides = [1, 1]} : vector<16x128xf32> to vector<16x32xf32>
    %cst_17 = arith.constant dense<0.000000e+00> : vector<16x16xf32>
    %18 = tpu.matmul %15, %16, %cst_17 {dimension_numbers = #tpu.dot_dimension_numbers<[1], [1], [0], [0], [0, 0, 1, 0], [], []>} : vector<16x32xf32>, vector<16x32xf32>, vector<16x16xf32> -> vector<16x16xf32>
    %cst_18 = arith.constant dense<0xFF800000> : vector<16xf32>
    %19 = vector.multi_reduction <maximumf>, %18, %cst_18 [1] : vector<16x16xf32> to vector<16xf32>
    %20 = vector.shape_cast %19 : vector<16xf32> to vector<16x1xf32>
    %21 = vector.broadcast %20 : vector<16x1xf32> to vector<16x16xf32>
    %22 = arith.subf %18, %21 : vector<16x16xf32>
    %23 = math.exp %22 : vector<16x16xf32>
    %cst_19 = arith.constant dense<0.000000e+00> : vector<16xf32>
    %24 = vector.multi_reduction <add>, %23, %cst_19 [1] : vector<16x16xf32> to vector<16xf32>
    %25 = vector.shape_cast %24 : vector<16xf32> to vector<16x1xf32>
    %26 = tpu.reciprocal %25 {approx = true} : vector<16x1xf32> -> vector<16x1xf32>
    %27 = vector.broadcast %26 : vector<16x1xf32> to vector<16x16xf32>
    %28 = arith.mulf %23, %27 : vector<16x16xf32>
    %cst_20 = arith.constant dense<0.000000e+00> : vector<16x32xf32>
    %29 = tpu.matmul %28, %17, %cst_20 {dimension_numbers = #tpu.dot_dimension_numbers<[1], [0], [0], [1], [0, 0, 1, 1], [], []>} : vector<16x16xf32>, vector<16x32xf32>, vector<16x32xf32> -> vector<16x32xf32>
    %c0_21 = arith.constant 0 : index
    %c0_22 = arith.constant 0 : index
    %30 = vector.load %arg22[%c0_21, %c0_22] : memref<64x32xf32, #tpu.memory_space<vmem>>, vector<16x32xf32>
    tpu.vector_store %arg22[%c0_21, %c0_22], %29 {strides = array<i32>} : memref<64x32xf32, #tpu.memory_space<vmem>>, vector<16x32xf32>,
    %31 = vector.extract_strided_slice %12 {offsets = [0, 32], sizes = [16, 32], strides = [1, 1]} : vector<16x128xf32> to vector<16x32xf32>
    %32 = vector.extract_strided_slice %13 {offsets = [0, 32], sizes = [16, 32], strides = [1, 1]} : vector<16x128xf32> to vector<16x32xf32>
    %33 = vector.extract_strided_slice %14 {offsets = [0, 32], sizes = [16, 32], strides = [1, 1]} : vector<16x128xf32> to vector<16x32xf32>
    %cst_23 = arith.constant dense<0.000000e+00> : vector<16x16xf32>
    %34 = tpu.matmul %31, %32, %cst_23 {dimension_numbers = #tpu.dot_dimension_numbers<[1], [1], [0], [0], [0, 0, 1, 0], [], []>} : vector<16x32xf32>, vector<16x32xf32>, vector<16x16xf32> -> vector<16x16xf32>
    %cst_24 = arith.constant dense<0xFF800000> : vector<16xf32>
    %35 = vector.multi_reduction <maximumf>, %34, %cst_24 [1] : vector<16x16xf32> to vector<16xf32>
    %36 = vector.shape_cast %35 : vector<16xf32> to vector<16x1xf32>
    %37 = vector.broadcast %36 : vector<16x1xf32> to vector<16x16xf32>
    %38 = arith.subf %34, %37 : vector<16x16xf32>
    %39 = math.exp %38 : vector<16x16xf32>
    %cst_25 = arith.constant dense<0.000000e+00> : vector<16xf32>
    %40 = vector.multi_reduction <add>, %39, %cst_25 [1] : vector<16x16xf32> to vector<16xf32>
    %41 = vector.shape_cast %40 : vector<16xf32> to vector<16x1xf32>
    %42 = tpu.reciprocal %41 {approx = true} : vector<16x1xf32> -> vector<16x1xf32>
    %43 = vector.broadcast %42 : vector<16x1xf32> to vector<16x16xf32>
    %44 = arith.mulf %39, %43 : vector<16x16xf32>
    %cst_26 = arith.constant dense<0.000000e+00> : vector<16x32xf32>
    %45 = tpu.matmul %44, %33, %cst_26 {dimension_numbers = #tpu.dot_dimension_numbers<[1], [0], [0], [1], [0, 0, 1, 1], [], []>} : vector<16x16xf32>, vector<16x32xf32>, vector<16x32xf32> -> vector<16x32xf32>
    %c16 = arith.constant 16 : index
    %c0_27 = arith.constant 0 : index
    %46 = vector.load %arg22[%c16, %c0_27] : memref<64x32xf32, #tpu.memory_space<vmem>>, vector<16x32xf32>
    tpu.vector_store %arg22[%c16, %c0_27], %45 {strides = array<i32>} : memref<64x32xf32, #tpu.memory_space<vmem>>, vector<16x32xf32>,
    %47 = vector.extract_strided_slice %12 {offsets = [0, 64], sizes = [16, 32], strides = [1, 1]} : vector<16x128xf32> to vector<16x32xf32>
    %48 = vector.extract_strided_slice %13 {offsets = [0, 64], sizes = [16, 32], strides = [1, 1]} : vector<16x128xf32> to vector<16x32xf32>
    %49 = vector.extract_strided_slice %14 {offsets = [0, 64], sizes = [16, 32], strides = [1, 1]} : vector<16x128xf32> to vector<16x32xf32>
    %cst_28 = arith.constant dense<0.000000e+00> : vector<16x16xf32>
    %50 = tpu.matmul %47, %48, %cst_28 {dimension_numbers = #tpu.dot_dimension_numbers<[1], [1], [0], [0], [0, 0, 1, 0], [], []>} : vector<16x32xf32>, vector<16x32xf32>, vector<16x16xf32> -> vector<16x16xf32>
    %cst_29 = arith.constant dense<0xFF800000> : vector<16xf32>
    %51 = vector.multi_reduction <maximumf>, %50, %cst_29 [1] : vector<16x16xf32> to vector<16xf32>
    %52 = vector.shape_cast %51 : vector<16xf32> to vector<16x1xf32>
    %53 = vector.broadcast %52 : vector<16x1xf32> to vector<16x16xf32>
    %54 = arith.subf %50, %53 : vector<16x16xf32>
    %55 = math.exp %54 : vector<16x16xf32>
    %cst_30 = arith.constant dense<0.000000e+00> : vector<16xf32>
    %56 = vector.multi_reduction <add>, %55, %cst_30 [1] : vector<16x16xf32> to vector<16xf32>
    %57 = vector.shape_cast %56 : vector<16xf32> to vector<16x1xf32>
    %58 = tpu.reciprocal %57 {approx = true} : vector<16x1xf32> -> vector<16x1xf32>
    %59 = vector.broadcast %58 : vector<16x1xf32> to vector<16x16xf32>
    %60 = arith.mulf %55, %59 : vector<16x16xf32>
    %cst_31 = arith.constant dense<0.000000e+00> : vector<16x32xf32>
    %61 = tpu.matmul %60, %49, %cst_31 {dimension_numbers = #tpu.dot_dimension_numbers<[1], [0], [0], [1], [0, 0, 1, 1], [], []>} : vector<16x16xf32>, vector<16x32xf32>, vector<16x32xf32> -> vector<16x32xf32>
    %c32 = arith.constant 32 : index
    %c0_32 = arith.constant 0 : index
    %62 = vector.load %arg22[%c32, %c0_32] : memref<64x32xf32, #tpu.memory_space<vmem>>, vector<16x32xf32>
    tpu.vector_store %arg22[%c32, %c0_32], %61 {strides = array<i32>} : memref<64x32xf32, #tpu.memory_space<vmem>>, vector<16x32xf32>,
    %63 = vector.extract_strided_slice %12 {offsets = [0, 96], sizes = [16, 32], strides = [1, 1]} : vector<16x128xf32> to vector<16x32xf32>
    %64 = vector.extract_strided_slice %13 {offsets = [0, 96], sizes = [16, 32], strides = [1, 1]} : vector<16x128xf32> to vector<16x32xf32>
    %65 = vector.extract_strided_slice %14 {offsets = [0, 96], sizes = [16, 32], strides = [1, 1]} : vector<16x128xf32> to vector<16x32xf32>
    %cst_33 = arith.constant dense<0.000000e+00> : vector<16x16xf32>
    %66 = tpu.matmul %63, %64, %cst_33 {dimension_numbers = #tpu.dot_dimension_numbers<[1], [1], [0], [0], [0, 0, 1, 0], [], []>} : vector<16x32xf32>, vector<16x32xf32>, vector<16x16xf32> -> vector<16x16xf32>
    %cst_34 = arith.constant dense<0xFF800000> : vector<16xf32>
    %67 = vector.multi_reduction <maximumf>, %66, %cst_34 [1] : vector<16x16xf32> to vector<16xf32>
    %68 = vector.shape_cast %67 : vector<16xf32> to vector<16x1xf32>
    %69 = vector.broadcast %68 : vector<16x1xf32> to vector<16x16xf32>
    %70 = arith.subf %66, %69 : vector<16x16xf32>
    %71 = math.exp %70 : vector<16x16xf32>
    %cst_35 = arith.constant dense<0.000000e+00> : vector<16xf32>
    %72 = vector.multi_reduction <add>, %71, %cst_35 [1] : vector<16x16xf32> to vector<16xf32>
    %73 = vector.shape_cast %72 : vector<16xf32> to vector<16x1xf32>
    %74 = tpu.reciprocal %73 {approx = true} : vector<16x1xf32> -> vector<16x1xf32>
    %75 = vector.broadcast %74 : vector<16x1xf32> to vector<16x16xf32>
    %76 = arith.mulf %71, %75 : vector<16x16xf32>
    %cst_36 = arith.constant dense<0.000000e+00> : vector<16x32xf32>
    %77 = tpu.matmul %76, %65, %cst_36 {dimension_numbers = #tpu.dot_dimension_numbers<[1], [0], [0], [1], [0, 0, 1, 1], [], []>} : vector<16x16xf32>, vector<16x32xf32>, vector<16x32xf32> -> vector<16x32xf32>
    %c48 = arith.constant 48 : index
    %c0_37 = arith.constant 0 : index
    %78 = vector.load %arg22[%c48, %c0_37] : memref<64x32xf32, #tpu.memory_space<vmem>>, vector<16x32xf32>
    tpu.vector_store %arg22[%c48, %c0_37], %77 {strides = array<i32>} : memref<64x32xf32, #tpu.memory_space<vmem>>, vector<16x32xf32>,
    %c0_38 = arith.constant 0 : index
    %c0_39 = arith.constant 0 : index
    %79 = tpu.strided_load %arg22[%c0_38, %c0_39] {strides = array<i32: 4, 1>} : memref<64x32xf32, #tpu.memory_space<vmem>>, vector<16x32xf32>
    %c1 = arith.constant 1 : index
    %c0_40 = arith.constant 0 : index
    %80 = tpu.strided_load %arg22[%c1, %c0_40] {strides = array<i32: 4, 1>} : memref<64x32xf32, #tpu.memory_space<vmem>>, vector<16x32xf32>
    %c2 = arith.constant 2 : index
    %c0_41 = arith.constant 0 : index
    %81 = tpu.strided_load %arg22[%c2, %c0_41] {strides = array<i32: 4, 1>} : memref<64x32xf32, #tpu.memory_space<vmem>>, vector<16x32xf32>
    %c3 = arith.constant 3 : index
    %c0_42 = arith.constant 0 : index
    %82 = tpu.strided_load %arg22[%c3, %c0_42] {strides = array<i32: 4, 1>} : memref<64x32xf32, #tpu.memory_space<vmem>>, vector<16x32xf32>
    %83 = tpu.concatenate %79, %80, %81, %82 in 1 : vector<16x32xf32>, vector<16x32xf32>, vector<16x32xf32>, vector<16x32xf32> -> vector<16x128xf32>
    %cst_43 = arith.constant dense<0.000000e+00> : vector<16x128xf32>
    %84 = tpu.matmul %83, %7, %cst_43 {dimension_numbers = #tpu.dot_dimension_numbers<[1], [0], [0], [1], [0, 0, 1, 1], [], []>} : vector<16x128xf32>, vector<128x128xf32>, vector<16x128xf32> -> vector<16x128xf32>
    %85 = arith.addf %84, %1 : vector<16x128xf32>
    %c0_44 = arith.constant 0 : index
    %c0_45 = arith.constant 0 : index
    %86 = vector.load %arg7[%c0_44, %c0_45] : memref<1x128xf32, #tpu.memory_space<vmem>>, vector<1x128xf32>
    %c0_46 = arith.constant 0 : index
    %c0_47 = arith.constant 0 : index
    %87 = vector.load %arg8[%c0_46, %c0_47] : memref<1x128xf32, #tpu.memory_space<vmem>>, vector<1x128xf32>
    %cst_48 = arith.constant dense<0.000000e+00> : vector<16xf32>
    %88 = vector.multi_reduction <add>, %85, %cst_48 [1] : vector<16x128xf32> to vector<16xf32>
    %89 = vector.shape_cast %88 : vector<16xf32> to vector<16x1xf32>
    %cst_49 = arith.constant 1.280000e+02 : f32
    %90 = vector.broadcast %cst_49 : f32 to vector<16x1xf32>
    %91 = arith.divf %89, %90 : vector<16x1xf32>
    %92 = vector.broadcast %91 : vector<16x1xf32> to vector<16x128xf32>
    %93 = arith.subf %85, %92 : vector<16x128xf32>
    %94 = arith.mulf %93, %93 : vector<16x128xf32>
    %cst_50 = arith.constant dense<0.000000e+00> : vector<16xf32>
    %95 = vector.multi_reduction <add>, %94, %cst_50 [1] : vector<16x128xf32> to vector<16xf32>
    %96 = vector.shape_cast %95 : vector<16xf32> to vector<16x1xf32>
    %cst_51 = arith.constant 1.280000e+02 : f32
    %97 = vector.broadcast %cst_51 : f32 to vector<16x1xf32>
    %98 = arith.divf %96, %97 : vector<16x1xf32>
    %99 = vector.broadcast %91 : vector<16x1xf32> to vector<16x128xf32>
    %100 = arith.subf %85, %99 : vector<16x128xf32>
    %cst_52 = arith.constant 9.99999974E-6 : f32
    %101 = vector.broadcast %cst_52 : f32 to vector<16x1xf32>
    %102 = arith.addf %98, %101 : vector<16x1xf32>
    %103 = math.rsqrt %102 : vector<16x1xf32>
    %104 = vector.broadcast %103 : vector<16x1xf32> to vector<16x128xf32>
    %105 = arith.mulf %100, %104 : vector<16x128xf32>
    %106 = vector.broadcast %86 : vector<1x128xf32> to vector<16x128xf32>
    %107 = arith.mulf %105, %106 : vector<16x128xf32>
    %108 = vector.broadcast %87 : vector<1x128xf32> to vector<16x128xf32>
    %109 = arith.addf %107, %108 : vector<16x128xf32>
    %c0_53 = arith.constant 0 : index
    %c0_54 = arith.constant 0 : index
    %110 = vector.load %arg9[%c0_53, %c0_54] : memref<128x128xf32, #tpu.memory_space<vmem>>, vector<128x128xf32>
    %c0_55 = arith.constant 0 : index
    %c0_56 = arith.constant 0 : index
    %111 = vector.load %arg10[%c0_55, %c0_56] : memref<128x128xf32, #tpu.memory_space<vmem>>, vector<128x128xf32>
    %c0_57 = arith.constant 0 : index
    %c0_58 = arith.constant 0 : index
    %112 = vector.load %arg11[%c0_57, %c0_58] : memref<128x128xf32, #tpu.memory_space<vmem>>, vector<128x128xf32>
    %c0_59 = arith.constant 0 : index
    %c0_60 = arith.constant 0 : index
    %113 = vector.load %arg12[%c0_59, %c0_60] : memref<128x128xf32, #tpu.memory_space<vmem>>, vector<128x128xf32>
    %cst_61 = arith.constant 3.200000e+01 : f32
    %114 = math.sqrt %cst_61 : f32
    %cst_62 = arith.constant 1.000000e+00 : f32
    %115 = arith.divf %cst_62, %114 : f32
    %cst_63 = arith.constant dense<0.000000e+00> : vector<16x128xf32>
    %116 = tpu.matmul %109, %110, %cst_63 {dimension_numbers = #tpu.dot_dimension_numbers<[1], [0], [0], [1], [0, 0, 1, 1], [], []>} : vector<16x128xf32>, vector<128x128xf32>, vector<16x128xf32> -> vector<16x128xf32>
    %117 = vector.broadcast %115 : f32 to vector<16x128xf32>
    %118 = arith.mulf %116, %117 : vector<16x128xf32>
    %cst_64 = arith.constant dense<0.000000e+00> : vector<16x128xf32>
    %119 = tpu.matmul %3, %111, %cst_64 {dimension_numbers = #tpu.dot_dimension_numbers<[1], [0], [0], [1], [0, 0, 1, 1], [], []>} : vector<16x128xf32>, vector<128x128xf32>, vector<16x128xf32> -> vector<16x128xf32>
    %cst_65 = arith.constant dense<0.000000e+00> : vector<16x128xf32>
    %120 = tpu.matmul %3, %112, %cst_65 {dimension_numbers = #tpu.dot_dimension_numbers<[1], [0], [0], [1], [0, 0, 1, 1], [], []>} : vector<16x128xf32>, vector<128x128xf32>, vector<16x128xf32> -> vector<16x128xf32>
    %121 = vector.extract_strided_slice %118 {offsets = [0, 0], sizes = [16, 32], strides = [1, 1]} : vector<16x128xf32> to vector<16x32xf32>
    %122 = vector.extract_strided_slice %119 {offsets = [0, 0], sizes = [16, 32], strides = [1, 1]} : vector<16x128xf32> to vector<16x32xf32>
    %123 = vector.extract_strided_slice %120 {offsets = [0, 0], sizes = [16, 32], strides = [1, 1]} : vector<16x128xf32> to vector<16x32xf32>
    %cst_66 = arith.constant dense<0.000000e+00> : vector<16x16xf32>
    %124 = tpu.matmul %121, %122, %cst_66 {dimension_numbers = #tpu.dot_dimension_numbers<[1], [1], [0], [0], [0, 0, 1, 0], [], []>} : vector<16x32xf32>, vector<16x32xf32>, vector<16x16xf32> -> vector<16x16xf32>
    %cst_67 = arith.constant dense<0xFF800000> : vector<16xf32>
    %125 = vector.multi_reduction <maximumf>, %124, %cst_67 [1] : vector<16x16xf32> to vector<16xf32>
    %126 = vector.shape_cast %125 : vector<16xf32> to vector<16x1xf32>
    %127 = vector.broadcast %126 : vector<16x1xf32> to vector<16x16xf32>
    %128 = arith.subf %124, %127 : vector<16x16xf32>
    %129 = math.exp %128 : vector<16x16xf32>
    %cst_68 = arith.constant dense<0.000000e+00> : vector<16xf32>
    %130 = vector.multi_reduction <add>, %129, %cst_68 [1] : vector<16x16xf32> to vector<16xf32>
    %131 = vector.shape_cast %130 : vector<16xf32> to vector<16x1xf32>
    %132 = tpu.reciprocal %131 {approx = true} : vector<16x1xf32> -> vector<16x1xf32>
    %133 = vector.broadcast %132 : vector<16x1xf32> to vector<16x16xf32>
    %134 = arith.mulf %129, %133 : vector<16x16xf32>
    %cst_69 = arith.constant dense<0.000000e+00> : vector<16x32xf32>
    %135 = tpu.matmul %134, %123, %cst_69 {dimension_numbers = #tpu.dot_dimension_numbers<[1], [0], [0], [1], [0, 0, 1, 1], [], []>} : vector<16x16xf32>, vector<16x32xf32>, vector<16x32xf32> -> vector<16x32xf32>
    %c0_70 = arith.constant 0 : index
    %c0_71 = arith.constant 0 : index
    %136 = vector.load %arg22[%c0_70, %c0_71] : memref<64x32xf32, #tpu.memory_space<vmem>>, vector<16x32xf32>
    tpu.vector_store %arg22[%c0_70, %c0_71], %135 {strides = array<i32>} : memref<64x32xf32, #tpu.memory_space<vmem>>, vector<16x32xf32>,
    %137 = vector.extract_strided_slice %118 {offsets = [0, 32], sizes = [16, 32], strides = [1, 1]} : vector<16x128xf32> to vector<16x32xf32>
    %138 = vector.extract_strided_slice %119 {offsets = [0, 32], sizes = [16, 32], strides = [1, 1]} : vector<16x128xf32> to vector<16x32xf32>
    %139 = vector.extract_strided_slice %120 {offsets = [0, 32], sizes = [16, 32], strides = [1, 1]} : vector<16x128xf32> to vector<16x32xf32>
    %cst_72 = arith.constant dense<0.000000e+00> : vector<16x16xf32>
    %140 = tpu.matmul %137, %138, %cst_72 {dimension_numbers = #tpu.dot_dimension_numbers<[1], [1], [0], [0], [0, 0, 1, 0], [], []>} : vector<16x32xf32>, vector<16x32xf32>, vector<16x16xf32> -> vector<16x16xf32>
    %cst_73 = arith.constant dense<0xFF800000> : vector<16xf32>
    %141 = vector.multi_reduction <maximumf>, %140, %cst_73 [1] : vector<16x16xf32> to vector<16xf32>
    %142 = vector.shape_cast %141 : vector<16xf32> to vector<16x1xf32>
    %143 = vector.broadcast %142 : vector<16x1xf32> to vector<16x16xf32>
    %144 = arith.subf %140, %143 : vector<16x16xf32>
    %145 = math.exp %144 : vector<16x16xf32>
    %cst_74 = arith.constant dense<0.000000e+00> : vector<16xf32>
    %146 = vector.multi_reduction <add>, %145, %cst_74 [1] : vector<16x16xf32> to vector<16xf32>
    %147 = vector.shape_cast %146 : vector<16xf32> to vector<16x1xf32>
    %148 = tpu.reciprocal %147 {approx = true} : vector<16x1xf32> -> vector<16x1xf32>
    %149 = vector.broadcast %148 : vector<16x1xf32> to vector<16x16xf32>
    %150 = arith.mulf %145, %149 : vector<16x16xf32>
    %cst_75 = arith.constant dense<0.000000e+00> : vector<16x32xf32>
    %151 = tpu.matmul %150, %139, %cst_75 {dimension_numbers = #tpu.dot_dimension_numbers<[1], [0], [0], [1], [0, 0, 1, 1], [], []>} : vector<16x16xf32>, vector<16x32xf32>, vector<16x32xf32> -> vector<16x32xf32>
    %c16_76 = arith.constant 16 : index
    %c0_77 = arith.constant 0 : index
    %152 = vector.load %arg22[%c16_76, %c0_77] : memref<64x32xf32, #tpu.memory_space<vmem>>, vector<16x32xf32>
    tpu.vector_store %arg22[%c16_76, %c0_77], %151 {strides = array<i32>} : memref<64x32xf32, #tpu.memory_space<vmem>>, vector<16x32xf32>,
    %153 = vector.extract_strided_slice %118 {offsets = [0, 64], sizes = [16, 32], strides = [1, 1]} : vector<16x128xf32> to vector<16x32xf32>
    %154 = vector.extract_strided_slice %119 {offsets = [0, 64], sizes = [16, 32], strides = [1, 1]} : vector<16x128xf32> to vector<16x32xf32>
    %155 = vector.extract_strided_slice %120 {offsets = [0, 64], sizes = [16, 32], strides = [1, 1]} : vector<16x128xf32> to vector<16x32xf32>
    %cst_78 = arith.constant dense<0.000000e+00> : vector<16x16xf32>
    %156 = tpu.matmul %153, %154, %cst_78 {dimension_numbers = #tpu.dot_dimension_numbers<[1], [1], [0], [0], [0, 0, 1, 0], [], []>} : vector<16x32xf32>, vector<16x32xf32>, vector<16x16xf32> -> vector<16x16xf32>
    %cst_79 = arith.constant dense<0xFF800000> : vector<16xf32>
    %157 = vector.multi_reduction <maximumf>, %156, %cst_79 [1] : vector<16x16xf32> to vector<16xf32>
    %158 = vector.shape_cast %157 : vector<16xf32> to vector<16x1xf32>
    %159 = vector.broadcast %158 : vector<16x1xf32> to vector<16x16xf32>
    %160 = arith.subf %156, %159 : vector<16x16xf32>
    %161 = math.exp %160 : vector<16x16xf32>
    %cst_80 = arith.constant dense<0.000000e+00> : vector<16xf32>
    %162 = vector.multi_reduction <add>, %161, %cst_80 [1] : vector<16x16xf32> to vector<16xf32>
    %163 = vector.shape_cast %162 : vector<16xf32> to vector<16x1xf32>
    %164 = tpu.reciprocal %163 {approx = true} : vector<16x1xf32> -> vector<16x1xf32>
    %165 = vector.broadcast %164 : vector<16x1xf32> to vector<16x16xf32>
    %166 = arith.mulf %161, %165 : vector<16x16xf32>
    %cst_81 = arith.constant dense<0.000000e+00> : vector<16x32xf32>
    %167 = tpu.matmul %166, %155, %cst_81 {dimension_numbers = #tpu.dot_dimension_numbers<[1], [0], [0], [1], [0, 0, 1, 1], [], []>} : vector<16x16xf32>, vector<16x32xf32>, vector<16x32xf32> -> vector<16x32xf32>
    %c32_82 = arith.constant 32 : index
    %c0_83 = arith.constant 0 : index
    %168 = vector.load %arg22[%c32_82, %c0_83] : memref<64x32xf32, #tpu.memory_space<vmem>>, vector<16x32xf32>
    tpu.vector_store %arg22[%c32_82, %c0_83], %167 {strides = array<i32>} : memref<64x32xf32, #tpu.memory_space<vmem>>, vector<16x32xf32>,
    %169 = vector.extract_strided_slice %118 {offsets = [0, 96], sizes = [16, 32], strides = [1, 1]} : vector<16x128xf32> to vector<16x32xf32>
    %170 = vector.extract_strided_slice %119 {offsets = [0, 96], sizes = [16, 32], strides = [1, 1]} : vector<16x128xf32> to vector<16x32xf32>
    %171 = vector.extract_strided_slice %120 {offsets = [0, 96], sizes = [16, 32], strides = [1, 1]} : vector<16x128xf32> to vector<16x32xf32>
    %cst_84 = arith.constant dense<0.000000e+00> : vector<16x16xf32>
    %172 = tpu.matmul %169, %170, %cst_84 {dimension_numbers = #tpu.dot_dimension_numbers<[1], [1], [0], [0], [0, 0, 1, 0], [], []>} : vector<16x32xf32>, vector<16x32xf32>, vector<16x16xf32> -> vector<16x16xf32>
    %cst_85 = arith.constant dense<0xFF800000> : vector<16xf32>
    %173 = vector.multi_reduction <maximumf>, %172, %cst_85 [1] : vector<16x16xf32> to vector<16xf32>
    %174 = vector.shape_cast %173 : vector<16xf32> to vector<16x1xf32>
    %175 = vector.broadcast %174 : vector<16x1xf32> to vector<16x16xf32>
    %176 = arith.subf %172, %175 : vector<16x16xf32>
    %177 = math.exp %176 : vector<16x16xf32>
    %cst_86 = arith.constant dense<0.000000e+00> : vector<16xf32>
    %178 = vector.multi_reduction <add>, %177, %cst_86 [1] : vector<16x16xf32> to vector<16xf32>
    %179 = vector.shape_cast %178 : vector<16xf32> to vector<16x1xf32>
    %180 = tpu.reciprocal %179 {approx = true} : vector<16x1xf32> -> vector<16x1xf32>
    %181 = vector.broadcast %180 : vector<16x1xf32> to vector<16x16xf32>
    %182 = arith.mulf %177, %181 : vector<16x16xf32>
    %cst_87 = arith.constant dense<0.000000e+00> : vector<16x32xf32>
    %183 = tpu.matmul %182, %171, %cst_87 {dimension_numbers = #tpu.dot_dimension_numbers<[1], [0], [0], [1], [0, 0, 1, 1], [], []>} : vector<16x16xf32>, vector<16x32xf32>, vector<16x32xf32> -> vector<16x32xf32>
    %c48_88 = arith.constant 48 : index
    %c0_89 = arith.constant 0 : index
    %184 = vector.load %arg22[%c48_88, %c0_89] : memref<64x32xf32, #tpu.memory_space<vmem>>, vector<16x32xf32>
    tpu.vector_store %arg22[%c48_88, %c0_89], %183 {strides = array<i32>} : memref<64x32xf32, #tpu.memory_space<vmem>>, vector<16x32xf32>,
    %c0_90 = arith.constant 0 : index
    %c0_91 = arith.constant 0 : index
    %185 = tpu.strided_load %arg22[%c0_90, %c0_91] {strides = array<i32: 4, 1>} : memref<64x32xf32, #tpu.memory_space<vmem>>, vector<16x32xf32>
    %c1_92 = arith.constant 1 : index
    %c0_93 = arith.constant 0 : index
    %186 = tpu.strided_load %arg22[%c1_92, %c0_93] {strides = array<i32: 4, 1>} : memref<64x32xf32, #tpu.memory_space<vmem>>, vector<16x32xf32>
    %c2_94 = arith.constant 2 : index
    %c0_95 = arith.constant 0 : index
    %187 = tpu.strided_load %arg22[%c2_94, %c0_95] {strides = array<i32: 4, 1>} : memref<64x32xf32, #tpu.memory_space<vmem>>, vector<16x32xf32>
    %c3_96 = arith.constant 3 : index
    %c0_97 = arith.constant 0 : index
    %188 = tpu.strided_load %arg22[%c3_96, %c0_97] {strides = array<i32: 4, 1>} : memref<64x32xf32, #tpu.memory_space<vmem>>, vector<16x32xf32>
    %189 = tpu.concatenate %185, %186, %187, %188 in 1 : vector<16x32xf32>, vector<16x32xf32>, vector<16x32xf32>, vector<16x32xf32> -> vector<16x128xf32>
    %cst_98 = arith.constant dense<0.000000e+00> : vector<16x128xf32>
    %190 = tpu.matmul %189, %113, %cst_98 {dimension_numbers = #tpu.dot_dimension_numbers<[1], [0], [0], [1], [0, 0, 1, 1], [], []>} : vector<16x128xf32>, vector<128x128xf32>, vector<16x128xf32> -> vector<16x128xf32>
    %191 = arith.addf %190, %109 : vector<16x128xf32>
    %c0_99 = arith.constant 0 : index
    %c0_100 = arith.constant 0 : index
    %192 = vector.load %arg13[%c0_99, %c0_100] : memref<1x128xf32, #tpu.memory_space<vmem>>, vector<1x128xf32>
    %c0_101 = arith.constant 0 : index
    %c0_102 = arith.constant 0 : index
    %193 = vector.load %arg14[%c0_101, %c0_102] : memref<1x128xf32, #tpu.memory_space<vmem>>, vector<1x128xf32>
    %cst_103 = arith.constant dense<0.000000e+00> : vector<16xf32>
    %194 = vector.multi_reduction <add>, %191, %cst_103 [1] : vector<16x128xf32> to vector<16xf32>
    %195 = vector.shape_cast %194 : vector<16xf32> to vector<16x1xf32>
    %cst_104 = arith.constant 1.280000e+02 : f32
    %196 = vector.broadcast %cst_104 : f32 to vector<16x1xf32>
    %197 = arith.divf %195, %196 : vector<16x1xf32>
    %198 = vector.broadcast %197 : vector<16x1xf32> to vector<16x128xf32>
    %199 = arith.subf %191, %198 : vector<16x128xf32>
    %200 = arith.mulf %199, %199 : vector<16x128xf32>
    %cst_105 = arith.constant dense<0.000000e+00> : vector<16xf32>
    %201 = vector.multi_reduction <add>, %200, %cst_105 [1] : vector<16x128xf32> to vector<16xf32>
    %202 = vector.shape_cast %201 : vector<16xf32> to vector<16x1xf32>
    %cst_106 = arith.constant 1.280000e+02 : f32
    %203 = vector.broadcast %cst_106 : f32 to vector<16x1xf32>
    %204 = arith.divf %202, %203 : vector<16x1xf32>
    %205 = vector.broadcast %197 : vector<16x1xf32> to vector<16x128xf32>
    %206 = arith.subf %191, %205 : vector<16x128xf32>
    %cst_107 = arith.constant 9.99999974E-6 : f32
    %207 = vector.broadcast %cst_107 : f32 to vector<16x1xf32>
    %208 = arith.addf %204, %207 : vector<16x1xf32>
    %209 = math.rsqrt %208 : vector<16x1xf32>
    %210 = vector.broadcast %209 : vector<16x1xf32> to vector<16x128xf32>
    %211 = arith.mulf %206, %210 : vector<16x128xf32>
    %212 = vector.broadcast %192 : vector<1x128xf32> to vector<16x128xf32>
    %213 = arith.mulf %211, %212 : vector<16x128xf32>
    %214 = vector.broadcast %193 : vector<1x128xf32> to vector<16x128xf32>
    %215 = arith.addf %213, %214 : vector<16x128xf32>
    %c0_108 = arith.constant 0 : index
    %c0_109 = arith.constant 0 : index
    %216 = vector.load %arg15[%c0_108, %c0_109] : memref<128x256xf32, #tpu.memory_space<vmem>>, vector<128x256xf32>
    %cst_110 = arith.constant dense<0.000000e+00> : vector<16x256xf32>
    %217 = tpu.matmul %215, %216, %cst_110 {dimension_numbers = #tpu.dot_dimension_numbers<[1], [0], [0], [1], [0, 0, 1, 1], [], []>} : vector<16x128xf32>, vector<128x256xf32>, vector<16x256xf32> -> vector<16x256xf32>
    %c0_111 = arith.constant 0 : index
    %c0_112 = arith.constant 0 : index
    %218 = vector.load %arg16[%c0_111, %c0_112] : memref<1x256xf32, #tpu.memory_space<vmem>>, vector<1x256xf32>
    %219 = vector.broadcast %218 : vector<1x256xf32> to vector<16x256xf32>
    %220 = arith.addf %217, %219 : vector<16x256xf32>
    %cst_113 = arith.constant 0.000000e+00 : f32
    %221 = vector.broadcast %cst_113 : f32 to vector<16x256xf32>
    %222 = arith.maximumf %220, %221 : vector<16x256xf32>
    %c0_114 = arith.constant 0 : index
    %c0_115 = arith.constant 0 : index
    %223 = vector.load %arg17[%c0_114, %c0_115] : memref<256x128xf32, #tpu.memory_space<vmem>>, vector<256x128xf32>
    %cst_116 = arith.constant dense<0.000000e+00> : vector<16x128xf32>
    %224 = tpu.matmul %222, %223, %cst_116 {dimension_numbers = #tpu.dot_dimension_numbers<[1], [0], [0], [1], [0, 0, 1, 1], [], []>} : vector<16x256xf32>, vector<256x128xf32>, vector<16x128xf32> -> vector<16x128xf32>
    %c0_117 = arith.constant 0 : index
    %c0_118 = arith.constant 0 : index
    %225 = vector.load %arg18[%c0_117, %c0_118] : memref<1x128xf32, #tpu.memory_space<vmem>>, vector<1x128xf32>
    %226 = vector.broadcast %225 : vector<1x128xf32> to vector<16x128xf32>
    %227 = arith.addf %224, %226 : vector<16x128xf32>
    %228 = arith.addf %227, %215 : vector<16x128xf32>
    %c0_119 = arith.constant 0 : index
    %c0_120 = arith.constant 0 : index
    %229 = vector.load %arg19[%c0_119, %c0_120] : memref<1x128xf32, #tpu.memory_space<vmem>>, vector<1x128xf32>
    %c0_121 = arith.constant 0 : index
    %c0_122 = arith.constant 0 : index
    %230 = vector.load %arg20[%c0_121, %c0_122] : memref<1x128xf32, #tpu.memory_space<vmem>>, vector<1x128xf32>
    %cst_123 = arith.constant dense<0.000000e+00> : vector<16xf32>
    %231 = vector.multi_reduction <add>, %228, %cst_123 [1] : vector<16x128xf32> to vector<16xf32>
    %232 = vector.shape_cast %231 : vector<16xf32> to vector<16x1xf32>
    %cst_124 = arith.constant 1.280000e+02 : f32
    %233 = vector.broadcast %cst_124 : f32 to vector<16x1xf32>
    %234 = arith.divf %232, %233 : vector<16x1xf32>
    %235 = vector.broadcast %234 : vector<16x1xf32> to vector<16x128xf32>
    %236 = arith.subf %228, %235 : vector<16x128xf32>
    %237 = arith.mulf %236, %236 : vector<16x128xf32>
    %cst_125 = arith.constant dense<0.000000e+00> : vector<16xf32>
    %238 = vector.multi_reduction <add>, %237, %cst_125 [1] : vector<16x128xf32> to vector<16xf32>
    %239 = vector.shape_cast %238 : vector<16xf32> to vector<16x1xf32>
    %cst_126 = arith.constant 1.280000e+02 : f32
    %240 = vector.broadcast %cst_126 : f32 to vector<16x1xf32>
    %241 = arith.divf %239, %240 : vector<16x1xf32>
    %242 = vector.broadcast %234 : vector<16x1xf32> to vector<16x128xf32>
    %243 = arith.subf %228, %242 : vector<16x128xf32>
    %cst_127 = arith.constant 9.99999974E-6 : f32
    %244 = vector.broadcast %cst_127 : f32 to vector<16x1xf32>
    %245 = arith.addf %241, %244 : vector<16x1xf32>
    %246 = math.rsqrt %245 : vector<16x1xf32>
    %247 = vector.broadcast %246 : vector<16x1xf32> to vector<16x128xf32>
    %248 = arith.mulf %243, %247 : vector<16x128xf32>
    %249 = vector.broadcast %229 : vector<1x128xf32> to vector<16x128xf32>
    %250 = arith.mulf %248, %249 : vector<16x128xf32>
    %251 = vector.broadcast %230 : vector<1x128xf32> to vector<16x128xf32>
    %252 = arith.addf %250, %251 : vector<16x128xf32>
    %c0_128 = arith.constant 0 : index
    %c0_129 = arith.constant 0 : index
    %c0_130 = arith.constant 0 : index
    %253 = vector.load %arg21[%c0_128, %c0_129, %c0_130] : memref<1x16x128xf32, #tpu.memory_space<vmem>>, vector<1x16x128xf32>
    %254 = vector.shape_cast %253 : vector<1x16x128xf32> to vector<16x128xf32>
    %255 = vector.shape_cast %252 : vector<16x128xf32> to vector<1x16x128xf32>
    tpu.vector_store %arg21[%c0_128, %c0_129, %c0_130], %255 {strides = array<i32>} : memref<1x16x128xf32, #tpu.memory_space<vmem>>, vector<1x16x128xf32>,
    return
  }
  func.func @transform_0(%arg0: i32) -> (i32, i32, i32) {
    %c0_i32 = arith.constant 0 : i32
    %c0_i32_0 = arith.constant 0 : i32
    %c0_i32_1 = arith.constant 0 : i32
    return %arg0, %c0_i32, %c0_i32_0 : i32, i32, i32
  }
  func.func @transform_1(%arg0: i32) -> (i32, i32, i32) {
    %c0_i32 = arith.constant 0 : i32
    %c0_i32_0 = arith.constant 0 : i32
    %c0_i32_1 = arith.constant 0 : i32
    return %arg0, %c0_i32, %c0_i32_0 : i32, i32, i32
  }
  func.func @transform_2(%arg0: i32) -> (i32, i32) {
    %c0_i32 = arith.constant 0 : i32
    %c0_i32_0 = arith.constant 0 : i32
    %c0_i32_1 = arith.constant 0 : i32
    return %c0_i32, %c0_i32_0 : i32, i32
  }
  func.func @transform_3(%arg0: i32) -> (i32, i32) {
    %c0_i32 = arith.constant 0 : i32
    %c0_i32_0 = arith.constant 0 : i32
    %c0_i32_1 = arith.constant 0 : i32
    return %c0_i32, %c0_i32_0 : i32, i32
  }
  func.func @transform_4(%arg0: i32) -> (i32, i32) {
    %c0_i32 = arith.constant 0 : i32
    %c0_i32_0 = arith.constant 0 : i32
    %c0_i32_1 = arith.constant 0 : i32
    return %c0_i32, %c0_i32_0 : i32, i32
  }
  func.func @transform_5(%arg0: i32) -> (i32, i32) {
    %c0_i32 = arith.constant 0 : i32
    %c0_i32_0 = arith.constant 0 : i32
    %c0_i32_1 = arith.constant 0 : i32
    return %c0_i32, %c0_i32_0 : i32, i32
  }
  func.func @transform_6(%arg0: i32) -> (i32, i32) {
    %c0_i32 = arith.constant 0 : i32
    %c0_i32_0 = arith.constant 0 : i32
    %c0_i32_1 = arith.constant 0 : i32
    return %c0_i32, %c0_i32_0 : i32, i32
  }
  func.func @transform_7(%arg0: i32) -> (i32, i32) {
    %c0_i32 = arith.constant 0 : i32
    %c0_i32_0 = arith.constant 0 : i32
    %c0_i32_1 = arith.constant 0 : i32
    return %c0_i32, %c0_i32_0 : i32, i32
  }
  func.func @transform_8(%arg0: i32) -> (i32, i32) {
    %c0_i32 = arith.constant 0 : i32
    %c0_i32_0 = arith.constant 0 : i32
    %c0_i32_1 = arith.constant 0 : i32
    return %c0_i32, %c0_i32_0 : i32, i32
  }
  func.func @transform_9(%arg0: i32) -> (i32, i32) {
    %c0_i32 = arith.constant 0 : i32
    %c0_i32_0 = arith.constant 0 : i32
    %c0_i32_1 = arith.constant 0 : i32
    return %c0_i32, %c0_i32_0 : i32, i32
  }
  func.func @transform_10(%arg0: i32) -> (i32, i32) {
    %c0_i32 = arith.constant 0 : i32
    %c0_i32_0 = arith.constant 0 : i32
    %c0_i32_1 = arith.constant 0 : i32
    return %c0_i32, %c0_i32_0 : i32, i32
  }
  func.func @transform_11(%arg0: i32) -> (i32, i32) {
    %c0_i32 = arith.constant 0 : i32
    %c0_i32_0 = arith.constant 0 : i32
    %c0_i32_1 = arith.constant 0 : i32
    return %c0_i32, %c0_i32_0 : i32, i32
  }
  func.func @transform_12(%arg0: i32) -> (i32, i32) {
    %c0_i32 = arith.constant 0 : i32
    %c0_i32_0 = arith.constant 0 : i32
    %c0_i32_1 = arith.constant 0 : i32
    return %c0_i32, %c0_i32_0 : i32, i32
  }
  func.func @transform_13(%arg0: i32) -> (i32, i32) {
    %c0_i32 = arith.constant 0 : i32
    %c0_i32_0 = arith.constant 0 : i32
    %c0_i32_1 = arith.constant 0 : i32
    return %c0_i32, %c0_i32_0 : i32, i32
  }
  func.func @transform_14(%arg0: i32) -> (i32, i32) {
    %c0_i32 = arith.constant 0 : i32
    %c0_i32_0 = arith.constant 0 : i32
    %c0_i32_1 = arith.constant 0 : i32
    return %c0_i32, %c0_i32_0 : i32, i32
  }
  func.func @transform_15(%arg0: i32) -> (i32, i32) {
    %c0_i32 = arith.constant 0 : i32
    %c0_i32_0 = arith.constant 0 : i32
    %c0_i32_1 = arith.constant 0 : i32
    return %c0_i32, %c0_i32_0 : i32, i32
  }
  func.func @transform_16(%arg0: i32) -> (i32, i32) {
    %c0_i32 = arith.constant 0 : i32
    %c0_i32_0 = arith.constant 0 : i32
    %c0_i32_1 = arith.constant 0 : i32
    return %c0_i32, %c0_i32_0 : i32, i32
  }
  func.func @transform_17(%arg0: i32) -> (i32, i32) {
    %c0_i32 = arith.constant 0 : i32
    %c0_i32_0 = arith.constant 0 : i32
    %c0_i32_1 = arith.constant 0 : i32
    return %c0_i32, %c0_i32_0 : i32, i32
  }
  func.func @transform_18(%arg0: i32) -> (i32, i32) {
    %c0_i32 = arith.constant 0 : i32
    %c0_i32_0 = arith.constant 0 : i32
    %c0_i32_1 = arith.constant 0 : i32
    return %c0_i32, %c0_i32_0 : i32, i32
  }
  func.func @transform_19(%arg0: i32) -> (i32, i32) {
    %c0_i32 = arith.constant 0 : i32
    %c0_i32_0 = arith.constant 0 : i32
    %c0_i32_1 = arith.constant 0 : i32
    return %c0_i32, %c0_i32_0 : i32, i32
  }
  func.func @transform_20(%arg0: i32) -> (i32, i32, i32) {
    %c0_i32 = arith.constant 0 : i32
    %c0_i32_0 = arith.constant 0 : i32
    %c0_i32_1 = arith.constant 0 : i32
    return %arg0, %c0_i32, %c0_i32_0 : i32, i32, i32
  }
}

</mosaic_0001>

<bundles_post_ra>
// kernel: tpu_custom_call.1
= control target key start
LH: loop header
LB: loop body
LE: loop exit
PB: predicated region body
PF: predicated region fallthrough
CT: control target
= control target key end

     0   :  { %s6620_s0 = inlined_call_operand.hbm [shape: f32[2,16,128], index: 0, kind: input, shape index: {}]   ;;  %s6621_s1 = inlined_call_operand.hbm [shape: f32[2,16,128], index: 1, kind: input, shape index: {}]   ;;  %s6622_s2 = inlined_call_operand.hbm [shape: f32[128,128], index: 2, kind: input, shape index: {}]   ;;  %s6623_s3 = inlined_call_operand.hbm [shape: f32[128,128], index: 3, kind: input, shape index: {}]   ;;  %s6624_s4 = inlined_call_operand.hbm [shape: f32[128,128], index: 4, kind: input, shape index: {}]   ;;  %s6625_s5 = inlined_call_operand.hbm [shape: f32[128,128], index: 5, kind: input, shape index: {}]   ;;  %s6626_s6 = inlined_call_operand.vmem [shape: f32[1,128], index: 6, kind: input, shape index: {}]   ;;  %s6627_s7 = inlined_call_operand.vmem [shape: f32[1,128], index: 7, kind: input, shape index: {}]   ;;  %s6628_s8 = inlined_call_operand.hbm [shape: f32[128,128], index: 8, kind: input, shape index: {}]   ;;  %s6629_s9 = inlined_call_operand.hbm [shape: f32[128,128], index: 9, kind: input, shape index: {}]   ;;  %s6630_s10 = inlined_call_operand.hbm [shape: f32[128,128], index: 10, kind: input, shape index: {}]   ;;  %s6631_s11 = inlined_call_operand.hbm [shape: f32[128,128], index: 11, kind: input, shape index: {}]   ;;  %s6632_s12 = inlined_call_operand.vmem [shape: f32[1,128], index: 12, kind: input, shape index: {}]   ;;  %s6633_s13 = inlined_call_operand.vmem [shape: f32[1,128], index: 13, kind: input, shape index: {}]   ;;  %s6634_s14 = inlined_call_operand.hbm [shape: f32[128,256], index: 14, kind: input, shape index: {}]   ;;  %s6635_s15 = inlined_call_operand.vmem [shape: f32[1,256], index: 15, kind: input, shape index: {}]   ;;  %s6636_s16 = inlined_call_operand.hbm [shape: f32[256,128], index: 16, kind: input, shape index: {}]   ;;  %s6637_s17 = inlined_call_operand.vmem [shape: f32[1,128], index: 17, kind: input, shape index: {}]   ;;  %s6638_s18 = inlined_call_operand.vmem [shape: f32[1,128], index: 18, kind: input, shape index: {}]   ;;  %s6639_s19 = inlined_call_operand.vmem [shape: f32[1,128], index: 19, kind: input, shape index: {}]   ;;  %s6640_s20 = inlined_call_operand.hbm [shape: f32[2,16,128], index: 20, kind: output, shape index: {}]  }
   0x1   :  { %6656 = sst [smem:[#allocation33_spill]] %s6620_s0 }
   0x2   :  { %6657 = sst [smem:[#allocation34_spill]] %s6621_s1 }
   0x3   :  { %6658 = sst [smem:[#allocation35_spill]] %s6622_s2 }
   0x4   :  { %6659 = sst [smem:[#allocation36_spill]] %s6623_s3 }
   0x5   :  { %6660 = sst [smem:[#allocation37_spill]] %s6624_s4 }
   0x6   :  { %6661 = sst [smem:[#allocation38_spill]] %s6625_s5 }
   0x7   :  { %6662 = sst [smem:[#allocation39_spill]] %s6626_s6 }
   0x8   :  { %6663 = sst [smem:[#allocation40_spill]] %s6627_s7 }
   0x9   :  { %6664 = sst [smem:[#allocation41_spill]] %s6628_s8 }
   0xa   :  { %6665 = sst [smem:[#allocation42_spill]] %s6629_s9 }
   0xb   :  { %6666 = sst [smem:[#allocation43_spill]] %s6630_s10 }
   0xc   :  { %6667 = sst [smem:[#allocation44_spill]] %s6631_s11 }
   0xd   :  { %6668 = sst [smem:[#allocation45_spill]] %s6632_s12 }
   0xe   :  { %6669 = sst [smem:[#allocation46_spill]] %s6633_s13 }
   0xf   :  { %6670 = sst [smem:[#allocation47_spill]] %s6634_s14 }
  0x10   :  { %6671 = sst [smem:[#allocation48_spill]] %s6635_s15 }
  0x11   :  { %6672 = sst [smem:[#allocation49_spill]] %s6637_s17 }
  0x12   :  { %6673 = sst [smem:[#allocation50_spill]] %s6638_s18 }
  0x13   :  { %6674 = sst [smem:[#allocation51_spill]] %s6639_s19 }
  0x14   :  { %6675 = sst [smem:[#allocation52_spill]] %s6640_s20 }
  0x15   :  { %25 = vsyncpa [#allocation4], 0 }
  0x16   :  { %27 = vsyncpa [#allocation4 + $0x1], 0 }
  0x17   :  { %28 = vsyncpa [#allocation7], 0 }
  0x18   :  { %30 = vsyncpa [#allocation7 + $0x1], 0 }
  0x19   :  { %31 = vsyncpa [#allocation10], 0 }
  0x1a   :  { %32 = vsyncpa [#allocation13], 0 }
  0x1b   :  { %33 = vsyncpa [#allocation16], 0 }
  0x1c   :  { %34 = vsyncpa [#allocation19], 0 }
  0x1d   :  { %35 = vsyncpa [#allocation22], 0 }
  0x1e   :  { %36 = vsyncpa [#allocation5], 0 }
  0x1f   :  { %38 = vsyncpa [#allocation5 + $0x1], 0  ;;  %s5851_s1 = smov 0   ;;  %s5853_s22 = smov 0  }
  0x20   :  { %s5855_s23 = smov 0   ;;  %s5857_s24 = smov 0  }
  0x21 LB: > { %s5723_s2 = smov [#allocation8]   ;;  %s5872_s3 = sadd.s32 4294967295, %s5721_s24   ;;  %s5721_s24 = sphi %s5857_s24, %s6728_s24   ;;  %s5717_s23 = sphi %s5855_s23, %s6727_s23   ;;  %s5713_s22 = sphi %s5853_s22, %s6726_s22   ;;  %s5709_s1 = sphi %s5851_s1, %s6725_s1  }
  0x22   : > { %s517_s25 = sshll.u32 %s5723_s2, 4  ;;  %p3826_p0 = scmp.ge.s32.totalorder %s5721_s24, 1  ;;  %s5877_s25 = int_to_ptr.vmem [resolvable:$true] %s517_s25 }
  0x23   : > { %p6648_p1 = scmp.eq.s32.totalorder %s5872_s3, 0  ;;  %p505_p2 = scmp.lt.s32.totalorder %s5721_s24, 3 }
  0x24   : > { %s5724_s27 = smov [#allocation9]   ;;  %s5725_s29 = smov [#allocation12]  }
  0x25   : > { %p5879_p3 = pnand %p3826_p0, %p505_p2  ;;  %s530_s28 = sshll.u32 %s5724_s27, 4  ;;  %s5892_s28 = int_to_ptr.vmem [resolvable:$true] %s530_s28 }
  0x26   : > { %s556_s30 = sshll.u32 %s5725_s29, 4  ;;  %s6678_s2 = sld [smem:[#allocation35_spill]]  ;;  %s5894_s30 = int_to_ptr.vmem [resolvable:$true] %s556_s30 }
  0x27   : > { %s6676_s26 = scalar_select %p5879_p3, 1, 0 }
  0x28   : > { %p5005_p5 = pneg %p5879_p3 }
  0x2a   : > { %p5888_p6 = pnand %p5005_p5, %p6648_p1 }
  0x2c   : > { %s5287_s20 = scalar_lea.hbm %s6678_s2, 2048  ;;  %p5904_p8 = pneg %p5888_p6 }
  0x2d   : > { %p5288_p7 = scmp.ne.s32.totalorder %s6678_s2, %s5287_s20  ;;  %p5294_p11 = scmp.lt.u32.totalorder %s5287_s20, %s6678_s2 }
  0x2f   : > { %p5290_p9 = pnand %p5904_p8, %p5288_p7 }
  0x31   : > { %p5291_p10 = pneg %p5290_p9 }
  0x33   : > { %p5296_p12 = pnand %p5294_p11, %p5291_p10 }
  0x35   : > { %5299 = shalt.err (!%p5296_p12)
}
  0x36   : > { %s5300_s18 = scalar_lea.vmem %s5877_s25, 2048  ;;  %p5308_p5 = scmp.lt.s32.totalorder %s5877_s25, %s5877_s25 }
  0x37   : > { %p5301_p13 = scmp.ne.s32.totalorder %s5877_s25, %s5300_s18  ;;  %p5309_p4 = scmp.lt.s32.totalorder %s5300_s18, %s5300_s18 }
  0x39   : > { %p5303_p0 = pnand %p5301_p13, %p5904_p8  ;;  %p5310_p7 = por %p5309_p4, %p5308_p5 }
  0x3b   : > { %p5304_p2 = pneg %p5303_p0 }
  0x3d   : > { %p5311_p9 = pnand %p5310_p7, %p5304_p2 }
  0x3f   : > { %5314 = shalt.err (!%p5311_p9)
}
  0x40   : > { %s6650_s19 = smov 128   ;;  %s6652_s17 = smov 8  }
  0x41   : > { %5008 = dma.hbm_to_vmem [thread:$0]  (!%p5888_p6), %s6678_s2, 2048, %s5877_s25, [#allocation7], %s6650_s19, %s6650_s19, %s6652_s17  }
  0x42   : > { %s6680_s15 = sld [smem:[#allocation36_spill]] }
  0x48   : > { %s5315_s18 = scalar_lea.hbm %s6680_s15, 2048 }
  0x49   : > { %p5316_p4 = scmp.ne.s32.totalorder %s6680_s15, %s5315_s18  ;;  %p5322_p12 = scmp.lt.u32.totalorder %s5315_s18, %s6680_s15 }
  0x4b   : > { %p5318_p10 = pnand %p5316_p4, %p5904_p8 }
  0x4d   : > { %p5319_p11 = pneg %p5318_p10 }
  0x4f   : > { %p5324_p13 = pnand %p5322_p12, %p5319_p11 }
  0x51   : > { %5327 = shalt.err (!%p5324_p13)
}
  0x52   : > { %s5328_s25 = scalar_lea.vmem %s5892_s28, 2048  ;;  %p5336_p7 = scmp.lt.s32.totalorder %s5892_s28, %s5892_s28 }
  0x53   : > { %p5329_p0 = scmp.ne.s32.totalorder %s5892_s28, %s5328_s25  ;;  %p5337_p9 = scmp.lt.s32.totalorder %s5328_s25, %s5328_s25 }
  0x55   : > { %p5331_p2 = pnand %p5329_p0, %p5904_p8  ;;  %p5338_p4 = por %p5337_p9, %p5336_p7 }
  0x57   : > { %p5332_p5 = pneg %p5331_p2 }
  0x59   : > { %p5339_p10 = pnand %p5338_p4, %p5332_p5 }
  0x5b   : > { %5342 = shalt.err (!%p5339_p10)
}
  0x5c   : > { %5011 = dma.hbm_to_vmem [thread:$0]  (!%p5888_p6), %s6680_s15, 2048, %s5892_s28, [#allocation10], %s6650_s19, %s6650_s19, %s6652_s17  }
  0x5d   : > { %s6681_s5 = sld [smem:[#allocation38_spill]] }
  0x63   : > { %s5343_s20 = scalar_lea.hbm %s6681_s5, 2048 }
  0x64   : > { %p5344_p11 = scmp.ne.s32.totalorder %s6681_s5, %s5343_s20  ;;  %p5350_p0 = scmp.lt.u32.totalorder %s5343_s20, %s6681_s5 }
  0x66   : > { %p5346_p12 = pnand %p5344_p11, %p5904_p8 }
  0x68   : > { %p5347_p13 = pneg %p5346_p12 }
  0x6a   : > { %p5352_p2 = pnand %p5350_p0, %p5347_p13 }
  0x6c   : > { %5355 = shalt.err (!%p5352_p2)
}
  0x6d   : > { %s5356_s28 = scalar_lea.vmem %s5894_s30, 2048  ;;  %p5364_p4 = scmp.lt.s32.totalorder %s5894_s30, %s5894_s30 }
  0x6e   : > { %p5357_p5 = scmp.ne.s32.totalorder %s5894_s30, %s5356_s28  ;;  %p5365_p10 = scmp.lt.s32.totalorder %s5356_s28, %s5356_s28 }
  0x70   : > { %p5359_p7 = pnand %p5357_p5, %p5904_p8  ;;  %p5366_p11 = por %p5365_p10, %p5364_p4 }
  0x72   : > { %p5360_p9 = pneg %p5359_p7 }
  0x74   : > { %p5367_p12 = pnand %p5366_p11, %p5360_p9 }
  0x76   : > { %5370 = shalt.err (!%p5367_p12)
}
  0x77   : > { %5017 = dma.hbm_to_vmem [thread:$0]  (!%p5888_p6), %s6681_s5, 2048, %s5894_s30, [#allocation13], %s6650_s19, %s6650_s19, %s6652_s17  }
  0x78   : > { %s5728_s7 = smov [#allocation15]   ;;  %s5729_s13 = smov [#allocation18]  }
  0x79   : > { %s588_s12 = sshll.u32 %s5728_s7, 4  ;;  %s614_s20 = sshll.u32 %s5729_s13, 4  ;;  %s589_s12 = int_to_ptr.vmem [resolvable:$true] %s588_s12  ;;  %s615_s20 = int_to_ptr.vmem [resolvable:$true] %s614_s20 }
  0x7a   : > { %s6682_s9 = sld [smem:[#allocation42_spill]] }
  0x80   : > { %s5371_s29 = scalar_lea.hbm %s6682_s9, 2048 }
  0x81   : > { %p5372_p13 = scmp.ne.s32.totalorder %s6682_s9, %s5371_s29  ;;  %p5378_p5 = scmp.lt.u32.totalorder %s5371_s29, %s6682_s9 }
  0x83   : > { %p5374_p0 = pnand %p5372_p13, %p5904_p8 }
  0x85   : > { %p5375_p2 = pneg %p5374_p0 }
  0x87   : > { %p5380_p7 = pnand %p5378_p5, %p5375_p2 }
  0x89   : > { %5383 = shalt.err (!%p5380_p7)
}
  0x8a   : > { %s5384_s30 = scalar_lea.vmem %s589_s12, 2048  ;;  %p5392_p11 = scmp.lt.s32.totalorder %s589_s12, %s589_s12 }
  0x8b   : > { %p5385_p9 = scmp.ne.s32.totalorder %s589_s12, %s5384_s30  ;;  %p5393_p12 = scmp.lt.s32.totalorder %s5384_s30, %s5384_s30 }
  0x8d   : > { %p5387_p4 = pnand %p5385_p9, %p5904_p8  ;;  %p5394_p1 = por %p5393_p12, %p5392_p11 }
  0x8f   : > { %p5388_p10 = pneg %p5387_p4 }
  0x91   : > { %p5395_p3 = pnand %p5394_p1, %p5388_p10 }
  0x93   : > { %5398 = shalt.err (!%p5395_p3)
}
  0x94   : > { %5023 = dma.hbm_to_vmem [thread:$0]  (!%p5888_p6), %s6682_s9, 2048, %s589_s12, [#allocation16], %s6650_s19, %s6650_s19, %s6652_s17  }
  0x95   : > { %s6683_s11 = sld [smem:[#allocation44_spill]] }
  0x9b   : > { %s5399_s0 = scalar_lea.hbm %s6683_s11, 2048 }
  0x9c   : > { %p5400_p1 = scmp.ne.s32.totalorder %s6683_s11, %s5399_s0  ;;  %p5406_p0 = scmp.lt.u32.totalorder %s5399_s0, %s6683_s11 }
  0x9e   : > { %p5402_p3 = pnand %p5400_p1, %p5904_p8 }
  0xa0   : > { %p5403_p13 = pneg %p5402_p3 }
  0xa2   : > { %p5408_p2 = pnand %p5406_p0, %p5403_p13 }
  0xa4   : > { %5411 = shalt.err (!%p5408_p2)
}
  0xa5   : > { %s5412_s25 = scalar_lea.vmem %s615_s20, 2048  ;;  %p5420_p4 = scmp.lt.s32.totalorder %s615_s20, %s615_s20 }
  0xa6   : > { %p5413_p5 = scmp.ne.s32.totalorder %s615_s20, %s5412_s25  ;;  %p5421_p10 = scmp.lt.s32.totalorder %s5412_s25, %s5412_s25 }
  0xa8   : > { %p5415_p7 = pnand %p5413_p5, %p5904_p8  ;;  %p5422_p11 = por %p5421_p10, %p5420_p4 }
  0xaa   : > { %p5416_p9 = pneg %p5415_p7 }
  0xac   : > { %p5423_p12 = pnand %p5422_p11, %p5416_p9 }
  0xae   : > { %5426 = shalt.err (!%p5423_p12)
}
  0xaf   : > { %5029 = dma.hbm_to_vmem [thread:$0]  (!%p5888_p6), %s6683_s11, 2048, %s615_s20, [#allocation19], %s6650_s19, %s6650_s19, %s6652_s17  }
  0xb0   : > { %s5730_s2 = smov [#allocation11]   ;;  %s5731_s7 = smov [#allocation14]  }
  0xb1   : > { %s543_s6 = sshll.u32 %s5730_s2, 4  ;;  %s575_s13 = sshll.u32 %s5731_s7, 4  ;;  %s544_s6 = int_to_ptr.vmem [resolvable:$true] %s543_s6  ;;  %s576_s13 = int_to_ptr.vmem [resolvable:$true] %s575_s13 }
  0xb2   : > { %s6684_s29 = sld [smem:[#allocation37_spill]] }
  0xb8   : > { %s5427_s18 = scalar_lea.hbm %s6684_s29, 2048 }
  0xb9   : > { %p5428_p1 = scmp.ne.s32.totalorder %s6684_s29, %s5427_s18  ;;  %p5434_p0 = scmp.lt.u32.totalorder %s5427_s18, %s6684_s29 }
  0xbb   : > { %p5430_p3 = pnand %p5428_p1, %p5904_p8 }
  0xbd   : > { %p5431_p13 = pneg %p5430_p3 }
  0xbf   : > { %p5436_p2 = pnand %p5434_p0, %p5431_p13 }
  0xc1   : > { %5439 = shalt.err (!%p5436_p2)
}
  0xc2   : > { %s5440_s20 = scalar_lea.vmem %s544_s6, 2048  ;;  %p5448_p4 = scmp.lt.s32.totalorder %s544_s6, %s544_s6 }
  0xc3   : > { %p5441_p5 = scmp.ne.s32.totalorder %s544_s6, %s5440_s20  ;;  %p5449_p10 = scmp.lt.s32.totalorder %s5440_s20, %s5440_s20 }
  0xc5   : > { %p5443_p7 = pnand %p5441_p5, %p5904_p8  ;;  %p5450_p11 = por %p5449_p10, %p5448_p4 }
  0xc7   : > { %p5444_p9 = pneg %p5443_p7 }
  0xc9   : > { %p5451_p12 = pnand %p5450_p11, %p5444_p9 }
  0xcb   : > { %5454 = shalt.err (!%p5451_p12)
}
  0xcc   : > { %5014 = dma.hbm_to_vmem [thread:$0]  (!%p5888_p6), %s6684_s29, 2048, %s544_s6, [#allocation10], %s6650_s19, %s6650_s19, %s6652_s17  }
  0xcd   : > { %s6685_s8 = sld [smem:[#allocation41_spill]] }
  0xd3   : > { %s5455_s0 = scalar_lea.hbm %s6685_s8, 2048 }
  0xd4   : > { %p5456_p1 = scmp.ne.s32.totalorder %s6685_s8, %s5455_s0  ;;  %p5462_p0 = scmp.lt.u32.totalorder %s5455_s0, %s6685_s8 }
  0xd6   : > { %p5458_p3 = pnand %p5456_p1, %p5904_p8 }
  0xd8   : > { %p5459_p13 = pneg %p5458_p3 }
  0xda   : > { %p5464_p2 = pnand %p5462_p0, %p5459_p13 }
  0xdc   : > { %5467 = shalt.err (!%p5464_p2)
}
  0xdd   : > { %s5468_s12 = scalar_lea.vmem %s576_s13, 2048  ;;  %p5476_p4 = scmp.lt.s32.totalorder %s576_s13, %s576_s13 }
  0xde   : > { %p5469_p5 = scmp.ne.s32.totalorder %s576_s13, %s5468_s12  ;;  %p5477_p10 = scmp.lt.s32.totalorder %s5468_s12, %s5468_s12 }
  0xe0   : > { %p5471_p7 = pnand %p5469_p5, %p5904_p8  ;;  %p5478_p11 = por %p5477_p10, %p5476_p4 }
  0xe2   : > { %p5472_p9 = pneg %p5471_p7 }
  0xe4   : > { %p5479_p12 = pnand %p5478_p11, %p5472_p9 }
  0xe6   : > { %5482 = shalt.err (!%p5479_p12)
}
  0xe7   : > { %5020 = dma.hbm_to_vmem [thread:$0]  (!%p5888_p6), %s6685_s8, 2048, %s576_s13, [#allocation13], %s6650_s19, %s6650_s19, %s6652_s17  }
  0xe8   : > { %s5732_s5 = smov [#allocation17]   ;;  %s5733_s2 = smov [#allocation20]  }
  0xe9   : > { %s601_s30 = sshll.u32 %s5732_s5, 4  ;;  %s633_s7 = sshll.u32 %s5733_s2, 4  ;;  %s602_s30 = int_to_ptr.vmem [resolvable:$true] %s601_s30  ;;  %s634_s7 = int_to_ptr.vmem [resolvable:$true] %s633_s7 }
  0xea   : > { %s6686_s10 = sld [smem:[#allocation43_spill]] }
  0xf0   : > { %s5483_s18 = scalar_lea.hbm %s6686_s10, 2048 }
  0xf1   : > { %p5484_p1 = scmp.ne.s32.totalorder %s6686_s10, %s5483_s18  ;;  %p5490_p0 = scmp.lt.u32.totalorder %s5483_s18, %s6686_s10 }
  0xf3   : > { %p5486_p3 = pnand %p5484_p1, %p5904_p8 }
  0xf5   : > { %p5487_p13 = pneg %p5486_p3 }
  0xf7   : > { %p5492_p2 = pnand %p5490_p0, %p5487_p13 }
  0xf9   : > { %5495 = shalt.err (!%p5492_p2)
}
  0xfa   : > { %s5496_s13 = scalar_lea.vmem %s602_s30, 2048  ;;  %p5504_p4 = scmp.lt.s32.totalorder %s602_s30, %s602_s30 }
  0xfb   : > { %p5497_p5 = scmp.ne.s32.totalorder %s602_s30, %s5496_s13  ;;  %p5505_p10 = scmp.lt.s32.totalorder %s5496_s13, %s5496_s13 }
  0xfd   : > { %p5499_p7 = pnand %p5497_p5, %p5904_p8  ;;  %p5506_p11 = por %p5505_p10, %p5504_p4 }
  0xff   : > { %p5500_p9 = pneg %p5499_p7 }
 0x101   : > { %p5507_p12 = pnand %p5506_p11, %p5500_p9 }
 0x103   : > { %5510 = shalt.err (!%p5507_p12)
}
 0x104   : > { %5026 = dma.hbm_to_vmem [thread:$0]  (!%p5888_p6), %s6686_s10, 2048, %s602_s30, [#allocation16], %s6650_s19, %s6650_s19, %s6652_s17  }
 0x105   : > { %s6687_s14 = sld [smem:[#allocation47_spill]] }
 0x10b   : > { %s5511_s21 = scalar_lea.hbm %s6687_s14, 4096 }
 0x10c   : > { %p5512_p1 = scmp.ne.s32.totalorder %s6687_s14, %s5511_s21  ;;  %p5518_p0 = scmp.lt.u32.totalorder %s5511_s21, %s6687_s14 }
 0x10e   : > { %p5514_p3 = pnand %p5512_p1, %p5904_p8 }
 0x110   : > { %p5515_p13 = pneg %p5514_p3 }
 0x112   : > { %p5520_p2 = pnand %p5518_p0, %p5515_p13 }
 0x114   : > { %5523 = shalt.err (!%p5520_p2)
}
 0x115   : > { %s5524_s6 = scalar_lea.vmem %s634_s7, 4096  ;;  %p5532_p4 = scmp.lt.s32.totalorder %s634_s7, %s634_s7 }
 0x116   : > { %p5525_p5 = scmp.ne.s32.totalorder %s634_s7, %s5524_s6  ;;  %p5533_p10 = scmp.lt.s32.totalorder %s5524_s6, %s5524_s6 }
 0x118   : > { %p5527_p7 = pnand %p5525_p5, %p5904_p8  ;;  %p5534_p11 = por %p5533_p10, %p5532_p4 }
 0x11a   : > { %p5528_p9 = pneg %p5527_p7 }
 0x11c   : > { %p5535_p12 = pnand %p5534_p11, %p5528_p9 }
 0x11e   : > { %5538 = shalt.err (!%p5535_p12)
}
 0x11f   : > { %s5734_s30 = smov 256   ;;  %s5735_s13 = smov 16  }
 0x120   : > { %5032 = dma.hbm_to_vmem [thread:$0]  (!%p5888_p6), %s6687_s14, 4096, %s634_s7, [#allocation19], %s5734_s30, %s5734_s30, %s5735_s13  }
 0x121   : > { %s5736_s2 = smov [#allocation21]   ;;  %s5539_s28 = scalar_lea.hbm %s6636_s16, 4096 }
 0x122   : > { %s649_s0 = sshll.u32 %s5736_s2, 4  ;;  %p5540_p1 = scmp.ne.s32.totalorder %s6636_s16, %s5539_s28  ;;  %s650_s0 = int_to_ptr.vmem [resolvable:$true] %s649_s0 }
 0x123   : > { %p5546_p0 = scmp.lt.u32.totalorder %s5539_s28, %s6636_s16 }
 0x124   : > { %p5542_p3 = pnand %p5540_p1, %p5904_p8 }
 0x126   : > { %p5543_p13 = pneg %p5542_p3 }
 0x128   : > { %p5548_p2 = pnand %p5546_p0, %p5543_p13 }
 0x12a   : > { %5551 = shalt.err (!%p5548_p2)
}
 0x12b   : > { %s5552_s7 = scalar_lea.vmem %s650_s0, 4096  ;;  %p5560_p4 = scmp.lt.s32.totalorder %s650_s0, %s650_s0 }
 0x12c   : > { %p5553_p5 = scmp.ne.s32.totalorder %s650_s0, %s5552_s7  ;;  %p5561_p10 = scmp.lt.s32.totalorder %s5552_s7, %s5552_s7 }
 0x12e   : > { %p5555_p7 = pnand %p5553_p5, %p5904_p8  ;;  %p5562_p11 = por %p5561_p10, %p5560_p4 }
 0x130   : > { %p5556_p9 = pneg %p5555_p7 }
 0x132   : > { %p5563_p12 = pnand %p5562_p11, %p5556_p9 }
 0x134   : > { %5566 = shalt.err (!%p5563_p12)
}
 0x135   : > { %s6688_s30 = smov 128   ;;  %s3825_s4 = sadd.s32 4294967294, %s5721_s24  }
 0x136   : > { %5035 = dma.hbm_to_vmem [thread:$0]  (!%p5888_p6), %s6636_s16, 4096, %s650_s0, [#allocation22], %s6688_s30, %s6688_s30, %s6652_s17  }
 0x137   : > { %s6126_s27 = sadd.s32 1, %s5721_s24   ;;  %s51_s5 = sadd.s32 1, %s5717_s23 }
 0x138   : > { %s48_s20 = ssub.s32 %s5721_s24, %s6126_s27  ;;  %p58_p1 = scmp.ne.s32.totalorder %s5717_s23, %s5713_s22 }
 0x139   : > { %p49_p8 = scmp.eq.s32.totalorder %s48_s20, 0  ;;  %p59_p3 = scmp.eq.s32.totalorder %s5721_s24, 0 }
 0x13a   : > { %p64_p13 = scmp.ne.s32.totalorder %s5713_s22, %s5709_s1  ;;  %p6690_p2 = scmp.eq.s32.totalorder %s5872_s3, 0 }
 0x13b   : > { %s6137_s2 = scalar_select %p49_p8, %s5717_s23, %s51_s5  }
 0x13c   : > { %p6139_p0 = por %p59_p3, %p58_p1  ;;  %p6145_p6 = por %p6690_p2, %p64_p13 }
 0x13d   : > { %p492_p5 = scmp.eq.s32.totalorder %s5872_s3, 1  ;;  %p498_p7 = scmp.eq.s32.totalorder %s3825_s4, 1 }
 0x13e   : > { %p5057_p9 = scmp.lt.s32.totalorder %s5721_s24, 2  ;;  %s672_s18 = sand.u32 1, %s5717_s23  }
 0x13f   : > { %p6152_p4 = por %p492_p5, %p58_p1  ;;  %p6156_p10 = por %p498_p7, %p64_p13 }
 0x140   : > { %s3838_s12 = sshll.u32 %s672_s18, 4  ;;  %s3918_s6 = sshll.u32 %s5721_s24, 8 }
 0x141   : > { %s6692_s28 = scalar_select %p6152_p4, 1, 0 }
 0x142   : > { %s6693_s25 = scalar_select %p6156_p10, 1, 0 }
 0x143   : > { %s6694_s13 = sld [smem:[#allocation33_spill]]  ;;  %s676_s4 = scalar_lea.vmem [#allocation3], %s3838_s12 }
 0x144   : > { %s683_s5 = sshll.u32 %s676_s4, 4  ;;  %p6170_p11 = pnand %p5057_p9, %p6139_p0  ;;  %s6166_s5 = int_to_ptr.vmem [resolvable:$true] %s683_s5 }
 0x145   : > { %s6696_s10 = sld [smem:[#allocation34_spill]]  ;;  %s697_s19 = scalar_lea.vmem [#allocation6], %s3838_s12 }
 0x146   : > { %s6179_s11 = sshll.u32 %s697_s19, 4  ;;  %s6181_s14 = scalar_lea.sflag [#allocation4], %s672_s18  ;;  %s6213_s11 = int_to_ptr.vmem [resolvable:$true] %s6179_s11 }
 0x147   : > { %p5569_p8 = pneg %p6170_p11 }
 0x149   : > { %s6164_s20 = scalar_lea.hbm %s6694_s13, %s3918_s6  ;;  %s5572_s8 = scalar_lea.hbm %s6694_s13, 512 }
 0x14a   : > { %s5567_s4 = scalar_lea.hbm %s6164_s20, 256  ;;  %p5573_p13 = scmp.lt.u32.totalorder %s6164_s20, %s6694_s13 }
 0x14b   : > { %s6177_s7 = scalar_lea.hbm %s6696_s10, %s3918_s6  ;;  %p5568_p12 = scmp.ne.s32.totalorder %s6164_s20, %s5567_s4 }
 0x14c   : > { %p5574_p0 = scmp.lt.u32.totalorder %s5572_s8, %s5567_s4  ;;  %p5576_p5 = scmp.lt.u32.totalorder %s5567_s4, %s6164_s20 }
 0x14d   : > { %p5570_p1 = pnand %p5569_p8, %p5568_p12 }
 0x14e   : > { %p5575_p2 = por %p5574_p0, %p5573_p13 }
 0x14f   : > { %p5571_p3 = pneg %p5570_p1 }
 0x150   : > { %p5577_p7 = por %p5576_p5, %p5575_p2 }
 0x152   : > { %p5578_p9 = pnand %p5577_p7, %p5571_p3 }
 0x154   : > { %5581 = shalt.err (!%p5578_p9)
}
 0x155   : > { %s5582_s18 = scalar_lea.vmem %s6166_s5, 256  ;;  %s5737_s15 = smov [#allocation3]  }
 0x156   : > { %p5583_p12 = scmp.ne.s32.totalorder %s6166_s5, %s5582_s18  ;;  %s5587_s12 = sshll.u32 %s5737_s15, 4  ;;  %s5588_s12 = int_to_ptr.vmem [resolvable:$false] %s5587_s12 }
 0x157   : > { %s5589_s19 = scalar_lea.vmem %s5588_s12, 512  ;;  %p5590_p4 = scmp.lt.s32.totalorder %s6166_s5, %s5588_s12 }
 0x158   : > { %p5585_p1 = pnand %p5583_p12, %p5569_p8  ;;  %p5591_p13 = scmp.lt.s32.totalorder %s5589_s19, %s5582_s18 }
 0x15a   : > { %p5586_p10 = pneg %p5585_p1  ;;  %p5592_p0 = por %p5591_p13, %p5590_p4 }
 0x15c   : > { %p5593_p2 = pnand %p5592_p0, %p5586_p10 }
 0x15e   : > { %5596 = shalt.err (!%p5593_p2)
}
 0x15f   : > { %s6697_s4 = smov 8   ;;  %s693_s21 = sand.u32 1, %s5721_s24  }
 0x160   : > { %5039 = dma.hbm_to_vmem [thread:$0]  (!%p6170_p11), %s6164_s20, 256, %s6166_s5, %s6181_s14, %s6688_s30, %s6688_s30, %s6697_s4  }
 0x161   : > { %s6216_s8 = scalar_lea.sflag [#allocation7], %s693_s21  ;;  %s5597_s9 = scalar_lea.hbm %s6177_s7, 256 }
 0x162   : > { %p5598_p4 = scmp.ne.s32.totalorder %s6177_s7, %s5597_s9  ;;  %s5602_s15 = scalar_lea.hbm %s6696_s10, 512 }
 0x163   : > { %p5603_p5 = scmp.lt.u32.totalorder %s6177_s7, %s6696_s10  ;;  %p5604_p7 = scmp.lt.u32.totalorder %s5602_s15, %s5597_s9 }
 0x164   : > { %p5600_p10 = pnand %p5598_p4, %p5569_p8  ;;  %p5606_p12 = scmp.lt.u32.totalorder %s5597_s9, %s6177_s7 }
 0x165   : > { %p5605_p9 = por %p5604_p7, %p5603_p5 }
 0x166   : > { %p5601_p3 = pneg %p5600_p10 }
 0x167   : > { %p5607_p1 = por %p5606_p12, %p5605_p9 }
 0x169   : > { %p5608_p13 = pnand %p5607_p1, %p5601_p3 }
 0x16b   : > { %5611 = shalt.err (!%p5608_p13)
}
 0x16c   : > { %s5612_s14 = scalar_lea.vmem %s6213_s11, 256  ;;  %s5738_s20 = smov [#allocation6]  }
 0x16d   : > { %p5613_p0 = scmp.ne.s32.totalorder %s6213_s11, %s5612_s14  ;;  %s5617_s5 = sshll.u32 %s5738_s20, 4  ;;  %s5618_s5 = int_to_ptr.vmem [resolvable:$false] %s5617_s5 }
 0x16e   : > { %s5619_s21 = scalar_lea.vmem %s5618_s5, 512  ;;  %p5620_p10 = scmp.lt.s32.totalorder %s6213_s11, %s5618_s5 }
 0x16f   : > { %p5615_p2 = pnand %p5613_p0, %p5569_p8  ;;  %p5621_p5 = scmp.lt.s32.totalorder %s5619_s21, %s5612_s14 }
 0x171   : > { %p5616_p4 = pneg %p5615_p2  ;;  %p5622_p7 = por %p5621_p5, %p5620_p10 }
 0x173   : > { %p5623_p9 = pnand %p5622_p7, %p5616_p4 }
 0x175   : > { %5626 = shalt.err (!%p5623_p9)
}
 0x176   : > { %5042 = dma.hbm_to_vmem [thread:$0]  (!%p6170_p11), %s6177_s7, 256, %s6213_s11, %s6216_s8, %s6688_s30, %s6688_s30, %s6697_s4  }
 0x177   : > { %p6698_p8 = scmp.ne.s32.totalorder %s6676_s26, 0 }
 0x178   : > { %s6248_s9 = sand.u32 (!%p6698_p8), 1, %s5713_s22  }
 0x179   : > { %716 = sbr.rel (%p6698_p8) target bundleno = 6637 (0x19ed), region = 100  ;;  %s6251_s6 = sshll.u32 (!%p6698_p8), %s6248_s9, 4 }
 0x17a   : > { %s719_s17 = scalar_lea.sflag (!%p6698_p8), [#allocation4], %s6248_s9  ;;  %s722_s18 = scalar_lea.vmem (!%p6698_p8), [#allocation3], %s6251_s6 }
 0x180   : > { %5672 = dma.done.wait (%p6145_p6), %s719_s17, 256  }
 0x181   : > { %5674 = vsyncadd (%p6145_p6), %s719_s17, 4294967040  ;;  %s727_s11 = sand.u32 1, %s5872_s3   ;;  %s731_s30 = scalar_lea.vmem [#allocation6], %s6251_s6 }
 0x182   : > { %s728_s26 = scalar_lea.sflag [#allocation7], %s727_s11 }
 0x183   : > { %5676 = dma.done.wait (%p6145_p6), %s728_s26, 256  }
 0x184   : > { %5678 = vsyncadd (%p6145_p6), %s728_s26, 4294967040  ;;  %p6699_p11 = scmp.eq.s32.totalorder %s5872_s3, 0 }
 0x186   : > { %5680 = dma.done.wait (%p6699_p11), [#allocation7], 2048   ;;  %p6700_p3 = pmov %p6699_p11 }
 0x188   : > { %5682 = vsyncadd (%p6700_p3), [#allocation7], 4294965248  ;;  %p6701_p12 = pmov %p6700_p3 }
 0x189   : > { %p6702_p1 = pmov %p6700_p3 }
 0x18a   : > { %5684 = dma.done.wait (%p6701_p12), [#allocation10], 4096  }
 0x18b   : > { %5686 = vsyncadd (%p6702_p1), [#allocation10], 4294963200  ;;  %p6703_p13 = pmov %p6702_p1 }
 0x18c   : > { %p6704_p0 = pmov %p6702_p1 }
 0x18d   : > { %5688 = dma.done.wait (%p6703_p13), [#allocation13], 4096  }
 0x18e   : > { %5690 = vsyncadd (%p6704_p0), [#allocation13], 4294963200  ;;  %p6705_p6 = pmov %p6704_p0 }
 0x18f   : > { %p6706_p2 = pmov %p6704_p0 }
 0x190   : > { %5692 = dma.done.wait (%p6705_p6), [#allocation16], 4096  }
 0x191   : > { %5694 = vsyncadd (%p6706_p2), [#allocation16], 4294963200  ;;  %p6707_p4 = pmov %p6704_p0 }
 0x192   : > { %p6708_p10 = pmov %p6704_p0 }
 0x193   : > { %5696 = dma.done.wait (%p6707_p4), [#allocation19], 6144  }
 0x194   : > { %5698 = vsyncadd (%p6708_p10), [#allocation19], 4294961152  ;;  %p6709_p5 = pmov %p6704_p0 }
 0x195   : > { %p6710_p7 = pmov %p6704_p0 }
 0x196   : > { %5700 = dma.done.wait (%p6709_p5), [#allocation22], 4096  }
 0x197   : > { %5702 = vsyncadd (%p6710_p7), [#allocation22], 4294963200  ;;  %v853_v0 = vld [vmem:[#allocation9] sm:$0xff]  ;;  %v854_v1 = vld [vmem:[#allocation9 + $0x8] sm:$0xff]  ;;  %vm1128_vm0 = vcmask 261120   ;;  %s5739_s0 = smov 96  }
 0x198   : > { %v855_v2 = vld [vmem:[#allocation9 + $0x10] sm:$0xff]  ;;  %v4591_v3 = vpack.c.bf16 %v854_v1, %v853_v0  ;;  %v856_v4 = vld [vmem:[#allocation9 + $0x18] sm:$0xff]  ;;  %v837_v5 = vld [vmem:[#allocation8] sm:$0xff]  ;;  %vm1216_vm2 = vcmask 130048   ;;  %s5740_s7 = smov 32   ;;  %s5741_s4 = smov 64  }
 0x199   : > { %v838_v6 = vld [vmem:[#allocation8 + $0x8] sm:$0xff]  ;;  %v4595_v7 = vpack.c.bf16 %v856_v4, %v855_v2  ;;  %v857_v9 = vld [vmem:[#allocation9 + $0x20] sm:$0xff]  ;;  %v839_v11 = vld [vmem:[#allocation8 + $0x10] sm:$0xff]  ;;  %vm1971_vm3 = vcmask 523264   ;;  %vm1974_vm4 = vcmask 785408   ;;  %s6713_s12 = sld [smem:[#allocation39_spill]] }
 0x19a   : > { %v4559_v8 = vpack.c.bf16 %v838_v6, %v837_v5  ;;  %v858_v10 = vld [vmem:[#allocation9 + $0x28] sm:$0xff]  ;;  %4592 = vmatprep.subr.bf16.mxu1 %v4591_v3  ;;  %v840_v12 = vld [vmem:[#allocation8 + $0x18] sm:$0xff]  ;;  %v841_v14 = vld [vmem:[#allocation8 + $0x20] sm:$0xff]  ;;  %s6714_s20 = sld [smem:[#allocation40_spill]]  ;;  %s6715_s17 = sld [smem:[#allocation45_spill]] }
 0x19b   : > { %4594 = vmatpush3.bf16.msra.mxu1 %v4591_v3  ;;  %v4563_v13 = vpack.c.bf16 %v840_v12, %v839_v11  ;;  %v842_v15 = vld [vmem:[#allocation8 + $0x28] sm:$0xff]  ;;  %v4599_v16 = vpack.c.bf16 %v858_v10, %v857_v9  ;;  %v859_v17 = vld [vmem:[#allocation9 + $0x30] sm:$0xff]  ;;  %v860_v18 = vld [vmem:[#allocation9 + $0x38] sm:$0xff]  ;;  %s6716_s26 = sld [smem:[#allocation46_spill]]  ;;  %s6718_s15 = sld [smem:[#allocation49_spill]] }
 0x19c   : > { %4560 = vmatprep.subr.bf16.mxu0 %v4559_v8  ;;  %4596 = vmatprep.subr.bf16.mxu1 %v4595_v7  ;;  %v4567_v19 = vpack.c.bf16 %v842_v15, %v841_v14  ;;  %v843_v20 = vld [vmem:[#allocation8 + $0x30] sm:$0xff]  ;;  %v844_v21 = vld [vmem:[#allocation8 + $0x38] sm:$0xff]  ;;  %v4603_v22 = vpack.c.bf16 %v860_v18, %v859_v17  ;;  %v861_v23 = vld [vmem:[#allocation9 + $0x40] sm:$0xff]  ;;  %s6719_s14 = sld [smem:[#allocation50_spill]]  ;;  %s6720_s21 = sld [smem:[#allocation51_spill]] }
 0x19d   : > { %4562 = vmatpush3.bf16.msra.mxu0 %v4559_v8  ;;  %v862_v24 = vld [vmem:[#allocation9 + $0x48] sm:$0xff]  ;;  %v4571_v25 = vpack.c.bf16 %v844_v21, %v843_v20  ;;  %v845_v26 = vld [vmem:[#allocation8 + $0x40] sm:$0xff]  ;;  %v863_v29 = vld [vmem:[#allocation9 + $0x50] sm:$0xff]  ;;  %p6722_p8 = scmp.ne.s32.totalorder %s6692_s28, 0 }
 0x19e   : > { %4564 = vmatprep.subr.bf16.mxu0 %v4563_v13  ;;  %v846_v27 = vld [vmem:[#allocation8 + $0x48] sm:$0xff]  ;;  %v4607_v28 = vpack.c.bf16 %v862_v24, %v861_v23  ;;  %v864_v30 = vld [vmem:[#allocation9 + $0x58] sm:$0xff]  ;;  %v847_v32 = vld [vmem:[#allocation8 + $0x50] sm:$0xff] }
 0x19f   : > { %4598 = vmatpush3.bf16.msra.mxu1 %v4595_v7  ;;  %v4575_v31 = vpack.c.bf16 %v846_v27, %v845_v26  ;;  %v848_v33 = vld [vmem:[#allocation8 + $0x58] sm:$0xff]  ;;  %v4611_v34 = vpack.c.bf16 %v864_v30, %v863_v29  ;;  %v865_v35 = vld [vmem:[#allocation9 + $0x60] sm:$0xff]  ;;  %v866_v36 = vld [vmem:[#allocation9 + $0x68] sm:$0xff] }
 0x1a0   : > { %4600 = vmatprep.subr.bf16.mxu1 %v4599_v16  ;;  %v4579_v37 = vpack.c.bf16 %v848_v33, %v847_v32  ;;  %v849_v38 = vld [vmem:[#allocation8 + $0x60] sm:$0xff]  ;;  %v850_v39 = vld [vmem:[#allocation8 + $0x68] sm:$0xff]  ;;  %v4615_v40 = vpack.c.bf16 %v866_v36, %v865_v35  ;;  %v867_v41 = vld [vmem:[#allocation9 + $0x70] sm:$0xff] }
 0x1a1   : > { %4566 = vmatpush3.bf16.msra.mxu0 %v4563_v13  ;;  %v868_v42 = vld [vmem:[#allocation9 + $0x78] sm:$0xff]  ;;  %v4583_v43 = vpack.c.bf16 %v850_v39, %v849_v38  ;;  %v851_v44 = vld [vmem:[#allocation8 + $0x70] sm:$0xff]  ;;  %v869_v49 = vld [vmem:[#allocation11] sm:$0xff] }
 0x1a2   : > { %4568 = vmatprep.subr.bf16.mxu0 %v4567_v19  ;;  %v852_v45 = vld [vmem:[#allocation8 + $0x78] sm:$0xff]  ;;  %v4619_v46 = vpack.c.bf16 %v868_v42, %v867_v41  ;;  %v870_v50 = vld [vmem:[#allocation11 + $0x8] sm:$0xff]  ;;  %v871_v51 = vld [vmem:[#allocation11 + $0x10] sm:$0xff] }
 0x1a3   : > { %4602 = vmatpush3.bf16.msra.mxu1 %v4599_v16  ;;  %v4587_v47 = vpack.c.bf16 %v852_v45, %v851_v44  ;;  %v6291_v48 = vld [vmem:[%s722_s18 + $0x8] sm:$0xff]  ;;  %v4623_v52 = vpack.c.bf16 %v870_v50, %v869_v49  ;;  %v873_v55 = vld [vmem:[#allocation11 + $0x20] sm:$0xff]  ;;  %v875_v58 = vld [vmem:[#allocation11 + $0x30] sm:$0xff] }
 0x1a4   : > { %4604 = vmatprep.subr.bf16.mxu1 %v4603_v22  ;;  %v872_v53 = vld [vmem:[#allocation11 + $0x18] sm:$0xff]  ;;  %v874_v56 = vld [vmem:[#allocation11 + $0x28] sm:$0xff]  ;;  %vm6297_vm1 = vmpackc.low %vm1128_vm0, %vm1128_vm0 }
 0x1a5   : > { %4570 = vmatpush3.bf16.msra.mxu0 %v4567_v19  ;;  %v4627_v54 = vpack.c.bf16 %v872_v53, %v871_v51  ;;  %v4631_v57 = vpack.c.bf16 %v874_v56, %v873_v55  ;;  %v876_v59 = vld [vmem:[#allocation11 + $0x38] sm:$0xff]  ;;  %v877_v1 = vld [vmem:[#allocation11 + $0x40] sm:$0xff]  ;;  %v878_v2 = vld [vmem:[#allocation11 + $0x48] sm:$0xff] }
 0x1a6   : > { %4572 = vmatprep.subr.bf16.mxu0 %v4571_v25  ;;  %v4635_v61 = vpack.c.bf16 %v876_v59, %v875_v58  ;;  %v4639_v7 = vpack.c.bf16 %v878_v2, %v877_v1  ;;  %v879_v8 = vld [vmem:[#allocation11 + $0x50] sm:$0xff]  ;;  %v880_v9 = vld [vmem:[#allocation11 + $0x58] sm:$0xff]  ;;  %v881_v11 = vld [vmem:[#allocation11 + $0x60] sm:$0xff] }
 0x1a7   : > { %4606 = vmatpush3.bf16.msra.mxu1 %v4603_v22  ;;  %v4643_v10 = vpack.c.bf16 %v880_v9, %v879_v8  ;;  %v882_v12 = vld [vmem:[#allocation11 + $0x68] sm:$0xff]  ;;  %v883_v15 = vld [vmem:[#allocation11 + $0x70] sm:$0xff]  ;;  %v884_v16 = vld [vmem:[#allocation11 + $0x78] sm:$0xff] }
 0x1a8   : > { %4608 = vmatprep.subr.bf16.mxu1 %v4607_v28  ;;  %v4647_v14 = vpack.c.bf16 %v882_v12, %v881_v11  ;;  %v4651_v17 = vpack.c.bf16 %v884_v16, %v883_v15 }
 0x1a9   : > { %4574 = vmatpush3.bf16.msra.mxu0 %v4571_v25 }
 0x1aa   : > { %4576 = vmatprep.subr.bf16.mxu0 %v4575_v31 }
 0x1ab   : > { %4610 = vmatpush3.bf16.msra.mxu1 %v4607_v28 }
 0x1ac   : > { %4612 = vmatprep.subr.bf16.mxu1 %v4611_v34 }
 0x1ad   : > { %4578 = vmatpush3.bf16.msra.mxu0 %v4575_v31 }
 0x1ae   : > { %4580 = vmatprep.subr.bf16.mxu0 %v4579_v37 }
 0x1af   : > { %4614 = vmatpush3.bf16.msra.mxu1 %v4611_v34 }
 0x1b0   : > { %4616 = vmatprep.subr.bf16.mxu1 %v4615_v40 }
 0x1b1   : > { %4582 = vmatpush3.bf16.msra.mxu0 %v4579_v37 }
 0x1b2   : > { %4584 = vmatprep.subr.bf16.mxu0 %v4583_v43 }
 0x1b3   : > { %4618 = vmatpush3.bf16.msra.mxu1 %v4615_v40 }
 0x1b4   : > { %4620 = vmatprep.subr.bf16.mxu1 %v4619_v46 }
 0x1b5   : > { %4586 = vmatpush3.bf16.msra.mxu0 %v4583_v43 }
 0x1b6   : > { %4588 = vmatprep.subr.bf16.mxu0 %v4587_v47 }
 0x1b7   : > { %4622 = vmatpush3.bf16.msra.mxu1 %v4619_v46 }
 0x1b9   : > { %4590 = vmatpush3.bf16.msra.mxu0 %v4587_v47 }
 0x1ba   : > { %4235 = vmatmul.mubr.f32.vlgmr.msra.gmra.mrb[0].mxu1 %v6291_v48  ;;  %4624 = vmatprep.subr.bf16.mxu0 %v4623_v52 }
 0x1bc   : > { %4200 = vmatmul.mubr.f32.vlgmr.msra.gmra.mrb[0].mxu0 %v6291_v48 }
 0x1bd   : > { %4626 = vmatpush3.bf16.msra.mxu0 %v4623_v52 }
 0x1be   : > { %4628 = vmatprep.subr.bf16.mxu0 %v4627_v54 }
 0x1c1   : > { %4630 = vmatpush3.bf16.msra.mxu0 %v4627_v54 }
 0x1c2   : > { %4632 = vmatprep.subr.bf16.mxu0 %v4631_v57 }
 0x1c5   : > { %4634 = vmatpush3.bf16.msra.mxu0 %v4631_v57 }
 0x1c6   : > { %4636 = vmatprep.subr.bf16.mxu0 %v4635_v61 }
 0x1c9   : > { %4638 = vmatpush3.bf16.msra.mxu0 %v4635_v61 }
 0x1ca   : > { %4640 = vmatprep.subr.bf16.mxu0 %v4639_v7 }
 0x1cd   : > { %4642 = vmatpush3.bf16.msra.mxu0 %v4639_v7 }
 0x1ce   : > { %4644 = vmatprep.subr.bf16.mxu0 %v4643_v10 }
 0x1d1   : > { %4646 = vmatpush3.bf16.msra.mxu0 %v4643_v10 }
 0x1d2   : > { %4648 = vmatprep.subr.bf16.mxu0 %v4647_v14 }
 0x1d5   : > { %4650 = vmatpush3.bf16.msra.mxu0 %v4647_v14 }
 0x1d6   : > { %4652 = vmatprep.subr.bf16.mxu0 %v4651_v17 }
 0x1d9   : > { %4654 = vmatpush3.bf16.msra.mxu0 %v4651_v17 }
 0x1dc   : > { %4270 = vmatmul.mubr.f32.vlgmr.msra.gmra.mrb[2].mxu0 %v6291_v48 }
 0x28d   : > { %v4236_v60 = vpop.f32.mrb[0].mxu1 }
 0x28e   : > { %v1044_v62 = vpop.f32.mrb[1].mxu1 }
 0x28f   : > { %v4201_v0 = vpop.f32.mrb[0].mxu0  ;;  %v4655_v3 = vpack.c.bf16 %v4236_v60, %v1044_v62  ;;  %v6301_v5 = vpack.i.bf16 %v4236_v60, %v1044_v62 }
 0x290   : > { %v967_v4 = vpop.f32.mrb[1].mxu0  ;;  %v6313_v13 = vmul.f32 0.17677669, %v4201_v0 }
 0x291   : > { %v6303_v6 = vmul.f32 0.17677669, %v967_v4  ;;  %4657 = vmatprep.subr.msk.bf16.mxu1 %vm6297_vm1, %v4655_v3 }
 0x292   : > { %4660 = vmatpush3.bf16.xpose.msk.msra.mxu1 %vm6297_vm1, %v4655_v3 }
 0x293   : > { %1322 = vrot.lane.b32.xlu1 %v6303_v6, %s5739_s0  ;;  %4276 = vmatprep.mubr.msk.f32.mxu1 %vm1128_vm0, %v6303_v6 }
 0x299   : > { %4277 = vmatmul.mubr.msk.f32.vlgmr.msra.gmra.mrb[2].mxu1 %vm1128_vm0, %v6313_v13 }
 0x2af   : > { %v4271_v22 = vpop.f32.mrb[2].mxu0 }
 0x2b0   : > { %v1119_v23 = vpop.f32.mrb[3].mxu0 }
 0x2b1   : > { %v4661_v24 = vpack.c.bf16 %v4271_v22, %v1119_v23  ;;  %v6326_v39 = vpack.i.bf16 %v4271_v22, %v1119_v23 }
 0x2b3   : > { %4662 = vmatprep.subr.bf16.mxu1 %v4661_v24 }
 0x2b4   : > { %4664 = vmatpush3.bf16.msra.mxu1 %v4661_v24 }
 0x305   : > { %v1323_v40 = vpop.permute.xlu1 %1322 }
 0x36c   : > { %v4278_v18 = vpop.f32.mrb[2].mxu1 }
 0x36d   : > { %v1207_v19 = vpop.f32.mrb[3].mxu1  ;;  %v1220_v21 = vsel %vm1216_vm2, %v4278_v18, -inf }
 0x36e   : > { %v1217_v20 = vsel %vm1216_vm2, %v1207_v19, -inf }
 0x36f   : > { %1218 = vmax.xlane.f32.xlu0 %v1217_v20 }
 0x373   : > { %1221 = vmax.xlane.f32.xlu0 %v1220_v21 }
 0x389   : > { %5122 = vrot.lane.b32.xlu0 %v6301_v5, %s5739_s0 }
 0x3fc   : > { %v1219_v25 = vpop.xlane.xlu0 %1218 }
 0x3fd   : > { %v1223_v26 = vsub.f32 %v1207_v19, %v1219_v25 }
 0x3ff   : > { %v1225_v29 = vmul.f32 1.442695, %v1223_v26 }
 0x400   : > { %v1222_v27 = vpop.xlane.xlu0 %1221 }
 0x401   : > { %v1224_v28 = vsub.f32 %v4278_v18, %v1222_v27 }
 0x403   : > { %v1227_v30 = vmul.f32 1.442695, %v1224_v28 }
 0x404   : > { %v5123_v31 = vpop.permute.xlu0 %5122 }
 0x405   : > { %5211 = vpow2.f32 %v1227_v30  ;;  %v5125_v32 = vunpack.i.h.bf16 %v5123_v31  ;;  %v5124_v33 = vunpack.i.l.bf16 %v5123_v31 }
 0x406   : > { %5213 = vpow2.f32 %v1225_v29 }
 0x407   : > { %v4665_v34 = vpack.c.bf16 %v5125_v32, %v5124_v33 }
 0x409   : > { %4667 = vmatprep.subr.msk.bf16.mxu1 %vm6297_vm1, %v4665_v34 }
 0x40f   : > { %v5212_v35 = vpop.eup %5211 }
 0x410   : > { %v1232_v36 = vsel %vm1216_vm2, %v5212_v35, 0.0  ;;  %v5214_v37 = vpop.eup %5213 }
 0x411   : > { %1233 = vadd.xlane.f32.xlu1 %v1232_v36  ;;  %v1229_v38 = vsel %vm1216_vm2, %v5214_v37, 0.0 }
 0x415   : > { %1230 = vadd.xlane.f32.xlu1 %v1229_v38 }
 0x426   : > { %1324 = vrot.lane.b32.xlu1 %v6313_v13, %s5739_s0 }
 0x49e   : > { %v1234_v41 = vpop.xlane.xlu1 %1233 }
 0x49f   : > { %5215 = vrcp.f32 %v1234_v41 }
 0x4a2   : > { %v1231_v42 = vpop.xlane.xlu1 %1230 }
 0x4a3   : > { %5217 = vrcp.f32 %v1231_v42 }
 0x4a6   : > { %v1325_v47 = vpop.permute.xlu1 %1324 }
 0x4a9   : > { %v5216_v43 = vpop.eup %5215 }
 0x4aa   : > { %v1238_v46 = vmul.f32 %v5216_v43, %v5212_v35 }
 0x4ad   : > { %v5218_v44 = vpop.eup %5217 }
 0x4ae   : > { %v1237_v45 = vmul.f32 %v5218_v44, %v5214_v37 }
 0x4b0   : > { %4283 = vmatprep.mubr.msk.f32.mxu1 %vm1216_vm2, %v1237_v45 }
 0x4b1   : > { %4284 = vmatmul.mubr.msk.f32.vlgmr.msra.gmra.mrb[4].mxu1 %vm1216_vm2, %v1238_v46 }
 0x4b2   : > { %4670 = vmatpush3.bf16.xpose.msk.msra.mxu1 %vm6297_vm1, %v4665_v34  ;;  %4290 = vmatprep.mubr.msk.f32.mxu1 %vm1128_vm0, %v1323_v40 }
 0x4b9   : > { %4291 = vmatmul.mubr.msk.f32.vlgmr.msra.gmra.mrb[6].mxu1 %vm1128_vm0, %v1325_v47 }
 0x584   : > { %v4285_v49 = vpop.f32.mrb[4].mxu1 }
 0x585   : > { %1321 = vst.msk [vmem:[#allocation2 + $0x8] sm:$0xff] %vm1128_vm0, %v4285_v49  ;;  %v1311_v50 = vpop.f32.mrb[5].mxu1 }
 0x586   : > { %1320 = vst.msk [vmem:[#allocation2] sm:$0xff] %vm1128_vm0, %v1311_v50 }
 0x58c   : > { %v4292_v51 = vpop.f32.mrb[6].mxu1 }
 0x58d   : > { %v1404_v52 = vpop.f32.mrb[7].mxu1  ;;  %v1416_v53 = vsel %vm1216_vm2, %v4292_v51, -inf }
 0x58e   : > { %1417 = vmax.xlane.f32.xlu0 %v1416_v53  ;;  %v1413_v54 = vsel %vm1216_vm2, %v1404_v52, -inf }
 0x58f   : > { %1414 = vmax.xlane.f32.xlu1 %v1413_v54 }
 0x5a0   : > { %5127 = vrot.lane.b32.xlu1 %v6326_v39, %s5739_s0 }
 0x5a4   : > { %5137 = vrot.lane.b32.xlu1 %v6301_v5, %s5740_s7 }
 0x5a8   : > { %1526 = vrot.lane.b32.xlu1 %v6303_v6, %s5741_s4 }
 0x5ac   : > { %1528 = vrot.lane.b32.xlu1 %v6313_v13, %s5741_s4 }
 0x5b0   : > { %1730 = vrot.lane.b32.xlu1 %v6313_v13, %s5740_s7 }
 0x61b   : > { %v1418_v55 = vpop.xlane.xlu0 %1417 }
 0x61c   : > { %v1420_v56 = vsub.f32 %v4292_v51, %v1418_v55  ;;  %v1415_v57 = vpop.xlane.xlu1 %1414 }
 0x61d   : > { %v1419_v58 = vsub.f32 %v1404_v52, %v1415_v57 }
 0x61e   : > { %v1423_v59 = vmul.f32 1.442695, %v1420_v56 }
 0x61f   : > { %v1421_v60 = vmul.f32 1.442695, %v1419_v58 }
 0x620   : > { %5219 = vpow2.f32 %v1423_v59  ;;  %v5128_v61 = vpop.permute.xlu1 %5127 }
 0x621   : > { %v5130_v62 = vunpack.i.h.bf16 %v5128_v61  ;;  %v5129_v0 = vunpack.i.l.bf16 %v5128_v61  ;;  %5221 = vpow2.f32 %v1421_v60 }
 0x623   : > { %v4671_v1 = vpack.c.bf16 %v5130_v62, %v5129_v0 }
 0x624   : > { %v5138_v14 = vpop.permute.xlu1 %5137 }
 0x625   : > { %4672 = vmatprep.subr.bf16.mxu1 %v4671_v1  ;;  %v5140_v17 = vunpack.i.h.bf16 %v5138_v14  ;;  %v5139_v18 = vunpack.i.l.bf16 %v5138_v14  ;;  %v885_v14 = vld [vmem:[#allocation12] sm:$0xff] }
 0x626   : > { %4674 = vmatpush3.bf16.msra.mxu1 %v4671_v1 }
 0x628   : > { %v1527_v20 = vpop.permute.xlu1 %1526 }
 0x62a   : > { %v5220_v2 = vpop.eup %5219 }
 0x62b   : > { %v1428_v3 = vsel %vm1216_vm2, %v5220_v2, 0.0  ;;  %v5222_v4 = vpop.eup %5221 }
 0x62c   : > { %1429 = vadd.xlane.f32.xlu0 %v1428_v3  ;;  %v1425_v7 = vsel %vm1216_vm2, %v5222_v4, 0.0  ;;  %v1529_v21 = vpop.permute.xlu1 %1528 }
 0x630   : > { %1426 = vadd.xlane.f32.xlu0 %v1425_v7  ;;  %v1731_v23 = vpop.permute.xlu1 %1730 }
 0x646   : > { %5132 = vrot.lane.b32.xlu0 %v6301_v5, %s5741_s4 }
 0x64a   : > { %1728 = vrot.lane.b32.xlu0 %v6303_v6, %s5740_s7  ;;  %v4685_v6 = vpack.c.bf16 %v5140_v17, %v5139_v18  ;;  %v888_v18 = vld [vmem:[#allocation12 + $0x18] sm:$0xff] }
 0x6b9   : > { %v1430_v8 = vpop.xlane.xlu0 %1429 }
 0x6ba   : > { %5223 = vrcp.f32 %v1430_v8 }
 0x6bd   : > { %v1427_v9 = vpop.xlane.xlu0 %1426 }
 0x6be   : > { %5225 = vrcp.f32 %v1427_v9 }
 0x6c1   : > { %v5133_v10 = vpop.permute.xlu0 %5132 }
 0x6c2   : > { %v5135_v11 = vunpack.i.h.bf16 %v5133_v10  ;;  %v5134_v12 = vunpack.i.l.bf16 %v5133_v10 }
 0x6c4   : > { %v4675_v13 = vpack.c.bf16 %v5135_v11, %v5134_v12  ;;  %v5224_v15 = vpop.eup %5223 }
 0x6c5   : > { %v1434_v19 = vmul.f32 %v5224_v15, %v5220_v2  ;;  %v1729_v22 = vpop.permute.xlu0 %1728  ;;  %v886_v15 = vld [vmem:[#allocation12 + $0x8] sm:$0xff] }
 0x6c6   : > { %4677 = vmatprep.subr.msk.bf16.mxu1 %vm6297_vm1, %v4675_v13  ;;  %v4695_v17 = vpack.c.bf16 %v886_v15, %v885_v14  ;;  %v2112_v15 = vld [vmem:[#allocation15 + $0x18] sm:$0xff] }
 0x6c8   : > { %v5226_v16 = vpop.eup %5225 }
 0x6c9   : > { %v1433_v5 = vmul.f32 %v5226_v16, %v5222_v4  ;;  %v887_v16 = vld [vmem:[#allocation12 + $0x10] sm:$0xff] }
 0x6cb   : > { %4297 = vmatprep.mubr.msk.f32.mxu1 %vm1216_vm2, %v1433_v5  ;;  %v4699_v5 = vpack.c.bf16 %v888_v18, %v887_v16  ;;  %v2113_v16 = vld [vmem:[#allocation15 + $0x20] sm:$0xff]  ;;  %v2114_v18 = vld [vmem:[#allocation15 + $0x28] sm:$0xff] }
 0x6cc   : > { %4298 = vmatmul.mubr.msk.f32.vlgmr.msra.gmra.mrb[8].mxu1 %vm1216_vm2, %v1434_v19  ;;  %v889_v19 = vld [vmem:[#allocation12 + $0x20] sm:$0xff] }
 0x6cd   : > { %4680 = vmatpush3.bf16.xpose.msk.msra.mxu1 %vm6297_vm1, %v4675_v13  ;;  %4304 = vmatprep.mubr.msk.f32.mxu1 %vm1128_vm0, %v1527_v20 }
 0x6ce   : > { %4687 = vmatprep.subr.msk.bf16.mxu1 %vm6297_vm1, %v4685_v6 }
 0x6d4   : > { %4305 = vmatmul.mubr.msk.f32.vlgmr.msra.gmra.mrb[10].mxu1 %vm1128_vm0, %v1529_v21  ;;  %v891_v21 = vld [vmem:[#allocation12 + $0x30] sm:$0xff] }
 0x6d5   : > { %4690 = vmatpush3.bf16.xpose.msk.msra.mxu1 %vm6297_vm1, %v4685_v6  ;;  %4318 = vmatprep.mubr.msk.f32.mxu1 %vm1128_vm0, %v1729_v22  ;;  %v890_v6 = vld [vmem:[#allocation12 + $0x28] sm:$0xff]  ;;  %v892_v22 = vld [vmem:[#allocation12 + $0x38] sm:$0xff] }
 0x6d6   : > { %v4703_v20 = vpack.c.bf16 %v890_v6, %v889_v19  ;;  %v2094_v19 = vld [vmem:[#allocation14 + $0x8] sm:$0xff] }
 0x6dc   : > { %4319 = vmatmul.mubr.msk.f32.vlgmr.msra.gmra.mrb[12].mxu1 %vm1128_vm0, %v1731_v23  ;;  %v4707_v23 = vpack.c.bf16 %v892_v22, %v891_v21  ;;  %v2096_v21 = vld [vmem:[#allocation14 + $0x18] sm:$0xff]  ;;  %v4767_v22 = vpack.c.bf16 %v2114_v18, %v2113_v16  ;;  %v3882_v16 = vld [vmem:[%s6713_s12] ss:$0 sm:$0xff] }
 0x6dd   : > { %v3883_v18 = vld [vmem:[%s6714_s20] ss:$0 sm:$0xff] }
 0x79f   : > { %v4299_v24 = vpop.f32.mrb[8].mxu1 }
 0x7a0   : > { %1525 = vst.msk [vmem:[#allocation2 + $0x18] sm:$0xff] %vm1128_vm0, %v4299_v24  ;;  %v1515_v25 = vpop.f32.mrb[9].mxu1  ;;  %v893_v24 = vld [vmem:[#allocation12 + $0x40] sm:$0xff] }
 0x7a1   : > { %1524 = vst.msk [vmem:[#allocation2 + $0x10] sm:$0xff] %vm1128_vm0, %v1515_v25  ;;  %v894_v25 = vld [vmem:[#allocation12 + $0x48] sm:$0xff] }
 0x7a7   : > { %v4306_v26 = vpop.f32.mrb[10].mxu1 }
 0x7a8   : > { %v1608_v27 = vpop.f32.mrb[11].mxu1  ;;  %v1620_v28 = vsel %vm1216_vm2, %v4306_v26, -inf }
 0x7a9   : > { %1621 = vmax.xlane.f32.xlu1 %v1620_v28  ;;  %v1617_v29 = vsel %vm1216_vm2, %v1608_v27, -inf  ;;  %v896_v28 = vld [vmem:[#allocation12 + $0x58] sm:$0xff] }
 0x7aa   : > { %1618 = vmax.xlane.f32.xlu0 %v1617_v29 }
 0x7af   : > { %v4320_v30 = vpop.f32.mrb[12].mxu1 }
 0x7b0   : > { %v1810_v31 = vpop.f32.mrb[13].mxu1  ;;  %v1822_v33 = vsel %vm1216_vm2, %v4320_v30, -inf }
 0x7b1   : > { %v1819_v32 = vsel %vm1216_vm2, %v1810_v31, -inf }
 0x7b2   : > { %1820 = vmax.xlane.f32.xlu0 %v1819_v32  ;;  %v897_v32 = vld [vmem:[#allocation12 + $0x60] sm:$0xff] }
 0x7b6   : > { %1823 = vmax.xlane.f32.xlu0 %v1822_v33  ;;  %v898_v33 = vld [vmem:[#allocation12 + $0x68] sm:$0xff] }
 0x836   : > { %v1622_v34 = vpop.xlane.xlu1 %1621 }
 0x837   : > { %v1624_v35 = vsub.f32 %v4306_v26, %v1622_v34  ;;  %v1619_v36 = vpop.xlane.xlu0 %1618  ;;  %v4711_v26 = vpack.c.bf16 %v894_v25, %v893_v24  ;;  %v4719_v34 = vpack.c.bf16 %v898_v33, %v897_v32  ;;  %v2116_v24 = vld [vmem:[#allocation15 + $0x38] sm:$0xff] }
 0x838   : > { %v1623_v37 = vsub.f32 %v1608_v27, %v1619_v36  ;;  %v895_v27 = vld [vmem:[#allocation12 + $0x50] sm:$0xff] }
 0x839   : > { %v1627_v38 = vmul.f32 1.442695, %v1624_v35  ;;  %v4715_v29 = vpack.c.bf16 %v896_v28, %v895_v27 }
 0x83a   : > { %v1625_v40 = vmul.f32 1.442695, %v1623_v37  ;;  %v899_v37 = vld [vmem:[#allocation12 + $0x70] sm:$0xff] }
 0x83b   : > { %5227 = vpow2.f32 %v1627_v38  ;;  %v900_v38 = vld [vmem:[#allocation12 + $0x78] sm:$0xff] }
 0x83c   : > { %5229 = vpow2.f32 %v1625_v40  ;;  %v4723_v40 = vpack.c.bf16 %v900_v38, %v899_v37  ;;  %v2097_v37 = vld [vmem:[#allocation14 + $0x20] sm:$0xff]  ;;  %v2098_v38 = vld [vmem:[#allocation14 + $0x28] sm:$0xff] }
 0x83f   : > { %v1821_v41 = vpop.xlane.xlu0 %1820 }
 0x840   : > { %v1825_v42 = vsub.f32 %v1810_v31, %v1821_v41  ;;  %v1942_v41 = vld [vmem:[#allocation2 + $0x3] ss:$4 sm:$0xff] }
 0x842   : > { %v1827_v43 = vmul.f32 1.442695, %v1825_v42 }
 0x843   : > { %v1824_v44 = vpop.xlane.xlu0 %1823 }
 0x844   : > { %5231 = vpow2.f32 %v1827_v43  ;;  %v1826_v45 = vsub.f32 %v4320_v30, %v1824_v44  ;;  %v1934_v43 = vld [vmem:[#allocation2 + $0x1] ss:$4 sm:$0xff] }
 0x845   : > { %v5228_v46 = vpop.eup %5227 }
 0x846   : > { %v5230_v47 = vpop.eup %5229  ;;  %v1829_v49 = vmul.f32 1.442695, %v1826_v45  ;;  %v1632_v50 = vsel %vm1216_vm2, %v5228_v46, 0.0 }
 0x847   : > { %1633 = vadd.xlane.f32.xlu1 %v1632_v50  ;;  %v1629_v51 = vsel %vm1216_vm2, %v5230_v47, 0.0 }
 0x848   : > { %5233 = vpow2.f32 %v1829_v49  ;;  %1630 = vadd.xlane.f32.xlu0 %v1629_v51  ;;  %v1938_v49 = vld [vmem:[#allocation2 + $0x2] ss:$4 sm:$0xff] }
 0x84e   : > { %v5232_v52 = vpop.eup %5231 }
 0x84f   : > { %v1831_v53 = vsel %vm1216_vm2, %v5232_v52, 0.0 }
 0x850   : > { %1832 = vadd.xlane.f32.xlu0 %v1831_v53 }
 0x852   : > { %v5234_v54 = vpop.eup %5233 }
 0x853   : > { %v1834_v55 = vsel %vm1216_vm2, %v5234_v54, 0.0 }
 0x854   : > { %1835 = vadd.xlane.f32.xlu1 %v1834_v55 }
 0x865   : > { %5147 = vrot.lane.b32.xlu1 %v6326_v39, %s5740_s7 }
 0x866   : > { %5142 = vrot.lane.b32.xlu0 %v6326_v39, %s5741_s4 }
 0x8d4   : > { %v1634_v57 = vpop.xlane.xlu1 %1633 }
 0x8d5   : > { %v1631_v56 = vpop.xlane.xlu0 %1630 }
 0x8d6   : > { %5235 = vrcp.f32 %v1631_v56 }
 0x8d7   : > { %5237 = vrcp.f32 %v1634_v57 }
 0x8dd   : > { %v1833_v58 = vpop.xlane.xlu0 %1832 }
 0x8de   : > { %5239 = vrcp.f32 %v1833_v58 }
 0x8e0   : > { %v5236_v59 = vpop.eup %5235 }
 0x8e1   : > { %v1836_v60 = vpop.xlane.xlu1 %1835  ;;  %v5143_v61 = vpop.permute.xlu0 %5142  ;;  %v1637_v62 = vmul.f32 %v5236_v59, %v5230_v47  ;;  %v1930_v59 = vld [vmem:[#allocation2] ss:$4 sm:$0xff] }
 0x8e2   : > { %5241 = vrcp.f32 %v1836_v60  ;;  %v5145_v0 = vunpack.i.h.bf16 %v5143_v61  ;;  %v5144_v1 = vunpack.i.l.bf16 %v5143_v61  ;;  %v5238_v3 = vpop.eup %5237 }
 0x8e3   : > { %4311 = vmatprep.mubr.msk.f32.mxu0 %vm1216_vm2, %v1637_v62  ;;  %v1638_v9 = vmul.f32 %v5238_v3, %v5228_v46 }
 0x8e4   : > { %v4681_v2 = vpack.c.bf16 %v5145_v0, %v5144_v1 }
 0x8e5   : > { %v5148_v4 = vpop.permute.xlu1 %5147 }
 0x8e6   : > { %v5150_v7 = vunpack.i.h.bf16 %v5148_v4  ;;  %v5149_v39 = vunpack.i.l.bf16 %v5148_v4  ;;  %4682 = vmatprep.subr.bf16.mxu0 %v4681_v2 }
 0x8e7   : > { %4684 = vmatpush3.bf16.msra.mxu0 %v4681_v2 }
 0x8e8   : > { %v5240_v8 = vpop.eup %5239  ;;  %v4691_v10 = vpack.c.bf16 %v5150_v7, %v5149_v39  ;;  %v833_v7 = vld [vmem:[%s722_s18] sm:$0xff]  ;;  %s832_s18 = scalar_lea.vmem [#allocation23], %s6251_s6 }
 0x8e9   : > { %v1839_v11 = vmul.f32 %v5240_v8, %v5232_v52  ;;  %s3634_s11 = sshll.u32 %s832_s18, 4  ;;  %s6576_s11 = int_to_ptr.vmem [resolvable:$true] %s3634_s11 }
 0x8ea   : > { %4312 = vmatmul.mubr.msk.f32.vlgmr.msra.gmra.mrb[4].mxu0 %vm1216_vm2, %v1638_v9  ;;  %4692 = vmatprep.subr.bf16.mxu0 %v4691_v10  ;;  %s5627_s8 = scalar_lea.vmem %s6576_s11, 256 }
 0x8eb   : > { %4694 = vmatpush3.bf16.msra.mxu0 %v4691_v10  ;;  %4325 = vmatprep.mubr.msk.f32.mxu0 %vm1216_vm2, %v1839_v11  ;;  %v2109_v11 = vld [vmem:[#allocation15] sm:$0xff]  ;;  %p5628_p9 = scmp.ne.s32.totalorder %s6576_s11, %s5627_s8 }
 0x8ec   : > { %v5242_v12 = vpop.eup %5241  ;;  %4696 = vmatprep.subr.bf16.mxu0 %v4695_v17 }
 0x8ed   : > { %v1840_v13 = vmul.f32 %v5242_v12, %v5234_v54  ;;  %v2110_v12 = vld [vmem:[#allocation15 + $0x8] sm:$0xff]  ;;  %p5629_p11 = pnand %p5628_p9, %p6722_p8 }
 0x8ee   : > { %v4759_v14 = vpack.c.bf16 %v2110_v12, %v2109_v11 }
 0x8ef   : > { %4326 = vmatmul.mubr.msk.f32.vlgmr.msra.gmra.mrb[6].mxu0 %vm1216_vm2, %v1840_v13  ;;  %v2111_v13 = vld [vmem:[#allocation15 + $0x10] sm:$0xff]  ;;  %p5630_p3 = pneg %p5629_p11 }
 0x8f0   : > { %4698 = vmatpush3.bf16.msra.mxu0 %v4695_v17  ;;  %v4763_v17 = vpack.c.bf16 %v2112_v15, %v2111_v13 }
 0x8f1   : > { %4700 = vmatprep.subr.bf16.mxu0 %v4699_v5 }
 0x8f4   : > { %4702 = vmatpush3.bf16.msra.mxu0 %v4699_v5  ;;  %v2093_v5 = vld [vmem:[#allocation14] sm:$0xff] }
 0x8f5   : > { %4704 = vmatprep.subr.bf16.mxu0 %v4703_v20  ;;  %v4727_v6 = vpack.c.bf16 %v2094_v19, %v2093_v5 }
 0x8f7   : > { %4728 = vmatprep.subr.bf16.mxu1 %v4727_v6 }
 0x8f8   : > { %4706 = vmatpush3.bf16.msra.mxu0 %v4703_v20  ;;  %v2095_v20 = vld [vmem:[#allocation14 + $0x10] sm:$0xff]  ;;  %4730 = vmatpush3.bf16.msra.mxu1 %v4727_v6 }
 0x8f9   : > { %4708 = vmatprep.subr.bf16.mxu0 %v4707_v23 }
 0x8fc   : > { %4710 = vmatpush3.bf16.msra.mxu0 %v4707_v23  ;;  %v2115_v23 = vld [vmem:[#allocation15 + $0x30] sm:$0xff] }
 0x8fd   : > { %4712 = vmatprep.subr.bf16.mxu0 %v4711_v26  ;;  %v4771_v25 = vpack.c.bf16 %v2116_v24, %v2115_v23 }
 0x900   : > { %4714 = vmatpush3.bf16.msra.mxu0 %v4711_v26 }
 0x901   : > { %4716 = vmatprep.subr.bf16.mxu0 %v4715_v29 }
 0x904   : > { %4718 = vmatpush3.bf16.msra.mxu0 %v4715_v29 }
 0x905   : > { %4720 = vmatprep.subr.bf16.mxu0 %v4719_v34 }
 0x908   : > { %4722 = vmatpush3.bf16.msra.mxu0 %v4719_v34  ;;  %v2117_v34 = vld [vmem:[#allocation15 + $0x40] sm:$0xff] }
 0x909   : > { %4724 = vmatprep.subr.bf16.mxu0 %v4723_v40 }
 0x90c   : > { %4726 = vmatpush3.bf16.msra.mxu0 %v4723_v40  ;;  %v4735_v40 = vpack.c.bf16 %v2098_v38, %v2097_v37  ;;  %v2137_v37 = vld [vmem:[#allocation17 + $0x60] sm:$0xff]  ;;  %v2138_v38 = vld [vmem:[#allocation17 + $0x68] sm:$0xff] }
 0x90d   : > { %4760 = vmatprep.subr.bf16.mxu0 %v4759_v14 }
 0x9bd   : > { %v4313_v30 = vpop.f32.mrb[4].mxu0 }
 0x9be   : > { %1727 = vst.msk [vmem:[#allocation2 + $0x28] sm:$0xff] %vm1128_vm0, %v4313_v30  ;;  %v1717_v31 = vpop.f32.mrb[5].mxu0 }
 0x9bf   : > { %1726 = vst.msk [vmem:[#allocation2 + $0x20] sm:$0xff] %vm1128_vm0, %v1717_v31 }
 0x9c2   : > { %v4327_v35 = vpop.f32.mrb[6].mxu0 }
 0x9c3   : > { %1929 = vst.msk [vmem:[#allocation2 + $0x38] sm:$0xff] %vm1128_vm0, %v4327_v35  ;;  %v1919_v36 = vpop.f32.mrb[7].mxu0  ;;  %v2118_v35 = vld [vmem:[#allocation15 + $0x48] sm:$0xff] }
 0x9c4   : > { %1928 = vst.msk [vmem:[#allocation2 + $0x30] sm:$0xff] %vm1128_vm0, %v1919_v36  ;;  %v4775_v36 = vpack.c.bf16 %v2118_v35, %v2117_v34  ;;  %v2135_v34 = vld [vmem:[#allocation17 + $0x50] sm:$0xff]  ;;  %v2136_v35 = vld [vmem:[#allocation17 + $0x58] sm:$0xff] }
 0x9cb   : > { %v1944_v42 = vld [vmem:[#allocation2 + $0x23] ss:$4 sm:$0xff]  ;;  %v1936_v44 = vld [vmem:[#allocation2 + $0x21] ss:$4 sm:$0xff]  ;;  %v1940_v47 = vld [vmem:[#allocation2 + $0x22] ss:$4 sm:$0xff] }
 0x9cc   : > { %v5161_v45 = vpack.i.bf16 %v1944_v42, %v1942_v41  ;;  %v5151_v46 = vpack.i.bf16 %v1936_v44, %v1934_v43  ;;  %v5156_v50 = vpack.i.bf16 %v1940_v47, %v1938_v49  ;;  %v1932_v56 = vld [vmem:[#allocation2 + $0x20] ss:$4 sm:$0xff] }
 0x9cd   : > { %v2119_v41 = vld [vmem:[#allocation15 + $0x50] sm:$0xff]  ;;  %v2120_v42 = vld [vmem:[#allocation15 + $0x58] sm:$0xff]  ;;  %v2121_v47 = vld [vmem:[#allocation15 + $0x60] sm:$0xff] }
 0x9ce   : > { %5162 = vrot.lane.b32.xlu0 %v5161_v45, %s5739_s0  ;;  %5152 = vrot.lane.b32.xlu1 %v5151_v46, %s5740_s7  ;;  %v4779_v43 = vpack.c.bf16 %v2120_v42, %v2119_v41  ;;  %v2099_v44 = vld [vmem:[#allocation14 + $0x30] sm:$0xff]  ;;  %v2100_v45 = vld [vmem:[#allocation14 + $0x38] sm:$0xff]  ;;  %v2122_v49 = vld [vmem:[#allocation15 + $0x68] sm:$0xff] }
 0x9cf   : > { %v4739_v46 = vpack.c.bf16 %v2100_v45, %v2099_v44  ;;  %v2139_v41 = vld [vmem:[#allocation17 + $0x70] sm:$0xff]  ;;  %v2140_v42 = vld [vmem:[#allocation17 + $0x78] sm:$0xff] }
 0x9d2   : > { %5157 = vrot.lane.b32.xlu1 %v5156_v50, %s5741_s4  ;;  %v4783_v50 = vpack.c.bf16 %v2122_v49, %v2121_v47 }
 0xa40   : > { %v5153_v51 = vpop.permute.xlu1 %5152  ;;  %v5163_v54 = vpop.permute.xlu0 %5162 }
 0xa41   : > { %v5155_v52 = vunpack.i.h.bf16 %v5153_v51  ;;  %v5154_v53 = vunpack.i.l.bf16 %v5153_v51  ;;  %v5165_v60 = vunpack.i.h.bf16 %v5163_v54  ;;  %v5164_v61 = vunpack.i.l.bf16 %v5163_v54  ;;  %v2101_v51 = vld [vmem:[#allocation14 + $0x40] sm:$0xff]  ;;  %v2123_v54 = vld [vmem:[#allocation15 + $0x70] sm:$0xff] }
 0xa43   : > { %v1970_v62 = vsel %vm1128_vm0, %v1932_v56, %v5155_v52  ;;  %v1969_v0 = vsel %vm1128_vm0, %v1930_v59, %v5154_v53  ;;  %v2102_v52 = vld [vmem:[#allocation14 + $0x48] sm:$0xff]  ;;  %v2103_v56 = vld [vmem:[#allocation14 + $0x50] sm:$0xff] }
 0xa44   : > { %v5158_v55 = vpop.permute.xlu1 %5157  ;;  %v4743_v53 = vpack.c.bf16 %v2102_v52, %v2101_v51  ;;  %v835_v59 = vld [vmem:[%s731_s30] sm:$0xff] }
 0xa45   : > { %v5160_v57 = vunpack.i.h.bf16 %v5158_v55  ;;  %v5159_v58 = vunpack.i.l.bf16 %v5158_v55  ;;  %v2124_v55 = vld [vmem:[#allocation15 + $0x78] sm:$0xff] }
 0xa47   : > { %v1972_v1 = vsel %vm1971_vm3, %v1969_v0, %v5159_v58  ;;  %v1973_v2 = vsel %vm1971_vm3, %v1970_v62, %v5160_v57  ;;  %v4787_v57 = vpack.c.bf16 %v2124_v55, %v2123_v54  ;;  %v2104_v58 = vld [vmem:[#allocation14 + $0x58] sm:$0xff]  ;;  %v2106_v62 = vld [vmem:[#allocation14 + $0x68] sm:$0xff] }
 0xa48   : > { %v1975_v3 = vsel %vm1974_vm4, %v1972_v1, %v5164_v61  ;;  %v1976_v4 = vsel %vm1974_vm4, %v1973_v2, %v5165_v60  ;;  %v4747_v60 = vpack.c.bf16 %v2104_v58, %v2103_v56  ;;  %v2105_v61 = vld [vmem:[#allocation14 + $0x60] sm:$0xff]  ;;  %v2107_v1 = vld [vmem:[#allocation14 + $0x70] sm:$0xff]  ;;  %v2108_v2 = vld [vmem:[#allocation14 + $0x78] sm:$0xff] }
 0xa49   : > { %4360 = vmatprep.mubr.f32.mxu0 %v1975_v3  ;;  %v4751_v0 = vpack.c.bf16 %v2106_v62, %v2105_v61  ;;  %v6416_v3 = vld [vmem:[%s731_s30 + $0x8] sm:$0xff] }
 0xa4a   : > { %4361 = vmatmul.mubr.f32.vlgmr.msra.gmra.mrb[8].mxu0 %v1976_v4  ;;  %v4755_v4 = vpack.c.bf16 %v2108_v2, %v2107_v1 }
 0xa4b   : > { %4199 = vmatprep.mubr.f32.mxu0 %v833_v7  ;;  %4762 = vmatpush3.bf16.msra.mxu0 %v4759_v14 }
 0xa4c   : > { %4234 = vmatprep.mubr.f32.mxu0 %v833_v7  ;;  %4764 = vmatprep.subr.bf16.mxu0 %v4763_v17 }
 0xa4d   : > { %4269 = vmatprep.mubr.f32.mxu0 %v833_v7 }
 0xa4e   : > { %4430 = vmatprep.mubr.f32.mxu0 %v835_v59 }
 0xa4f   : > { %4766 = vmatpush3.bf16.msra.mxu0 %v4763_v17 }
 0xa50   : > { %4768 = vmatprep.subr.bf16.mxu0 %v4767_v22 }
 0xa53   : > { %4770 = vmatpush3.bf16.msra.mxu0 %v4767_v22 }
 0xa54   : > { %4772 = vmatprep.subr.bf16.mxu0 %v4771_v25 }
 0xa57   : > { %4774 = vmatpush3.bf16.msra.mxu0 %v4771_v25  ;;  %v2129_v25 = vld [vmem:[#allocation17 + $0x20] sm:$0xff] }
 0xa58   : > { %4776 = vmatprep.subr.bf16.mxu0 %v4775_v36 }
 0xa5b   : > { %4778 = vmatpush3.bf16.msra.mxu0 %v4775_v36  ;;  %v4811_v36 = vpack.c.bf16 %v2136_v35, %v2135_v34 }
 0xa5c   : > { %4780 = vmatprep.subr.bf16.mxu0 %v4779_v43 }
 0xa5f   : > { %4782 = vmatpush3.bf16.msra.mxu0 %v4779_v43  ;;  %v4819_v43 = vpack.c.bf16 %v2140_v42, %v2139_v41 }
 0xa60   : > { %4784 = vmatprep.subr.bf16.mxu0 %v4783_v50 }
 0xa63   : > { %4786 = vmatpush3.bf16.msra.mxu0 %v4783_v50 }
 0xa64   : > { %4788 = vmatprep.subr.bf16.mxu0 %v4787_v57 }
 0xa67   : > { %4790 = vmatpush3.bf16.msra.mxu0 %v4787_v57 }
 0xa6a   : > { %4431 = vmatmul.mubr.f32.vlgmr.msra.gmra.mrb[10].mxu0 %v6416_v3 }
 0xb1d   : > { %v4362_v39 = vpop.f32.mrb[8].mxu0 }
 0xb1e   : > { %v2049_v8 = vadd.f32 %v4362_v39, %v6291_v48  ;;  %v2043_v9 = vpop.f32.mrb[9].mxu0  ;;  %v4731_v48 = vpack.c.bf16 %v2096_v21, %v2095_v20  ;;  %v2126_v39 = vld [vmem:[#allocation17 + $0x8] sm:$0xff]  ;;  %v2127_v21 = vld [vmem:[#allocation17 + $0x10] sm:$0xff] }
 0xb1f   : > { %v2044_v10 = vadd.f32 %v2043_v9, %v833_v7  ;;  %v2125_v7 = vld [vmem:[#allocation17] sm:$0xff] }
 0xb20   : > { %2056 = vadd.xlane.f32.xlu0 %v2049_v8  ;;  %4732 = vmatprep.subr.bf16.mxu1 %v4731_v48 }
 0xb21   : > { %2054 = vadd.xlane.f32.xlu1 %v2044_v10  ;;  %4734 = vmatpush3.bf16.msra.mxu1 %v4731_v48  ;;  %v2128_v48 = vld [vmem:[#allocation17 + $0x18] sm:$0xff] }
 0xb22   : > { %4736 = vmatprep.subr.bf16.mxu1 %v4735_v40  ;;  %v4795_v24 = vpack.c.bf16 %v2128_v48, %v2127_v21 }
 0xb25   : > { %4738 = vmatpush3.bf16.msra.mxu1 %v4735_v40  ;;  %v4815_v40 = vpack.c.bf16 %v2138_v38, %v2137_v37 }
 0xb26   : > { %4740 = vmatprep.subr.bf16.mxu1 %v4739_v46 }
 0xb29   : > { %4742 = vmatpush3.bf16.msra.mxu1 %v4739_v46 }
 0xb2a   : > { %4744 = vmatprep.subr.bf16.mxu1 %v4743_v53 }
 0xb2d   : > { %4746 = vmatpush3.bf16.msra.mxu1 %v4743_v53 }
 0xb2e   : > { %4748 = vmatprep.subr.bf16.mxu1 %v4747_v60 }
 0xb31   : > { %4750 = vmatpush3.bf16.msra.mxu1 %v4747_v60 }
 0xb32   : > { %4752 = vmatprep.subr.bf16.mxu1 %v4751_v0 }
 0xb35   : > { %4754 = vmatpush3.bf16.msra.mxu1 %v4751_v0 }
 0xb36   : > { %4756 = vmatprep.subr.bf16.mxu1 %v4755_v4 }
 0xb39   : > { %4758 = vmatpush3.bf16.msra.mxu1 %v4755_v4 }
 0xb3d   : > { %v4432_v44 = vpop.f32.mrb[10].mxu0 }
 0xb3e   : > { %v2300_v45 = vpop.f32.mrb[11].mxu0 }
 0xb3f   : > { %v4823_v46 = vpack.c.bf16 %v4432_v44, %v2300_v45  ;;  %v6434_v47 = vpack.i.bf16 %v4432_v44, %v2300_v45 }
 0xbad   : > { %v2057_v26 = vpop.xlane.xlu0 %2056 }
 0xbae   : > { %v2055_v27 = vpop.xlane.xlu1 %2054  ;;  %v2060_v28 = vmul.f32 0.0078125, %v2057_v26  ;;  %v2130_v26 = vld [vmem:[#allocation17 + $0x28] sm:$0xff] }
 0xbaf   : > { %v2059_v29 = vmul.f32 0.0078125, %v2055_v27  ;;  %v4799_v27 = vpack.c.bf16 %v2130_v26, %v2129_v25 }
 0xbb0   : > { %v6406_v31 = vsub.f32 %v2049_v8, %v2060_v28  ;;  %v4791_v8 = vpack.c.bf16 %v2126_v39, %v2125_v7  ;;  %v2131_v28 = vld [vmem:[#allocation17 + $0x30] sm:$0xff] }
 0xbb1   : > { %v6404_v30 = vsub.f32 %v2044_v10, %v2059_v29  ;;  %v2132_v29 = vld [vmem:[#allocation17 + $0x38] sm:$0xff] }
 0xbb2   : > { %v2064_v33 = vmul.f32 %v6406_v31, %v6406_v31  ;;  %4792 = vmatprep.subr.bf16.mxu1 %v4791_v8 }
 0xbb3   : > { %v2063_v32 = vmul.f32 %v6404_v30, %v6404_v30 }
 0xbb5   : > { %2065 = vadd.xlane.f32.xlu0 %v2063_v32  ;;  %v2134_v32 = vld [vmem:[#allocation17 + $0x48] sm:$0xff] }
 0xbb9   : > { %2067 = vadd.xlane.f32.xlu0 %v2064_v33 }
 0xc42   : > { %v2066_v9 = vpop.xlane.xlu0 %2065 }
 0xc43   : > { %v2069_v10 = vmul.f32 0.0078125, %v2066_v9 }
 0xc45   : > { %v2071_v11 = vadd.f32 1e-05, %v2069_v10 }
 0xc46   : > { %v2068_v12 = vpop.xlane.xlu0 %2067 }
 0xc47   : > { %5243 = vrsqrt.f32 %v2071_v11  ;;  %v2070_v13 = vmul.f32 0.0078125, %v2068_v12 }
 0xc49   : > { %v2072_v14 = vadd.f32 1e-05, %v2070_v13 }
 0xc4b   : > { %5245 = vrsqrt.f32 %v2072_v14 }
 0xc51   : > { %v5244_v15 = vpop.eup %5243 }
 0xc52   : > { %v2075_v17 = vmul.f32 %v5244_v15, %v6404_v30  ;;  %v4803_v30 = vpack.c.bf16 %v2132_v29, %v2131_v28 }
 0xc54   : > { %v2083_v5 = vmul.f32 %v3882_v16, %v2075_v17 }
 0xc55   : > { %v5246_v19 = vpop.eup %5245 }
 0xc56   : > { %v2076_v6 = vmul.f32 %v5246_v19, %v6406_v31  ;;  %v6427_v20 = vadd.f32 %v3883_v18, %v2083_v5  ;;  %v2133_v31 = vld [vmem:[#allocation17 + $0x40] sm:$0xff] }
 0xc57   : > { %v4807_v33 = vpack.c.bf16 %v2134_v32, %v2133_v31 }
 0xc58   : > { %v2084_v22 = vmul.f32 %v3882_v16, %v2076_v6  ;;  %4395 = vmatprep.mubr.f32.mxu1 %v6427_v20 }
 0xc5a   : > { %v6430_v23 = vadd.f32 %v3883_v18, %v2084_v22 }
 0xc5c   : > { %4396 = vmatmul.mubr.f32.vlgmr.msra.gmra.mrb[14].mxu1 %v6430_v23 }
 0xc5d   : > { %4794 = vmatpush3.bf16.msra.mxu1 %v4791_v8  ;;  %4465 = vmatprep.mubr.f32.mxu1 %v835_v59 }
 0xc5e   : > { %4796 = vmatprep.subr.bf16.mxu1 %v4795_v24 }
 0xc61   : > { %4798 = vmatpush3.bf16.msra.mxu1 %v4795_v24 }
 0xc62   : > { %4800 = vmatprep.subr.bf16.mxu1 %v4799_v27 }
 0xc65   : > { %4802 = vmatpush3.bf16.msra.mxu1 %v4799_v27 }
 0xc66   : > { %4804 = vmatprep.subr.bf16.mxu1 %v4803_v30 }
 0xc69   : > { %4806 = vmatpush3.bf16.msra.mxu1 %v4803_v30 }
 0xc6a   : > { %4808 = vmatprep.subr.bf16.mxu1 %v4807_v33 }
 0xc6d   : > { %4810 = vmatpush3.bf16.msra.mxu1 %v4807_v33 }
 0xc6e   : > { %4812 = vmatprep.subr.bf16.mxu1 %v4811_v36 }
 0xc71   : > { %4814 = vmatpush3.bf16.msra.mxu1 %v4811_v36 }
 0xc72   : > { %4816 = vmatprep.subr.bf16.mxu1 %v4815_v40 }
 0xc75   : > { %4818 = vmatpush3.bf16.msra.mxu1 %v4815_v40 }
 0xc76   : > { %4820 = vmatprep.subr.bf16.mxu1 %v4819_v43 }
 0xc79   : > { %4822 = vmatpush3.bf16.msra.mxu1 %v4819_v43 }
 0xc7a   : > { %4825 = vmatprep.subr.msk.bf16.mxu1 %vm6297_vm1, %v4823_v46 }
 0xc7c   : > { %4466 = vmatmul.mubr.f32.vlgmr.msra.gmra.mrb[16].mxu1 %v6416_v3 }
 0xc82   : > { %4828 = vmatpush3.bf16.xpose.msk.msra.mxu1 %vm6297_vm1, %v4823_v46 }
 0xd2f   : > { %v4397_v49 = vpop.f32.mrb[14].mxu1 }
 0xd30   : > { %v2223_v50 = vpop.f32.mrb[15].mxu1  ;;  %v6442_v52 = vmul.f32 0.17677669, %v4397_v49 }
 0xd31   : > { %v6440_v51 = vmul.f32 0.17677669, %v2223_v50 }
 0xd33   : > { %4472 = vmatprep.mubr.msk.f32.mxu1 %vm1128_vm0, %v6440_v51 }
 0xd34   : > { %4473 = vmatmul.mubr.msk.f32.vlgmr.msra.gmra.mrb[18].mxu1 %vm1128_vm0, %v6442_v52 }
 0xd4f   : > { %v4467_v53 = vpop.f32.mrb[16].mxu1 }
 0xd50   : > { %v2375_v54 = vpop.f32.mrb[17].mxu1 }
 0xd51   : > { %v4829_v55 = vpack.c.bf16 %v4467_v53, %v2375_v54  ;;  %v6448_v56 = vpack.i.bf16 %v4467_v53, %v2375_v54 }
 0xd53   : > { %4830 = vmatprep.subr.bf16.mxu1 %v4829_v55 }
 0xd54   : > { %4832 = vmatpush3.bf16.msra.mxu1 %v4829_v55 }
 0xe07   : > { %v4474_v57 = vpop.f32.mrb[18].mxu1 }
 0xe08   : > { %v2462_v58 = vpop.f32.mrb[19].mxu1  ;;  %v2474_v59 = vsel %vm1216_vm2, %v4474_v57, -inf }
 0xe09   : > { %2475 = vmax.xlane.f32.xlu0 %v2474_v59  ;;  %v2471_v60 = vsel %vm1216_vm2, %v2462_v58, -inf }
 0xe0a   : > { %2472 = vmax.xlane.f32.xlu1 %v2471_v60 }
 0xe1b   : > { %5167 = vrot.lane.b32.xlu1 %v6434_v47, %s5739_s0 }
 0xe1f   : > { %2576 = vrot.lane.b32.xlu1 %v6440_v51, %s5739_s0 }
 0xe96   : > { %v2476_v61 = vpop.xlane.xlu0 %2475 }
 0xe97   : > { %v2478_v62 = vsub.f32 %v4474_v57, %v2476_v61  ;;  %v2473_v0 = vpop.xlane.xlu1 %2472 }
 0xe98   : > { %v2477_v1 = vsub.f32 %v2462_v58, %v2473_v0 }
 0xe99   : > { %v2481_v2 = vmul.f32 1.442695, %v2478_v62 }
 0xe9a   : > { %v2479_v3 = vmul.f32 1.442695, %v2477_v1 }
 0xe9b   : > { %5247 = vpow2.f32 %v2481_v2  ;;  %v5168_v4 = vpop.permute.xlu1 %5167 }
 0xe9c   : > { %5249 = vpow2.f32 %v2479_v3  ;;  %v5170_v7 = vunpack.i.h.bf16 %v5168_v4  ;;  %v5169_v39 = vunpack.i.l.bf16 %v5168_v4 }
 0xe9e   : > { %v4833_v8 = vpack.c.bf16 %v5170_v7, %v5169_v39 }
 0xe9f   : > { %v2577_v13 = vpop.permute.xlu1 %2576 }
 0xea0   : > { %4835 = vmatprep.subr.msk.bf16.mxu1 %vm6297_vm1, %v4833_v8 }
 0xea5   : > { %v5248_v9 = vpop.eup %5247 }
 0xea6   : > { %v5250_v10 = vpop.eup %5249  ;;  %v2486_v11 = vsel %vm1216_vm2, %v5248_v9, 0.0 }
 0xea7   : > { %2487 = vadd.xlane.f32.xlu0 %v2486_v11  ;;  %v2483_v12 = vsel %vm1216_vm2, %v5250_v10, 0.0 }
 0xea8   : > { %2484 = vadd.xlane.f32.xlu1 %v2483_v12 }
 0xeb9   : > { %2578 = vrot.lane.b32.xlu1 %v6442_v52, %s5739_s0 }
 0xebd   : > { %5172 = vrot.lane.b32.xlu0 %v6434_v47, %s5741_s4  ;;  %2780 = vrot.lane.b32.xlu1 %v6440_v51, %s5741_s4 }
 0xec1   : > { %2782 = vrot.lane.b32.xlu0 %v6442_v52, %s5741_s4 }
 0xf34   : > { %v2488_v14 = vpop.xlane.xlu0 %2487 }
 0xf35   : > { %5251 = vrcp.f32 %v2488_v14  ;;  %v2485_v15 = vpop.xlane.xlu1 %2484 }
 0xf36   : > { %5253 = vrcp.f32 %v2485_v15 }
 0xf38   : > { %v5173_v16 = vpop.permute.xlu0 %5172 }
 0xf39   : > { %v5175_v5 = vunpack.i.h.bf16 %v5173_v16  ;;  %v5174_v19 = vunpack.i.l.bf16 %v5173_v16  ;;  %v2579_v22 = vpop.permute.xlu1 %2578 }
 0xf3b   : > { %v4843_v48 = vpack.c.bf16 %v5175_v5, %v5174_v19 }
 0xf3c   : > { %v2783_v25 = vpop.permute.xlu0 %2782 }
 0xf3d   : > { %v2781_v24 = vpop.permute.xlu1 %2780 }
 0xf3f   : > { %v5252_v17 = vpop.eup %5251 }
 0xf40   : > { %v5254_v18 = vpop.eup %5253  ;;  %v2492_v21 = vmul.f32 %v5252_v17, %v5248_v9 }
 0xf41   : > { %v2491_v6 = vmul.f32 %v5254_v18, %v5250_v10 }
 0xf43   : > { %4479 = vmatprep.mubr.msk.f32.mxu1 %vm1216_vm2, %v2491_v6 }
 0xf44   : > { %4480 = vmatmul.mubr.msk.f32.vlgmr.msra.gmra.mrb[20].mxu1 %vm1216_vm2, %v2492_v21 }
 0xf45   : > { %4838 = vmatpush3.bf16.xpose.msk.msra.mxu1 %vm6297_vm1, %v4833_v8  ;;  %4486 = vmatprep.mubr.msk.f32.mxu1 %vm1128_vm0, %v2577_v13 }
 0xf46   : > { %4845 = vmatprep.subr.msk.bf16.mxu1 %vm6297_vm1, %v4843_v48 }
 0xf4c   : > { %4487 = vmatmul.mubr.msk.f32.vlgmr.msra.gmra.mrb[22].mxu1 %vm1128_vm0, %v2579_v22 }
 0xf4d   : > { %4848 = vmatpush3.bf16.xpose.msk.msra.mxu1 %vm6297_vm1, %v4843_v48  ;;  %4500 = vmatprep.mubr.msk.f32.mxu1 %vm1128_vm0, %v2781_v24 }
 0xf54   : > { %4501 = vmatmul.mubr.msk.f32.vlgmr.msra.gmra.mrb[24].mxu1 %vm1128_vm0, %v2783_v25 }
0x1017   : > { %v4481_v26 = vpop.f32.mrb[20].mxu1 }
0x1018   : > { %2575 = vst.msk [vmem:[#allocation2 + $0x8] sm:$0xff] %vm1128_vm0, %v4481_v26  ;;  %v2565_v27 = vpop.f32.mrb[21].mxu1 }
0x1019   : > { %2574 = vst.msk [vmem:[#allocation2] sm:$0xff] %vm1128_vm0, %v2565_v27 }
0x101f   : > { %v6482_v28 = vpop.f32.mrb[22].mxu1 }
0x1020   : > { %v2658_v29 = vpop.f32.mrb[23].mxu1  ;;  %v2670_v58 = vsel %vm1216_vm2, %v6482_v28, -inf }
0x1021   : > { %v2667_v34 = vsel %vm1216_vm2, %v2658_v29, -inf }
0x1027   : > { %v4502_v30 = vpop.f32.mrb[24].mxu1 }
0x1028   : > { %v2862_v31 = vpop.f32.mrb[25].mxu1  ;;  %v2874_v32 = vsel %vm1216_vm2, %v4502_v30, -inf }
0x1029   : > { %2875 = vmax.xlane.f32.xlu0 %v2874_v32  ;;  %v2871_v33 = vsel %vm1216_vm2, %v2862_v31, -inf }
0x102a   : > { %2872 = vmax.xlane.f32.xlu1 %v2871_v33 }
0x103b   : > { %5177 = vrot.lane.b32.xlu1 %v6448_v56, %s5741_s4 }
0x103f   : > { %2982 = vrot.lane.b32.xlu1 %v6440_v51, %s5740_s7 }
0x1043   : > { %2984 = vrot.lane.b32.xlu1 %v6442_v52, %s5740_s7 }
0x1067   : > { %2668 = vmax.xlane.f32.xlu1 %v2667_v34 }
0x10b6   : > { %v2876_v35 = vpop.xlane.xlu0 %2875 }
0x10b7   : > { %v2878_v36 = vsub.f32 %v4502_v30, %v2876_v35  ;;  %v2873_v37 = vpop.xlane.xlu1 %2872 }
0x10b8   : > { %v2877_v38 = vsub.f32 %v2862_v31, %v2873_v37 }
0x10b9   : > { %v2881_v40 = vmul.f32 1.442695, %v2878_v36 }
0x10ba   : > { %v2879_v41 = vmul.f32 1.442695, %v2877_v38 }
0x10bb   : > { %5255 = vpow2.f32 %v2881_v40  ;;  %v5178_v42 = vpop.permute.xlu1 %5177 }
0x10bc   : > { %v5180_v43 = vunpack.i.h.bf16 %v5178_v42  ;;  %v5179_v44 = vunpack.i.l.bf16 %v5178_v42  ;;  %5257 = vpow2.f32 %v2879_v41 }
0x10be   : > { %v4849_v45 = vpack.c.bf16 %v5180_v43, %v5179_v44 }
0x10bf   : > { %v2983_v52 = vpop.permute.xlu1 %2982 }
0x10c0   : > { %4850 = vmatprep.subr.bf16.mxu1 %v4849_v45 }
0x10c1   : > { %4852 = vmatpush3.bf16.msra.mxu1 %v4849_v45 }
0x10c3   : > { %v2985_v53 = vpop.permute.xlu1 %2984 }
0x10c5   : > { %v5256_v46 = vpop.eup %5255 }
0x10c6   : > { %v2886_v49 = vsel %vm1216_vm2, %v5256_v46, 0.0  ;;  %v5258_v50 = vpop.eup %5257 }
0x10c7   : > { %2887 = vadd.xlane.f32.xlu0 %v2886_v49  ;;  %v2883_v51 = vsel %vm1216_vm2, %v5258_v50, 0.0  ;;  %v2141_v49 = vld [vmem:[#allocation18] sm:$0xff] }
0x10cb   : > { %2884 = vadd.xlane.f32.xlu0 %v2883_v51  ;;  %v2143_v51 = vld [vmem:[#allocation18 + $0x10] sm:$0xff] }
0x10e1   : > { %5182 = vrot.lane.b32.xlu0 %v6434_v47, %s5740_s7 }
0x10f4   : > { %v2669_v54 = vpop.xlane.xlu1 %2668 }
0x10f5   : > { %v2673_v55 = vsub.f32 %v2658_v29, %v2669_v54 }
0x10f7   : > { %v2675_v57 = vmul.f32 1.442695, %v2673_v55  ;;  %v2145_v55 = vld [vmem:[#allocation18 + $0x20] sm:$0xff] }
0x10f9   : > { %5259 = vpow2.f32 %v2675_v57  ;;  %v2146_v57 = vld [vmem:[#allocation18 + $0x28] sm:$0xff] }
0x1100   : > { %2671 = vmax.xlane.f32.xlu0 %v2670_v58  ;;  %v4871_v58 = vpack.c.bf16 %v2146_v57, %v2145_v55  ;;  %v3343_v55 = vld [vmem:[#allocation20 + $0x30] sm:$0xff]  ;;  %v3346_v57 = vld [vmem:[#allocation20 + $0x48] sm:$0xff] }
0x1103   : > { %v5260_v59 = vpop.eup %5259 }
0x1104   : > { %v2679_v60 = vsel %vm1216_vm2, %v5260_v59, 0.0 }
0x1105   : > { %2680 = vadd.xlane.f32.xlu1 %v2679_v60  ;;  %v2148_v60 = vld [vmem:[#allocation18 + $0x38] sm:$0xff] }
0x1154   : > { %v2888_v61 = vpop.xlane.xlu0 %2887 }
0x1155   : > { %5261 = vrcp.f32 %v2888_v61 }
0x1158   : > { %v2885_v62 = vpop.xlane.xlu0 %2884 }
0x1159   : > { %5263 = vrcp.f32 %v2885_v62  ;;  %v2149_v62 = vld [vmem:[#allocation18 + $0x40] sm:$0xff] }
0x115c   : > { %v5183_v0 = vpop.permute.xlu0 %5182 }
0x115d   : > { %v5185_v47 = vunpack.i.h.bf16 %v5183_v0  ;;  %v5184_v1 = vunpack.i.l.bf16 %v5183_v0  ;;  %v2150_v0 = vld [vmem:[#allocation18 + $0x48] sm:$0xff] }
0x115f   : > { %v4853_v2 = vpack.c.bf16 %v5185_v47, %v5184_v1  ;;  %v5262_v3 = vpop.eup %5261  ;;  %v4879_v47 = vpack.c.bf16 %v2150_v0, %v2149_v62 }
0x1160   : > { %v2892_v39 = vmul.f32 %v5262_v3, %v5256_v46  ;;  %v2151_v3 = vld [vmem:[#allocation18 + $0x50] sm:$0xff] }
0x1161   : > { %4855 = vmatprep.subr.msk.bf16.mxu1 %vm6297_vm1, %v4853_v2 }
0x1163   : > { %v5264_v4 = vpop.eup %5263 }
0x1164   : > { %v2891_v7 = vmul.f32 %v5264_v4, %v5258_v50  ;;  %v2142_v50 = vld [vmem:[#allocation18 + $0x8] sm:$0xff]  ;;  %v2152_v4 = vld [vmem:[#allocation18 + $0x58] sm:$0xff] }
0x1166   : > { %4507 = vmatprep.mubr.msk.f32.mxu1 %vm1216_vm2, %v2891_v7  ;;  %v4883_v7 = vpack.c.bf16 %v2152_v4, %v2151_v3 }
0x1167   : > { %4508 = vmatmul.mubr.msk.f32.vlgmr.msra.gmra.mrb[26].mxu1 %vm1216_vm2, %v2892_v39 }
0x1168   : > { %4858 = vmatpush3.bf16.xpose.msk.msra.mxu1 %vm6297_vm1, %v4853_v2  ;;  %4514 = vmatprep.mubr.msk.f32.mxu1 %vm1128_vm0, %v2983_v52  ;;  %v4863_v52 = vpack.c.bf16 %v2142_v50, %v2141_v49  ;;  %v3339_v49 = vld [vmem:[#allocation20 + $0x10] sm:$0xff]  ;;  %v3342_v50 = vld [vmem:[#allocation20 + $0x28] sm:$0xff] }
0x116f   : > { %4515 = vmatmul.mubr.msk.f32.vlgmr.msra.gmra.mrb[28].mxu1 %vm1128_vm0, %v2985_v53  ;;  %v2144_v53 = vld [vmem:[#allocation18 + $0x18] sm:$0xff] }
0x1170   : > { %v4867_v54 = vpack.c.bf16 %v2144_v53, %v2143_v51  ;;  %v3344_v51 = vld [vmem:[#allocation20 + $0x38] sm:$0xff] }
0x1171   : > { %v4899_v53 = vpack.c.bf16 %v3344_v51, %v3342_v50  ;;  %v3483_v50 = vld [vmem:[#allocation21 + $0xa8] sm:$0xff] }
0x118d   : > { %v2672_v11 = vpop.xlane.xlu0 %2671 }
0x118e   : > { %v2674_v12 = vsub.f32 %v6482_v28, %v2672_v11 }
0x1190   : > { %v2677_v14 = vmul.f32 1.442695, %v2674_v12  ;;  %v2155_v12 = vld [vmem:[#allocation18 + $0x70] sm:$0xff] }
0x1192   : > { %v2681_v8 = vpop.xlane.xlu1 %2680 }
0x1193   : > { %5265 = vrcp.f32 %v2681_v8 }
0x1194   : > { %5267 = vpow2.f32 %v2677_v14 }
0x119d   : > { %v5266_v9 = vpop.eup %5265 }
0x119e   : > { %v2687_v10 = vmul.f32 %v5266_v9, %v5260_v59  ;;  %v5268_v5 = vpop.eup %5267  ;;  %v2147_v59 = vld [vmem:[#allocation18 + $0x30] sm:$0xff]  ;;  %v2153_v9 = vld [vmem:[#allocation18 + $0x60] sm:$0xff] }
0x119f   : > { %v2682_v19 = vsel %vm1216_vm2, %v5268_v5, 0.0  ;;  %v4875_v61 = vpack.c.bf16 %v2148_v60, %v2147_v59  ;;  %v3345_v59 = vld [vmem:[#allocation20 + $0x40] sm:$0xff]  ;;  %v3347_v60 = vld [vmem:[#allocation20 + $0x50] sm:$0xff] }
0x11a0   : > { %4493 = vmatprep.mubr.msk.f32.mxu0 %vm1216_vm2, %v2687_v10  ;;  %v2154_v10 = vld [vmem:[#allocation18 + $0x68] sm:$0xff] }
0x11a1   : > { %v4887_v11 = vpack.c.bf16 %v2154_v10, %v2153_v9  ;;  %v3349_v10 = vld [vmem:[#allocation20 + $0x60] sm:$0xff] }
0x123a   : > { %v4509_v13 = vpop.f32.mrb[26].mxu1 }
0x123b   : > { %2981 = vst.msk [vmem:[#allocation2 + $0x28] sm:$0xff] %vm1128_vm0, %v4509_v13  ;;  %v2971_v15 = vpop.f32.mrb[27].mxu1  ;;  %v2156_v13 = vld [vmem:[#allocation18 + $0x78] sm:$0xff] }
0x123c   : > { %2980 = vst.msk [vmem:[#allocation2 + $0x20] sm:$0xff] %vm1128_vm0, %v2971_v15  ;;  %v4891_v14 = vpack.c.bf16 %v2156_v13, %v2155_v12  ;;  %v3354_v13 = vld [vmem:[#allocation20 + $0x88] sm:$0xff] }
0x1242   : > { %v4516_v63 = vpop.f32.mrb[28].mxu1 }
0x1243   : > { %v3064_v16 = vpop.f32.mrb[29].mxu1  ;;  %v3076_v18 = vsel %vm1216_vm2, %v4516_v63, -inf }
0x1244   : > { %v3073_v17 = vsel %vm1216_vm2, %v3064_v16, -inf }
0x1245   : > { %3074 = vmax.xlane.f32.xlu0 %v3073_v17 }
0x1249   : > { %3077 = vmax.xlane.f32.xlu0 %v3076_v18 }
0x124d   : > { %2683 = vadd.xlane.f32.xlu0 %v2682_v19 }
0x12d2   : > { %v3075_v6 = vpop.xlane.xlu0 %3074 }
0x12d3   : > { %v3079_v21 = vsub.f32 %v3064_v16, %v3075_v6 }
0x12d5   : > { %v3081_v48 = vmul.f32 1.442695, %v3079_v21 }
0x12d6   : > { %v3078_v22 = vpop.xlane.xlu0 %3077 }
0x12d7   : > { %5269 = vpow2.f32 %v3081_v48  ;;  %v3080_v24 = vsub.f32 %v4516_v63, %v3078_v22 }
0x12d9   : > { %v3083_v25 = vmul.f32 1.442695, %v3080_v24 }
0x12da   : > { %v2684_v30 = vpop.xlane.xlu0 %2683 }
0x12db   : > { %5271 = vpow2.f32 %v3083_v25 }
0x12dc   : > { %5273 = vrcp.f32 %v2684_v30 }
0x12e1   : > { %v5270_v26 = vpop.eup %5269 }
0x12e2   : > { %v3085_v27 = vsel %vm1216_vm2, %v5270_v26, 0.0 }
0x12e3   : > { %3086 = vadd.xlane.f32.xlu1 %v3085_v27 }
0x12e5   : > { %v5272_v28 = vpop.eup %5271 }
0x12e6   : > { %v3088_v29 = vsel %vm1216_vm2, %v5272_v28, 0.0  ;;  %v5274_v37 = vpop.eup %5273 }
0x12e7   : > { %3089 = vadd.xlane.f32.xlu0 %v3088_v29  ;;  %v2688_v43 = vmul.f32 %v5274_v37, %v5268_v5 }
0x12f4   : > { %5187 = vrot.lane.b32.xlu1 %v6448_v56, %s5739_s0 }
0x12fd   : > { %5192 = vrot.lane.b32.xlu0 %v6448_v56, %s5740_s7 }
0x1370   : > { %v3087_v31 = vpop.xlane.xlu1 %3086 }
0x1371   : > { %5275 = vrcp.f32 %v3087_v31 }
0x1374   : > { %v3090_v32 = vpop.xlane.xlu0 %3089  ;;  %v5188_v33 = vpop.permute.xlu1 %5187 }
0x1375   : > { %5277 = vrcp.f32 %v3090_v32  ;;  %v5190_v34 = vunpack.i.h.bf16 %v5188_v33  ;;  %v5189_v35 = vunpack.i.l.bf16 %v5188_v33 }
0x1377   : > { %v4839_v36 = vpack.c.bf16 %v5190_v34, %v5189_v35 }
0x1378   : > { %v5193_v38 = vpop.permute.xlu0 %5192 }
0x1379   : > { %v5195_v40 = vunpack.i.h.bf16 %v5193_v38  ;;  %v5194_v41 = vunpack.i.l.bf16 %v5193_v38  ;;  %4840 = vmatprep.subr.bf16.mxu0 %v4839_v36 }
0x137a   : > { %4842 = vmatpush3.bf16.msra.mxu0 %v4839_v36 }
0x137b   : > { %v5276_v42 = vpop.eup %5275  ;;  %v4859_v44 = vpack.c.bf16 %v5195_v40, %v5194_v41 }
0x137c   : > { %v3093_v56 = vmul.f32 %v5276_v42, %v5270_v26 }
0x137d   : > { %4494 = vmatmul.mubr.msk.f32.vlgmr.msra.gmra.mrb[12].mxu0 %vm1216_vm2, %v2688_v43  ;;  %4860 = vmatprep.subr.bf16.mxu0 %v4859_v44 }
0x137e   : > { %4862 = vmatpush3.bf16.msra.mxu0 %v4859_v44  ;;  %4521 = vmatprep.mubr.msk.f32.mxu0 %vm1216_vm2, %v3093_v56  ;;  %v3338_v44 = vld [vmem:[#allocation20 + $0x8] sm:$0xff]  ;;  %v3340_v56 = vld [vmem:[#allocation20 + $0x18] sm:$0xff] }
0x137f   : > { %v5278_v45 = vpop.eup %5277  ;;  %4864 = vmatprep.subr.bf16.mxu0 %v4863_v52 }
0x1380   : > { %v3094_v46 = vmul.f32 %v5278_v45, %v5272_v28  ;;  %v3337_v45 = vld [vmem:[#allocation20] sm:$0xff] }
0x1382   : > { %4522 = vmatmul.mubr.msk.f32.vlgmr.msra.gmra.mrb[14].mxu0 %vm1216_vm2, %v3094_v46  ;;  %v4895_v46 = vpack.c.bf16 %v3340_v56, %v3338_v44 }
0x1383   : > { %4866 = vmatpush3.bf16.msra.mxu0 %v4863_v52  ;;  %v4897_v52 = vpack.c.bf16 %v3339_v49, %v3337_v45  ;;  %v3464_v45 = vld [vmem:[#allocation21 + $0x10] sm:$0xff]  ;;  %v3482_v49 = vld [vmem:[#allocation21 + $0xa0] sm:$0xff] }
0x1384   : > { %4868 = vmatprep.subr.bf16.mxu0 %v4867_v54  ;;  %4896 = vmatprep.subr.bf16.mxu1 %v4895_v46  ;;  %v3465_v46 = vld [vmem:[#allocation21 + $0x18] sm:$0xff] }
0x1385   : > { %4898 = vmatpush1.bf16.msra.mxu1 %v4897_v52  ;;  %v4933_v51 = vpack.c.bf16 %v3465_v46, %v3464_v45  ;;  %v4935_v52 = vpack.c.bf16 %v3483_v50, %v3482_v49 }
0x1386   : > { %4900 = vmatprep.subr.bf16.mxu1 %v4899_v53  ;;  %v3466_v53 = vld [vmem:[#allocation21 + $0x20] sm:$0xff] }
0x1387   : > { %4870 = vmatpush3.bf16.msra.mxu0 %v4867_v54  ;;  %v3341_v54 = vld [vmem:[#allocation20 + $0x20] sm:$0xff] }
0x1388   : > { %4872 = vmatprep.subr.bf16.mxu0 %v4871_v58 }
0x138b   : > { %4874 = vmatpush3.bf16.msra.mxu0 %v4871_v58  ;;  %v3348_v58 = vld [vmem:[#allocation20 + $0x58] sm:$0xff] }
0x138c   : > { %4876 = vmatprep.subr.bf16.mxu0 %v4875_v61 }
0x138f   : > { %4878 = vmatpush3.bf16.msra.mxu0 %v4875_v61  ;;  %v4905_v61 = vpack.c.bf16 %v3347_v60, %v3345_v59  ;;  %v3469_v59 = vld [vmem:[#allocation21 + $0x38] sm:$0xff]  ;;  %v3486_v60 = vld [vmem:[#allocation21 + $0xc0] sm:$0xff] }
0x1390   : > { %4880 = vmatprep.subr.bf16.mxu0 %v4879_v47 }
0x1393   : > { %4882 = vmatpush3.bf16.msra.mxu0 %v4879_v47 }
0x1394   : > { %4884 = vmatprep.subr.bf16.mxu0 %v4883_v7 }
0x1397   : > { %4886 = vmatpush3.bf16.msra.mxu0 %v4883_v7 }
0x1398   : > { %4888 = vmatprep.subr.bf16.mxu0 %v4887_v11 }
0x139b   : > { %4890 = vmatpush3.bf16.msra.mxu0 %v4887_v11  ;;  %v3351_v11 = vld [vmem:[#allocation20 + $0x70] sm:$0xff] }
0x139c   : > { %4892 = vmatprep.subr.bf16.mxu0 %v4891_v14  ;;  %v4909_v12 = vpack.c.bf16 %v3351_v11, %v3349_v10  ;;  %v3473_v10 = vld [vmem:[#allocation21 + $0x58] sm:$0xff]  ;;  %v3490_v11 = vld [vmem:[#allocation21 + $0xe0] sm:$0xff] }
0x139f   : > { %4894 = vmatpush3.bf16.msra.mxu0 %v4891_v14  ;;  %v3356_v14 = vld [vmem:[#allocation20 + $0x98] sm:$0xff] }
0x1450   : > { %v4495_v1 = vpop.f32.mrb[12].mxu0 }
0x1451   : > { %2779 = vst.msk [vmem:[#allocation2 + $0x18] sm:$0xff] %vm1128_vm0, %v4495_v1  ;;  %v2769_v2 = vpop.f32.mrb[13].mxu0 }
0x1452   : > { %2778 = vst.msk [vmem:[#allocation2 + $0x10] sm:$0xff] %vm1128_vm0, %v2769_v2 }
0x1455   : > { %v4523_v39 = vpop.f32.mrb[14].mxu0 }
0x1456   : > { %3183 = vst.msk [vmem:[#allocation2 + $0x38] sm:$0xff] %vm1128_vm0, %v4523_v39  ;;  %v3173_v8 = vpop.f32.mrb[15].mxu0  ;;  %v3350_v39 = vld [vmem:[#allocation20 + $0x68] sm:$0xff] }
0x1457   : > { %3182 = vst.msk [vmem:[#allocation2 + $0x30] sm:$0xff] %vm1128_vm0, %v3173_v8  ;;  %v3352_v8 = vld [vmem:[#allocation20 + $0x78] sm:$0xff] }
0x1458   : > { %v4907_v9 = vpack.c.bf16 %v3352_v8, %v3350_v39 }
0x1459   : > { %v3186_v15 = vld [vmem:[#allocation2 + $0x1] ss:$4 sm:$0xff]  ;;  %v3188_v18 = vld [vmem:[#allocation2 + $0x2] ss:$4 sm:$0xff]  ;;  %v3190_v6 = vld [vmem:[#allocation2 + $0x3] ss:$4 sm:$0xff] }
0x145a   : > { %v3184_v30 = vld [vmem:[#allocation2] ss:$4 sm:$0xff] }
0x145e   : > { %v3187_v63 = vld [vmem:[#allocation2 + $0x21] ss:$4 sm:$0xff]  ;;  %v3189_v17 = vld [vmem:[#allocation2 + $0x22] ss:$4 sm:$0xff]  ;;  %v3191_v19 = vld [vmem:[#allocation2 + $0x23] ss:$4 sm:$0xff] }
0x145f   : > { %v5196_v16 = vpack.i.bf16 %v3187_v63, %v3186_v15  ;;  %v5201_v5 = vpack.i.bf16 %v3189_v17, %v3188_v18  ;;  %v5206_v21 = vpack.i.bf16 %v3191_v19, %v3190_v6  ;;  %v3185_v28 = vld [vmem:[#allocation2 + $0x20] ss:$4 sm:$0xff]  ;;  %v4911_v15 = vpack.c.bf16 %v3356_v14, %v3354_v13 }
0x1460   : > { %v3353_v63 = vld [vmem:[#allocation20 + $0x80] sm:$0xff]  ;;  %v3358_v18 = vld [vmem:[#allocation20 + $0xa8] sm:$0xff] }
0x1461   : > { %5197 = vrot.lane.b32.xlu1 %v5196_v16, %s5740_s7  ;;  %v3355_v16 = vld [vmem:[#allocation20 + $0x90] sm:$0xff]  ;;  %v3357_v6 = vld [vmem:[#allocation20 + $0xa0] sm:$0xff]  ;;  %s6717_s7 = sld [smem:[#allocation48_spill]] }
0x1462   : > { %v4913_v17 = vpack.c.bf16 %v3355_v16, %v3353_v63 }
0x1465   : > { %5202 = vrot.lane.b32.xlu1 %v5201_v5, %s5741_s4  ;;  %v3360_v5 = vld [vmem:[#allocation20 + $0xb8] sm:$0xff]  ;;  %s3621_s4 = scalar_lea.sflag [#allocation5], %s6248_s9 }
0x1466   : > { %v4915_v19 = vpack.c.bf16 %v3360_v5, %v3358_v18 }
0x1469   : > { %5207 = vrot.lane.b32.xlu1 %v5206_v21, %s5739_s0  ;;  %v3359_v21 = vld [vmem:[#allocation20 + $0xb0] sm:$0xff]  ;;  %s6721_s0 = sld [smem:[#allocation52_spill]] }
0x14d3   : > { %v5198_v48 = vpop.permute.xlu1 %5197 }
0x14d4   : > { %v5200_v24 = vunpack.i.h.bf16 %v5198_v48  ;;  %v5199_v25 = vunpack.i.l.bf16 %v5198_v48  ;;  %v3362_v48 = vld [vmem:[#allocation20 + $0xc8] sm:$0xff] }
0x14d6   : > { %v3217_v31 = vsel %vm1128_vm0, %v3185_v28, %v5200_v24  ;;  %v3216_v34 = vsel %vm1128_vm0, %v3184_v30, %v5199_v25  ;;  %v3364_v24 = vld [vmem:[#allocation20 + $0xd8] sm:$0xff]  ;;  %v3361_v25 = vld [vmem:[#allocation20 + $0xc0] sm:$0xff] }
0x14d7   : > { %v5203_v22 = vpop.permute.xlu1 %5202  ;;  %v4919_v28 = vpack.c.bf16 %v3364_v24, %v3362_v48  ;;  %v3368_v30 = vld [vmem:[#allocation20 + $0xf8] sm:$0xff]  ;;  %v3909_v48 = vld [vmem:[%s6716_s26] ss:$0 sm:$0xff] }
0x14d8   : > { %v5205_v26 = vunpack.i.h.bf16 %v5203_v22  ;;  %v5204_v27 = vunpack.i.l.bf16 %v5203_v22  ;;  %v4917_v22 = vpack.c.bf16 %v3359_v21, %v3357_v6  ;;  %v3908_v6 = vld [vmem:[%s6715_s17] ss:$0 sm:$0xff]  ;;  %s3920_s17 = sshll.u32 %s5872_s3, 8  ;;  %s5743_s3 = smov [#allocation23]  }
0x14d9   : > { %s5631_s6 = sshll.u32 %s5743_s3, 4  ;;  %s5632_s6 = int_to_ptr.vmem [resolvable:$false] %s5631_s6 }
0x14da   : > { %v3218_v35 = vsel %vm1971_vm3, %v3216_v34, %v5204_v27  ;;  %v3219_v36 = vsel %vm1971_vm3, %v3217_v31, %v5205_v26  ;;  %v3363_v26 = vld [vmem:[#allocation20 + $0xd0] sm:$0xff]  ;;  %v5742_v27 = vmov 0.0   ;;  %p5634_p12 = scmp.lt.s32.totalorder %s6576_s11, %s5632_s6 }
0x14db   : > { %v5208_v29 = vpop.permute.xlu1 %5207  ;;  %3445 = vmatprep.mubr.f32.mxu1 %v5742_v27  ;;  %v4921_v31 = vpack.c.bf16 %v3363_v26, %v3361_v25  ;;  %v3367_v34 = vld [vmem:[#allocation20 + $0xf0] sm:$0xff] }
0x14dc   : > { %v5210_v32 = vunpack.i.h.bf16 %v5208_v29  ;;  %v5209_v33 = vunpack.i.l.bf16 %v5208_v29  ;;  %v3366_v29 = vld [vmem:[#allocation20 + $0xe8] sm:$0xff] }
0x14de   : > { %v3220_v37 = vsel %vm1974_vm4, %v3218_v35, %v5209_v33  ;;  %v3221_v38 = vsel %vm1974_vm4, %v3219_v36, %v5210_v32  ;;  %v4923_v32 = vpack.c.bf16 %v3368_v30, %v3366_v29  ;;  %v3365_v33 = vld [vmem:[#allocation20 + $0xe0] sm:$0xff] }
0x14df   : > { %4556 = vmatprep.mubr.f32.mxu0 %v3220_v37  ;;  %v4925_v35 = vpack.c.bf16 %v3367_v34, %v3365_v33  ;;  %v3478_v36 = vld [vmem:[#allocation21 + $0x80] sm:$0xff]  ;;  %v3479_v37 = vld [vmem:[#allocation21 + $0x88] sm:$0xff]  ;;  %v3493_v33 = vld [vmem:[#allocation21 + $0xf8] sm:$0xff] }
0x14e0   : > { %4557 = vmatmul.mubr.f32.vlgmr.msra.gmra.mrb[16].mxu0 %v3221_v38  ;;  %v3462_v38 = vld [vmem:[#allocation21] sm:$0xff] }
0x14e1   : > { %v3474_v30 = vld [vmem:[#allocation21 + $0x60] sm:$0xff] }
0x15b3   : > { %v4558_v40 = vpop.f32.mrb[16].mxu0 }
0x15b4   : > { %v3294_v41 = vadd.f32 %v4558_v40, %v6430_v23  ;;  %v3288_v42 = vpop.f32.mrb[17].mxu0  ;;  %v4901_v23 = vpack.c.bf16 %v3343_v55, %v3341_v54  ;;  %v4927_v40 = vpack.c.bf16 %v3479_v37, %v3478_v36  ;;  %v3467_v54 = vld [vmem:[#allocation21 + $0x28] sm:$0xff]  ;;  %v3484_v55 = vld [vmem:[#allocation21 + $0xb0] sm:$0xff]  ;;  %v3477_v36 = vld [vmem:[#allocation21 + $0x78] sm:$0xff] }
0x15b5   : > { %v3289_v43 = vadd.f32 %v3288_v42, %v6427_v20  ;;  %v4903_v20 = vpack.c.bf16 %v3348_v58, %v3346_v57  ;;  %v3480_v42 = vld [vmem:[#allocation21 + $0x90] sm:$0xff]  ;;  %v3485_v57 = vld [vmem:[#allocation21 + $0xb8] sm:$0xff]  ;;  %v4937_v58 = vpack.c.bf16 %v3467_v54, %v3466_v53 }
0x15b6   : > { %3301 = vadd.xlane.f32.xlu1 %v3294_v41  ;;  %4902 = vmatpush1.bf16.msra.mxu1 %v4901_v23  ;;  %v4939_v23 = vpack.c.bf16 %v3485_v57, %v3484_v55 }
0x15b7   : > { %3299 = vadd.xlane.f32.xlu0 %v3289_v43  ;;  %4904 = vmatprep.subr.bf16.mxu1 %v4903_v20  ;;  %v3468_v20 = vld [vmem:[#allocation21 + $0x30] sm:$0xff] }
0x15b8   : > { %4928 = vmatprep.subr.bf16.mxu0 %v4927_v40 }
0x15ba   : > { %4906 = vmatpush1.bf16.msra.mxu1 %v4905_v61  ;;  %v3487_v61 = vld [vmem:[#allocation21 + $0xc8] sm:$0xff] }
0x15bb   : > { %4908 = vmatprep.subr.bf16.mxu1 %v4907_v9  ;;  %v3472_v9 = vld [vmem:[#allocation21 + $0x50] sm:$0xff] }
0x15bc   : > { %v4949_v13 = vpack.c.bf16 %v3473_v10, %v3472_v9 }
0x15be   : > { %4910 = vmatpush1.bf16.msra.mxu1 %v4909_v12  ;;  %v3491_v12 = vld [vmem:[#allocation21 + $0xe8] sm:$0xff] }
0x15bf   : > { %4912 = vmatprep.subr.bf16.mxu1 %v4911_v15  ;;  %v4951_v14 = vpack.c.bf16 %v3491_v12, %v3490_v11 }
0x15c2   : > { %4914 = vmatpush1.bf16.msra.mxu1 %v4913_v17 }
0x15c3   : > { %4916 = vmatprep.subr.bf16.mxu1 %v4915_v19 }
0x15c6   : > { %4918 = vmatpush1.bf16.msra.mxu1 %v4917_v22 }
0x15c7   : > { %4920 = vmatprep.subr.bf16.mxu1 %v4919_v28 }
0x15ca   : > { %4922 = vmatpush1.bf16.msra.mxu1 %v4921_v31  ;;  %v3475_v31 = vld [vmem:[#allocation21 + $0x68] sm:$0xff] }
0x15cb   : > { %4924 = vmatprep.subr.bf16.mxu1 %v4923_v32  ;;  %v4953_v32 = vpack.c.bf16 %v3475_v31, %v3474_v30 }
0x15ce   : > { %4926 = vmatpush1.bf16.msra.mxu1 %v4925_v35  ;;  %v3476_v35 = vld [vmem:[#allocation21 + $0x70] sm:$0xff] }
0x15cf   : > { %v4957_v37 = vpack.c.bf16 %v3477_v36, %v3476_v35 }
0x1643   : > { %v3302_v62 = vpop.xlane.xlu1 %3301 }
0x1644   : > { %v3300_v0 = vpop.xlane.xlu0 %3299  ;;  %v3304_v47 = vmul.f32 0.0078125, %v3302_v62  ;;  %v4941_v62 = vpack.c.bf16 %v3469_v59, %v3468_v20 }
0x1645   : > { %v3303_v1 = vmul.f32 0.0078125, %v3300_v0  ;;  %v4943_v0 = vpack.c.bf16 %v3487_v61, %v3486_v60 }
0x1646   : > { %v6541_v3 = vsub.f32 %v3294_v41, %v3304_v47  ;;  %v3463_v41 = vld [vmem:[#allocation21 + $0x8] sm:$0xff]  ;;  %v3470_v47 = vld [vmem:[#allocation21 + $0x40] sm:$0xff] }
0x1647   : > { %v6539_v2 = vsub.f32 %v3289_v43, %v3303_v1  ;;  %v3481_v43 = vld [vmem:[#allocation21 + $0x98] sm:$0xff]  ;;  %v4929_v44 = vpack.c.bf16 %v3463_v41, %v3462_v38  ;;  %v3471_v1 = vld [vmem:[#allocation21 + $0x48] sm:$0xff]  ;;  %v3371_v38 = vlaneseq }
0x1648   : > { %v3308_v7 = vmul.f32 %v6541_v3, %v6541_v3  ;;  %v4931_v56 = vpack.c.bf16 %v3481_v43, %v3480_v42  ;;  %v4945_v39 = vpack.c.bf16 %v3471_v1, %v3470_v47 }
0x1649   : > { %v3307_v4 = vmul.f32 %v6539_v2, %v6539_v2  ;;  %4930 = vmatpush3.bf16.msra.mxu0 %v4929_v44 }
0x164a   : > { %4932 = vmatprep.subr.bf16.mxu0 %v4931_v56 }
0x164b   : > { %3309 = vadd.xlane.f32.xlu0 %v3307_v4  ;;  %v3488_v4 = vld [vmem:[#allocation21 + $0xd0] sm:$0xff] }
0x164d   : > { %4934 = vmatpush3.bf16.msra.mxu0 %v4933_v51 }
0x164e   : > { %4936 = vmatprep.subr.bf16.mxu0 %v4935_v52 }
0x164f   : > { %3311 = vadd.xlane.f32.xlu0 %v3308_v7  ;;  %v3489_v7 = vld [vmem:[#allocation21 + $0xd8] sm:$0xff] }
0x1650   : > { %v4947_v8 = vpack.c.bf16 %v3489_v7, %v3488_v4 }
0x1651   : > { %4938 = vmatpush3.bf16.msra.mxu0 %v4937_v58 }
0x1652   : > { %4940 = vmatprep.subr.bf16.mxu0 %v4939_v23  ;;  %v3910_v23 = vld [vmem:[%s6718_s15] ss:$0 sm:$0xff]  ;;  %s5633_s15 = scalar_lea.vmem %s5632_s6, 512 }
0x1653   : > { %p5635_p1 = scmp.lt.s32.totalorder %s5633_s15, %s5627_s8 }
0x1655   : > { %4942 = vmatpush3.bf16.msra.mxu0 %v4941_v62  ;;  %p5636_p13 = por %p5635_p1, %p5634_p12 }
0x1656   : > { %4944 = vmatprep.subr.bf16.mxu0 %v4943_v0 }
0x1657   : > { %p5637_p0 = pnand %p5636_p13, %p5630_p3 }
0x1659   : > { %4946 = vmatpush3.bf16.msra.mxu0 %v4945_v39 }
0x165a   : > { %4948 = vmatprep.subr.bf16.mxu0 %v4947_v8 }
0x165d   : > { %4950 = vmatpush3.bf16.msra.mxu0 %v4949_v13 }
0x165e   : > { %4952 = vmatprep.subr.bf16.mxu0 %v4951_v14 }
0x1661   : > { %4954 = vmatpush3.bf16.msra.mxu0 %v4953_v32 }
0x16d8   : > { %v3310_v15 = vpop.xlane.xlu0 %3309 }
0x16d9   : > { %v3313_v63 = vmul.f32 0.0078125, %v3310_v15 }
0x16db   : > { %v3315_v16 = vadd.f32 1e-05, %v3313_v63 }
0x16dc   : > { %v3312_v17 = vpop.xlane.xlu0 %3311 }
0x16dd   : > { %5279 = vrsqrt.f32 %v3315_v16  ;;  %v3314_v18 = vmul.f32 0.0078125, %v3312_v17 }
0x16df   : > { %v3316_v5 = vadd.f32 1e-05, %v3314_v18 }
0x16e1   : > { %5281 = vrsqrt.f32 %v3316_v5 }
0x16e7   : > { %v5280_v19 = vpop.eup %5279 }
0x16e8   : > { %v3319_v21 = vmul.f32 %v5280_v19, %v6539_v2  ;;  %v3492_v2 = vld [vmem:[#allocation21 + $0xf0] sm:$0xff]  ;;  %v3911_v19 = vld [vmem:[%s6719_s14] ss:$0 sm:$0xff] }
0x16e9   : > { %v4955_v34 = vpack.c.bf16 %v3493_v33, %v3492_v2 }
0x16ea   : > { %v3327_v22 = vmul.f32 %v3908_v6, %v3319_v21  ;;  %v3912_v21 = vld [vmem:[%s6720_s21] ss:$0 sm:$0xff] }
0x16eb   : > { %v5282_v24 = vpop.eup %5281  ;;  %4956 = vmatprep.subr.bf16.mxu0 %v4955_v34 }
0x16ec   : > { %v3335_v25 = vadd.f32 %v3909_v48, %v3327_v22  ;;  %v3320_v26 = vmul.f32 %v5282_v24, %v6541_v3  ;;  %4958 = vmatpush3.bf16.msra.mxu0 %v4957_v37  ;;  %v3372_v3 = vshrl.u32 %v3371_v38, 7 }
0x16ee   : > { %3446 = vmatmul.mubr.f32.vlgmr.msra.gmra.mrb[30].mxu1 %v3335_v25  ;;  %v3328_v28 = vmul.f32 %v3908_v6, %v3320_v26  ;;  %v3373_v40 = vsub.s32 0, %v3372_v3  ;;  %v3377_v41 = vsub.s32 1, %v3372_v3 }
0x16ef   : > { %3451 = vmatprep.mubr.f32.mxu1 %v5742_v27  ;;  %v3369_v27 = vld [vmem:[%s6717_s7] sm:$0x3]  ;;  %s6574_s7 = scalar_lea.hbm %s6721_s0, %s3920_s17 }
0x16f0   : > { %v3336_v29 = vadd.f32 %v3909_v48, %v3328_v28  ;;  %v3374_v42 = vrot.slane %v3369_v27, %v3373_v40  ;;  %v3378_v43 = vrot.slane %v3369_v27, %v3377_v41 }
0x16f2   : > { %3452 = vmatmul.mubr.f32.gmra.mrb[32].mxu1 %v3336_v29 }
0x17c1   : > { %v3447_v44 = vpop.f32.mrb[30].mxu1 }
0x17c2   : > { %v3448_v56 = vadd.f32 %v3447_v44, %v3374_v42  ;;  %v3449_v45 = vpop.f32.mrb[31].mxu1 }
0x17c3   : > { %v3450_v46 = vadd.f32 %v3449_v45, %v3378_v43 }
0x17c4   : > { %v3458_v51 = vmax.f32 %v3448_v56, 0.0 }
0x17c5   : > { %v3459_v49 = vmax.f32 %v3450_v46, 0.0  ;;  %v3453_v50 = vpop.f32.mrb[32].mxu1 }
0x17c6   : > { %v3454_v52 = vadd.f32 %v3453_v50, %v3374_v42  ;;  %v3455_v53 = vpop.f32.mrb[33].mxu1 }
0x17c7   : > { %v3456_v54 = vadd.f32 %v3455_v53, %v3378_v43  ;;  %3565 = vmatprep.mubr.f32.mxu0 %v3459_v49 }
0x17c8   : > { %3566 = vmatmul.mubr.f32.vlgmr.msra.gmra.mrb[18].mxu0 %v3458_v51  ;;  %v3460_v57 = vmax.f32 %v3454_v52, 0.0 }
0x17c9   : > { %v3461_v55 = vmax.f32 %v3456_v54, 0.0 }
0x17cb   : > { %3570 = vmatprep.mubr.f32.mxu0 %v3461_v55 }
0x17cc   : > { %3571 = vmatmul.mubr.f32.gmra.mrb[20].mxu0 %v3460_v57 }
0x189b   : > { %v4161_v58 = vpop.f32.mrb[18].mxu0 }
0x189c   : > { %v4162_v20 = vpop.f32.mrb[19].mxu0 }
0x189d   : > { %v4163_v59 = vadd.f32 %v4162_v20, %v4161_v58 }
0x189f   : > { %v3568_v60 = vadd.f32 %v4163_v59, %v3910_v23  ;;  %v4164_v61 = vpop.f32.mrb[20].mxu0 }
0x18a0   : > { %v4165_v62 = vpop.f32.mrb[21].mxu0 }
0x18a1   : > { %v4166_v0 = vadd.f32 %v4165_v62, %v4164_v61  ;;  %v3576_v47 = vadd.f32 %v3568_v60, %v3335_v25 }
0x18a3   : > { %v3573_v1 = vadd.f32 %v4166_v0, %v3910_v23  ;;  %3580 = vadd.xlane.f32.xlu0 %v3576_v47 }
0x18a5   : > { %v3577_v4 = vadd.f32 %v3573_v1, %v3336_v29 }
0x18a7   : > { %3582 = vadd.xlane.f32.xlu1 %v3577_v4 }
0x1930   : > { %v3581_v7 = vpop.xlane.xlu0 %3580 }
0x1931   : > { %v3584_v39 = vmul.f32 0.0078125, %v3581_v7 }
0x1933   : > { %v3586_v8 = vsub.f32 %v3576_v47, %v3584_v39 }
0x1934   : > { %v3583_v9 = vpop.xlane.xlu1 %3582 }
0x1935   : > { %v3585_v10 = vmul.f32 0.0078125, %v3583_v9  ;;  %v3588_v11 = vmul.f32 %v3586_v8, %v3586_v8 }
0x1937   : > { %v3587_v12 = vsub.f32 %v3577_v4, %v3585_v10  ;;  %3590 = vadd.xlane.f32.xlu0 %v3588_v11 }
0x1939   : > { %v3589_v13 = vmul.f32 %v3587_v12, %v3587_v12 }
0x193b   : > { %3592 = vadd.xlane.f32.xlu1 %v3589_v13 }
0x19c4   : > { %v3591_v14 = vpop.xlane.xlu0 %3590 }
0x19c5   : > { %v3594_v15 = vmul.f32 0.0078125, %v3591_v14 }
0x19c7   : > { %v3596_v63 = vadd.f32 1e-05, %v3594_v15 }
0x19c8   : > { %v3593_v16 = vpop.xlane.xlu1 %3592 }
0x19c9   : > { %5283 = vrsqrt.f32 %v3596_v63  ;;  %v3595_v17 = vmul.f32 0.0078125, %v3593_v16 }
0x19cb   : > { %v3597_v18 = vadd.f32 1e-05, %v3595_v17 }
0x19cd   : > { %5285 = vrsqrt.f32 %v3597_v18 }
0x19d3   : > { %v5284_v5 = vpop.eup %5283 }
0x19d4   : > { %v3600_v6 = vmul.f32 %v5284_v5, %v3586_v8 }
0x19d6   : > { %v3608_v48 = vmul.f32 %v3911_v19, %v3600_v6 }
0x19d7   : > { %v5286_v22 = vpop.eup %5285 }
0x19d8   : > { %v3616_v24 = vadd.f32 %v3912_v21, %v3608_v48  ;;  %v3601_v25 = vmul.f32 %v5286_v22, %v3587_v12 }
0x19da   : > { %v3609_v26 = vmul.f32 %v3911_v19, %v3601_v25  ;;  %3618 = vst [vmem:[%s832_s18] sm:$0xff] %v3616_v24 }
0x19dc   : > { %v3617_v28 = vadd.f32 %v3912_v21, %v3609_v26 }
0x19de   : > { %3619 = vst [vmem:[%s832_s18 + $0x8] sm:$0xff] %v3617_v28 }
0x19df   : > { %5640 = shalt.err (!%p5637_p0)
}
0x19e0   : > { %s5641_s12 = scalar_lea.hbm %s6574_s7, 256  ;;  %s5645_s20 = scalar_lea.hbm %s6721_s0, 512 }
0x19e1   : > { %p5642_p6 = scmp.ne.s32.totalorder %s6574_s7, %s5641_s12  ;;  %p5646_p10 = scmp.lt.u32.totalorder %s6574_s7, %s6721_s0 }
0x19e2   : > { %p5647_p5 = scmp.lt.u32.totalorder %s5645_s20, %s5641_s12  ;;  %p5649_p9 = scmp.lt.u32.totalorder %s5641_s12, %s6574_s7 }
0x19e3   : > { %p5643_p2 = pnand %p5642_p6, %p6722_p8 }
0x19e4   : > { %p5648_p7 = por %p5647_p5, %p5646_p10 }
0x19e5   : > { %p5644_p4 = pneg %p5643_p2 }
0x19e6   : > { %p5650_p11 = por %p5649_p9, %p5648_p7 }
0x19e8   : > { %p5651_p3 = pnand %p5650_p11, %p5644_p4 }
0x19ea   : > { %5654 = shalt.err (!%p5651_p3)
}
0x19eb   : > { %s5744_s17 = smov 128   ;;  %s5745_s18 = smov 8  }
0x19ec   : > { %5003 = dma.vmem_to_hbm [thread:$0]  (%p6722_p8), %s6576_s11, 256, %s6574_s7, %s3621_s4, %s5744_s17, %s5744_s17, %s5745_s18  }
0x19ed PF: > { %s3649_s26 = sand.u32 1, %s5709_s1   ;;  %p6723_p12 = scmp.ne.s32.totalorder %s6693_s25, 0 }
0x19ee   : > { %p6724_p1 = scmp.ge.s32.totalorder %s5721_s24, 2  ;;  %s3650_s30 = scalar_lea.sflag [#allocation5], %s3649_s26 }
0x19f0   : > { %p5044_p13 = pnand %p6724_p1, %p6723_p12 }
0x19f2   : > { %5704 = dma.done.wait (!%p5044_p13), %s3650_s30, 256  }
0x19f3   : > { %5706 = vsyncadd (!%p5044_p13), %s3650_s30, 4294967040  ;;  %p41_p0 = scmp.ge.s32.totalorder %s6126_s27, 4   ;;  %s6725_s1 = smov %s5713_s22 }
0x19f4   : > { %s6726_s22 = smov %s5717_s23  ;;  %s6727_s23 = smov %s6137_s2 }
0x19f5   : > { %s6728_s24 = smov %s6126_s27  ;;  %43 = sbr.rel (!%p41_p0) target bundleno = 33 (0x21), region = 205 }
0x19fc   :  { %3655 = vsyncpa [#allocation4], 1 }
0x19fd   :  { %3657 = vsyncpa [#allocation4 + $0x1], 1 }
0x19fe   :  { %3658 = vsyncpa [#allocation7], 1 }
0x19ff   :  { %3660 = vsyncpa [#allocation7 + $0x1], 1 }
0x1a00   :  { %3661 = vsyncpa [#allocation10], 1 }
0x1a01   :  { %3662 = vsyncpa [#allocation13], 1 }
0x1a02   :  { %3663 = vsyncpa [#allocation16], 1 }
0x1a03   :  { %3664 = vsyncpa [#allocation19], 1 }
0x1a04   :  { %3665 = vsyncpa [#allocation22], 1 }
0x1a05   :  { %3666 = vsyncpa [#allocation5], 1 }
0x1a06   :  { %3668 = vsyncpa [#allocation5 + $0x1], 1 }

// kernel: tpu_custom_call.1
= control target key start
LH: loop header
LB: loop body
LE: loop exit
PB: predicated region body
PF: predicated region fallthrough
CT: control target
= control target key end

     0   :  { %s6620_s0 = inlined_call_operand.hbm [shape: f32[2,16,128], index: 0, kind: input, shape index: {}]   ;;  %s6621_s1 = inlined_call_operand.hbm [shape: f32[2,16,128], index: 1, kind: input, shape index: {}]   ;;  %s6622_s2 = inlined_call_operand.hbm [shape: f32[128,128], index: 2, kind: input, shape index: {}]   ;;  %s6623_s3 = inlined_call_operand.hbm [shape: f32[128,128], index: 3, kind: input, shape index: {}]   ;;  %s6624_s4 = inlined_call_operand.hbm [shape: f32[128,128], index: 4, kind: input, shape index: {}]   ;;  %s6625_s5 = inlined_call_operand.hbm [shape: f32[128,128], index: 5, kind: input, shape index: {}]   ;;  %s6626_s6 = inlined_call_operand.vmem [shape: f32[1,128], index: 6, kind: input, shape index: {}]   ;;  %s6627_s7 = inlined_call_operand.vmem [shape: f32[1,128], index: 7, kind: input, shape index: {}]   ;;  %s6628_s8 = inlined_call_operand.hbm [shape: f32[128,128], index: 8, kind: input, shape index: {}]   ;;  %s6629_s9 = inlined_call_operand.hbm [shape: f32[128,128], index: 9, kind: input, shape index: {}]   ;;  %s6630_s10 = inlined_call_operand.hbm [shape: f32[128,128], index: 10, kind: input, shape index: {}]   ;;  %s6631_s11 = inlined_call_operand.hbm [shape: f32[128,128], index: 11, kind: input, shape index: {}]   ;;  %s6632_s12 = inlined_call_operand.vmem [shape: f32[1,128], index: 12, kind: input, shape index: {}]   ;;  %s6633_s13 = inlined_call_operand.vmem [shape: f32[1,128], index: 13, kind: input, shape index: {}]   ;;  %s6634_s14 = inlined_call_operand.hbm [shape: f32[128,256], index: 14, kind: input, shape index: {}]   ;;  %s6635_s15 = inlined_call_operand.vmem [shape: f32[1,256], index: 15, kind: input, shape index: {}]   ;;  %s6636_s16 = inlined_call_operand.hbm [shape: f32[256,128], index: 16, kind: input, shape index: {}]   ;;  %s6637_s17 = inlined_call_operand.vmem [shape: f32[1,128], index: 17, kind: input, shape index: {}]   ;;  %s6638_s18 = inlined_call_operand.vmem [shape: f32[1,128], index: 18, kind: input, shape index: {}]   ;;  %s6639_s19 = inlined_call_operand.vmem [shape: f32[1,128], index: 19, kind: input, shape index: {}]   ;;  %s6640_s20 = inlined_call_operand.hbm [shape: f32[2,16,128], index: 20, kind: output, shape index: {}]  }
   0x1   :  { %6656 = sst [smem:[#allocation33_spill]] %s6620_s0 }
   0x2   :  { %6657 = sst [smem:[#allocation34_spill]] %s6621_s1 }
   0x3   :  { %6658 = sst [smem:[#allocation35_spill]] %s6622_s2 }
   0x4   :  { %6659 = sst [smem:[#allocation36_spill]] %s6623_s3 }
   0x5   :  { %6660 = sst [smem:[#allocation37_spill]] %s6624_s4 }
   0x6   :  { %6661 = sst [smem:[#allocation38_spill]] %s6625_s5 }
   0x7   :  { %6662 = sst [smem:[#allocation39_spill]] %s6626_s6 }
   0x8   :  { %6663 = sst [smem:[#allocation40_spill]] %s6627_s7 }
   0x9   :  { %6664 = sst [smem:[#allocation41_spill]] %s6628_s8 }
   0xa   :  { %6665 = sst [smem:[#allocation42_spill]] %s6629_s9 }
   0xb   :  { %6666 = sst [smem:[#allocation43_spill]] %s6630_s10 }
   0xc   :  { %6667 = sst [smem:[#allocation44_spill]] %s6631_s11 }
   0xd   :  { %6668 = sst [smem:[#allocation45_spill]] %s6632_s12 }
   0xe   :  { %6669 = sst [smem:[#allocation46_spill]] %s6633_s13 }
   0xf   :  { %6670 = sst [smem:[#allocation47_spill]] %s6634_s14 }
  0x10   :  { %6671 = sst [smem:[#allocation48_spill]] %s6635_s15 }
  0x11   :  { %6672 = sst [smem:[#allocation49_spill]] %s6637_s17 }
  0x12   :  { %6673 = sst [smem:[#allocation50_spill]] %s6638_s18 }
  0x13   :  { %6674 = sst [smem:[#allocation51_spill]] %s6639_s19 }
  0x14   :  { %6675 = sst [smem:[#allocation52_spill]] %s6640_s20 }
  0x15   :  { %25 = vsyncpa [#allocation4], 0 }
  0x16   :  { %27 = vsyncpa [#allocation4 + $0x1], 0 }
  0x17   :  { %28 = vsyncpa [#allocation7], 0 }
  0x18   :  { %30 = vsyncpa [#allocation7 + $0x1], 0 }
  0x19   :  { %31 = vsyncpa [#allocation10], 0 }
  0x1a   :  { %32 = vsyncpa [#allocation13], 0 }
  0x1b   :  { %33 = vsyncpa [#allocation16], 0 }
  0x1c   :  { %34 = vsyncpa [#allocation19], 0 }
  0x1d   :  { %35 = vsyncpa [#allocation22], 0 }
  0x1e   :  { %36 = vsyncpa [#allocation5], 0 }
  0x1f   :  { %38 = vsyncpa [#allocation5 + $0x1], 0  ;;  %s5851_s1 = smov 0   ;;  %s5853_s22 = smov 0  }
  0x20   :  { %s5855_s23 = smov 0   ;;  %s5857_s24 = smov 0  }
  0x21 LB: > { %s5723_s2 = smov [#allocation8]   ;;  %s5872_s3 = sadd.s32 4294967295, %s5721_s24   ;;  %s5721_s24 = sphi %s5857_s24, %s6728_s24   ;;  %s5717_s23 = sphi %s5855_s23, %s6727_s23   ;;  %s5713_s22 = sphi %s5853_s22, %s6726_s22   ;;  %s5709_s1 = sphi %s5851_s1, %s6725_s1  }
  0x22   : > { %s517_s25 = sshll.u32 %s5723_s2, 4  ;;  %p3826_p0 = scmp.ge.s32.totalorder %s5721_s24, 1  ;;  %s5877_s25 = int_to_ptr.vmem [resolvable:$true] %s517_s25 }
  0x23   : > { %p6648_p1 = scmp.eq.s32.totalorder %s5872_s3, 0  ;;  %p505_p2 = scmp.lt.s32.totalorder %s5721_s24, 3 }
  0x24   : > { %s5724_s27 = smov [#allocation9]   ;;  %s5725_s29 = smov [#allocation12]  }
  0x25   : > { %p5879_p3 = pnand %p3826_p0, %p505_p2  ;;  %s530_s28 = sshll.u32 %s5724_s27, 4  ;;  %s5892_s28 = int_to_ptr.vmem [resolvable:$true] %s530_s28 }
  0x26   : > { %s556_s30 = sshll.u32 %s5725_s29, 4  ;;  %s6678_s2 = sld [smem:[#allocation35_spill]]  ;;  %s5894_s30 = int_to_ptr.vmem [resolvable:$true] %s556_s30 }
  0x27   : > { %s6676_s26 = scalar_select %p5879_p3, 1, 0 }
  0x28   : > { %p5005_p5 = pneg %p5879_p3 }
  0x2a   : > { %p5888_p6 = pnand %p5005_p5, %p6648_p1 }
  0x2c   : > { %s5287_s20 = scalar_lea.hbm %s6678_s2, 2048  ;;  %p5904_p8 = pneg %p5888_p6 }
  0x2d   : > { %p5288_p7 = scmp.ne.s32.totalorder %s6678_s2, %s5287_s20  ;;  %p5294_p11 = scmp.lt.u32.totalorder %s5287_s20, %s6678_s2 }
  0x2f   : > { %p5290_p9 = pnand %p5904_p8, %p5288_p7 }
  0x31   : > { %p5291_p10 = pneg %p5290_p9 }
  0x33   : > { %p5296_p12 = pnand %p5294_p11, %p5291_p10 }
  0x35   : > { %5299 = shalt.err (!%p5296_p12)
}
  0x36   : > { %s5300_s18 = scalar_lea.vmem %s5877_s25, 2048  ;;  %p5308_p5 = scmp.lt.s32.totalorder %s5877_s25, %s5877_s25 }
  0x37   : > { %p5301_p13 = scmp.ne.s32.totalorder %s5877_s25, %s5300_s18  ;;  %p5309_p4 = scmp.lt.s32.totalorder %s5300_s18, %s5300_s18 }
  0x39   : > { %p5303_p0 = pnand %p5301_p13, %p5904_p8  ;;  %p5310_p7 = por %p5309_p4, %p5308_p5 }
  0x3b   : > { %p5304_p2 = pneg %p5303_p0 }
  0x3d   : > { %p5311_p9 = pnand %p5310_p7, %p5304_p2 }
  0x3f   : > { %5314 = shalt.err (!%p5311_p9)
}
  0x40   : > { %s6650_s19 = smov 128   ;;  %s6652_s17 = smov 8  }
  0x41   : > { %5008 = dma.hbm_to_vmem [thread:$0]  (!%p5888_p6), %s6678_s2, 2048, %s5877_s25, [#allocation7], %s6650_s19, %s6650_s19, %s6652_s17  }
  0x42   : > { %s6680_s15 = sld [smem:[#allocation36_spill]] }
  0x48   : > { %s5315_s18 = scalar_lea.hbm %s6680_s15, 2048 }
  0x49   : > { %p5316_p4 = scmp.ne.s32.totalorder %s6680_s15, %s5315_s18  ;;  %p5322_p12 = scmp.lt.u32.totalorder %s5315_s18, %s6680_s15 }
  0x4b   : > { %p5318_p10 = pnand %p5316_p4, %p5904_p8 }
  0x4d   : > { %p5319_p11 = pneg %p5318_p10 }
  0x4f   : > { %p5324_p13 = pnand %p5322_p12, %p5319_p11 }
  0x51   : > { %5327 = shalt.err (!%p5324_p13)
}
  0x52   : > { %s5328_s25 = scalar_lea.vmem %s5892_s28, 2048  ;;  %p5336_p7 = scmp.lt.s32.totalorder %s5892_s28, %s5892_s28 }
  0x53   : > { %p5329_p0 = scmp.ne.s32.totalorder %s5892_s28, %s5328_s25  ;;  %p5337_p9 = scmp.lt.s32.totalorder %s5328_s25, %s5328_s25 }
  0x55   : > { %p5331_p2 = pnand %p5329_p0, %p5904_p8  ;;  %p5338_p4 = por %p5337_p9, %p5336_p7 }
  0x57   : > { %p5332_p5 = pneg %p5331_p2 }
  0x59   : > { %p5339_p10 = pnand %p5338_p4, %p5332_p5 }
  0x5b   : > { %5342 = shalt.err (!%p5339_p10)
}
  0x5c   : > { %5011 = dma.hbm_to_vmem [thread:$0]  (!%p5888_p6), %s6680_s15, 2048, %s5892_s28, [#allocation10], %s6650_s19, %s6650_s19, %s6652_s17  }
  0x5d   : > { %s6681_s5 = sld [smem:[#allocation38_spill]] }
  0x63   : > { %s5343_s20 = scalar_lea.hbm %s6681_s5, 2048 }
  0x64   : > { %p5344_p11 = scmp.ne.s32.totalorder %s6681_s5, %s5343_s20  ;;  %p5350_p0 = scmp.lt.u32.totalorder %s5343_s20, %s6681_s5 }
  0x66   : > { %p5346_p12 = pnand %p5344_p11, %p5904_p8 }
  0x68   : > { %p5347_p13 = pneg %p5346_p12 }
  0x6a   : > { %p5352_p2 = pnand %p5350_p0, %p5347_p13 }
  0x6c   : > { %5355 = shalt.err (!%p5352_p2)
}
  0x6d   : > { %s5356_s28 = scalar_lea.vmem %s5894_s30, 2048  ;;  %p5364_p4 = scmp.lt.s32.totalorder %s5894_s30, %s5894_s30 }
  0x6e   : > { %p5357_p5 = scmp.ne.s32.totalorder %s5894_s30, %s5356_s28  ;;  %p5365_p10 = scmp.lt.s32.totalorder %s5356_s28, %s5356_s28 }
  0x70   : > { %p5359_p7 = pnand %p5357_p5, %p5904_p8  ;;  %p5366_p11 = por %p5365_p10, %p5364_p4 }
  0x72   : > { %p5360_p9 = pneg %p5359_p7 }
  0x74   : > { %p5367_p12 = pnand %p5366_p11, %p5360_p9 }
  0x76   : > { %5370 = shalt.err (!%p5367_p12)
}
  0x77   : > { %5017 = dma.hbm_to_vmem [thread:$0]  (!%p5888_p6), %s6681_s5, 2048, %s5894_s30, [#allocation13], %s6650_s19, %s6650_s19, %s6652_s17  }
  0x78   : > { %s5728_s7 = smov [#allocation15]   ;;  %s5729_s13 = smov [#allocation18]  }
  0x79   : > { %s588_s12 = sshll.u32 %s5728_s7, 4  ;;  %s614_s20 = sshll.u32 %s5729_s13, 4  ;;  %s589_s12 = int_to_ptr.vmem [resolvable:$true] %s588_s12  ;;  %s615_s20 = int_to_ptr.vmem [resolvable:$true] %s614_s20 }
  0x7a   : > { %s6682_s9 = sld [smem:[#allocation42_spill]] }
  0x80   : > { %s5371_s29 = scalar_lea.hbm %s6682_s9, 2048 }
  0x81   : > { %p5372_p13 = scmp.ne.s32.totalorder %s6682_s9, %s5371_s29  ;;  %p5378_p5 = scmp.lt.u32.totalorder %s5371_s29, %s6682_s9 }
  0x83   : > { %p5374_p0 = pnand %p5372_p13, %p5904_p8 }
  0x85   : > { %p5375_p2 = pneg %p5374_p0 }
  0x87   : > { %p5380_p7 = pnand %p5378_p5, %p5375_p2 }
  0x89   : > { %5383 = shalt.err (!%p5380_p7)
}
  0x8a   : > { %s5384_s30 = scalar_lea.vmem %s589_s12, 2048  ;;  %p5392_p11 = scmp.lt.s32.totalorder %s589_s12, %s589_s12 }
  0x8b   : > { %p5385_p9 = scmp.ne.s32.totalorder %s589_s12, %s5384_s30  ;;  %p5393_p12 = scmp.lt.s32.totalorder %s5384_s30, %s5384_s30 }
  0x8d   : > { %p5387_p4 = pnand %p5385_p9, %p5904_p8  ;;  %p5394_p1 = por %p5393_p12, %p5392_p11 }
  0x8f   : > { %p5388_p10 = pneg %p5387_p4 }
  0x91   : > { %p5395_p3 = pnand %p5394_p1, %p5388_p10 }
  0x93   : > { %5398 = shalt.err (!%p5395_p3)
}
  0x94   : > { %5023 = dma.hbm_to_vmem [thread:$0]  (!%p5888_p6), %s6682_s9, 2048, %s589_s12, [#allocation16], %s6650_s19, %s6650_s19, %s6652_s17  }
  0x95   : > { %s6683_s11 = sld [smem:[#allocation44_spill]] }
  0x9b   : > { %s5399_s0 = scalar_lea.hbm %s6683_s11, 2048 }
  0x9c   : > { %p5400_p1 = scmp.ne.s32.totalorder %s6683_s11, %s5399_s0  ;;  %p5406_p0 = scmp.lt.u32.totalorder %s5399_s0, %s6683_s11 }
  0x9e   : > { %p5402_p3 = pnand %p5400_p1, %p5904_p8 }
  0xa0   : > { %p5403_p13 = pneg %p5402_p3 }
  0xa2   : > { %p5408_p2 = pnand %p5406_p0, %p5403_p13 }
  0xa4   : > { %5411 = shalt.err (!%p5408_p2)
}
  0xa5   : > { %s5412_s25 = scalar_lea.vmem %s615_s20, 2048  ;;  %p5420_p4 = scmp.lt.s32.totalorder %s615_s20, %s615_s20 }
  0xa6   : > { %p5413_p5 = scmp.ne.s32.totalorder %s615_s20, %s5412_s25  ;;  %p5421_p10 = scmp.lt.s32.totalorder %s5412_s25, %s5412_s25 }
  0xa8   : > { %p5415_p7 = pnand %p5413_p5, %p5904_p8  ;;  %p5422_p11 = por %p5421_p10, %p5420_p4 }
  0xaa   : > { %p5416_p9 = pneg %p5415_p7 }
  0xac   : > { %p5423_p12 = pnand %p5422_p11, %p5416_p9 }
  0xae   : > { %5426 = shalt.err (!%p5423_p12)
}
  0xaf   : > { %5029 = dma.hbm_to_vmem [thread:$0]  (!%p5888_p6), %s6683_s11, 2048, %s615_s20, [#allocation19], %s6650_s19, %s6650_s19, %s6652_s17  }
  0xb0   : > { %s5730_s2 = smov [#allocation11]   ;;  %s5731_s7 = smov [#allocation14]  }
  0xb1   : > { %s543_s6 = sshll.u32 %s5730_s2, 4  ;;  %s575_s13 = sshll.u32 %s5731_s7, 4  ;;  %s544_s6 = int_to_ptr.vmem [resolvable:$true] %s543_s6  ;;  %s576_s13 = int_to_ptr.vmem [resolvable:$true] %s575_s13 }
  0xb2   : > { %s6684_s29 = sld [smem:[#allocation37_spill]] }
  0xb8   : > { %s5427_s18 = scalar_lea.hbm %s6684_s29, 2048 }
  0xb9   : > { %p5428_p1 = scmp.ne.s32.totalorder %s6684_s29, %s5427_s18  ;;  %p5434_p0 = scmp.lt.u32.totalorder %s5427_s18, %s6684_s29 }
  0xbb   : > { %p5430_p3 = pnand %p5428_p1, %p5904_p8 }
  0xbd   : > { %p5431_p13 = pneg %p5430_p3 }
  0xbf   : > { %p5436_p2 = pnand %p5434_p0, %p5431_p13 }
  0xc1   : > { %5439 = shalt.err (!%p5436_p2)
}
  0xc2   : > { %s5440_s20 = scalar_lea.vmem %s544_s6, 2048  ;;  %p5448_p4 = scmp.lt.s32.totalorder %s544_s6, %s544_s6 }
  0xc3   : > { %p5441_p5 = scmp.ne.s32.totalorder %s544_s6, %s5440_s20  ;;  %p5449_p10 = scmp.lt.s32.totalorder %s5440_s20, %s5440_s20 }
  0xc5   : > { %p5443_p7 = pnand %p5441_p5, %p5904_p8  ;;  %p5450_p11 = por %p5449_p10, %p5448_p4 }
  0xc7   : > { %p5444_p9 = pneg %p5443_p7 }
  0xc9   : > { %p5451_p12 = pnand %p5450_p11, %p5444_p9 }
  0xcb   : > { %5454 = shalt.err (!%p5451_p12)
}
  0xcc   : > { %5014 = dma.hbm_to_vmem [thread:$0]  (!%p5888_p6), %s6684_s29, 2048, %s544_s6, [#allocation10], %s6650_s19, %s6650_s19, %s6652_s17  }
  0xcd   : > { %s6685_s8 = sld [smem:[#allocation41_spill]] }
  0xd3   : > { %s5455_s0 = scalar_lea.hbm %s6685_s8, 2048 }
  0xd4   : > { %p5456_p1 = scmp.ne.s32.totalorder %s6685_s8, %s5455_s0  ;;  %p5462_p0 = scmp.lt.u32.totalorder %s5455_s0, %s6685_s8 }
  0xd6   : > { %p5458_p3 = pnand %p5456_p1, %p5904_p8 }
  0xd8   : > { %p5459_p13 = pneg %p5458_p3 }
  0xda   : > { %p5464_p2 = pnand %p5462_p0, %p5459_p13 }
  0xdc   : > { %5467 = shalt.err (!%p5464_p2)
}
  0xdd   : > { %s5468_s12 = scalar_lea.vmem %s576_s13, 2048  ;;  %p5476_p4 = scmp.lt.s32.totalorder %s576_s13, %s576_s13 }
  0xde   : > { %p5469_p5 = scmp.ne.s32.totalorder %s576_s13, %s5468_s12  ;;  %p5477_p10 = scmp.lt.s32.totalorder %s5468_s12, %s5468_s12 }
  0xe0   : > { %p5471_p7 = pnand %p5469_p5, %p5904_p8  ;;  %p5478_p11 = por %p5477_p10, %p5476_p4 }
  0xe2   : > { %p5472_p9 = pneg %p5471_p7 }
  0xe4   : > { %p5479_p12 = pnand %p5478_p11, %p5472_p9 }
  0xe6   : > { %5482 = shalt.err (!%p5479_p12)
}
  0xe7   : > { %5020 = dma.hbm_to_vmem [thread:$0]  (!%p5888_p6), %s6685_s8, 2048, %s576_s13, [#allocation13], %s6650_s19, %s6650_s19, %s6652_s17  }
  0xe8   : > { %s5732_s5 = smov [#allocation17]   ;;  %s5733_s2 = smov [#allocation20]  }
  0xe9   : > { %s601_s30 = sshll.u32 %s5732_s5, 4  ;;  %s633_s7 = sshll.u32 %s5733_s2, 4  ;;  %s602_s30 = int_to_ptr.vmem [resolvable:$true] %s601_s30  ;;  %s634_s7 = int_to_ptr.vmem [resolvable:$true] %s633_s7 }
  0xea   : > { %s6686_s10 = sld [smem:[#allocation43_spill]] }
  0xf0   : > { %s5483_s18 = scalar_lea.hbm %s6686_s10, 2048 }
  0xf1   : > { %p5484_p1 = scmp.ne.s32.totalorder %s6686_s10, %s5483_s18  ;;  %p5490_p0 = scmp.lt.u32.totalorder %s5483_s18, %s6686_s10 }
  0xf3   : > { %p5486_p3 = pnand %p5484_p1, %p5904_p8 }
  0xf5   : > { %p5487_p13 = pneg %p5486_p3 }
  0xf7   : > { %p5492_p2 = pnand %p5490_p0, %p5487_p13 }
  0xf9   : > { %5495 = shalt.err (!%p5492_p2)
}
  0xfa   : > { %s5496_s13 = scalar_lea.vmem %s602_s30, 2048  ;;  %p5504_p4 = scmp.lt.s32.totalorder %s602_s30, %s602_s30 }
  0xfb   : > { %p5497_p5 = scmp.ne.s32.totalorder %s602_s30, %s5496_s13  ;;  %p5505_p10 = scmp.lt.s32.totalorder %s5496_s13, %s5496_s13 }
  0xfd   : > { %p5499_p7 = pnand %p5497_p5, %p5904_p8  ;;  %p5506_p11 = por %p5505_p10, %p5504_p4 }
  0xff   : > { %p5500_p9 = pneg %p5499_p7 }
 0x101   : > { %p5507_p12 = pnand %p5506_p11, %p5500_p9 }
 0x103   : > { %5510 = shalt.err (!%p5507_p12)
}
 0x104   : > { %5026 = dma.hbm_to_vmem [thread:$0]  (!%p5888_p6), %s6686_s10, 2048, %s602_s30, [#allocation16], %s6650_s19, %s6650_s19, %s6652_s17  }
 0x105   : > { %s6687_s14 = sld [smem:[#allocation47_spill]] }
 0x10b   : > { %s5511_s21 = scalar_lea.hbm %s6687_s14, 4096 }
 0x10c   : > { %p5512_p1 = scmp.ne.s32.totalorder %s6687_s14, %s5511_s21  ;;  %p5518_p0 = scmp.lt.u32.totalorder %s5511_s21, %s6687_s14 }
 0x10e   : > { %p5514_p3 = pnand %p5512_p1, %p5904_p8 }
 0x110   : > { %p5515_p13 = pneg %p5514_p3 }
 0x112   : > { %p5520_p2 = pnand %p5518_p0, %p5515_p13 }
 0x114   : > { %5523 = shalt.err (!%p5520_p2)
}
 0x115   : > { %s5524_s6 = scalar_lea.vmem %s634_s7, 4096  ;;  %p5532_p4 = scmp.lt.s32.totalorder %s634_s7, %s634_s7 }
 0x116   : > { %p5525_p5 = scmp.ne.s32.totalorder %s634_s7, %s5524_s6  ;;  %p5533_p10 = scmp.lt.s32.totalorder %s5524_s6, %s5524_s6 }
 0x118   : > { %p5527_p7 = pnand %p5525_p5, %p5904_p8  ;;  %p5534_p11 = por %p5533_p10, %p5532_p4 }
 0x11a   : > { %p5528_p9 = pneg %p5527_p7 }
 0x11c   : > { %p5535_p12 = pnand %p5534_p11, %p5528_p9 }
 0x11e   : > { %5538 = shalt.err (!%p5535_p12)
}
 0x11f   : > { %s5734_s30 = smov 256   ;;  %s5735_s13 = smov 16  }
 0x120   : > { %5032 = dma.hbm_to_vmem [thread:$0]  (!%p5888_p6), %s6687_s14, 4096, %s634_s7, [#allocation19], %s5734_s30, %s5734_s30, %s5735_s13  }
 0x121   : > { %s5736_s2 = smov [#allocation21]   ;;  %s5539_s28 = scalar_lea.hbm %s6636_s16, 4096 }
 0x122   : > { %s649_s0 = sshll.u32 %s5736_s2, 4  ;;  %p5540_p1 = scmp.ne.s32.totalorder %s6636_s16, %s5539_s28  ;;  %s650_s0 = int_to_ptr.vmem [resolvable:$true] %s649_s0 }
 0x123   : > { %p5546_p0 = scmp.lt.u32.totalorder %s5539_s28, %s6636_s16 }
 0x124   : > { %p5542_p3 = pnand %p5540_p1, %p5904_p8 }
 0x126   : > { %p5543_p13 = pneg %p5542_p3 }
 0x128   : > { %p5548_p2 = pnand %p5546_p0, %p5543_p13 }
 0x12a   : > { %5551 = shalt.err (!%p5548_p2)
}
 0x12b   : > { %s5552_s7 = scalar_lea.vmem %s650_s0, 4096  ;;  %p5560_p4 = scmp.lt.s32.totalorder %s650_s0, %s650_s0 }
 0x12c   : > { %p5553_p5 = scmp.ne.s32.totalorder %s650_s0, %s5552_s7  ;;  %p5561_p10 = scmp.lt.s32.totalorder %s5552_s7, %s5552_s7 }
 0x12e   : > { %p5555_p7 = pnand %p5553_p5, %p5904_p8  ;;  %p5562_p11 = por %p5561_p10, %p5560_p4 }
 0x130   : > { %p5556_p9 = pneg %p5555_p7 }
 0x132   : > { %p5563_p12 = pnand %p5562_p11, %p5556_p9 }
 0x134   : > { %5566 = shalt.err (!%p5563_p12)
}
 0x135   : > { %s6688_s30 = smov 128   ;;  %s3825_s4 = sadd.s32 4294967294, %s5721_s24  }
 0x136   : > { %5035 = dma.hbm_to_vmem [thread:$0]  (!%p5888_p6), %s6636_s16, 4096, %s650_s0, [#allocation22], %s6688_s30, %s6688_s30, %s6652_s17  }
 0x137   : > { %s6126_s27 = sadd.s32 1, %s5721_s24   ;;  %s51_s5 = sadd.s32 1, %s5717_s23 }
 0x138   : > { %s48_s20 = ssub.s32 %s5721_s24, %s6126_s27  ;;  %p58_p1 = scmp.ne.s32.totalorder %s5717_s23, %s5713_s22 }
 0x139   : > { %p49_p8 = scmp.eq.s32.totalorder %s48_s20, 0  ;;  %p59_p3 = scmp.eq.s32.totalorder %s5721_s24, 0 }
 0x13a   : > { %p64_p13 = scmp.ne.s32.totalorder %s5713_s22, %s5709_s1  ;;  %p6690_p2 = scmp.eq.s32.totalorder %s5872_s3, 0 }
 0x13b   : > { %s6137_s2 = scalar_select %p49_p8, %s5717_s23, %s51_s5  }
 0x13c   : > { %p6139_p0 = por %p59_p3, %p58_p1  ;;  %p6145_p6 = por %p6690_p2, %p64_p13 }
 0x13d   : > { %p492_p5 = scmp.eq.s32.totalorder %s5872_s3, 1  ;;  %p498_p7 = scmp.eq.s32.totalorder %s3825_s4, 1 }
 0x13e   : > { %p5057_p9 = scmp.lt.s32.totalorder %s5721_s24, 2  ;;  %s672_s18 = sand.u32 1, %s5717_s23  }
 0x13f   : > { %p6152_p4 = por %p492_p5, %p58_p1  ;;  %p6156_p10 = por %p498_p7, %p64_p13 }
 0x140   : > { %s3838_s12 = sshll.u32 %s672_s18, 4  ;;  %s3918_s6 = sshll.u32 %s5721_s24, 8 }
 0x141   : > { %s6692_s28 = scalar_select %p6152_p4, 1, 0 }
 0x142   : > { %s6693_s25 = scalar_select %p6156_p10, 1, 0 }
 0x143   : > { %s6694_s13 = sld [smem:[#allocation33_spill]]  ;;  %s676_s4 = scalar_lea.vmem [#allocation3], %s3838_s12 }
 0x144   : > { %s683_s5 = sshll.u32 %s676_s4, 4  ;;  %p6170_p11 = pnand %p5057_p9, %p6139_p0  ;;  %s6166_s5 = int_to_ptr.vmem [resolvable:$true] %s683_s5 }
 0x145   : > { %s6696_s10 = sld [smem:[#allocation34_spill]]  ;;  %s697_s19 = scalar_lea.vmem [#allocation6], %s3838_s12 }
 0x146   : > { %s6179_s11 = sshll.u32 %s697_s19, 4  ;;  %s6181_s14 = scalar_lea.sflag [#allocation4], %s672_s18  ;;  %s6213_s11 = int_to_ptr.vmem [resolvable:$true] %s6179_s11 }
 0x147   : > { %p5569_p8 = pneg %p6170_p11 }
 0x149   : > { %s6164_s20 = scalar_lea.hbm %s6694_s13, %s3918_s6  ;;  %s5572_s8 = scalar_lea.hbm %s6694_s13, 512 }
 0x14a   : > { %s5567_s4 = scalar_lea.hbm %s6164_s20, 256  ;;  %p5573_p13 = scmp.lt.u32.totalorder %s6164_s20, %s6694_s13 }
 0x14b   : > { %s6177_s7 = scalar_lea.hbm %s6696_s10, %s3918_s6  ;;  %p5568_p12 = scmp.ne.s32.totalorder %s6164_s20, %s5567_s4 }
 0x14c   : > { %p5574_p0 = scmp.lt.u32.totalorder %s5572_s8, %s5567_s4  ;;  %p5576_p5 = scmp.lt.u32.totalorder %s5567_s4, %s6164_s20 }
 0x14d   : > { %p5570_p1 = pnand %p5569_p8, %p5568_p12 }
 0x14e   : > { %p5575_p2 = por %p5574_p0, %p5573_p13 }
 0x14f   : > { %p5571_p3 = pneg %p5570_p1 }
 0x150   : > { %p5577_p7 = por %p5576_p5, %p5575_p2 }
 0x152   : > { %p5578_p9 = pnand %p5577_p7, %p5571_p3 }
 0x154   : > { %5581 = shalt.err (!%p5578_p9)
}
 0x155   : > { %s5582_s18 = scalar_lea.vmem %s6166_s5, 256  ;;  %s5737_s15 = smov [#allocation3]  }
 0x156   : > { %p5583_p12 = scmp.ne.s32.totalorder %s6166_s5, %s5582_s18  ;;  %s5587_s12 = sshll.u32 %s5737_s15, 4  ;;  %s5588_s12 = int_to_ptr.vmem [resolvable:$false] %s5587_s12 }
 0x157   : > { %s5589_s19 = scalar_lea.vmem %s5588_s12, 512  ;;  %p5590_p4 = scmp.lt.s32.totalorder %s6166_s5, %s5588_s12 }
 0x158   : > { %p5585_p1 = pnand %p5583_p12, %p5569_p8  ;;  %p5591_p13 = scmp.lt.s32.totalorder %s5589_s19, %s5582_s18 }
 0x15a   : > { %p5586_p10 = pneg %p5585_p1  ;;  %p5592_p0 = por %p5591_p13, %p5590_p4 }
 0x15c   : > { %p5593_p2 = pnand %p5592_p0, %p5586_p10 }
 0x15e   : > { %5596 = shalt.err (!%p5593_p2)
}
 0x15f   : > { %s6697_s4 = smov 8   ;;  %s693_s21 = sand.u32 1, %s5721_s24  }
 0x160   : > { %5039 = dma.hbm_to_vmem [thread:$0]  (!%p6170_p11), %s6164_s20, 256, %s6166_s5, %s6181_s14, %s6688_s30, %s6688_s30, %s6697_s4  }
 0x161   : > { %s6216_s8 = scalar_lea.sflag [#allocation7], %s693_s21  ;;  %s5597_s9 = scalar_lea.hbm %s6177_s7, 256 }
 0x162   : > { %p5598_p4 = scmp.ne.s32.totalorder %s6177_s7, %s5597_s9  ;;  %s5602_s15 = scalar_lea.hbm %s6696_s10, 512 }
 0x163   : > { %p5603_p5 = scmp.lt.u32.totalorder %s6177_s7, %s6696_s10  ;;  %p5604_p7 = scmp.lt.u32.totalorder %s5602_s15, %s5597_s9 }
 0x164   : > { %p5600_p10 = pnand %p5598_p4, %p5569_p8  ;;  %p5606_p12 = scmp.lt.u32.totalorder %s5597_s9, %s6177_s7 }
 0x165   : > { %p5605_p9 = por %p5604_p7, %p5603_p5 }
 0x166   : > { %p5601_p3 = pneg %p5600_p10 }
 0x167   : > { %p5607_p1 = por %p5606_p12, %p5605_p9 }
 0x169   : > { %p5608_p13 = pnand %p5607_p1, %p5601_p3 }
 0x16b   : > { %5611 = shalt.err (!%p5608_p13)
}
 0x16c   : > { %s5612_s14 = scalar_lea.vmem %s6213_s11, 256  ;;  %s5738_s20 = smov [#allocation6]  }
 0x16d   : > { %p5613_p0 = scmp.ne.s32.totalorder %s6213_s11, %s5612_s14  ;;  %s5617_s5 = sshll.u32 %s5738_s20, 4  ;;  %s5618_s5 = int_to_ptr.vmem [resolvable:$false] %s5617_s5 }
 0x16e   : > { %s5619_s21 = scalar_lea.vmem %s5618_s5, 512  ;;  %p5620_p10 = scmp.lt.s32.totalorder %s6213_s11, %s5618_s5 }
 0x16f   : > { %p5615_p2 = pnand %p5613_p0, %p5569_p8  ;;  %p5621_p5 = scmp.lt.s32.totalorder %s5619_s21, %s5612_s14 }
 0x171   : > { %p5616_p4 = pneg %p5615_p2  ;;  %p5622_p7 = por %p5621_p5, %p5620_p10 }
 0x173   : > { %p5623_p9 = pnand %p5622_p7, %p5616_p4 }
 0x175   : > { %5626 = shalt.err (!%p5623_p9)
}
 0x176   : > { %5042 = dma.hbm_to_vmem [thread:$0]  (!%p6170_p11), %s6177_s7, 256, %s6213_s11, %s6216_s8, %s6688_s30, %s6688_s30, %s6697_s4  }
 0x177   : > { %p6698_p8 = scmp.ne.s32.totalorder %s6676_s26, 0 }
 0x178   : > { %s6248_s9 = sand.u32 (!%p6698_p8), 1, %s5713_s22  }
 0x179   : > { %716 = sbr.rel (%p6698_p8) target bundleno = 6637 (0x19ed), region = 100  ;;  %s6251_s6 = sshll.u32 (!%p6698_p8), %s6248_s9, 4 }
 0x17a   : > { %s719_s17 = scalar_lea.sflag (!%p6698_p8), [#allocation4], %s6248_s9  ;;  %s722_s18 = scalar_lea.vmem (!%p6698_p8), [#allocation3], %s6251_s6 }
 0x180   : > { %5672 = dma.done.wait (%p6145_p6), %s719_s17, 256  }
 0x181   : > { %5674 = vsyncadd (%p6145_p6), %s719_s17, 4294967040  ;;  %s727_s11 = sand.u32 1, %s5872_s3   ;;  %s731_s30 = scalar_lea.vmem [#allocation6], %s6251_s6 }
 0x182   : > { %s728_s26 = scalar_lea.sflag [#allocation7], %s727_s11 }
 0x183   : > { %5676 = dma.done.wait (%p6145_p6), %s728_s26, 256  }
 0x184   : > { %5678 = vsyncadd (%p6145_p6), %s728_s26, 4294967040  ;;  %p6699_p11 = scmp.eq.s32.totalorder %s5872_s3, 0 }
 0x186   : > { %5680 = dma.done.wait (%p6699_p11), [#allocation7], 2048   ;;  %p6700_p3 = pmov %p6699_p11 }
 0x188   : > { %5682 = vsyncadd (%p6700_p3), [#allocation7], 4294965248  ;;  %p6701_p12 = pmov %p6700_p3 }
 0x189   : > { %p6702_p1 = pmov %p6700_p3 }
 0x18a   : > { %5684 = dma.done.wait (%p6701_p12), [#allocation10], 4096  }
 0x18b   : > { %5686 = vsyncadd (%p6702_p1), [#allocation10], 4294963200  ;;  %p6703_p13 = pmov %p6702_p1 }
 0x18c   : > { %p6704_p0 = pmov %p6702_p1 }
 0x18d   : > { %5688 = dma.done.wait (%p6703_p13), [#allocation13], 4096  }
 0x18e   : > { %5690 = vsyncadd (%p6704_p0), [#allocation13], 4294963200  ;;  %p6705_p6 = pmov %p6704_p0 }
 0x18f   : > { %p6706_p2 = pmov %p6704_p0 }
 0x190   : > { %5692 = dma.done.wait (%p6705_p6), [#allocation16], 4096  }
 0x191   : > { %5694 = vsyncadd (%p6706_p2), [#allocation16], 4294963200  ;;  %p6707_p4 = pmov %p6704_p0 }
 0x192   : > { %p6708_p10 = pmov %p6704_p0 }
 0x193   : > { %5696 = dma.done.wait (%p6707_p4), [#allocation19], 6144  }
 0x194   : > { %5698 = vsyncadd (%p6708_p10), [#allocation19], 4294961152  ;;  %p6709_p5 = pmov %p6704_p0 }
 0x195   : > { %p6710_p7 = pmov %p6704_p0 }
 0x196   : > { %5700 = dma.done.wait (%p6709_p5), [#allocation22], 4096  }
 0x197   : > { %5702 = vsyncadd (%p6710_p7), [#allocation22], 4294963200  ;;  %v853_v0 = vld [vmem:[#allocation9] sm:$0xff]  ;;  %v854_v1 = vld [vmem:[#allocation9 + $0x8] sm:$0xff]  ;;  %vm1128_vm0 = vcmask 261120   ;;  %s5739_s0 = smov 96  }
 0x198   : > { %v855_v2 = vld [vmem:[#allocation9 + $0x10] sm:$0xff]  ;;  %v4591_v3 = vpack.c.bf16 %v854_v1, %v853_v0  ;;  %v856_v4 = vld [vmem:[#allocation9 + $0x18] sm:$0xff]  ;;  %v837_v5 = vld [vmem:[#allocation8] sm:$0xff]  ;;  %vm1216_vm2 = vcmask 130048   ;;  %s5740_s7 = smov 32   ;;  %s5741_s4 = smov 64  }
 0x199   : > { %v838_v6 = vld [vmem:[#allocation8 + $0x8] sm:$0xff]  ;;  %v4595_v7 = vpack.c.bf16 %v856_v4, %v855_v2  ;;  %v857_v9 = vld [vmem:[#allocation9 + $0x20] sm:$0xff]  ;;  %v839_v11 = vld [vmem:[#allocation8 + $0x10] sm:$0xff]  ;;  %vm1971_vm3 = vcmask 523264   ;;  %vm1974_vm4 = vcmask 785408   ;;  %s6713_s12 = sld [smem:[#allocation39_spill]] }
 0x19a   : > { %v4559_v8 = vpack.c.bf16 %v838_v6, %v837_v5  ;;  %v858_v10 = vld [vmem:[#allocation9 + $0x28] sm:$0xff]  ;;  %4592 = vmatprep.subr.bf16.mxu1 %v4591_v3  ;;  %v840_v12 = vld [vmem:[#allocation8 + $0x18] sm:$0xff]  ;;  %v841_v14 = vld [vmem:[#allocation8 + $0x20] sm:$0xff]  ;;  %s6714_s20 = sld [smem:[#allocation40_spill]]  ;;  %s6715_s17 = sld [smem:[#allocation45_spill]] }
 0x19b   : > { %4594 = vmatpush3.bf16.msra.mxu1 %v4591_v3  ;;  %v4563_v13 = vpack.c.bf16 %v840_v12, %v839_v11  ;;  %v842_v15 = vld [vmem:[#allocation8 + $0x28] sm:$0xff]  ;;  %v4599_v16 = vpack.c.bf16 %v858_v10, %v857_v9  ;;  %v859_v17 = vld [vmem:[#allocation9 + $0x30] sm:$0xff]  ;;  %v860_v18 = vld [vmem:[#allocation9 + $0x38] sm:$0xff]  ;;  %s6716_s26 = sld [smem:[#allocation46_spill]]  ;;  %s6718_s15 = sld [smem:[#allocation49_spill]] }
 0x19c   : > { %4560 = vmatprep.subr.bf16.mxu0 %v4559_v8  ;;  %4596 = vmatprep.subr.bf16.mxu1 %v4595_v7  ;;  %v4567_v19 = vpack.c.bf16 %v842_v15, %v841_v14  ;;  %v843_v20 = vld [vmem:[#allocation8 + $0x30] sm:$0xff]  ;;  %v844_v21 = vld [vmem:[#allocation8 + $0x38] sm:$0xff]  ;;  %v4603_v22 = vpack.c.bf16 %v860_v18, %v859_v17  ;;  %v861_v23 = vld [vmem:[#allocation9 + $0x40] sm:$0xff]  ;;  %s6719_s14 = sld [smem:[#allocation50_spill]]  ;;  %s6720_s21 = sld [smem:[#allocation51_spill]] }
 0x19d   : > { %4562 = vmatpush3.bf16.msra.mxu0 %v4559_v8  ;;  %v862_v24 = vld [vmem:[#allocation9 + $0x48] sm:$0xff]  ;;  %v4571_v25 = vpack.c.bf16 %v844_v21, %v843_v20  ;;  %v845_v26 = vld [vmem:[#allocation8 + $0x40] sm:$0xff]  ;;  %v863_v29 = vld [vmem:[#allocation9 + $0x50] sm:$0xff]  ;;  %p6722_p8 = scmp.ne.s32.totalorder %s6692_s28, 0 }
 0x19e   : > { %4564 = vmatprep.subr.bf16.mxu0 %v4563_v13  ;;  %v846_v27 = vld [vmem:[#allocation8 + $0x48] sm:$0xff]  ;;  %v4607_v28 = vpack.c.bf16 %v862_v24, %v861_v23  ;;  %v864_v30 = vld [vmem:[#allocation9 + $0x58] sm:$0xff]  ;;  %v847_v32 = vld [vmem:[#allocation8 + $0x50] sm:$0xff] }
 0x19f   : > { %4598 = vmatpush3.bf16.msra.mxu1 %v4595_v7  ;;  %v4575_v31 = vpack.c.bf16 %v846_v27, %v845_v26  ;;  %v848_v33 = vld [vmem:[#allocation8 + $0x58] sm:$0xff]  ;;  %v4611_v34 = vpack.c.bf16 %v864_v30, %v863_v29  ;;  %v865_v35 = vld [vmem:[#allocation9 + $0x60] sm:$0xff]  ;;  %v866_v36 = vld [vmem:[#allocation9 + $0x68] sm:$0xff] }
 0x1a0   : > { %4600 = vmatprep.subr.bf16.mxu1 %v4599_v16  ;;  %v4579_v37 = vpack.c.bf16 %v848_v33, %v847_v32  ;;  %v849_v38 = vld [vmem:[#allocation8 + $0x60] sm:$0xff]  ;;  %v850_v39 = vld [vmem:[#allocation8 + $0x68] sm:$0xff]  ;;  %v4615_v40 = vpack.c.bf16 %v866_v36, %v865_v35  ;;  %v867_v41 = vld [vmem:[#allocation9 + $0x70] sm:$0xff] }
 0x1a1   : > { %4566 = vmatpush3.bf16.msra.mxu0 %v4563_v13  ;;  %v868_v42 = vld [vmem:[#allocation9 + $0x78] sm:$0xff]  ;;  %v4583_v43 = vpack.c.bf16 %v850_v39, %v849_v38  ;;  %v851_v44 = vld [vmem:[#allocation8 + $0x70] sm:$0xff]  ;;  %v869_v49 = vld [vmem:[#allocation11] sm:$0xff] }
 0x1a2   : > { %4568 = vmatprep.subr.bf16.mxu0 %v4567_v19  ;;  %v852_v45 = vld [vmem:[#allocation8 + $0x78] sm:$0xff]  ;;  %v4619_v46 = vpack.c.bf16 %v868_v42, %v867_v41  ;;  %v870_v50 = vld [vmem:[#allocation11 + $0x8] sm:$0xff]  ;;  %v871_v51 = vld [vmem:[#allocation11 + $0x10] sm:$0xff] }
 0x1a3   : > { %4602 = vmatpush3.bf16.msra.mxu1 %v4599_v16  ;;  %v4587_v47 = vpack.c.bf16 %v852_v45, %v851_v44  ;;  %v6291_v48 = vld [vmem:[%s722_s18 + $0x8] sm:$0xff]  ;;  %v4623_v52 = vpack.c.bf16 %v870_v50, %v869_v49  ;;  %v873_v55 = vld [vmem:[#allocation11 + $0x20] sm:$0xff]  ;;  %v875_v58 = vld [vmem:[#allocation11 + $0x30] sm:$0xff] }
 0x1a4   : > { %4604 = vmatprep.subr.bf16.mxu1 %v4603_v22  ;;  %v872_v53 = vld [vmem:[#allocation11 + $0x18] sm:$0xff]  ;;  %v874_v56 = vld [vmem:[#allocation11 + $0x28] sm:$0xff]  ;;  %vm6297_vm1 = vmpackc.low %vm1128_vm0, %vm1128_vm0 }
 0x1a5   : > { %4570 = vmatpush3.bf16.msra.mxu0 %v4567_v19  ;;  %v4627_v54 = vpack.c.bf16 %v872_v53, %v871_v51  ;;  %v4631_v57 = vpack.c.bf16 %v874_v56, %v873_v55  ;;  %v876_v59 = vld [vmem:[#allocation11 + $0x38] sm:$0xff]  ;;  %v877_v1 = vld [vmem:[#allocation11 + $0x40] sm:$0xff]  ;;  %v878_v2 = vld [vmem:[#allocation11 + $0x48] sm:$0xff] }
 0x1a6   : > { %4572 = vmatprep.subr.bf16.mxu0 %v4571_v25  ;;  %v4635_v61 = vpack.c.bf16 %v876_v59, %v875_v58  ;;  %v4639_v7 = vpack.c.bf16 %v878_v2, %v877_v1  ;;  %v879_v8 = vld [vmem:[#allocation11 + $0x50] sm:$0xff]  ;;  %v880_v9 = vld [vmem:[#allocation11 + $0x58] sm:$0xff]  ;;  %v881_v11 = vld [vmem:[#allocation11 + $0x60] sm:$0xff] }
 0x1a7   : > { %4606 = vmatpush3.bf16.msra.mxu1 %v4603_v22  ;;  %v4643_v10 = vpack.c.bf16 %v880_v9, %v879_v8  ;;  %v882_v12 = vld [vmem:[#allocation11 + $0x68] sm:$0xff]  ;;  %v883_v15 = vld [vmem:[#allocation11 + $0x70] sm:$0xff]  ;;  %v884_v16 = vld [vmem:[#allocation11 + $0x78] sm:$0xff] }
 0x1a8   : > { %4608 = vmatprep.subr.bf16.mxu1 %v4607_v28  ;;  %v4647_v14 = vpack.c.bf16 %v882_v12, %v881_v11  ;;  %v4651_v17 = vpack.c.bf16 %v884_v16, %v883_v15 }
 0x1a9   : > { %4574 = vmatpush3.bf16.msra.mxu0 %v4571_v25 }
 0x1aa   : > { %4576 = vmatprep.subr.bf16.mxu0 %v4575_v31 }
 0x1ab   : > { %4610 = vmatpush3.bf16.msra.mxu1 %v4607_v28 }
 0x1ac   : > { %4612 = vmatprep.subr.bf16.mxu1 %v4611_v34 }
 0x1ad   : > { %4578 = vmatpush3.bf16.msra.mxu0 %v4575_v31 }
 0x1ae   : > { %4580 = vmatprep.subr.bf16.mxu0 %v4579_v37 }
 0x1af   : > { %4614 = vmatpush3.bf16.msra.mxu1 %v4611_v34 }
 0x1b0   : > { %4616 = vmatprep.subr.bf16.mxu1 %v4615_v40 }
 0x1b1   : > { %4582 = vmatpush3.bf16.msra.mxu0 %v4579_v37 }
 0x1b2   : > { %4584 = vmatprep.subr.bf16.mxu0 %v4583_v43 }
 0x1b3   : > { %4618 = vmatpush3.bf16.msra.mxu1 %v4615_v40 }
 0x1b4   : > { %4620 = vmatprep.subr.bf16.mxu1 %v4619_v46 }
 0x1b5   : > { %4586 = vmatpush3.bf16.msra.mxu0 %v4583_v43 }
 0x1b6   : > { %4588 = vmatprep.subr.bf16.mxu0 %v4587_v47 }
 0x1b7   : > { %4622 = vmatpush3.bf16.msra.mxu1 %v4619_v46 }
 0x1b9   : > { %4590 = vmatpush3.bf16.msra.mxu0 %v4587_v47 }
 0x1ba   : > { %4235 = vmatmul.mubr.f32.vlgmr.msra.gmra.mrb[0].mxu1 %v6291_v48  ;;  %4624 = vmatprep.subr.bf16.mxu0 %v4623_v52 }
 0x1bc   : > { %4200 = vmatmul.mubr.f32.vlgmr.msra.gmra.mrb[0].mxu0 %v6291_v48 }
 0x1bd   : > { %4626 = vmatpush3.bf16.msra.mxu0 %v4623_v52 }
 0x1be   : > { %4628 = vmatprep.subr.bf16.mxu0 %v4627_v54 }
 0x1c1   : > { %4630 = vmatpush3.bf16.msra.mxu0 %v4627_v54 }
 0x1c2   : > { %4632 = vmatprep.subr.bf16.mxu0 %v4631_v57 }
 0x1c5   : > { %4634 = vmatpush3.bf16.msra.mxu0 %v4631_v57 }
 0x1c6   : > { %4636 = vmatprep.subr.bf16.mxu0 %v4635_v61 }
 0x1c9   : > { %4638 = vmatpush3.bf16.msra.mxu0 %v4635_v61 }
 0x1ca   : > { %4640 = vmatprep.subr.bf16.mxu0 %v4639_v7 }
 0x1cd   : > { %4642 = vmatpush3.bf16.msra.mxu0 %v4639_v7 }
 0x1ce   : > { %4644 = vmatprep.subr.bf16.mxu0 %v4643_v10 }
 0x1d1   : > { %4646 = vmatpush3.bf16.msra.mxu0 %v4643_v10 }
 0x1d2   : > { %4648 = vmatprep.subr.bf16.mxu0 %v4647_v14 }
 0x1d5   : > { %4650 = vmatpush3.bf16.msra.mxu0 %v4647_v14 }
 0x1d6   : > { %4652 = vmatprep.subr.bf16.mxu0 %v4651_v17 }
 0x1d9   : > { %4654 = vmatpush3.bf16.msra.mxu0 %v4651_v17 }
 0x1dc   : > { %4270 = vmatmul.mubr.f32.vlgmr.msra.gmra.mrb[2].mxu0 %v6291_v48 }
 0x28d   : > { %v4236_v60 = vpop.f32.mrb[0].mxu1 }
 0x28e   : > { %v1044_v62 = vpop.f32.mrb[1].mxu1 }
 0x28f   : > { %v4201_v0 = vpop.f32.mrb[0].mxu0  ;;  %v4655_v3 = vpack.c.bf16 %v4236_v60, %v1044_v62  ;;  %v6301_v5 = vpack.i.bf16 %v4236_v60, %v1044_v62 }
 0x290   : > { %v967_v4 = vpop.f32.mrb[1].mxu0  ;;  %v6313_v13 = vmul.f32 0.17677669, %v4201_v0 }
 0x291   : > { %v6303_v6 = vmul.f32 0.17677669, %v967_v4  ;;  %4657 = vmatprep.subr.msk.bf16.mxu1 %vm6297_vm1, %v4655_v3 }
 0x292   : > { %4660 = vmatpush3.bf16.xpose.msk.msra.mxu1 %vm6297_vm1, %v4655_v3 }
 0x293   : > { %1322 = vrot.lane.b32.xlu1 %v6303_v6, %s5739_s0  ;;  %4276 = vmatprep.mubr.msk.f32.mxu1 %vm1128_vm0, %v6303_v6 }
 0x299   : > { %4277 = vmatmul.mubr.msk.f32.vlgmr.msra.gmra.mrb[2].mxu1 %vm1128_vm0, %v6313_v13 }
 0x2af   : > { %v4271_v22 = vpop.f32.mrb[2].mxu0 }
 0x2b0   : > { %v1119_v23 = vpop.f32.mrb[3].mxu0 }
 0x2b1   : > { %v4661_v24 = vpack.c.bf16 %v4271_v22, %v1119_v23  ;;  %v6326_v39 = vpack.i.bf16 %v4271_v22, %v1119_v23 }
 0x2b3   : > { %4662 = vmatprep.subr.bf16.mxu1 %v4661_v24 }
 0x2b4   : > { %4664 = vmatpush3.bf16.msra.mxu1 %v4661_v24 }
 0x305   : > { %v1323_v40 = vpop.permute.xlu1 %1322 }
 0x36c   : > { %v4278_v18 = vpop.f32.mrb[2].mxu1 }
 0x36d   : > { %v1207_v19 = vpop.f32.mrb[3].mxu1  ;;  %v1220_v21 = vsel %vm1216_vm2, %v4278_v18, -inf }
 0x36e   : > { %v1217_v20 = vsel %vm1216_vm2, %v1207_v19, -inf }
 0x36f   : > { %1218 = vmax.xlane.f32.xlu0 %v1217_v20 }
 0x373   : > { %1221 = vmax.xlane.f32.xlu0 %v1220_v21 }
 0x389   : > { %5122 = vrot.lane.b32.xlu0 %v6301_v5, %s5739_s0 }
 0x3fc   : > { %v1219_v25 = vpop.xlane.xlu0 %1218 }
 0x3fd   : > { %v1223_v26 = vsub.f32 %v1207_v19, %v1219_v25 }
 0x3ff   : > { %v1225_v29 = vmul.f32 1.442695, %v1223_v26 }
 0x400   : > { %v1222_v27 = vpop.xlane.xlu0 %1221 }
 0x401   : > { %v1224_v28 = vsub.f32 %v4278_v18, %v1222_v27 }
 0x403   : > { %v1227_v30 = vmul.f32 1.442695, %v1224_v28 }
 0x404   : > { %v5123_v31 = vpop.permute.xlu0 %5122 }
 0x405   : > { %5211 = vpow2.f32 %v1227_v30  ;;  %v5125_v32 = vunpack.i.h.bf16 %v5123_v31  ;;  %v5124_v33 = vunpack.i.l.bf16 %v5123_v31 }
 0x406   : > { %5213 = vpow2.f32 %v1225_v29 }
 0x407   : > { %v4665_v34 = vpack.c.bf16 %v5125_v32, %v5124_v33 }
 0x409   : > { %4667 = vmatprep.subr.msk.bf16.mxu1 %vm6297_vm1, %v4665_v34 }
 0x40f   : > { %v5212_v35 = vpop.eup %5211 }
 0x410   : > { %v1232_v36 = vsel %vm1216_vm2, %v5212_v35, 0.0  ;;  %v5214_v37 = vpop.eup %5213 }
 0x411   : > { %1233 = vadd.xlane.f32.xlu1 %v1232_v36  ;;  %v1229_v38 = vsel %vm1216_vm2, %v5214_v37, 0.0 }
 0x415   : > { %1230 = vadd.xlane.f32.xlu1 %v1229_v38 }
 0x426   : > { %1324 = vrot.lane.b32.xlu1 %v6313_v13, %s5739_s0 }
 0x49e   : > { %v1234_v41 = vpop.xlane.xlu1 %1233 }
 0x49f   : > { %5215 = vrcp.f32 %v1234_v41 }
 0x4a2   : > { %v1231_v42 = vpop.xlane.xlu1 %1230 }
 0x4a3   : > { %5217 = vrcp.f32 %v1231_v42 }
 0x4a6   : > { %v1325_v47 = vpop.permute.xlu1 %1324 }
 0x4a9   : > { %v5216_v43 = vpop.eup %5215 }
 0x4aa   : > { %v1238_v46 = vmul.f32 %v5216_v43, %v5212_v35 }
 0x4ad   : > { %v5218_v44 = vpop.eup %5217 }
 0x4ae   : > { %v1237_v45 = vmul.f32 %v5218_v44, %v5214_v37 }
 0x4b0   : > { %4283 = vmatprep.mubr.msk.f32.mxu1 %vm1216_vm2, %v1237_v45 }
 0x4b1   : > { %4284 = vmatmul.mubr.msk.f32.vlgmr.msra.gmra.mrb[4].mxu1 %vm1216_vm2, %v1238_v46 }
 0x4b2   : > { %4670 = vmatpush3.bf16.xpose.msk.msra.mxu1 %vm6297_vm1, %v4665_v34  ;;  %4290 = vmatprep.mubr.msk.f32.mxu1 %vm1128_vm0, %v1323_v40 }
 0x4b9   : > { %4291 = vmatmul.mubr.msk.f32.vlgmr.msra.gmra.mrb[6].mxu1 %vm1128_vm0, %v1325_v47 }
 0x584   : > { %v4285_v49 = vpop.f32.mrb[4].mxu1 }
 0x585   : > { %1321 = vst.msk [vmem:[#allocation2 + $0x8] sm:$0xff] %vm1128_vm0, %v4285_v49  ;;  %v1311_v50 = vpop.f32.mrb[5].mxu1 }
 0x586   : > { %1320 = vst.msk [vmem:[#allocation2] sm:$0xff] %vm1128_vm0, %v1311_v50 }
 0x58c   : > { %v4292_v51 = vpop.f32.mrb[6].mxu1 }
 0x58d   : > { %v1404_v52 = vpop.f32.mrb[7].mxu1  ;;  %v1416_v53 = vsel %vm1216_vm2, %v4292_v51, -inf }
 0x58e   : > { %1417 = vmax.xlane.f32.xlu0 %v1416_v53  ;;  %v1413_v54 = vsel %vm1216_vm2, %v1404_v52, -inf }
 0x58f   : > { %1414 = vmax.xlane.f32.xlu1 %v1413_v54 }
 0x5a0   : > { %5127 = vrot.lane.b32.xlu1 %v6326_v39, %s5739_s0 }
 0x5a4   : > { %5137 = vrot.lane.b32.xlu1 %v6301_v5, %s5740_s7 }
 0x5a8   : > { %1526 = vrot.lane.b32.xlu1 %v6303_v6, %s5741_s4 }
 0x5ac   : > { %1528 = vrot.lane.b32.xlu1 %v6313_v13, %s5741_s4 }
 0x5b0   : > { %1730 = vrot.lane.b32.xlu1 %v6313_v13, %s5740_s7 }
 0x61b   : > { %v1418_v55 = vpop.xlane.xlu0 %1417 }
 0x61c   : > { %v1420_v56 = vsub.f32 %v4292_v51, %v1418_v55  ;;  %v1415_v57 = vpop.xlane.xlu1 %1414 }
 0x61d   : > { %v1419_v58 = vsub.f32 %v1404_v52, %v1415_v57 }
 0x61e   : > { %v1423_v59 = vmul.f32 1.442695, %v1420_v56 }
 0x61f   : > { %v1421_v60 = vmul.f32 1.442695, %v1419_v58 }
 0x620   : > { %5219 = vpow2.f32 %v1423_v59  ;;  %v5128_v61 = vpop.permute.xlu1 %5127 }
 0x621   : > { %v5130_v62 = vunpack.i.h.bf16 %v5128_v61  ;;  %v5129_v0 = vunpack.i.l.bf16 %v5128_v61  ;;  %5221 = vpow2.f32 %v1421_v60 }
 0x623   : > { %v4671_v1 = vpack.c.bf16 %v5130_v62, %v5129_v0 }
 0x624   : > { %v5138_v14 = vpop.permute.xlu1 %5137 }
 0x625   : > { %4672 = vmatprep.subr.bf16.mxu1 %v4671_v1  ;;  %v5140_v17 = vunpack.i.h.bf16 %v5138_v14  ;;  %v5139_v18 = vunpack.i.l.bf16 %v5138_v14  ;;  %v885_v14 = vld [vmem:[#allocation12] sm:$0xff] }
 0x626   : > { %4674 = vmatpush3.bf16.msra.mxu1 %v4671_v1 }
 0x628   : > { %v1527_v20 = vpop.permute.xlu1 %1526 }
 0x62a   : > { %v5220_v2 = vpop.eup %5219 }
 0x62b   : > { %v1428_v3 = vsel %vm1216_vm2, %v5220_v2, 0.0  ;;  %v5222_v4 = vpop.eup %5221 }
 0x62c   : > { %1429 = vadd.xlane.f32.xlu0 %v1428_v3  ;;  %v1425_v7 = vsel %vm1216_vm2, %v5222_v4, 0.0  ;;  %v1529_v21 = vpop.permute.xlu1 %1528 }
 0x630   : > { %1426 = vadd.xlane.f32.xlu0 %v1425_v7  ;;  %v1731_v23 = vpop.permute.xlu1 %1730 }
 0x646   : > { %5132 = vrot.lane.b32.xlu0 %v6301_v5, %s5741_s4 }
 0x64a   : > { %1728 = vrot.lane.b32.xlu0 %v6303_v6, %s5740_s7  ;;  %v4685_v6 = vpack.c.bf16 %v5140_v17, %v5139_v18  ;;  %v888_v18 = vld [vmem:[#allocation12 + $0x18] sm:$0xff] }
 0x6b9   : > { %v1430_v8 = vpop.xlane.xlu0 %1429 }
 0x6ba   : > { %5223 = vrcp.f32 %v1430_v8 }
 0x6bd   : > { %v1427_v9 = vpop.xlane.xlu0 %1426 }
 0x6be   : > { %5225 = vrcp.f32 %v1427_v9 }
 0x6c1   : > { %v5133_v10 = vpop.permute.xlu0 %5132 }
 0x6c2   : > { %v5135_v11 = vunpack.i.h.bf16 %v5133_v10  ;;  %v5134_v12 = vunpack.i.l.bf16 %v5133_v10 }
 0x6c4   : > { %v4675_v13 = vpack.c.bf16 %v5135_v11, %v5134_v12  ;;  %v5224_v15 = vpop.eup %5223 }
 0x6c5   : > { %v1434_v19 = vmul.f32 %v5224_v15, %v5220_v2  ;;  %v1729_v22 = vpop.permute.xlu0 %1728  ;;  %v886_v15 = vld [vmem:[#allocation12 + $0x8] sm:$0xff] }
 0x6c6   : > { %4677 = vmatprep.subr.msk.bf16.mxu1 %vm6297_vm1, %v4675_v13  ;;  %v4695_v17 = vpack.c.bf16 %v886_v15, %v885_v14  ;;  %v2112_v15 = vld [vmem:[#allocation15 + $0x18] sm:$0xff] }
 0x6c8   : > { %v5226_v16 = vpop.eup %5225 }
 0x6c9   : > { %v1433_v5 = vmul.f32 %v5226_v16, %v5222_v4  ;;  %v887_v16 = vld [vmem:[#allocation12 + $0x10] sm:$0xff] }
 0x6cb   : > { %4297 = vmatprep.mubr.msk.f32.mxu1 %vm1216_vm2, %v1433_v5  ;;  %v4699_v5 = vpack.c.bf16 %v888_v18, %v887_v16  ;;  %v2113_v16 = vld [vmem:[#allocation15 + $0x20] sm:$0xff]  ;;  %v2114_v18 = vld [vmem:[#allocation15 + $0x28] sm:$0xff] }
 0x6cc   : > { %4298 = vmatmul.mubr.msk.f32.vlgmr.msra.gmra.mrb[8].mxu1 %vm1216_vm2, %v1434_v19  ;;  %v889_v19 = vld [vmem:[#allocation12 + $0x20] sm:$0xff] }
 0x6cd   : > { %4680 = vmatpush3.bf16.xpose.msk.msra.mxu1 %vm6297_vm1, %v4675_v13  ;;  %4304 = vmatprep.mubr.msk.f32.mxu1 %vm1128_vm0, %v1527_v20 }
 0x6ce   : > { %4687 = vmatprep.subr.msk.bf16.mxu1 %vm6297_vm1, %v4685_v6 }
 0x6d4   : > { %4305 = vmatmul.mubr.msk.f32.vlgmr.msra.gmra.mrb[10].mxu1 %vm1128_vm0, %v1529_v21  ;;  %v891_v21 = vld [vmem:[#allocation12 + $0x30] sm:$0xff] }
 0x6d5   : > { %4690 = vmatpush3.bf16.xpose.msk.msra.mxu1 %vm6297_vm1, %v4685_v6  ;;  %4318 = vmatprep.mubr.msk.f32.mxu1 %vm1128_vm0, %v1729_v22  ;;  %v890_v6 = vld [vmem:[#allocation12 + $0x28] sm:$0xff]  ;;  %v892_v22 = vld [vmem:[#allocation12 + $0x38] sm:$0xff] }
 0x6d6   : > { %v4703_v20 = vpack.c.bf16 %v890_v6, %v889_v19  ;;  %v2094_v19 = vld [vmem:[#allocation14 + $0x8] sm:$0xff] }
 0x6dc   : > { %4319 = vmatmul.mubr.msk.f32.vlgmr.msra.gmra.mrb[12].mxu1 %vm1128_vm0, %v1731_v23  ;;  %v4707_v23 = vpack.c.bf16 %v892_v22, %v891_v21  ;;  %v2096_v21 = vld [vmem:[#allocation14 + $0x18] sm:$0xff]  ;;  %v4767_v22 = vpack.c.bf16 %v2114_v18, %v2113_v16  ;;  %v3882_v16 = vld [vmem:[%s6713_s12] ss:$0 sm:$0xff] }
 0x6dd   : > { %v3883_v18 = vld [vmem:[%s6714_s20] ss:$0 sm:$0xff] }
 0x79f   : > { %v4299_v24 = vpop.f32.mrb[8].mxu1 }
 0x7a0   : > { %1525 = vst.msk [vmem:[#allocation2 + $0x18] sm:$0xff] %vm1128_vm0, %v4299_v24  ;;  %v1515_v25 = vpop.f32.mrb[9].mxu1  ;;  %v893_v24 = vld [vmem:[#allocation12 + $0x40] sm:$0xff] }
 0x7a1   : > { %1524 = vst.msk [vmem:[#allocation2 + $0x10] sm:$0xff] %vm1128_vm0, %v1515_v25  ;;  %v894_v25 = vld [vmem:[#allocation12 + $0x48] sm:$0xff] }
 0x7a7   : > { %v4306_v26 = vpop.f32.mrb[10].mxu1 }
 0x7a8   : > { %v1608_v27 = vpop.f32.mrb[11].mxu1  ;;  %v1620_v28 = vsel %vm1216_vm2, %v4306_v26, -inf }
 0x7a9   : > { %1621 = vmax.xlane.f32.xlu1 %v1620_v28  ;;  %v1617_v29 = vsel %vm1216_vm2, %v1608_v27, -inf  ;;  %v896_v28 = vld [vmem:[#allocation12 + $0x58] sm:$0xff] }
 0x7aa   : > { %1618 = vmax.xlane.f32.xlu0 %v1617_v29 }
 0x7af   : > { %v4320_v30 = vpop.f32.mrb[12].mxu1 }
 0x7b0   : > { %v1810_v31 = vpop.f32.mrb[13].mxu1  ;;  %v1822_v33 = vsel %vm1216_vm2, %v4320_v30, -inf }
 0x7b1   : > { %v1819_v32 = vsel %vm1216_vm2, %v1810_v31, -inf }
 0x7b2   : > { %1820 = vmax.xlane.f32.xlu0 %v1819_v32  ;;  %v897_v32 = vld [vmem:[#allocation12 + $0x60] sm:$0xff] }
 0x7b6   : > { %1823 = vmax.xlane.f32.xlu0 %v1822_v33  ;;  %v898_v33 = vld [vmem:[#allocation12 + $0x68] sm:$0xff] }
 0x836   : > { %v1622_v34 = vpop.xlane.xlu1 %1621 }
 0x837   : > { %v1624_v35 = vsub.f32 %v4306_v26, %v1622_v34  ;;  %v1619_v36 = vpop.xlane.xlu0 %1618  ;;  %v4711_v26 = vpack.c.bf16 %v894_v25, %v893_v24  ;;  %v4719_v34 = vpack.c.bf16 %v898_v33, %v897_v32  ;;  %v2116_v24 = vld [vmem:[#allocation15 + $0x38] sm:$0xff] }
 0x838   : > { %v1623_v37 = vsub.f32 %v1608_v27, %v1619_v36  ;;  %v895_v27 = vld [vmem:[#allocation12 + $0x50] sm:$0xff] }
 0x839   : > { %v1627_v38 = vmul.f32 1.442695, %v1624_v35  ;;  %v4715_v29 = vpack.c.bf16 %v896_v28, %v895_v27 }
 0x83a   : > { %v1625_v40 = vmul.f32 1.442695, %v1623_v37  ;;  %v899_v37 = vld [vmem:[#allocation12 + $0x70] sm:$0xff] }
 0x83b   : > { %5227 = vpow2.f32 %v1627_v38  ;;  %v900_v38 = vld [vmem:[#allocation12 + $0x78] sm:$0xff] }
 0x83c   : > { %5229 = vpow2.f32 %v1625_v40  ;;  %v4723_v40 = vpack.c.bf16 %v900_v38, %v899_v37  ;;  %v2097_v37 = vld [vmem:[#allocation14 + $0x20] sm:$0xff]  ;;  %v2098_v38 = vld [vmem:[#allocation14 + $0x28] sm:$0xff] }
 0x83f   : > { %v1821_v41 = vpop.xlane.xlu0 %1820 }
 0x840   : > { %v1825_v42 = vsub.f32 %v1810_v31, %v1821_v41  ;;  %v1942_v41 = vld [vmem:[#allocation2 + $0x3] ss:$4 sm:$0xff] }
 0x842   : > { %v1827_v43 = vmul.f32 1.442695, %v1825_v42 }
 0x843   : > { %v1824_v44 = vpop.xlane.xlu0 %1823 }
 0x844   : > { %5231 = vpow2.f32 %v1827_v43  ;;  %v1826_v45 = vsub.f32 %v4320_v30, %v1824_v44  ;;  %v1934_v43 = vld [vmem:[#allocation2 + $0x1] ss:$4 sm:$0xff] }
 0x845   : > { %v5228_v46 = vpop.eup %5227 }
 0x846   : > { %v5230_v47 = vpop.eup %5229  ;;  %v1829_v49 = vmul.f32 1.442695, %v1826_v45  ;;  %v1632_v50 = vsel %vm1216_vm2, %v5228_v46, 0.0 }
 0x847   : > { %1633 = vadd.xlane.f32.xlu1 %v1632_v50  ;;  %v1629_v51 = vsel %vm1216_vm2, %v5230_v47, 0.0 }
 0x848   : > { %5233 = vpow2.f32 %v1829_v49  ;;  %1630 = vadd.xlane.f32.xlu0 %v1629_v51  ;;  %v1938_v49 = vld [vmem:[#allocation2 + $0x2] ss:$4 sm:$0xff] }
 0x84e   : > { %v5232_v52 = vpop.eup %5231 }
 0x84f   : > { %v1831_v53 = vsel %vm1216_vm2, %v5232_v52, 0.0 }
 0x850   : > { %1832 = vadd.xlane.f32.xlu0 %v1831_v53 }
 0x852   : > { %v5234_v54 = vpop.eup %5233 }
 0x853   : > { %v1834_v55 = vsel %vm1216_vm2, %v5234_v54, 0.0 }
 0x854   : > { %1835 = vadd.xlane.f32.xlu1 %v1834_v55 }
 0x865   : > { %5147 = vrot.lane.b32.xlu1 %v6326_v39, %s5740_s7 }
 0x866   : > { %5142 = vrot.lane.b32.xlu0 %v6326_v39, %s5741_s4 }
 0x8d4   : > { %v1634_v57 = vpop.xlane.xlu1 %1633 }
 0x8d5   : > { %v1631_v56 = vpop.xlane.xlu0 %1630 }
 0x8d6   : > { %5235 = vrcp.f32 %v1631_v56 }
 0x8d7   : > { %5237 = vrcp.f32 %v1634_v57 }
 0x8dd   : > { %v1833_v58 = vpop.xlane.xlu0 %1832 }
 0x8de   : > { %5239 = vrcp.f32 %v1833_v58 }
 0x8e0   : > { %v5236_v59 = vpop.eup %5235 }
 0x8e1   : > { %v1836_v60 = vpop.xlane.xlu1 %1835  ;;  %v5143_v61 = vpop.permute.xlu0 %5142  ;;  %v1637_v62 = vmul.f32 %v5236_v59, %v5230_v47  ;;  %v1930_v59 = vld [vmem:[#allocation2] ss:$4 sm:$0xff] }
 0x8e2   : > { %5241 = vrcp.f32 %v1836_v60  ;;  %v5145_v0 = vunpack.i.h.bf16 %v5143_v61  ;;  %v5144_v1 = vunpack.i.l.bf16 %v5143_v61  ;;  %v5238_v3 = vpop.eup %5237 }
 0x8e3   : > { %4311 = vmatprep.mubr.msk.f32.mxu0 %vm1216_vm2, %v1637_v62  ;;  %v1638_v9 = vmul.f32 %v5238_v3, %v5228_v46 }
 0x8e4   : > { %v4681_v2 = vpack.c.bf16 %v5145_v0, %v5144_v1 }
 0x8e5   : > { %v5148_v4 = vpop.permute.xlu1 %5147 }
 0x8e6   : > { %v5150_v7 = vunpack.i.h.bf16 %v5148_v4  ;;  %v5149_v39 = vunpack.i.l.bf16 %v5148_v4  ;;  %4682 = vmatprep.subr.bf16.mxu0 %v4681_v2 }
 0x8e7   : > { %4684 = vmatpush3.bf16.msra.mxu0 %v4681_v2 }
 0x8e8   : > { %v5240_v8 = vpop.eup %5239  ;;  %v4691_v10 = vpack.c.bf16 %v5150_v7, %v5149_v39  ;;  %v833_v7 = vld [vmem:[%s722_s18] sm:$0xff]  ;;  %s832_s18 = scalar_lea.vmem [#allocation23], %s6251_s6 }
 0x8e9   : > { %v1839_v11 = vmul.f32 %v5240_v8, %v5232_v52  ;;  %s3634_s11 = sshll.u32 %s832_s18, 4  ;;  %s6576_s11 = int_to_ptr.vmem [resolvable:$true] %s3634_s11 }
 0x8ea   : > { %4312 = vmatmul.mubr.msk.f32.vlgmr.msra.gmra.mrb[4].mxu0 %vm1216_vm2, %v1638_v9  ;;  %4692 = vmatprep.subr.bf16.mxu0 %v4691_v10  ;;  %s5627_s8 = scalar_lea.vmem %s6576_s11, 256 }
 0x8eb   : > { %4694 = vmatpush3.bf16.msra.mxu0 %v4691_v10  ;;  %4325 = vmatprep.mubr.msk.f32.mxu0 %vm1216_vm2, %v1839_v11  ;;  %v2109_v11 = vld [vmem:[#allocation15] sm:$0xff]  ;;  %p5628_p9 = scmp.ne.s32.totalorder %s6576_s11, %s5627_s8 }
 0x8ec   : > { %v5242_v12 = vpop.eup %5241  ;;  %4696 = vmatprep.subr.bf16.mxu0 %v4695_v17 }
 0x8ed   : > { %v1840_v13 = vmul.f32 %v5242_v12, %v5234_v54  ;;  %v2110_v12 = vld [vmem:[#allocation15 + $0x8] sm:$0xff]  ;;  %p5629_p11 = pnand %p5628_p9, %p6722_p8 }
 0x8ee   : > { %v4759_v14 = vpack.c.bf16 %v2110_v12, %v2109_v11 }
 0x8ef   : > { %4326 = vmatmul.mubr.msk.f32.vlgmr.msra.gmra.mrb[6].mxu0 %vm1216_vm2, %v1840_v13  ;;  %v2111_v13 = vld [vmem:[#allocation15 + $0x10] sm:$0xff]  ;;  %p5630_p3 = pneg %p5629_p11 }
 0x8f0   : > { %4698 = vmatpush3.bf16.msra.mxu0 %v4695_v17  ;;  %v4763_v17 = vpack.c.bf16 %v2112_v15, %v2111_v13 }
 0x8f1   : > { %4700 = vmatprep.subr.bf16.mxu0 %v4699_v5 }
 0x8f4   : > { %4702 = vmatpush3.bf16.msra.mxu0 %v4699_v5  ;;  %v2093_v5 = vld [vmem:[#allocation14] sm:$0xff] }
 0x8f5   : > { %4704 = vmatprep.subr.bf16.mxu0 %v4703_v20  ;;  %v4727_v6 = vpack.c.bf16 %v2094_v19, %v2093_v5 }
 0x8f7   : > { %4728 = vmatprep.subr.bf16.mxu1 %v4727_v6 }
 0x8f8   : > { %4706 = vmatpush3.bf16.msra.mxu0 %v4703_v20  ;;  %v2095_v20 = vld [vmem:[#allocation14 + $0x10] sm:$0xff]  ;;  %4730 = vmatpush3.bf16.msra.mxu1 %v4727_v6 }
 0x8f9   : > { %4708 = vmatprep.subr.bf16.mxu0 %v4707_v23 }
 0x8fc   : > { %4710 = vmatpush3.bf16.msra.mxu0 %v4707_v23  ;;  %v2115_v23 = vld [vmem:[#allocation15 + $0x30] sm:$0xff] }
 0x8fd   : > { %4712 = vmatprep.subr.bf16.mxu0 %v4711_v26  ;;  %v4771_v25 = vpack.c.bf16 %v2116_v24, %v2115_v23 }
 0x900   : > { %4714 = vmatpush3.bf16.msra.mxu0 %v4711_v26 }
 0x901   : > { %4716 = vmatprep.subr.bf16.mxu0 %v4715_v29 }
 0x904   : > { %4718 = vmatpush3.bf16.msra.mxu0 %v4715_v29 }
 0x905   : > { %4720 = vmatprep.subr.bf16.mxu0 %v4719_v34 }
 0x908   : > { %4722 = vmatpush3.bf16.msra.mxu0 %v4719_v34  ;;  %v2117_v34 = vld [vmem:[#allocation15 + $0x40] sm:$0xff] }
 0x909   : > { %4724 = vmatprep.subr.bf16.mxu0 %v4723_v40 }
 0x90c   : > { %4726 = vmatpush3.bf16.msra.mxu0 %v4723_v40  ;;  %v4735_v40 = vpack.c.bf16 %v2098_v38, %v2097_v37  ;;  %v2137_v37 = vld [vmem:[#allocation17 + $0x60] sm:$0xff]  ;;  %v2138_v38 = vld [vmem:[#allocation17 + $0x68] sm:$0xff] }
 0x90d   : > { %4760 = vmatprep.subr.bf16.mxu0 %v4759_v14 }
 0x9bd   : > { %v4313_v30 = vpop.f32.mrb[4].mxu0 }
 0x9be   : > { %1727 = vst.msk [vmem:[#allocation2 + $0x28] sm:$0xff] %vm1128_vm0, %v4313_v30  ;;  %v1717_v31 = vpop.f32.mrb[5].mxu0 }
 0x9bf   : > { %1726 = vst.msk [vmem:[#allocation2 + $0x20] sm:$0xff] %vm1128_vm0, %v1717_v31 }
 0x9c2   : > { %v4327_v35 = vpop.f32.mrb[6].mxu0 }
 0x9c3   : > { %1929 = vst.msk [vmem:[#allocation2 + $0x38] sm:$0xff] %vm1128_vm0, %v4327_v35  ;;  %v1919_v36 = vpop.f32.mrb[7].mxu0  ;;  %v2118_v35 = vld [vmem:[#allocation15 + $0x48] sm:$0xff] }
 0x9c4   : > { %1928 = vst.msk [vmem:[#allocation2 + $0x30] sm:$0xff] %vm1128_vm0, %v1919_v36  ;;  %v4775_v36 = vpack.c.bf16 %v2118_v35, %v2117_v34  ;;  %v2135_v34 = vld [vmem:[#allocation17 + $0x50] sm:$0xff]  ;;  %v2136_v35 = vld [vmem:[#allocation17 + $0x58] sm:$0xff] }
 0x9cb   : > { %v1944_v42 = vld [vmem:[#allocation2 + $0x23] ss:$4 sm:$0xff]  ;;  %v1936_v44 = vld [vmem:[#allocation2 + $0x21] ss:$4 sm:$0xff]  ;;  %v1940_v47 = vld [vmem:[#allocation2 + $0x22] ss:$4 sm:$0xff] }
 0x9cc   : > { %v5161_v45 = vpack.i.bf16 %v1944_v42, %v1942_v41  ;;  %v5151_v46 = vpack.i.bf16 %v1936_v44, %v1934_v43  ;;  %v5156_v50 = vpack.i.bf16 %v1940_v47, %v1938_v49  ;;  %v1932_v56 = vld [vmem:[#allocation2 + $0x20] ss:$4 sm:$0xff] }
 0x9cd   : > { %v2119_v41 = vld [vmem:[#allocation15 + $0x50] sm:$0xff]  ;;  %v2120_v42 = vld [vmem:[#allocation15 + $0x58] sm:$0xff]  ;;  %v2121_v47 = vld [vmem:[#allocation15 + $0x60] sm:$0xff] }
 0x9ce   : > { %5162 = vrot.lane.b32.xlu0 %v5161_v45, %s5739_s0  ;;  %5152 = vrot.lane.b32.xlu1 %v5151_v46, %s5740_s7  ;;  %v4779_v43 = vpack.c.bf16 %v2120_v42, %v2119_v41  ;;  %v2099_v44 = vld [vmem:[#allocation14 + $0x30] sm:$0xff]  ;;  %v2100_v45 = vld [vmem:[#allocation14 + $0x38] sm:$0xff]  ;;  %v2122_v49 = vld [vmem:[#allocation15 + $0x68] sm:$0xff] }
 0x9cf   : > { %v4739_v46 = vpack.c.bf16 %v2100_v45, %v2099_v44  ;;  %v2139_v41 = vld [vmem:[#allocation17 + $0x70] sm:$0xff]  ;;  %v2140_v42 = vld [vmem:[#allocation17 + $0x78] sm:$0xff] }
 0x9d2   : > { %5157 = vrot.lane.b32.xlu1 %v5156_v50, %s5741_s4  ;;  %v4783_v50 = vpack.c.bf16 %v2122_v49, %v2121_v47 }
 0xa40   : > { %v5153_v51 = vpop.permute.xlu1 %5152  ;;  %v5163_v54 = vpop.permute.xlu0 %5162 }
 0xa41   : > { %v5155_v52 = vunpack.i.h.bf16 %v5153_v51  ;;  %v5154_v53 = vunpack.i.l.bf16 %v5153_v51  ;;  %v5165_v60 = vunpack.i.h.bf16 %v5163_v54  ;;  %v5164_v61 = vunpack.i.l.bf16 %v5163_v54  ;;  %v2101_v51 = vld [vmem:[#allocation14 + $0x40] sm:$0xff]  ;;  %v2123_v54 = vld [vmem:[#allocation15 + $0x70] sm:$0xff] }
 0xa43   : > { %v1970_v62 = vsel %vm1128_vm0, %v1932_v56, %v5155_v52  ;;  %v1969_v0 = vsel %vm1128_vm0, %v1930_v59, %v5154_v53  ;;  %v2102_v52 = vld [vmem:[#allocation14 + $0x48] sm:$0xff]  ;;  %v2103_v56 = vld [vmem:[#allocation14 + $0x50] sm:$0xff] }
 0xa44   : > { %v5158_v55 = vpop.permute.xlu1 %5157  ;;  %v4743_v53 = vpack.c.bf16 %v2102_v52, %v2101_v51  ;;  %v835_v59 = vld [vmem:[%s731_s30] sm:$0xff] }
 0xa45   : > { %v5160_v57 = vunpack.i.h.bf16 %v5158_v55  ;;  %v5159_v58 = vunpack.i.l.bf16 %v5158_v55  ;;  %v2124_v55 = vld [vmem:[#allocation15 + $0x78] sm:$0xff] }
 0xa47   : > { %v1972_v1 = vsel %vm1971_vm3, %v1969_v0, %v5159_v58  ;;  %v1973_v2 = vsel %vm1971_vm3, %v1970_v62, %v5160_v57  ;;  %v4787_v57 = vpack.c.bf16 %v2124_v55, %v2123_v54  ;;  %v2104_v58 = vld [vmem:[#allocation14 + $0x58] sm:$0xff]  ;;  %v2106_v62 = vld [vmem:[#allocation14 + $0x68] sm:$0xff] }
 0xa48   : > { %v1975_v3 = vsel %vm1974_vm4, %v1972_v1, %v5164_v61  ;;  %v1976_v4 = vsel %vm1974_vm4, %v1973_v2, %v5165_v60  ;;  %v4747_v60 = vpack.c.bf16 %v2104_v58, %v2103_v56  ;;  %v2105_v61 = vld [vmem:[#allocation14 + $0x60] sm:$0xff]  ;;  %v2107_v1 = vld [vmem:[#allocation14 + $0x70] sm:$0xff]  ;;  %v2108_v2 = vld [vmem:[#allocation14 + $0x78] sm:$0xff] }
 0xa49   : > { %4360 = vmatprep.mubr.f32.mxu0 %v1975_v3  ;;  %v4751_v0 = vpack.c.bf16 %v2106_v62, %v2105_v61  ;;  %v6416_v3 = vld [vmem:[%s731_s30 + $0x8] sm:$0xff] }
 0xa4a   : > { %4361 = vmatmul.mubr.f32.vlgmr.msra.gmra.mrb[8].mxu0 %v1976_v4  ;;  %v4755_v4 = vpack.c.bf16 %v2108_v2, %v2107_v1 }
 0xa4b   : > { %4199 = vmatprep.mubr.f32.mxu0 %v833_v7  ;;  %4762 = vmatpush3.bf16.msra.mxu0 %v4759_v14 }
 0xa4c   : > { %4234 = vmatprep.mubr.f32.mxu0 %v833_v7  ;;  %4764 = vmatprep.subr.bf16.mxu0 %v4763_v17 }
 0xa4d   : > { %4269 = vmatprep.mubr.f32.mxu0 %v833_v7 }
 0xa4e   : > { %4430 = vmatprep.mubr.f32.mxu0 %v835_v59 }
 0xa4f   : > { %4766 = vmatpush3.bf16.msra.mxu0 %v4763_v17 }
 0xa50   : > { %4768 = vmatprep.subr.bf16.mxu0 %v4767_v22 }
 0xa53   : > { %4770 = vmatpush3.bf16.msra.mxu0 %v4767_v22 }
 0xa54   : > { %4772 = vmatprep.subr.bf16.mxu0 %v4771_v25 }
 0xa57   : > { %4774 = vmatpush3.bf16.msra.mxu0 %v4771_v25  ;;  %v2129_v25 = vld [vmem:[#allocation17 + $0x20] sm:$0xff] }
 0xa58   : > { %4776 = vmatprep.subr.bf16.mxu0 %v4775_v36 }
 0xa5b   : > { %4778 = vmatpush3.bf16.msra.mxu0 %v4775_v36  ;;  %v4811_v36 = vpack.c.bf16 %v2136_v35, %v2135_v34 }
 0xa5c   : > { %4780 = vmatprep.subr.bf16.mxu0 %v4779_v43 }
 0xa5f   : > { %4782 = vmatpush3.bf16.msra.mxu0 %v4779_v43  ;;  %v4819_v43 = vpack.c.bf16 %v2140_v42, %v2139_v41 }
 0xa60   : > { %4784 = vmatprep.subr.bf16.mxu0 %v4783_v50 }
 0xa63   : > { %4786 = vmatpush3.bf16.msra.mxu0 %v4783_v50 }
 0xa64   : > { %4788 = vmatprep.subr.bf16.mxu0 %v4787_v57 }
 0xa67   : > { %4790 = vmatpush3.bf16.msra.mxu0 %v4787_v57 }
 0xa6a   : > { %4431 = vmatmul.mubr.f32.vlgmr.msra.gmra.mrb[10].mxu0 %v6416_v3 }
 0xb1d   : > { %v4362_v39 = vpop.f32.mrb[8].mxu0 }
 0xb1e   : > { %v2049_v8 = vadd.f32 %v4362_v39, %v6291_v48  ;;  %v2043_v9 = vpop.f32.mrb[9].mxu0  ;;  %v4731_v48 = vpack.c.bf16 %v2096_v21, %v2095_v20  ;;  %v2126_v39 = vld [vmem:[#allocation17 + $0x8] sm:$0xff]  ;;  %v2127_v21 = vld [vmem:[#allocation17 + $0x10] sm:$0xff] }
 0xb1f   : > { %v2044_v10 = vadd.f32 %v2043_v9, %v833_v7  ;;  %v2125_v7 = vld [vmem:[#allocation17] sm:$0xff] }
 0xb20   : > { %2056 = vadd.xlane.f32.xlu0 %v2049_v8  ;;  %4732 = vmatprep.subr.bf16.mxu1 %v4731_v48 }
 0xb21   : > { %2054 = vadd.xlane.f32.xlu1 %v2044_v10  ;;  %4734 = vmatpush3.bf16.msra.mxu1 %v4731_v48  ;;  %v2128_v48 = vld [vmem:[#allocation17 + $0x18] sm:$0xff] }
 0xb22   : > { %4736 = vmatprep.subr.bf16.mxu1 %v4735_v40  ;;  %v4795_v24 = vpack.c.bf16 %v2128_v48, %v2127_v21 }
 0xb25   : > { %4738 = vmatpush3.bf16.msra.mxu1 %v4735_v40  ;;  %v4815_v40 = vpack.c.bf16 %v2138_v38, %v2137_v37 }
 0xb26   : > { %4740 = vmatprep.subr.bf16.mxu1 %v4739_v46 }
 0xb29   : > { %4742 = vmatpush3.bf16.msra.mxu1 %v4739_v46 }
 0xb2a   : > { %4744 = vmatprep.subr.bf16.mxu1 %v4743_v53 }
 0xb2d   : > { %4746 = vmatpush3.bf16.msra.mxu1 %v4743_v53 }
 0xb2e   : > { %4748 = vmatprep.subr.bf16.mxu1 %v4747_v60 }
 0xb31   : > { %4750 = vmatpush3.bf16.msra.mxu1 %v4747_v60 }
 0xb32   : > { %4752 = vmatprep.subr.bf16.mxu1 %v4751_v0 }
 0xb35   : > { %4754 = vmatpush3.bf16.msra.mxu1 %v4751_v0 }
 0xb36   : > { %4756 = vmatprep.subr.bf16.mxu1 %v4755_v4 }
 0xb39   : > { %4758 = vmatpush3.bf16.msra.mxu1 %v4755_v4 }
 0xb3d   : > { %v4432_v44 = vpop.f32.mrb[10].mxu0 }
 0xb3e   : > { %v2300_v45 = vpop.f32.mrb[11].mxu0 }
 0xb3f   : > { %v4823_v46 = vpack.c.bf16 %v4432_v44, %v2300_v45  ;;  %v6434_v47 = vpack.i.bf16 %v4432_v44, %v2300_v45 }
 0xbad   : > { %v2057_v26 = vpop.xlane.xlu0 %2056 }
 0xbae   : > { %v2055_v27 = vpop.xlane.xlu1 %2054  ;;  %v2060_v28 = vmul.f32 0.0078125, %v2057_v26  ;;  %v2130_v26 = vld [vmem:[#allocation17 + $0x28] sm:$0xff] }
 0xbaf   : > { %v2059_v29 = vmul.f32 0.0078125, %v2055_v27  ;;  %v4799_v27 = vpack.c.bf16 %v2130_v26, %v2129_v25 }
 0xbb0   : > { %v6406_v31 = vsub.f32 %v2049_v8, %v2060_v28  ;;  %v4791_v8 = vpack.c.bf16 %v2126_v39, %v2125_v7  ;;  %v2131_v28 = vld [vmem:[#allocation17 + $0x30] sm:$0xff] }
 0xbb1   : > { %v6404_v30 = vsub.f32 %v2044_v10, %v2059_v29  ;;  %v2132_v29 = vld [vmem:[#allocation17 + $0x38] sm:$0xff] }
 0xbb2   : > { %v2064_v33 = vmul.f32 %v6406_v31, %v6406_v31  ;;  %4792 = vmatprep.subr.bf16.mxu1 %v4791_v8 }
 0xbb3   : > { %v2063_v32 = vmul.f32 %v6404_v30, %v6404_v30 }
 0xbb5   : > { %2065 = vadd.xlane.f32.xlu0 %v2063_v32  ;;  %v2134_v32 = vld [vmem:[#allocation17 + $0x48] sm:$0xff] }
 0xbb9   : > { %2067 = vadd.xlane.f32.xlu0 %v2064_v33 }
 0xc42   : > { %v2066_v9 = vpop.xlane.xlu0 %2065 }
 0xc43   : > { %v2069_v10 = vmul.f32 0.0078125, %v2066_v9 }
 0xc45   : > { %v2071_v11 = vadd.f32 1e-05, %v2069_v10 }
 0xc46   : > { %v2068_v12 = vpop.xlane.xlu0 %2067 }
 0xc47   : > { %5243 = vrsqrt.f32 %v2071_v11  ;;  %v2070_v13 = vmul.f32 0.0078125, %v2068_v12 }
 0xc49   : > { %v2072_v14 = vadd.f32 1e-05, %v2070_v13 }
 0xc4b   : > { %5245 = vrsqrt.f32 %v2072_v14 }
 0xc51   : > { %v5244_v15 = vpop.eup %5243 }
 0xc52   : > { %v2075_v17 = vmul.f32 %v5244_v15, %v6404_v30  ;;  %v4803_v30 = vpack.c.bf16 %v2132_v29, %v2131_v28 }
 0xc54   : > { %v2083_v5 = vmul.f32 %v3882_v16, %v2075_v17 }
 0xc55   : > { %v5246_v19 = vpop.eup %5245 }
 0xc56   : > { %v2076_v6 = vmul.f32 %v5246_v19, %v6406_v31  ;;  %v6427_v20 = vadd.f32 %v3883_v18, %v2083_v5  ;;  %v2133_v31 = vld [vmem:[#allocation17 + $0x40] sm:$0xff] }
 0xc57   : > { %v4807_v33 = vpack.c.bf16 %v2134_v32, %v2133_v31 }
 0xc58   : > { %v2084_v22 = vmul.f32 %v3882_v16, %v2076_v6  ;;  %4395 = vmatprep.mubr.f32.mxu1 %v6427_v20 }
 0xc5a   : > { %v6430_v23 = vadd.f32 %v3883_v18, %v2084_v22 }
 0xc5c   : > { %4396 = vmatmul.mubr.f32.vlgmr.msra.gmra.mrb[14].mxu1 %v6430_v23 }
 0xc5d   : > { %4794 = vmatpush3.bf16.msra.mxu1 %v4791_v8  ;;  %4465 = vmatprep.mubr.f32.mxu1 %v835_v59 }
 0xc5e   : > { %4796 = vmatprep.subr.bf16.mxu1 %v4795_v24 }
 0xc61   : > { %4798 = vmatpush3.bf16.msra.mxu1 %v4795_v24 }
 0xc62   : > { %4800 = vmatprep.subr.bf16.mxu1 %v4799_v27 }
 0xc65   : > { %4802 = vmatpush3.bf16.msra.mxu1 %v4799_v27 }
 0xc66   : > { %4804 = vmatprep.subr.bf16.mxu1 %v4803_v30 }
 0xc69   : > { %4806 = vmatpush3.bf16.msra.mxu1 %v4803_v30 }
 0xc6a   : > { %4808 = vmatprep.subr.bf16.mxu1 %v4807_v33 }
 0xc6d   : > { %4810 = vmatpush3.bf16.msra.mxu1 %v4807_v33 }
 0xc6e   : > { %4812 = vmatprep.subr.bf16.mxu1 %v4811_v36 }
 0xc71   : > { %4814 = vmatpush3.bf16.msra.mxu1 %v4811_v36 }
 0xc72   : > { %4816 = vmatprep.subr.bf16.mxu1 %v4815_v40 }
 0xc75   : > { %4818 = vmatpush3.bf16.msra.mxu1 %v4815_v40 }
 0xc76   : > { %4820 = vmatprep.subr.bf16.mxu1 %v4819_v43 }
 0xc79   : > { %4822 = vmatpush3.bf16.msra.mxu1 %v4819_v43 }
 0xc7a   : > { %4825 = vmatprep.subr.msk.bf16.mxu1 %vm6297_vm1, %v4823_v46 }
 0xc7c   : > { %4466 = vmatmul.mubr.f32.vlgmr.msra.gmra.mrb[16].mxu1 %v6416_v3 }
 0xc82   : > { %4828 = vmatpush3.bf16.xpose.msk.msra.mxu1 %vm6297_vm1, %v4823_v46 }
 0xd2f   : > { %v4397_v49 = vpop.f32.mrb[14].mxu1 }
 0xd30   : > { %v2223_v50 = vpop.f32.mrb[15].mxu1  ;;  %v6442_v52 = vmul.f32 0.17677669, %v4397_v49 }
 0xd31   : > { %v6440_v51 = vmul.f32 0.17677669, %v2223_v50 }
 0xd33   : > { %4472 = vmatprep.mubr.msk.f32.mxu1 %vm1128_vm0, %v6440_v51 }
 0xd34   : > { %4473 = vmatmul.mubr.msk.f32.vlgmr.msra.gmra.mrb[18].mxu1 %vm1128_vm0, %v6442_v52 }
 0xd4f   : > { %v4467_v53 = vpop.f32.mrb[16].mxu1 }
 0xd50   : > { %v2375_v54 = vpop.f32.mrb[17].mxu1 }
 0xd51   : > { %v4829_v55 = vpack.c.bf16 %v4467_v53, %v2375_v54  ;;  %v6448_v56 = vpack.i.bf16 %v4467_v53, %v2375_v54 }
 0xd53   : > { %4830 = vmatprep.subr.bf16.mxu1 %v4829_v55 }
 0xd54   : > { %4832 = vmatpush3.bf16.msra.mxu1 %v4829_v55 }
 0xe07   : > { %v4474_v57 = vpop.f32.mrb[18].mxu1 }
 0xe08   : > { %v2462_v58 = vpop.f32.mrb[19].mxu1  ;;  %v2474_v59 = vsel %vm1216_vm2, %v4474_v57, -inf }
 0xe09   : > { %2475 = vmax.xlane.f32.xlu0 %v2474_v59  ;;  %v2471_v60 = vsel %vm1216_vm2, %v2462_v58, -inf }
 0xe0a   : > { %2472 = vmax.xlane.f32.xlu1 %v2471_v60 }
 0xe1b   : > { %5167 = vrot.lane.b32.xlu1 %v6434_v47, %s5739_s0 }
 0xe1f   : > { %2576 = vrot.lane.b32.xlu1 %v6440_v51, %s5739_s0 }
 0xe96   : > { %v2476_v61 = vpop.xlane.xlu0 %2475 }
 0xe97   : > { %v2478_v62 = vsub.f32 %v4474_v57, %v2476_v61  ;;  %v2473_v0 = vpop.xlane.xlu1 %2472 }
 0xe98   : > { %v2477_v1 = vsub.f32 %v2462_v58, %v2473_v0 }
 0xe99   : > { %v2481_v2 = vmul.f32 1.442695, %v2478_v62 }
 0xe9a   : > { %v2479_v3 = vmul.f32 1.442695, %v2477_v1 }
 0xe9b   : > { %5247 = vpow2.f32 %v2481_v2  ;;  %v5168_v4 = vpop.permute.xlu1 %5167 }
 0xe9c   : > { %5249 = vpow2.f32 %v2479_v3  ;;  %v5170_v7 = vunpack.i.h.bf16 %v5168_v4  ;;  %v5169_v39 = vunpack.i.l.bf16 %v5168_v4 }
 0xe9e   : > { %v4833_v8 = vpack.c.bf16 %v5170_v7, %v5169_v39 }
 0xe9f   : > { %v2577_v13 = vpop.permute.xlu1 %2576 }
 0xea0   : > { %4835 = vmatprep.subr.msk.bf16.mxu1 %vm6297_vm1, %v4833_v8 }
 0xea5   : > { %v5248_v9 = vpop.eup %5247 }
 0xea6   : > { %v5250_v10 = vpop.eup %5249  ;;  %v2486_v11 = vsel %vm1216_vm2, %v5248_v9, 0.0 }
 0xea7   : > { %2487 = vadd.xlane.f32.xlu0 %v2486_v11  ;;  %v2483_v12 = vsel %vm1216_vm2, %v5250_v10, 0.0 }
 0xea8   : > { %2484 = vadd.xlane.f32.xlu1 %v2483_v12 }
 0xeb9   : > { %2578 = vrot.lane.b32.xlu1 %v6442_v52, %s5739_s0 }
 0xebd   : > { %5172 = vrot.lane.b32.xlu0 %v6434_v47, %s5741_s4  ;;  %2780 = vrot.lane.b32.xlu1 %v6440_v51, %s5741_s4 }
 0xec1   : > { %2782 = vrot.lane.b32.xlu0 %v6442_v52, %s5741_s4 }
 0xf34   : > { %v2488_v14 = vpop.xlane.xlu0 %2487 }
 0xf35   : > { %5251 = vrcp.f32 %v2488_v14  ;;  %v2485_v15 = vpop.xlane.xlu1 %2484 }
 0xf36   : > { %5253 = vrcp.f32 %v2485_v15 }
 0xf38   : > { %v5173_v16 = vpop.permute.xlu0 %5172 }
 0xf39   : > { %v5175_v5 = vunpack.i.h.bf16 %v5173_v16  ;;  %v5174_v19 = vunpack.i.l.bf16 %v5173_v16  ;;  %v2579_v22 = vpop.permute.xlu1 %2578 }
 0xf3b   : > { %v4843_v48 = vpack.c.bf16 %v5175_v5, %v5174_v19 }
 0xf3c   : > { %v2783_v25 = vpop.permute.xlu0 %2782 }
 0xf3d   : > { %v2781_v24 = vpop.permute.xlu1 %2780 }
 0xf3f   : > { %v5252_v17 = vpop.eup %5251 }
 0xf40   : > { %v5254_v18 = vpop.eup %5253  ;;  %v2492_v21 = vmul.f32 %v5252_v17, %v5248_v9 }
 0xf41   : > { %v2491_v6 = vmul.f32 %v5254_v18, %v5250_v10 }
 0xf43   : > { %4479 = vmatprep.mubr.msk.f32.mxu1 %vm1216_vm2, %v2491_v6 }
 0xf44   : > { %4480 = vmatmul.mubr.msk.f32.vlgmr.msra.gmra.mrb[20].mxu1 %vm1216_vm2, %v2492_v21 }
 0xf45   : > { %4838 = vmatpush3.bf16.xpose.msk.msra.mxu1 %vm6297_vm1, %v4833_v8  ;;  %4486 = vmatprep.mubr.msk.f32.mxu1 %vm1128_vm0, %v2577_v13 }
 0xf46   : > { %4845 = vmatprep.subr.msk.bf16.mxu1 %vm6297_vm1, %v4843_v48 }
 0xf4c   : > { %4487 = vmatmul.mubr.msk.f32.vlgmr.msra.gmra.mrb[22].mxu1 %vm1128_vm0, %v2579_v22 }
 0xf4d   : > { %4848 = vmatpush3.bf16.xpose.msk.msra.mxu1 %vm6297_vm1, %v4843_v48  ;;  %4500 = vmatprep.mubr.msk.f32.mxu1 %vm1128_vm0, %v2781_v24 }
 0xf54   : > { %4501 = vmatmul.mubr.msk.f32.vlgmr.msra.gmra.mrb[24].mxu1 %vm1128_vm0, %v2783_v25 }
0x1017   : > { %v4481_v26 = vpop.f32.mrb[20].mxu1 }
0x1018   : > { %2575 = vst.msk [vmem:[#allocation2 + $0x8] sm:$0xff] %vm1128_vm0, %v4481_v26  ;;  %v2565_v27 = vpop.f32.mrb[21].mxu1 }
0x1019   : > { %2574 = vst.msk [vmem:[#allocation2] sm:$0xff] %vm1128_vm0, %v2565_v27 }
0x101f   : > { %v6482_v28 = vpop.f32.mrb[22].mxu1 }
0x1020   : > { %v2658_v29 = vpop.f32.mrb[23].mxu1  ;;  %v2670_v58 = vsel %vm1216_vm2, %v6482_v28, -inf }
0x1021   : > { %v2667_v34 = vsel %vm1216_vm2, %v2658_v29, -inf }
0x1027   : > { %v4502_v30 = vpop.f32.mrb[24].mxu1 }
0x1028   : > { %v2862_v31 = vpop.f32.mrb[25].mxu1  ;;  %v2874_v32 = vsel %vm1216_vm2, %v4502_v30, -inf }
0x1029   : > { %2875 = vmax.xlane.f32.xlu0 %v2874_v32  ;;  %v2871_v33 = vsel %vm1216_vm2, %v2862_v31, -inf }
0x102a   : > { %2872 = vmax.xlane.f32.xlu1 %v2871_v33 }
0x103b   : > { %5177 = vrot.lane.b32.xlu1 %v6448_v56, %s5741_s4 }
0x103f   : > { %2982 = vrot.lane.b32.xlu1 %v6440_v51, %s5740_s7 }
0x1043   : > { %2984 = vrot.lane.b32.xlu1 %v6442_v52, %s5740_s7 }
0x1067   : > { %2668 = vmax.xlane.f32.xlu1 %v2667_v34 }
0x10b6   : > { %v2876_v35 = vpop.xlane.xlu0 %2875 }
0x10b7   : > { %v2878_v36 = vsub.f32 %v4502_v30, %v2876_v35  ;;  %v2873_v37 = vpop.xlane.xlu1 %2872 }
0x10b8   : > { %v2877_v38 = vsub.f32 %v2862_v31, %v2873_v37 }
0x10b9   : > { %v2881_v40 = vmul.f32 1.442695, %v2878_v36 }
0x10ba   : > { %v2879_v41 = vmul.f32 1.442695, %v2877_v38 }
0x10bb   : > { %5255 = vpow2.f32 %v2881_v40  ;;  %v5178_v42 = vpop.permute.xlu1 %5177 }
0x10bc   : > { %v5180_v43 = vunpack.i.h.bf16 %v5178_v42  ;;  %v5179_v44 = vunpack.i.l.bf16 %v5178_v42  ;;  %5257 = vpow2.f32 %v2879_v41 }
0x10be   : > { %v4849_v45 = vpack.c.bf16 %v5180_v43, %v5179_v44 }
0x10bf   : > { %v2983_v52 = vpop.permute.xlu1 %2982 }
0x10c0   : > { %4850 = vmatprep.subr.bf16.mxu1 %v4849_v45 }
0x10c1   : > { %4852 = vmatpush3.bf16.msra.mxu1 %v4849_v45 }
0x10c3   : > { %v2985_v53 = vpop.permute.xlu1 %2984 }
0x10c5   : > { %v5256_v46 = vpop.eup %5255 }
0x10c6   : > { %v2886_v49 = vsel %vm1216_vm2, %v5256_v46, 0.0  ;;  %v5258_v50 = vpop.eup %5257 }
0x10c7   : > { %2887 = vadd.xlane.f32.xlu0 %v2886_v49  ;;  %v2883_v51 = vsel %vm1216_vm2, %v5258_v50, 0.0  ;;  %v2141_v49 = vld [vmem:[#allocation18] sm:$0xff] }
0x10cb   : > { %2884 = vadd.xlane.f32.xlu0 %v2883_v51  ;;  %v2143_v51 = vld [vmem:[#allocation18 + $0x10] sm:$0xff] }
0x10e1   : > { %5182 = vrot.lane.b32.xlu0 %v6434_v47, %s5740_s7 }
0x10f4   : > { %v2669_v54 = vpop.xlane.xlu1 %2668 }
0x10f5   : > { %v2673_v55 = vsub.f32 %v2658_v29, %v2669_v54 }
0x10f7   : > { %v2675_v57 = vmul.f32 1.442695, %v2673_v55  ;;  %v2145_v55 = vld [vmem:[#allocation18 + $0x20] sm:$0xff] }
0x10f9   : > { %5259 = vpow2.f32 %v2675_v57  ;;  %v2146_v57 = vld [vmem:[#allocation18 + $0x28] sm:$0xff] }
0x1100   : > { %2671 = vmax.xlane.f32.xlu0 %v2670_v58  ;;  %v4871_v58 = vpack.c.bf16 %v2146_v57, %v2145_v55  ;;  %v3343_v55 = vld [vmem:[#allocation20 + $0x30] sm:$0xff]  ;;  %v3346_v57 = vld [vmem:[#allocation20 + $0x48] sm:$0xff] }
0x1103   : > { %v5260_v59 = vpop.eup %5259 }
0x1104   : > { %v2679_v60 = vsel %vm1216_vm2, %v5260_v59, 0.0 }
0x1105   : > { %2680 = vadd.xlane.f32.xlu1 %v2679_v60  ;;  %v2148_v60 = vld [vmem:[#allocation18 + $0x38] sm:$0xff] }
0x1154   : > { %v2888_v61 = vpop.xlane.xlu0 %2887 }
0x1155   : > { %5261 = vrcp.f32 %v2888_v61 }
0x1158   : > { %v2885_v62 = vpop.xlane.xlu0 %2884 }
0x1159   : > { %5263 = vrcp.f32 %v2885_v62  ;;  %v2149_v62 = vld [vmem:[#allocation18 + $0x40] sm:$0xff] }
0x115c   : > { %v5183_v0 = vpop.permute.xlu0 %5182 }
0x115d   : > { %v5185_v47 = vunpack.i.h.bf16 %v5183_v0  ;;  %v5184_v1 = vunpack.i.l.bf16 %v5183_v0  ;;  %v2150_v0 = vld [vmem:[#allocation18 + $0x48] sm:$0xff] }
0x115f   : > { %v4853_v2 = vpack.c.bf16 %v5185_v47, %v5184_v1  ;;  %v5262_v3 = vpop.eup %5261  ;;  %v4879_v47 = vpack.c.bf16 %v2150_v0, %v2149_v62 }
0x1160   : > { %v2892_v39 = vmul.f32 %v5262_v3, %v5256_v46  ;;  %v2151_v3 = vld [vmem:[#allocation18 + $0x50] sm:$0xff] }
0x1161   : > { %4855 = vmatprep.subr.msk.bf16.mxu1 %vm6297_vm1, %v4853_v2 }
0x1163   : > { %v5264_v4 = vpop.eup %5263 }
0x1164   : > { %v2891_v7 = vmul.f32 %v5264_v4, %v5258_v50  ;;  %v2142_v50 = vld [vmem:[#allocation18 + $0x8] sm:$0xff]  ;;  %v2152_v4 = vld [vmem:[#allocation18 + $0x58] sm:$0xff] }
0x1166   : > { %4507 = vmatprep.mubr.msk.f32.mxu1 %vm1216_vm2, %v2891_v7  ;;  %v4883_v7 = vpack.c.bf16 %v2152_v4, %v2151_v3 }
0x1167   : > { %4508 = vmatmul.mubr.msk.f32.vlgmr.msra.gmra.mrb[26].mxu1 %vm1216_vm2, %v2892_v39 }
0x1168   : > { %4858 = vmatpush3.bf16.xpose.msk.msra.mxu1 %vm6297_vm1, %v4853_v2  ;;  %4514 = vmatprep.mubr.msk.f32.mxu1 %vm1128_vm0, %v2983_v52  ;;  %v4863_v52 = vpack.c.bf16 %v2142_v50, %v2141_v49  ;;  %v3339_v49 = vld [vmem:[#allocation20 + $0x10] sm:$0xff]  ;;  %v3342_v50 = vld [vmem:[#allocation20 + $0x28] sm:$0xff] }
0x116f   : > { %4515 = vmatmul.mubr.msk.f32.vlgmr.msra.gmra.mrb[28].mxu1 %vm1128_vm0, %v2985_v53  ;;  %v2144_v53 = vld [vmem:[#allocation18 + $0x18] sm:$0xff] }
0x1170   : > { %v4867_v54 = vpack.c.bf16 %v2144_v53, %v2143_v51  ;;  %v3344_v51 = vld [vmem:[#allocation20 + $0x38] sm:$0xff] }
0x1171   : > { %v4899_v53 = vpack.c.bf16 %v3344_v51, %v3342_v50  ;;  %v3483_v50 = vld [vmem:[#allocation21 + $0xa8] sm:$0xff] }
0x118d   : > { %v2672_v11 = vpop.xlane.xlu0 %2671 }
0x118e   : > { %v2674_v12 = vsub.f32 %v6482_v28, %v2672_v11 }
0x1190   : > { %v2677_v14 = vmul.f32 1.442695, %v2674_v12  ;;  %v2155_v12 = vld [vmem:[#allocation18 + $0x70] sm:$0xff] }
0x1192   : > { %v2681_v8 = vpop.xlane.xlu1 %2680 }
0x1193   : > { %5265 = vrcp.f32 %v2681_v8 }
0x1194   : > { %5267 = vpow2.f32 %v2677_v14 }
0x119d   : > { %v5266_v9 = vpop.eup %5265 }
0x119e   : > { %v2687_v10 = vmul.f32 %v5266_v9, %v5260_v59  ;;  %v5268_v5 = vpop.eup %5267  ;;  %v2147_v59 = vld [vmem:[#allocation18 + $0x30] sm:$0xff]  ;;  %v2153_v9 = vld [vmem:[#allocation18 + $0x60] sm:$0xff] }
0x119f   : > { %v2682_v19 = vsel %vm1216_vm2, %v5268_v5, 0.0  ;;  %v4875_v61 = vpack.c.bf16 %v2148_v60, %v2147_v59  ;;  %v3345_v59 = vld [vmem:[#allocation20 + $0x40] sm:$0xff]  ;;  %v3347_v60 = vld [vmem:[#allocation20 + $0x50] sm:$0xff] }
0x11a0   : > { %4493 = vmatprep.mubr.msk.f32.mxu0 %vm1216_vm2, %v2687_v10  ;;  %v2154_v10 = vld [vmem:[#allocation18 + $0x68] sm:$0xff] }
0x11a1   : > { %v4887_v11 = vpack.c.bf16 %v2154_v10, %v2153_v9  ;;  %v3349_v10 = vld [vmem:[#allocation20 + $0x60] sm:$0xff] }
0x123a   : > { %v4509_v13 = vpop.f32.mrb[26].mxu1 }
0x123b   : > { %2981 = vst.msk [vmem:[#allocation2 + $0x28] sm:$0xff] %vm1128_vm0, %v4509_v13  ;;  %v2971_v15 = vpop.f32.mrb[27].mxu1  ;;  %v2156_v13 = vld [vmem:[#allocation18 + $0x78] sm:$0xff] }
0x123c   : > { %2980 = vst.msk [vmem:[#allocation2 + $0x20] sm:$0xff] %vm1128_vm0, %v2971_v15  ;;  %v4891_v14 = vpack.c.bf16 %v2156_v13, %v2155_v12  ;;  %v3354_v13 = vld [vmem:[#allocation20 + $0x88] sm:$0xff] }
0x1242   : > { %v4516_v63 = vpop.f32.mrb[28].mxu1 }
0x1243   : > { %v3064_v16 = vpop.f32.mrb[29].mxu1  ;;  %v3076_v18 = vsel %vm1216_vm2, %v4516_v63, -inf }
0x1244   : > { %v3073_v17 = vsel %vm1216_vm2, %v3064_v16, -inf }
0x1245   : > { %3074 = vmax.xlane.f32.xlu0 %v3073_v17 }
0x1249   : > { %3077 = vmax.xlane.f32.xlu0 %v3076_v18 }
0x124d   : > { %2683 = vadd.xlane.f32.xlu0 %v2682_v19 }
0x12d2   : > { %v3075_v6 = vpop.xlane.xlu0 %3074 }
0x12d3   : > { %v3079_v21 = vsub.f32 %v3064_v16, %v3075_v6 }
0x12d5   : > { %v3081_v48 = vmul.f32 1.442695, %v3079_v21 }
0x12d6   : > { %v3078_v22 = vpop.xlane.xlu0 %3077 }
0x12d7   : > { %5269 = vpow2.f32 %v3081_v48  ;;  %v3080_v24 = vsub.f32 %v4516_v63, %v3078_v22 }
0x12d9   : > { %v3083_v25 = vmul.f32 1.442695, %v3080_v24 }
0x12da   : > { %v2684_v30 = vpop.xlane.xlu0 %2683 }
0x12db   : > { %5271 = vpow2.f32 %v3083_v25 }
0x12dc   : > { %5273 = vrcp.f32 %v2684_v30 }
0x12e1   : > { %v5270_v26 = vpop.eup %5269 }
0x12e2   : > { %v3085_v27 = vsel %vm1216_vm2, %v5270_v26, 0.0 }
0x12e3   : > { %3086 = vadd.xlane.f32.xlu1 %v3085_v27 }
0x12e5   : > { %v5272_v28 = vpop.eup %5271 }
0x12e6   : > { %v3088_v29 = vsel %vm1216_vm2, %v5272_v28, 0.0  ;;  %v5274_v37 = vpop.eup %5273 }
0x12e7   : > { %3089 = vadd.xlane.f32.xlu0 %v3088_v29  ;;  %v2688_v43 = vmul.f32 %v5274_v37, %v5268_v5 }
0x12f4   : > { %5187 = vrot.lane.b32.xlu1 %v6448_v56, %s5739_s0 }
0x12fd   : > { %5192 = vrot.lane.b32.xlu0 %v6448_v56, %s5740_s7 }
0x1370   : > { %v3087_v31 = vpop.xlane.xlu1 %3086 }
0x1371   : > { %5275 = vrcp.f32 %v3087_v31 }
0x1374   : > { %v3090_v32 = vpop.xlane.xlu0 %3089  ;;  %v5188_v33 = vpop.permute.xlu1 %5187 }
0x1375   : > { %5277 = vrcp.f32 %v3090_v32  ;;  %v5190_v34 = vunpack.i.h.bf16 %v5188_v33  ;;  %v5189_v35 = vunpack.i.l.bf16 %v5188_v33 }
0x1377   : > { %v4839_v36 = vpack.c.bf16 %v5190_v34, %v5189_v35 }
0x1378   : > { %v5193_v38 = vpop.permute.xlu0 %5192 }
0x1379   : > { %v5195_v40 = vunpack.i.h.bf16 %v5193_v38  ;;  %v5194_v41 = vunpack.i.l.bf16 %v5193_v38  ;;  %4840 = vmatprep.subr.bf16.mxu0 %v4839_v36 }
0x137a   : > { %4842 = vmatpush3.bf16.msra.mxu0 %v4839_v36 }
0x137b   : > { %v5276_v42 = vpop.eup %5275  ;;  %v4859_v44 = vpack.c.bf16 %v5195_v40, %v5194_v41 }
0x137c   : > { %v3093_v56 = vmul.f32 %v5276_v42, %v5270_v26 }
0x137d   : > { %4494 = vmatmul.mubr.msk.f32.vlgmr.msra.gmra.mrb[12].mxu0 %vm1216_vm2, %v2688_v43  ;;  %4860 = vmatprep.subr.bf16.mxu0 %v4859_v44 }
0x137e   : > { %4862 = vmatpush3.bf16.msra.mxu0 %v4859_v44  ;;  %4521 = vmatprep.mubr.msk.f32.mxu0 %vm1216_vm2, %v3093_v56  ;;  %v3338_v44 = vld [vmem:[#allocation20 + $0x8] sm:$0xff]  ;;  %v3340_v56 = vld [vmem:[#allocation20 + $0x18] sm:$0xff] }
0x137f   : > { %v5278_v45 = vpop.eup %5277  ;;  %4864 = vmatprep.subr.bf16.mxu0 %v4863_v52 }
0x1380   : > { %v3094_v46 = vmul.f32 %v5278_v45, %v5272_v28  ;;  %v3337_v45 = vld [vmem:[#allocation20] sm:$0xff] }
0x1382   : > { %4522 = vmatmul.mubr.msk.f32.vlgmr.msra.gmra.mrb[14].mxu0 %vm1216_vm2, %v3094_v46  ;;  %v4895_v46 = vpack.c.bf16 %v3340_v56, %v3338_v44 }
0x1383   : > { %4866 = vmatpush3.bf16.msra.mxu0 %v4863_v52  ;;  %v4897_v52 = vpack.c.bf16 %v3339_v49, %v3337_v45  ;;  %v3464_v45 = vld [vmem:[#allocation21 + $0x10] sm:$0xff]  ;;  %v3482_v49 = vld [vmem:[#allocation21 + $0xa0] sm:$0xff] }
0x1384   : > { %4868 = vmatprep.subr.bf16.mxu0 %v4867_v54  ;;  %4896 = vmatprep.subr.bf16.mxu1 %v4895_v46  ;;  %v3465_v46 = vld [vmem:[#allocation21 + $0x18] sm:$0xff] }
0x1385   : > { %4898 = vmatpush1.bf16.msra.mxu1 %v4897_v52  ;;  %v4933_v51 = vpack.c.bf16 %v3465_v46, %v3464_v45  ;;  %v4935_v52 = vpack.c.bf16 %v3483_v50, %v3482_v49 }
0x1386   : > { %4900 = vmatprep.subr.bf16.mxu1 %v4899_v53  ;;  %v3466_v53 = vld [vmem:[#allocation21 + $0x20] sm:$0xff] }
0x1387   : > { %4870 = vmatpush3.bf16.msra.mxu0 %v4867_v54  ;;  %v3341_v54 = vld [vmem:[#allocation20 + $0x20] sm:$0xff] }
0x1388   : > { %4872 = vmatprep.subr.bf16.mxu0 %v4871_v58 }
0x138b   : > { %4874 = vmatpush3.bf16.msra.mxu0 %v4871_v58  ;;  %v3348_v58 = vld [vmem:[#allocation20 + $0x58] sm:$0xff] }
0x138c   : > { %4876 = vmatprep.subr.bf16.mxu0 %v4875_v61 }
0x138f   : > { %4878 = vmatpush3.bf16.msra.mxu0 %v4875_v61  ;;  %v4905_v61 = vpack.c.bf16 %v3347_v60, %v3345_v59  ;;  %v3469_v59 = vld [vmem:[#allocation21 + $0x38] sm:$0xff]  ;;  %v3486_v60 = vld [vmem:[#allocation21 + $0xc0] sm:$0xff] }
0x1390   : > { %4880 = vmatprep.subr.bf16.mxu0 %v4879_v47 }
0x1393   : > { %4882 = vmatpush3.bf16.msra.mxu0 %v4879_v47 }
0x1394   : > { %4884 = vmatprep.subr.bf16.mxu0 %v4883_v7 }
0x1397   : > { %4886 = vmatpush3.bf16.msra.mxu0 %v4883_v7 }
0x1398   : > { %4888 = vmatprep.subr.bf16.mxu0 %v4887_v11 }
0x139b   : > { %4890 = vmatpush3.bf16.msra.mxu0 %v4887_v11  ;;  %v3351_v11 = vld [vmem:[#allocation20 + $0x70] sm:$0xff] }
0x139c   : > { %4892 = vmatprep.subr.bf16.mxu0 %v4891_v14  ;;  %v4909_v12 = vpack.c.bf16 %v3351_v11, %v3349_v10  ;;  %v3473_v10 = vld [vmem:[#allocation21 + $0x58] sm:$0xff]  ;;  %v3490_v11 = vld [vmem:[#allocation21 + $0xe0] sm:$0xff] }
0x139f   : > { %4894 = vmatpush3.bf16.msra.mxu0 %v4891_v14  ;;  %v3356_v14 = vld [vmem:[#allocation20 + $0x98] sm:$0xff] }
0x1450   : > { %v4495_v1 = vpop.f32.mrb[12].mxu0 }
0x1451   : > { %2779 = vst.msk [vmem:[#allocation2 + $0x18] sm:$0xff] %vm1128_vm0, %v4495_v1  ;;  %v2769_v2 = vpop.f32.mrb[13].mxu0 }
0x1452   : > { %2778 = vst.msk [vmem:[#allocation2 + $0x10] sm:$0xff] %vm1128_vm0, %v2769_v2 }
0x1455   : > { %v4523_v39 = vpop.f32.mrb[14].mxu0 }
0x1456   : > { %3183 = vst.msk [vmem:[#allocation2 + $0x38] sm:$0xff] %vm1128_vm0, %v4523_v39  ;;  %v3173_v8 = vpop.f32.mrb[15].mxu0  ;;  %v3350_v39 = vld [vmem:[#allocation20 + $0x68] sm:$0xff] }
0x1457   : > { %3182 = vst.msk [vmem:[#allocation2 + $0x30] sm:$0xff] %vm1128_vm0, %v3173_v8  ;;  %v3352_v8 = vld [vmem:[#allocation20 + $0x78] sm:$0xff] }
0x1458   : > { %v4907_v9 = vpack.c.bf16 %v3352_v8, %v3350_v39 }
0x1459   : > { %v3186_v15 = vld [vmem:[#allocation2 + $0x1] ss:$4 sm:$0xff]  ;;  %v3188_v18 = vld [vmem:[#allocation2 + $0x2] ss:$4 sm:$0xff]  ;;  %v3190_v6 = vld [vmem:[#allocation2 + $0x3] ss:$4 sm:$0xff] }
0x145a   : > { %v3184_v30 = vld [vmem:[#allocation2] ss:$4 sm:$0xff] }
0x145e   : > { %v3187_v63 = vld [vmem:[#allocation2 + $0x21] ss:$4 sm:$0xff]  ;;  %v3189_v17 = vld [vmem:[#allocation2 + $0x22] ss:$4 sm:$0xff]  ;;  %v3191_v19 = vld [vmem:[#allocation2 + $0x23] ss:$4 sm:$0xff] }
0x145f   : > { %v5196_v16 = vpack.i.bf16 %v3187_v63, %v3186_v15  ;;  %v5201_v5 = vpack.i.bf16 %v3189_v17, %v3188_v18  ;;  %v5206_v21 = vpack.i.bf16 %v3191_v19, %v3190_v6  ;;  %v3185_v28 = vld [vmem:[#allocation2 + $0x20] ss:$4 sm:$0xff]  ;;  %v4911_v15 = vpack.c.bf16 %v3356_v14, %v3354_v13 }
0x1460   : > { %v3353_v63 = vld [vmem:[#allocation20 + $0x80] sm:$0xff]  ;;  %v3358_v18 = vld [vmem:[#allocation20 + $0xa8] sm:$0xff] }
0x1461   : > { %5197 = vrot.lane.b32.xlu1 %v5196_v16, %s5740_s7  ;;  %v3355_v16 = vld [vmem:[#allocation20 + $0x90] sm:$0xff]  ;;  %v3357_v6 = vld [vmem:[#allocation20 + $0xa0] sm:$0xff]  ;;  %s6717_s7 = sld [smem:[#allocation48_spill]] }
0x1462   : > { %v4913_v17 = vpack.c.bf16 %v3355_v16, %v3353_v63 }
0x1465   : > { %5202 = vrot.lane.b32.xlu1 %v5201_v5, %s5741_s4  ;;  %v3360_v5 = vld [vmem:[#allocation20 + $0xb8] sm:$0xff]  ;;  %s3621_s4 = scalar_lea.sflag [#allocation5], %s6248_s9 }
0x1466   : > { %v4915_v19 = vpack.c.bf16 %v3360_v5, %v3358_v18 }
0x1469   : > { %5207 = vrot.lane.b32.xlu1 %v5206_v21, %s5739_s0  ;;  %v3359_v21 = vld [vmem:[#allocation20 + $0xb0] sm:$0xff]  ;;  %s6721_s0 = sld [smem:[#allocation52_spill]] }
0x14d3   : > { %v5198_v48 = vpop.permute.xlu1 %5197 }
0x14d4   : > { %v5200_v24 = vunpack.i.h.bf16 %v5198_v48  ;;  %v5199_v25 = vunpack.i.l.bf16 %v5198_v48  ;;  %v3362_v48 = vld [vmem:[#allocation20 + $0xc8] sm:$0xff] }
0x14d6   : > { %v3217_v31 = vsel %vm1128_vm0, %v3185_v28, %v5200_v24  ;;  %v3216_v34 = vsel %vm1128_vm0, %v3184_v30, %v5199_v25  ;;  %v3364_v24 = vld [vmem:[#allocation20 + $0xd8] sm:$0xff]  ;;  %v3361_v25 = vld [vmem:[#allocation20 + $0xc0] sm:$0xff] }
0x14d7   : > { %v5203_v22 = vpop.permute.xlu1 %5202  ;;  %v4919_v28 = vpack.c.bf16 %v3364_v24, %v3362_v48  ;;  %v3368_v30 = vld [vmem:[#allocation20 + $0xf8] sm:$0xff]  ;;  %v3909_v48 = vld [vmem:[%s6716_s26] ss:$0 sm:$0xff] }
0x14d8   : > { %v5205_v26 = vunpack.i.h.bf16 %v5203_v22  ;;  %v5204_v27 = vunpack.i.l.bf16 %v5203_v22  ;;  %v4917_v22 = vpack.c.bf16 %v3359_v21, %v3357_v6  ;;  %v3908_v6 = vld [vmem:[%s6715_s17] ss:$0 sm:$0xff]  ;;  %s3920_s17 = sshll.u32 %s5872_s3, 8  ;;  %s5743_s3 = smov [#allocation23]  }
0x14d9   : > { %s5631_s6 = sshll.u32 %s5743_s3, 4  ;;  %s5632_s6 = int_to_ptr.vmem [resolvable:$false] %s5631_s6 }
0x14da   : > { %v3218_v35 = vsel %vm1971_vm3, %v3216_v34, %v5204_v27  ;;  %v3219_v36 = vsel %vm1971_vm3, %v3217_v31, %v5205_v26  ;;  %v3363_v26 = vld [vmem:[#allocation20 + $0xd0] sm:$0xff]  ;;  %v5742_v27 = vmov 0.0   ;;  %p5634_p12 = scmp.lt.s32.totalorder %s6576_s11, %s5632_s6 }
0x14db   : > { %v5208_v29 = vpop.permute.xlu1 %5207  ;;  %3445 = vmatprep.mubr.f32.mxu1 %v5742_v27  ;;  %v4921_v31 = vpack.c.bf16 %v3363_v26, %v3361_v25  ;;  %v3367_v34 = vld [vmem:[#allocation20 + $0xf0] sm:$0xff] }
0x14dc   : > { %v5210_v32 = vunpack.i.h.bf16 %v5208_v29  ;;  %v5209_v33 = vunpack.i.l.bf16 %v5208_v29  ;;  %v3366_v29 = vld [vmem:[#allocation20 + $0xe8] sm:$0xff] }
0x14de   : > { %v3220_v37 = vsel %vm1974_vm4, %v3218_v35, %v5209_v33  ;;  %v3221_v38 = vsel %vm1974_vm4, %v3219_v36, %v5210_v32  ;;  %v4923_v32 = vpack.c.bf16 %v3368_v30, %v3366_v29  ;;  %v3365_v33 = vld [vmem:[#allocation20 + $0xe0] sm:$0xff] }
0x14df   : > { %4556 = vmatprep.mubr.f32.mxu0 %v3220_v37  ;;  %v4925_v35 = vpack.c.bf16 %v3367_v34, %v3365_v33  ;;  %v3478_v36 = vld [vmem:[#allocation21 + $0x80] sm:$0xff]  ;;  %v3479_v37 = vld [vmem:[#allocation21 + $0x88] sm:$0xff]  ;;  %v3493_v33 = vld [vmem:[#allocation21 + $0xf8] sm:$0xff] }
0x14e0   : > { %4557 = vmatmul.mubr.f32.vlgmr.msra.gmra.mrb[16].mxu0 %v3221_v38  ;;  %v3462_v38 = vld [vmem:[#allocation21] sm:$0xff] }
0x14e1   : > { %v3474_v30 = vld [vmem:[#allocation21 + $0x60] sm:$0xff] }
0x15b3   : > { %v4558_v40 = vpop.f32.mrb[16].mxu0 }
0x15b4   : > { %v3294_v41 = vadd.f32 %v4558_v40, %v6430_v23  ;;  %v3288_v42 = vpop.f32.mrb[17].mxu0  ;;  %v4901_v23 = vpack.c.bf16 %v3343_v55, %v3341_v54  ;;  %v4927_v40 = vpack.c.bf16 %v3479_v37, %v3478_v36  ;;  %v3467_v54 = vld [vmem:[#allocation21 + $0x28] sm:$0xff]  ;;  %v3484_v55 = vld [vmem:[#allocation21 + $0xb0] sm:$0xff]  ;;  %v3477_v36 = vld [vmem:[#allocation21 + $0x78] sm:$0xff] }
0x15b5   : > { %v3289_v43 = vadd.f32 %v3288_v42, %v6427_v20  ;;  %v4903_v20 = vpack.c.bf16 %v3348_v58, %v3346_v57  ;;  %v3480_v42 = vld [vmem:[#allocation21 + $0x90] sm:$0xff]  ;;  %v3485_v57 = vld [vmem:[#allocation21 + $0xb8] sm:$0xff]  ;;  %v4937_v58 = vpack.c.bf16 %v3467_v54, %v3466_v53 }
0x15b6   : > { %3301 = vadd.xlane.f32.xlu1 %v3294_v41  ;;  %4902 = vmatpush1.bf16.msra.mxu1 %v4901_v23  ;;  %v4939_v23 = vpack.c.bf16 %v3485_v57, %v3484_v55 }
0x15b7   : > { %3299 = vadd.xlane.f32.xlu0 %v3289_v43  ;;  %4904 = vmatprep.subr.bf16.mxu1 %v4903_v20  ;;  %v3468_v20 = vld [vmem:[#allocation21 + $0x30] sm:$0xff] }
0x15b8   : > { %4928 = vmatprep.subr.bf16.mxu0 %v4927_v40 }
0x15ba   : > { %4906 = vmatpush1.bf16.msra.mxu1 %v4905_v61  ;;  %v3487_v61 = vld [vmem:[#allocation21 + $0xc8] sm:$0xff] }
0x15bb   : > { %4908 = vmatprep.subr.bf16.mxu1 %v4907_v9  ;;  %v3472_v9 = vld [vmem:[#allocation21 + $0x50] sm:$0xff] }
0x15bc   : > { %v4949_v13 = vpack.c.bf16 %v3473_v10, %v3472_v9 }
0x15be   : > { %4910 = vmatpush1.bf16.msra.mxu1 %v4909_v12  ;;  %v3491_v12 = vld [vmem:[#allocation21 + $0xe8] sm:$0xff] }
0x15bf   : > { %4912 = vmatprep.subr.bf16.mxu1 %v4911_v15  ;;  %v4951_v14 = vpack.c.bf16 %v3491_v12, %v3490_v11 }
0x15c2   : > { %4914 = vmatpush1.bf16.msra.mxu1 %v4913_v17 }
0x15c3   : > { %4916 = vmatprep.subr.bf16.mxu1 %v4915_v19 }
0x15c6   : > { %4918 = vmatpush1.bf16.msra.mxu1 %v4917_v22 }
0x15c7   : > { %4920 = vmatprep.subr.bf16.mxu1 %v4919_v28 }
0x15ca   : > { %4922 = vmatpush1.bf16.msra.mxu1 %v4921_v31  ;;  %v3475_v31 = vld [vmem:[#allocation21 + $0x68] sm:$0xff] }
0x15cb   : > { %4924 = vmatprep.subr.bf16.mxu1 %v4923_v32  ;;  %v4953_v32 = vpack.c.bf16 %v3475_v31, %v3474_v30 }
0x15ce   : > { %4926 = vmatpush1.bf16.msra.mxu1 %v4925_v35  ;;  %v3476_v35 = vld [vmem:[#allocation21 + $0x70] sm:$0xff] }
0x15cf   : > { %v4957_v37 = vpack.c.bf16 %v3477_v36, %v3476_v35 }
0x1643   : > { %v3302_v62 = vpop.xlane.xlu1 %3301 }
0x1644   : > { %v3300_v0 = vpop.xlane.xlu0 %3299  ;;  %v3304_v47 = vmul.f32 0.0078125, %v3302_v62  ;;  %v4941_v62 = vpack.c.bf16 %v3469_v59, %v3468_v20 }
0x1645   : > { %v3303_v1 = vmul.f32 0.0078125, %v3300_v0  ;;  %v4943_v0 = vpack.c.bf16 %v3487_v61, %v3486_v60 }
0x1646   : > { %v6541_v3 = vsub.f32 %v3294_v41, %v3304_v47  ;;  %v3463_v41 = vld [vmem:[#allocation21 + $0x8] sm:$0xff]  ;;  %v3470_v47 = vld [vmem:[#allocation21 + $0x40] sm:$0xff] }
0x1647   : > { %v6539_v2 = vsub.f32 %v3289_v43, %v3303_v1  ;;  %v3481_v43 = vld [vmem:[#allocation21 + $0x98] sm:$0xff]  ;;  %v4929_v44 = vpack.c.bf16 %v3463_v41, %v3462_v38  ;;  %v3471_v1 = vld [vmem:[#allocation21 + $0x48] sm:$0xff]  ;;  %v3371_v38 = vlaneseq }
0x1648   : > { %v3308_v7 = vmul.f32 %v6541_v3, %v6541_v3  ;;  %v4931_v56 = vpack.c.bf16 %v3481_v43, %v3480_v42  ;;  %v4945_v39 = vpack.c.bf16 %v3471_v1, %v3470_v47 }
0x1649   : > { %v3307_v4 = vmul.f32 %v6539_v2, %v6539_v2  ;;  %4930 = vmatpush3.bf16.msra.mxu0 %v4929_v44 }
0x164a   : > { %4932 = vmatprep.subr.bf16.mxu0 %v4931_v56 }
0x164b   : > { %3309 = vadd.xlane.f32.xlu0 %v3307_v4  ;;  %v3488_v4 = vld [vmem:[#allocation21 + $0xd0] sm:$0xff] }
0x164d   : > { %4934 = vmatpush3.bf16.msra.mxu0 %v4933_v51 }
0x164e   : > { %4936 = vmatprep.subr.bf16.mxu0 %v4935_v52 }
0x164f   : > { %3311 = vadd.xlane.f32.xlu0 %v3308_v7  ;;  %v3489_v7 = vld [vmem:[#allocation21 + $0xd8] sm:$0xff] }
0x1650   : > { %v4947_v8 = vpack.c.bf16 %v3489_v7, %v3488_v4 }
0x1651   : > { %4938 = vmatpush3.bf16.msra.mxu0 %v4937_v58 }
0x1652   : > { %4940 = vmatprep.subr.bf16.mxu0 %v4939_v23  ;;  %v3910_v23 = vld [vmem:[%s6718_s15] ss:$0 sm:$0xff]  ;;  %s5633_s15 = scalar_lea.vmem %s5632_s6, 512 }
0x1653   : > { %p5635_p1 = scmp.lt.s32.totalorder %s5633_s15, %s5627_s8 }
0x1655   : > { %4942 = vmatpush3.bf16.msra.mxu0 %v4941_v62  ;;  %p5636_p13 = por %p5635_p1, %p5634_p12 }
0x1656   : > { %4944 = vmatprep.subr.bf16.mxu0 %v4943_v0 }
0x1657   : > { %p5637_p0 = pnand %p5636_p13, %p5630_p3 }
0x1659   : > { %4946 = vmatpush3.bf16.msra.mxu0 %v4945_v39 }
0x165a   : > { %4948 = vmatprep.subr.bf16.mxu0 %v4947_v8 }
0x165d   : > { %4950 = vmatpush3.bf16.msra.mxu0 %v4949_v13 }
0x165e   : > { %4952 = vmatprep.subr.bf16.mxu0 %v4951_v14 }
0x1661   : > { %4954 = vmatpush3.bf16.msra.mxu0 %v4953_v32 }
0x16d8   : > { %v3310_v15 = vpop.xlane.xlu0 %3309 }
0x16d9   : > { %v3313_v63 = vmul.f32 0.0078125, %v3310_v15 }
0x16db   : > { %v3315_v16 = vadd.f32 1e-05, %v3313_v63 }
0x16dc   : > { %v3312_v17 = vpop.xlane.xlu0 %3311 }
0x16dd   : > { %5279 = vrsqrt.f32 %v3315_v16  ;;  %v3314_v18 = vmul.f32 0.0078125, %v3312_v17 }
0x16df   : > { %v3316_v5 = vadd.f32 1e-05, %v3314_v18 }
0x16e1   : > { %5281 = vrsqrt.f32 %v3316_v5 }
0x16e7   : > { %v5280_v19 = vpop.eup %5279 }
0x16e8   : > { %v3319_v21 = vmul.f32 %v5280_v19, %v6539_v2  ;;  %v3492_v2 = vld [vmem:[#allocation21 + $0xf0] sm:$0xff]  ;;  %v3911_v19 = vld [vmem:[%s6719_s14] ss:$0 sm:$0xff] }
0x16e9   : > { %v4955_v34 = vpack.c.bf16 %v3493_v33, %v3492_v2 }
0x16ea   : > { %v3327_v22 = vmul.f32 %v3908_v6, %v3319_v21  ;;  %v3912_v21 = vld [vmem:[%s6720_s21] ss:$0 sm:$0xff] }
0x16eb   : > { %v5282_v24 = vpop.eup %5281  ;;  %4956 = vmatprep.subr.bf16.mxu0 %v4955_v34 }
0x16ec   : > { %v3335_v25 = vadd.f32 %v3909_v48, %v3327_v22  ;;  %v3320_v26 = vmul.f32 %v5282_v24, %v6541_v3  ;;  %4958 = vmatpush3.bf16.msra.mxu0 %v4957_v37  ;;  %v3372_v3 = vshrl.u32 %v3371_v38, 7 }
0x16ee   : > { %3446 = vmatmul.mubr.f32.vlgmr.msra.gmra.mrb[30].mxu1 %v3335_v25  ;;  %v3328_v28 = vmul.f32 %v3908_v6, %v3320_v26  ;;  %v3373_v40 = vsub.s32 0, %v3372_v3  ;;  %v3377_v41 = vsub.s32 1, %v3372_v3 }
0x16ef   : > { %3451 = vmatprep.mubr.f32.mxu1 %v5742_v27  ;;  %v3369_v27 = vld [vmem:[%s6717_s7] sm:$0x3]  ;;  %s6574_s7 = scalar_lea.hbm %s6721_s0, %s3920_s17 }
0x16f0   : > { %v3336_v29 = vadd.f32 %v3909_v48, %v3328_v28  ;;  %v3374_v42 = vrot.slane %v3369_v27, %v3373_v40  ;;  %v3378_v43 = vrot.slane %v3369_v27, %v3377_v41 }
0x16f2   : > { %3452 = vmatmul.mubr.f32.gmra.mrb[32].mxu1 %v3336_v29 }
0x17c1   : > { %v3447_v44 = vpop.f32.mrb[30].mxu1 }
0x17c2   : > { %v3448_v56 = vadd.f32 %v3447_v44, %v3374_v42  ;;  %v3449_v45 = vpop.f32.mrb[31].mxu1 }
0x17c3   : > { %v3450_v46 = vadd.f32 %v3449_v45, %v3378_v43 }
0x17c4   : > { %v3458_v51 = vmax.f32 %v3448_v56, 0.0 }
0x17c5   : > { %v3459_v49 = vmax.f32 %v3450_v46, 0.0  ;;  %v3453_v50 = vpop.f32.mrb[32].mxu1 }
0x17c6   : > { %v3454_v52 = vadd.f32 %v3453_v50, %v3374_v42  ;;  %v3455_v53 = vpop.f32.mrb[33].mxu1 }
0x17c7   : > { %v3456_v54 = vadd.f32 %v3455_v53, %v3378_v43  ;;  %3565 = vmatprep.mubr.f32.mxu0 %v3459_v49 }
0x17c8   : > { %3566 = vmatmul.mubr.f32.vlgmr.msra.gmra.mrb[18].mxu0 %v3458_v51  ;;  %v3460_v57 = vmax.f32 %v3454_v52, 0.0 }
0x17c9   : > { %v3461_v55 = vmax.f32 %v3456_v54, 0.0 }
0x17cb   : > { %3570 = vmatprep.mubr.f32.mxu0 %v3461_v55 }
0x17cc   : > { %3571 = vmatmul.mubr.f32.gmra.mrb[20].mxu0 %v3460_v57 }
0x189b   : > { %v4161_v58 = vpop.f32.mrb[18].mxu0 }
0x189c   : > { %v4162_v20 = vpop.f32.mrb[19].mxu0 }
0x189d   : > { %v4163_v59 = vadd.f32 %v4162_v20, %v4161_v58 }
0x189f   : > { %v3568_v60 = vadd.f32 %v4163_v59, %v3910_v23  ;;  %v4164_v61 = vpop.f32.mrb[20].mxu0 }
0x18a0   : > { %v4165_v62 = vpop.f32.mrb[21].mxu0 }
0x18a1   : > { %v4166_v0 = vadd.f32 %v4165_v62, %v4164_v61  ;;  %v3576_v47 = vadd.f32 %v3568_v60, %v3335_v25 }
0x18a3   : > { %v3573_v1 = vadd.f32 %v4166_v0, %v3910_v23  ;;  %3580 = vadd.xlane.f32.xlu0 %v3576_v47 }
0x18a5   : > { %v3577_v4 = vadd.f32 %v3573_v1, %v3336_v29 }
0x18a7   : > { %3582 = vadd.xlane.f32.xlu1 %v3577_v4 }
0x1930   : > { %v3581_v7 = vpop.xlane.xlu0 %3580 }
0x1931   : > { %v3584_v39 = vmul.f32 0.0078125, %v3581_v7 }
0x1933   : > { %v3586_v8 = vsub.f32 %v3576_v47, %v3584_v39 }
0x1934   : > { %v3583_v9 = vpop.xlane.xlu1 %3582 }
0x1935   : > { %v3585_v10 = vmul.f32 0.0078125, %v3583_v9  ;;  %v3588_v11 = vmul.f32 %v3586_v8, %v3586_v8 }
0x1937   : > { %v3587_v12 = vsub.f32 %v3577_v4, %v3585_v10  ;;  %3590 = vadd.xlane.f32.xlu0 %v3588_v11 }
0x1939   : > { %v3589_v13 = vmul.f32 %v3587_v12, %v3587_v12 }
0x193b   : > { %3592 = vadd.xlane.f32.xlu1 %v3589_v13 }
0x19c4   : > { %v3591_v14 = vpop.xlane.xlu0 %3590 }
0x19c5   : > { %v3594_v15 = vmul.f32 0.0078125, %v3591_v14 }
0x19c7   : > { %v3596_v63 = vadd.f32 1e-05, %v3594_v15 }
0x19c8   : > { %v3593_v16 = vpop.xlane.xlu1 %3592 }
0x19c9   : > { %5283 = vrsqrt.f32 %v3596_v63  ;;  %v3595_v17 = vmul.f32 0.0078125, %v3593_v16 }
0x19cb   : > { %v3597_v18 = vadd.f32 1e-05, %v3595_v17 }
0x19cd   : > { %5285 = vrsqrt.f32 %v3597_v18 }
0x19d3   : > { %v5284_v5 = vpop.eup %5283 }
0x19d4   : > { %v3600_v6 = vmul.f32 %v5284_v5, %v3586_v8 }
0x19d6   : > { %v3608_v48 = vmul.f32 %v3911_v19, %v3600_v6 }
0x19d7   : > { %v5286_v22 = vpop.eup %5285 }
0x19d8   : > { %v3616_v24 = vadd.f32 %v3912_v21, %v3608_v48  ;;  %v3601_v25 = vmul.f32 %v5286_v22, %v3587_v12 }
0x19da   : > { %v3609_v26 = vmul.f32 %v3911_v19, %v3601_v25  ;;  %3618 = vst [vmem:[%s832_s18] sm:$0xff] %v3616_v24 }
0x19dc   : > { %v3617_v28 = vadd.f32 %v3912_v21, %v3609_v26 }
0x19de   : > { %3619 = vst [vmem:[%s832_s18 + $0x8] sm:$0xff] %v3617_v28 }
0x19df   : > { %5640 = shalt.err (!%p5637_p0)
}
0x19e0   : > { %s5641_s12 = scalar_lea.hbm %s6574_s7, 256  ;;  %s5645_s20 = scalar_lea.hbm %s6721_s0, 512 }
0x19e1   : > { %p5642_p6 = scmp.ne.s32.totalorder %s6574_s7, %s5641_s12  ;;  %p5646_p10 = scmp.lt.u32.totalorder %s6574_s7, %s6721_s0 }
0x19e2   : > { %p5647_p5 = scmp.lt.u32.totalorder %s5645_s20, %s5641_s12  ;;  %p5649_p9 = scmp.lt.u32.totalorder %s5641_s12, %s6574_s7 }
0x19e3   : > { %p5643_p2 = pnand %p5642_p6, %p6722_p8 }
0x19e4   : > { %p5648_p7 = por %p5647_p5, %p5646_p10 }
0x19e5   : > { %p5644_p4 = pneg %p5643_p2 }
0x19e6   : > { %p5650_p11 = por %p5649_p9, %p5648_p7 }
0x19e8   : > { %p5651_p3 = pnand %p5650_p11, %p5644_p4 }
0x19ea   : > { %5654 = shalt.err (!%p5651_p3)
}
0x19eb   : > { %s5744_s17 = smov 128   ;;  %s5745_s18 = smov 8  }
0x19ec   : > { %5003 = dma.vmem_to_hbm [thread:$0]  (%p6722_p8), %s6576_s11, 256, %s6574_s7, %s3621_s4, %s5744_s17, %s5744_s17, %s5745_s18  }
0x19ed PF: > { %s3649_s26 = sand.u32 1, %s5709_s1   ;;  %p6723_p12 = scmp.ne.s32.totalorder %s6693_s25, 0 }
0x19ee   : > { %p6724_p1 = scmp.ge.s32.totalorder %s5721_s24, 2  ;;  %s3650_s30 = scalar_lea.sflag [#allocation5], %s3649_s26 }
0x19f0   : > { %p5044_p13 = pnand %p6724_p1, %p6723_p12 }
0x19f2   : > { %5704 = dma.done.wait (!%p5044_p13), %s3650_s30, 256  }
0x19f3   : > { %5706 = vsyncadd (!%p5044_p13), %s3650_s30, 4294967040  ;;  %p41_p0 = scmp.ge.s32.totalorder %s6126_s27, 4   ;;  %s6725_s1 = smov %s5713_s22 }
0x19f4   : > { %s6726_s22 = smov %s5717_s23  ;;  %s6727_s23 = smov %s6137_s2 }
0x19f5   : > { %s6728_s24 = smov %s6126_s27  ;;  %43 = sbr.rel (!%p41_p0) target bundleno = 33 (0x21), region = 205 }
0x19fc   :  { %3655 = vsyncpa [#allocation4], 1 }
0x19fd   :  { %3657 = vsyncpa [#allocation4 + $0x1], 1 }
0x19fe   :  { %3658 = vsyncpa [#allocation7], 1 }
0x19ff   :  { %3660 = vsyncpa [#allocation7 + $0x1], 1 }
0x1a00   :  { %3661 = vsyncpa [#allocation10], 1 }
0x1a01   :  { %3662 = vsyncpa [#allocation13], 1 }
0x1a02   :  { %3663 = vsyncpa [#allocation16], 1 }
0x1a03   :  { %3664 = vsyncpa [#allocation19], 1 }
0x1a04   :  { %3665 = vsyncpa [#allocation22], 1 }
0x1a05   :  { %3666 = vsyncpa [#allocation5], 1 }
0x1a06   :  { %3668 = vsyncpa [#allocation5 + $0x1], 1 }

</bundles_post_ra>
